<compile_context>
chip_gen: v5e
topology: v5e:2x2
jax: 0.10.0
libtpu: 0.0.40
codegen_flags: <defaults>
</compile_context>

<pallas_src>
import functools

import jax
import jax.numpy as jnp
from jax.experimental import pallas as pl
from jax.experimental.pallas import tpu as pltpu


# ----------------------------------------------------------------------------
# Pallas kernels
# ----------------------------------------------------------------------------
def _linear_relu_kernel(z_ref, w_ref, b_ref, o_ref):
    """(N, Din) @ (Din, Dout) + bias, ReLU.  bf16 operands, f32 accumulation."""
    y = jnp.dot(z_ref[...], w_ref[...], preferred_element_type=jnp.float32)
    o_ref[...] = jnp.maximum(y + b_ref[...], 0.0)


def linear_relu(z, w, b):
    """z: (N, Din), w: (Din, Dout), b: (Dout,) -> (N, Dout) float32."""
    N, Din = z.shape
    Dout = w.shape[1]
    return pl.pallas_call(
        _linear_relu_kernel,
        out_shape=jax.ShapeDtypeStruct((N, Dout), jnp.float32),
        grid=(1,),
        in_specs=[
            pl.BlockSpec((N, Din), lambda i: (0, 0)),
            pl.BlockSpec((Din, Dout), lambda i: (0, 0)),
            pl.BlockSpec((1, Dout), lambda i: (0, 0)),
        ],
        out_specs=pl.BlockSpec((N, Dout), lambda i: (0, 0)),
    )(z.astype(jnp.bfloat16), w.astype(jnp.bfloat16),
      b.reshape(1, Dout).astype(jnp.float32))


def _convt_fused_kernel(a_ref, b_ref, bias_ref, gamma_ref, beta_ref, o_ref, *,
                        act, use_bn, eps):
    """Fused ConvTranspose2d(4,2,1) + bias + activation (+ BatchNorm2d).

    a_ref:  (4, R, K)  bf16  per-phase im2col patches (R = N*H*W, K = 4*Cin)
    b_ref:  (4, K, C)  bf16  per-phase weight matrices
    bias_ref / gamma_ref / beta_ref: (1, C) f32
    o_ref:  (4, R, C)  f32   per-phase outputs (interleaved to 2Hx2W outside)
    """
    C = b_ref.shape[-1]
    R = a_ref.shape[1]
    bias = bias_ref[...]                               # (1, C)

    if use_bn:
        s = jnp.zeros((1, C), jnp.float32)
        ss = jnp.zeros((1, C), jnp.float32)

    # 4 unrolled MXU dots in one kernel body (one grid step, no phase grid).
    for p in range(4):
        y = jnp.dot(a_ref[p], b_ref[p], preferred_element_type=jnp.float32)
        y = y + bias
        if act == "relu":
            y = jnp.maximum(y, 0.0)
        elif act == "sigmoid":
            # exp and approx reciprocal both run on the EUP slot.
            y = pl.reciprocal(1.0 + jnp.exp(-y), approx=True)
        if use_bn:
            s = s + jnp.sum(y, axis=0, keepdims=True)
            ss = ss + jnp.sum(y * y, axis=0, keepdims=True)
        o_ref[p] = y

    if use_bn:
        inv_n = 1.0 / (4.0 * R)                        # stats over all phases
        mean = s * inv_n
        var = jnp.maximum(ss * inv_n - mean * mean, 0.0)   # biased (training)
        scale = gamma_ref[...] * jax.lax.rsqrt(var + eps)
        shift = beta_ref[...] - mean * scale
        for p in range(4):
            o_ref[p] = o_ref[p] * scale + shift


# ----------------------------------------------------------------------------
# ConvTranspose2d(kernel=4, stride=2, padding=1) via phase decomposition:
# each of the 4 output sub-pixel phases is a channel matmul of a 2x2 shifted
# input neighbourhood.  Patch shifts / phase interleave stay as KiB-scale XLA
# glue; everything else (4 dots + bias + act + BN) is inside one kernel.
# ----------------------------------------------------------------------------
_PAIRS = {0: ((0, 1), (-1, 3)),   # phase 0: (input-offset, kernel-tap)
          1: ((0, 2), (1, 0))}    # phase 1


def _shift(x, off, axis):
    """y[..., i, ...] = x[..., i + off, ...] (zero outside bounds)."""
    if off == 0:
        return x
    n = x.shape[axis]
    pad = [(0, 0)] * x.ndim
    if off < 0:
        pad[axis] = (-off, 0)
        return jax.lax.slice_in_dim(jnp.pad(x, pad), 0, n, axis=axis)
    pad[axis] = (0, off)
    return jax.lax.slice_in_dim(jnp.pad(x, pad), off, off + n, axis=axis)


def conv_transpose_fused(x, w, bias, gamma, beta, *, act, use_bn, eps=1e-5):
    """x: (N,H,W,Cin), w: (Cin,Cout,4,4) (PyTorch layout) -> (N,2H,2W,Cout)."""
    N, H, W, Cin = x.shape
    Cout = w.shape[1]
    R = N * H * W

    patches, wmats = [], []
    for pa in (0, 1):                 # output-row phase
        for pc in (0, 1):             # output-col phase
            cols, wcols = [], []
            for (ho, kh) in _PAIRS[pa]:
                xh = _shift(x, ho, axis=1)
                for (wo, kw) in _PAIRS[pc]:
                    cols.append(_shift(xh, wo, axis=2))
                    wcols.append(w[:, :, kh, kw])
            patches.append(jnp.concatenate(cols, axis=-1).reshape(R, 4 * Cin))
            wmats.append(jnp.concatenate(wcols, axis=0))          # (4*Cin, Cout)
    A = jnp.stack(patches).astype(jnp.bfloat16)                   # (4, R, 4Cin)
    B = jnp.stack(wmats).astype(jnp.bfloat16)                     # (4, 4Cin, Cout)

    y = pl.pallas_call(
        functools.partial(_convt_fused_kernel, act=act, use_bn=use_bn, eps=eps),
        out_shape=jax.ShapeDtypeStruct((4, R, Cout), jnp.float32),
        grid=(1,),
        in_specs=[
            pl.BlockSpec((4, R, 4 * Cin), lambda i: (0, 0, 0)),
            pl.BlockSpec((4, 4 * Cin, Cout), lambda i: (0, 0, 0)),
            pl.BlockSpec((1, Cout), lambda i: (0, 0)),
            pl.BlockSpec((1, Cout), lambda i: (0, 0)),
            pl.BlockSpec((1, Cout), lambda i: (0, 0)),
        ],
        out_specs=pl.BlockSpec((4, R, Cout), lambda i: (0, 0, 0)),
        compiler_params=pltpu.CompilerParams(
            dimension_semantics=("arbitrary",)),
    )(A, B,
      bias.reshape(1, Cout).astype(jnp.float32),
      gamma.reshape(1, Cout).astype(jnp.float32),
      beta.reshape(1, Cout).astype(jnp.float32))

    # TODO(synk): patch shifts / phase interleave kept as XLA glue (in-kernel
    # sublane shifts + odd-width lane concats are riskier to lower and the
    # tensors are KiB-scale); full-network single-call fusion left for later.
    y = y.reshape(2, 2, N, H, W, Cout)
    y = jnp.transpose(y, (2, 3, 0, 4, 1, 5)).reshape(N, 2 * H, 2 * W, Cout)
    return y


# ----------------------------------------------------------------------------
# Generator_ forward:
#   Linear+ReLU -> view -> 3x[ConvT(4,2,1)+ReLU+BN] -> ConvT(4,2,1)+Sigmoid
# ----------------------------------------------------------------------------
def generator_forward(params, z, img_size, dim):
    N = z.shape[0]
    fs0, fs1 = img_size[0] // 16, img_size[1] // 16

    x = linear_relu(z, jnp.transpose(params["lin_w"]), params["lin_b"])
    # x.view(-1, 8*dim, fs0, fs1)  [NCHW] -> NHWC for the Pallas conv path
    x = x.reshape(N, 8 * dim, fs0, fs1).transpose(0, 2, 3, 1)

    x = conv_transpose_fused(x, params["c1_w"], params["c1_b"],
                             params["bn1_g"], params["bn1_b"],
                             act="relu", use_bn=True)
    x = conv_transpose_fused(x, params["c2_w"], params["c2_b"],
                             params["bn2_g"], params["bn2_b"],
                             act="relu", use_bn=True)
    x = conv_transpose_fused(x, params["c3_w"], params["c3_b"],
                             params["bn3_g"], params["bn3_b"],
                             act="relu", use_bn=True)
    ones = jnp.ones((img_size[2],), jnp.float32)
    zeros = jnp.zeros((img_size[2],), jnp.float32)
    x = conv_transpose_fused(x, params["c4_w"], params["c4_b"], ones, zeros,
                             act="sigmoid", use_bn=False)
    return x.transpose(0, 3, 1, 2)        # NCHW output, matching PyTorch


# ----------------------------------------------------------------------------
# Parameter init (deterministic, synthetic)
# ----------------------------------------------------------------------------
def init_params(key, img_size, latent_dim, dim):
    fs0, fs1 = img_size[0] // 16, img_size[1] // 16
    out_ch = img_size[2]
    feat = 8 * dim * fs0 * fs1

    def nrm(k, shape, scale):
        return scale * jax.random.normal(k, shape, dtype=jnp.float32)

    ks = jax.random.split(key, 16)
    return {
        "lin_w": nrm(ks[0], (feat, latent_dim), 0.1),
        "lin_b": nrm(ks[1], (feat,), 0.05),
        "c1_w": nrm(ks[2], (8 * dim, 4 * dim, 4, 4), 0.05),
        "c1_b": nrm(ks[3], (4 * dim,), 0.05),
        "bn1_g": 1.0 + nrm(ks[4], (4 * dim,), 0.05),
        "bn1_b": nrm(ks[5], (4 * dim,), 0.05),
        "c2_w": nrm(ks[6], (4 * dim, 2 * dim, 4, 4), 0.05),
        "c2_b": nrm(ks[7], (2 * dim,), 0.05),
        "bn2_g": 1.0 + nrm(ks[8], (2 * dim,), 0.05),
        "bn2_b": nrm(ks[9], (2 * dim,), 0.05),
        "c3_w": nrm(ks[10], (2 * dim, dim, 4, 4), 0.05),
        "c3_b": nrm(ks[11], (dim,), 0.05),
        "bn3_g": 1.0 + nrm(ks[12], (dim,), 0.05),
        "bn3_b": nrm(ks[13], (dim,), 0.05),
        "c4_w": nrm(ks[14], (dim, out_ch, 4, 4), 0.05),
        "c4_b": nrm(ks[15], (out_ch,), 0.05),
    }


# ----------------------------------------------------------------------------
# Pure-JAX f32 reference (XLA conv, HIGHEST precision) for correctness check
# ----------------------------------------------------------------------------
def reference_forward(params, z, img_size, dim):
    N = z.shape[0]
    fs0, fs1 = img_size[0] // 16, img_size[1] // 16
    x = jnp.maximum(
        jnp.dot(z, params["lin_w"].T, precision=jax.lax.Precision.HIGHEST)
        + params["lin_b"], 0.0)
    x = x.reshape(N, 8 * dim, fs0, fs1)

    def convT(t, w, b):
        k = jnp.transpose(jnp.flip(w, axis=(2, 3)), (2, 3, 0, 1))   # HWIO
        y = jax.lax.conv_general_dilated(
            t, k, window_strides=(1, 1), padding=((2, 2), (2, 2)),
            lhs_dilation=(2, 2),
            dimension_numbers=("NCHW", "HWIO", "NCHW"),
            precision=jax.lax.Precision.HIGHEST)
        return y + b[None, :, None, None]

    def bn(t, g, b, eps=1e-5):
        m = jnp.mean(t, axis=(0, 2, 3), keepdims=True)
        v = jnp.mean(jnp.square(t - m), axis=(0, 2, 3), keepdims=True)
        return (t - m) * jax.lax.rsqrt(v + eps) * g[None, :, None, None] \
            + b[None, :, None, None]

    x = bn(jnp.maximum(convT(x, params["c1_w"], params["c1_b"]), 0.0),
           params["bn1_g"], params["bn1_b"])
    x = bn(jnp.maximum(convT(x, params["c2_w"], params["c2_b"]), 0.0),
           params["bn2_g"], params["bn2_b"])
    x = bn(jnp.maximum(convT(x, params["c3_w"], params["c3_b"]), 0.0),
           params["bn3_g"], params["bn3_b"])
    x = convT(x, params["c4_w"], params["c4_b"])
    return jax.nn.sigmoid(x)


if __name__ == "__main__":
    img_size = (32, 32, 3)     # (H, W, out_channels); H, W must be /16
    latent_dim = 16
    dim = 8
    batch = 2

    root = jax.random.PRNGKey(0)
    pkey, zkey = jax.random.split(root)
    params = init_params(pkey, img_size, latent_dim, dim)
    z = jax.random.normal(zkey, (batch, latent_dim), dtype=jnp.float32)

    fwd = jax.jit(functools.partial(generator_forward, img_size=img_size, dim=dim))
    out = fwd(params, z)
    jax.block_until_ready(out)

    ref = reference_forward(params, z, img_size, dim)
    assert out.shape == (batch, img_size[2], img_size[0], img_size[1]), out.shape
    err = float(jnp.max(jnp.abs(out - ref)))
    # Kernel uses bf16 MXU operands (single pass) + approx reciprocal vs the
    # f32 HIGHEST-precision XLA reference, so allow a few e-2 of drift.
    assert err < 3e-2, f"max abs diff vs reference: {err}"
    print("KERNEL_OK")
</pallas_src>

<mosaic_0001>
module attributes {stable_mosaic.version = 11 : i64} {
  func.func @_linear_relu_kernel(%arg0: i32, %arg1: memref<2x16xbf16, #tpu.memory_space<vmem>>, %arg2: memref<16x256xbf16, #tpu.memory_space<vmem>>, %arg3: memref<1x256xf32, #tpu.memory_space<vmem>>, %arg4: memref<2x256xf32, #tpu.memory_space<vmem>>) attributes {dimension_semantics = [#tpu.dimension_semantics<arbitrary>], iteration_bounds = array<i64: 1>, scalar_prefetch = 0 : i64, scratch_operands = 0 : i64, tpu.core_type = #tpu.core_type<tc>, window_params = [{pipeline_mode = #tpu.pipeline_mode<synchronous>, transform_indices = @transform_0, window_bounds = array<i64: 2, 16>}, {pipeline_mode = #tpu.pipeline_mode<synchronous>, transform_indices = @transform_1, window_bounds = array<i64: 16, 256>}, {pipeline_mode = #tpu.pipeline_mode<synchronous>, transform_indices = @transform_2, window_bounds = array<i64: 1, 256>}, {pipeline_mode = #tpu.pipeline_mode<synchronous>, transform_indices = @transform_3, window_bounds = array<i64: 2, 256>}]} {
    %c0 = arith.constant 0 : index
    %c0_0 = arith.constant 0 : index
    %0 = vector.load %arg1[%c0, %c0_0] : memref<2x16xbf16, #tpu.memory_space<vmem>>, vector<2x16xbf16>
    %c0_1 = arith.constant 0 : index
    %c0_2 = arith.constant 0 : index
    %1 = vector.load %arg2[%c0_1, %c0_2] : memref<16x256xbf16, #tpu.memory_space<vmem>>, vector<16x256xbf16>
    %cst = arith.constant dense<0.000000e+00> : vector<2x256xf32>
    %2 = tpu.matmul %0, %1, %cst {dimension_numbers = #tpu.dot_dimension_numbers<[1], [0], [0], [1], [0, 0, 1, 1], [], []>} : vector<2x16xbf16>, vector<16x256xbf16>, vector<2x256xf32> -> vector<2x256xf32>
    %c0_3 = arith.constant 0 : index
    %c0_4 = arith.constant 0 : index
    %3 = vector.load %arg3[%c0_3, %c0_4] : memref<1x256xf32, #tpu.memory_space<vmem>>, vector<1x256xf32>
    %4 = vector.broadcast %3 : vector<1x256xf32> to vector<2x256xf32>
    %5 = arith.addf %2, %4 : vector<2x256xf32>
    %cst_5 = arith.constant 0.000000e+00 : f32
    %6 = vector.broadcast %cst_5 : f32 to vector<2x256xf32>
    %7 = arith.maximumf %5, %6 : vector<2x256xf32>
    %c0_6 = arith.constant 0 : index
    %c0_7 = arith.constant 0 : index
    %8 = vector.load %arg4[%c0_6, %c0_7] : memref<2x256xf32, #tpu.memory_space<vmem>>, vector<2x256xf32>
    tpu.vector_store %arg4[%c0_6, %c0_7], %7 {strides = array<i32>} : memref<2x256xf32, #tpu.memory_space<vmem>>, vector<2x256xf32>,
    return
  }
  func.func @transform_0(%arg0: i32) -> (i32, i32) {
    %c0_i32 = arith.constant 0 : i32
    %c0_i32_0 = arith.constant 0 : i32
    %c0_i32_1 = arith.constant 0 : i32
    return %c0_i32, %c0_i32_0 : i32, i32
  }
  func.func @transform_1(%arg0: i32) -> (i32, i32) {
    %c0_i32 = arith.constant 0 : i32
    %c0_i32_0 = arith.constant 0 : i32
    %c0_i32_1 = arith.constant 0 : i32
    return %c0_i32, %c0_i32_0 : i32, i32
  }
  func.func @transform_2(%arg0: i32) -> (i32, i32) {
    %c0_i32 = arith.constant 0 : i32
    %c0_i32_0 = arith.constant 0 : i32
    %c0_i32_1 = arith.constant 0 : i32
    return %c0_i32, %c0_i32_0 : i32, i32
  }
  func.func @transform_3(%arg0: i32) -> (i32, i32) {
    %c0_i32 = arith.constant 0 : i32
    %c0_i32_0 = arith.constant 0 : i32
    %c0_i32_1 = arith.constant 0 : i32
    return %c0_i32, %c0_i32_0 : i32, i32
  }
}

module attributes {stable_mosaic.version = 11 : i64} {
  func.func @_convt_fused_kernel(%arg0: i32, %arg1: memref<4x8x256xbf16, #tpu.memory_space<vmem>>, %arg2: memref<4x256x32xbf16, #tpu.memory_space<vmem>>, %arg3: memref<1x32xf32, #tpu.memory_space<vmem>>, %arg4: memref<1x32xf32, #tpu.memory_space<vmem>>, %arg5: memref<1x32xf32, #tpu.memory_space<vmem>>, %arg6: memref<4x8x32xf32, #tpu.memory_space<vmem>>) attributes {dimension_semantics = [#tpu.dimension_semantics<arbitrary>], iteration_bounds = array<i64: 1>, scalar_prefetch = 0 : i64, scratch_operands = 0 : i64, tpu.core_type = #tpu.core_type<tc>, window_params = [{pipeline_mode = #tpu.pipeline_mode<synchronous>, transform_indices = @transform_0, window_bounds = array<i64: 4, 8, 256>}, {pipeline_mode = #tpu.pipeline_mode<synchronous>, transform_indices = @transform_1, window_bounds = array<i64: 4, 256, 32>}, {pipeline_mode = #tpu.pipeline_mode<synchronous>, transform_indices = @transform_2, window_bounds = array<i64: 1, 32>}, {pipeline_mode = #tpu.pipeline_mode<synchronous>, transform_indices = @transform_3, window_bounds = array<i64: 1, 32>}, {pipeline_mode = #tpu.pipeline_mode<synchronous>, transform_indices = @transform_4, window_bounds = array<i64: 1, 32>}, {pipeline_mode = #tpu.pipeline_mode<synchronous>, transform_indices = @transform_5, window_bounds = array<i64: 4, 8, 32>}]} {
    %c0 = arith.constant 0 : index
    %c0_0 = arith.constant 0 : index
    %0 = vector.load %arg3[%c0, %c0_0] : memref<1x32xf32, #tpu.memory_space<vmem>>, vector<1x32xf32>
    %cst = arith.constant 0.000000e+00 : f32
    %1 = vector.broadcast %cst : f32 to vector<1x32xf32>
    %cst_1 = arith.constant 0.000000e+00 : f32
    %2 = vector.broadcast %cst_1 : f32 to vector<1x32xf32>
    %c0_2 = arith.constant 0 : index
    %c0_3 = arith.constant 0 : index
    %c0_4 = arith.constant 0 : index
    %3 = vector.load %arg1[%c0_2, %c0_3, %c0_4] : memref<4x8x256xbf16, #tpu.memory_space<vmem>>, vector<1x8x256xbf16>
    %4 = vector.shape_cast %3 : vector<1x8x256xbf16> to vector<8x256xbf16>
    %c0_5 = arith.constant 0 : index
    %c0_6 = arith.constant 0 : index
    %c0_7 = arith.constant 0 : index
    %5 = vector.load %arg2[%c0_5, %c0_6, %c0_7] : memref<4x256x32xbf16, #tpu.memory_space<vmem>>, vector<1x256x32xbf16>
    %6 = vector.shape_cast %5 : vector<1x256x32xbf16> to vector<256x32xbf16>
    %cst_8 = arith.constant dense<0.000000e+00> : vector<8x32xf32>
    %7 = tpu.matmul %4, %6, %cst_8 {dimension_numbers = #tpu.dot_dimension_numbers<[1], [0], [0], [1], [0, 0, 1, 1], [], []>} : vector<8x256xbf16>, vector<256x32xbf16>, vector<8x32xf32> -> vector<8x32xf32>
    %8 = vector.broadcast %0 : vector<1x32xf32> to vector<8x32xf32>
    %9 = arith.addf %7, %8 : vector<8x32xf32>
    %cst_9 = arith.constant 0.000000e+00 : f32
    %10 = vector.broadcast %cst_9 : f32 to vector<8x32xf32>
    %11 = arith.maximumf %9, %10 : vector<8x32xf32>
    %cst_10 = arith.constant dense<0.000000e+00> : vector<32xf32>
    %12 = vector.multi_reduction <add>, %11, %cst_10 [0] : vector<8x32xf32> to vector<32xf32>
    %13 = vector.shape_cast %12 : vector<32xf32> to vector<1x32xf32>
    %14 = arith.addf %1, %13 : vector<1x32xf32>
    %15 = arith.mulf %11, %11 : vector<8x32xf32>
    %cst_11 = arith.constant dense<0.000000e+00> : vector<32xf32>
    %16 = vector.multi_reduction <add>, %15, %cst_11 [0] : vector<8x32xf32> to vector<32xf32>
    %17 = vector.shape_cast %16 : vector<32xf32> to vector<1x32xf32>
    %18 = arith.addf %2, %17 : vector<1x32xf32>
    %c0_12 = arith.constant 0 : index
    %c0_13 = arith.constant 0 : index
    %c0_14 = arith.constant 0 : index
    %19 = vector.load %arg6[%c0_12, %c0_13, %c0_14] : memref<4x8x32xf32, #tpu.memory_space<vmem>>, vector<1x8x32xf32>
    %20 = vector.shape_cast %19 : vector<1x8x32xf32> to vector<8x32xf32>
    %21 = vector.shape_cast %11 : vector<8x32xf32> to vector<1x8x32xf32>
    tpu.vector_store %arg6[%c0_12, %c0_13, %c0_14], %21 {strides = array<i32>} : memref<4x8x32xf32, #tpu.memory_space<vmem>>, vector<1x8x32xf32>,
    %c1 = arith.constant 1 : index
    %c0_15 = arith.constant 0 : index
    %c0_16 = arith.constant 0 : index
    %22 = vector.load %arg1[%c1, %c0_15, %c0_16] : memref<4x8x256xbf16, #tpu.memory_space<vmem>>, vector<1x8x256xbf16>
    %23 = vector.shape_cast %22 : vector<1x8x256xbf16> to vector<8x256xbf16>
    %c1_17 = arith.constant 1 : index
    %c0_18 = arith.constant 0 : index
    %c0_19 = arith.constant 0 : index
    %24 = vector.load %arg2[%c1_17, %c0_18, %c0_19] : memref<4x256x32xbf16, #tpu.memory_space<vmem>>, vector<1x256x32xbf16>
    %25 = vector.shape_cast %24 : vector<1x256x32xbf16> to vector<256x32xbf16>
    %cst_20 = arith.constant dense<0.000000e+00> : vector<8x32xf32>
    %26 = tpu.matmul %23, %25, %cst_20 {dimension_numbers = #tpu.dot_dimension_numbers<[1], [0], [0], [1], [0, 0, 1, 1], [], []>} : vector<8x256xbf16>, vector<256x32xbf16>, vector<8x32xf32> -> vector<8x32xf32>
    %27 = vector.broadcast %0 : vector<1x32xf32> to vector<8x32xf32>
    %28 = arith.addf %26, %27 : vector<8x32xf32>
    %cst_21 = arith.constant 0.000000e+00 : f32
    %29 = vector.broadcast %cst_21 : f32 to vector<8x32xf32>
    %30 = arith.maximumf %28, %29 : vector<8x32xf32>
    %cst_22 = arith.constant dense<0.000000e+00> : vector<32xf32>
    %31 = vector.multi_reduction <add>, %30, %cst_22 [0] : vector<8x32xf32> to vector<32xf32>
    %32 = vector.shape_cast %31 : vector<32xf32> to vector<1x32xf32>
    %33 = arith.addf %14, %32 : vector<1x32xf32>
    %34 = arith.mulf %30, %30 : vector<8x32xf32>
    %cst_23 = arith.constant dense<0.000000e+00> : vector<32xf32>
    %35 = vector.multi_reduction <add>, %34, %cst_23 [0] : vector<8x32xf32> to vector<32xf32>
    %36 = vector.shape_cast %35 : vector<32xf32> to vector<1x32xf32>
    %37 = arith.addf %18, %36 : vector<1x32xf32>
    %c1_24 = arith.constant 1 : index
    %c0_25 = arith.constant 0 : index
    %c0_26 = arith.constant 0 : index
    %38 = vector.load %arg6[%c1_24, %c0_25, %c0_26] : memref<4x8x32xf32, #tpu.memory_space<vmem>>, vector<1x8x32xf32>
    %39 = vector.shape_cast %38 : vector<1x8x32xf32> to vector<8x32xf32>
    %40 = vector.shape_cast %30 : vector<8x32xf32> to vector<1x8x32xf32>
    tpu.vector_store %arg6[%c1_24, %c0_25, %c0_26], %40 {strides = array<i32>} : memref<4x8x32xf32, #tpu.memory_space<vmem>>, vector<1x8x32xf32>,
    %c2 = arith.constant 2 : index
    %c0_27 = arith.constant 0 : index
    %c0_28 = arith.constant 0 : index
    %41 = vector.load %arg1[%c2, %c0_27, %c0_28] : memref<4x8x256xbf16, #tpu.memory_space<vmem>>, vector<1x8x256xbf16>
    %42 = vector.shape_cast %41 : vector<1x8x256xbf16> to vector<8x256xbf16>
    %c2_29 = arith.constant 2 : index
    %c0_30 = arith.constant 0 : index
    %c0_31 = arith.constant 0 : index
    %43 = vector.load %arg2[%c2_29, %c0_30, %c0_31] : memref<4x256x32xbf16, #tpu.memory_space<vmem>>, vector<1x256x32xbf16>
    %44 = vector.shape_cast %43 : vector<1x256x32xbf16> to vector<256x32xbf16>
    %cst_32 = arith.constant dense<0.000000e+00> : vector<8x32xf32>
    %45 = tpu.matmul %42, %44, %cst_32 {dimension_numbers = #tpu.dot_dimension_numbers<[1], [0], [0], [1], [0, 0, 1, 1], [], []>} : vector<8x256xbf16>, vector<256x32xbf16>, vector<8x32xf32> -> vector<8x32xf32>
    %46 = vector.broadcast %0 : vector<1x32xf32> to vector<8x32xf32>
    %47 = arith.addf %45, %46 : vector<8x32xf32>
    %cst_33 = arith.constant 0.000000e+00 : f32
    %48 = vector.broadcast %cst_33 : f32 to vector<8x32xf32>
    %49 = arith.maximumf %47, %48 : vector<8x32xf32>
    %cst_34 = arith.constant dense<0.000000e+00> : vector<32xf32>
    %50 = vector.multi_reduction <add>, %49, %cst_34 [0] : vector<8x32xf32> to vector<32xf32>
    %51 = vector.shape_cast %50 : vector<32xf32> to vector<1x32xf32>
    %52 = arith.addf %33, %51 : vector<1x32xf32>
    %53 = arith.mulf %49, %49 : vector<8x32xf32>
    %cst_35 = arith.constant dense<0.000000e+00> : vector<32xf32>
    %54 = vector.multi_reduction <add>, %53, %cst_35 [0] : vector<8x32xf32> to vector<32xf32>
    %55 = vector.shape_cast %54 : vector<32xf32> to vector<1x32xf32>
    %56 = arith.addf %37, %55 : vector<1x32xf32>
    %c2_36 = arith.constant 2 : index
    %c0_37 = arith.constant 0 : index
    %c0_38 = arith.constant 0 : index
    %57 = vector.load %arg6[%c2_36, %c0_37, %c0_38] : memref<4x8x32xf32, #tpu.memory_space<vmem>>, vector<1x8x32xf32>
    %58 = vector.shape_cast %57 : vector<1x8x32xf32> to vector<8x32xf32>
    %59 = vector.shape_cast %49 : vector<8x32xf32> to vector<1x8x32xf32>
    tpu.vector_store %arg6[%c2_36, %c0_37, %c0_38], %59 {strides = array<i32>} : memref<4x8x32xf32, #tpu.memory_space<vmem>>, vector<1x8x32xf32>,
    %c3 = arith.constant 3 : index
    %c0_39 = arith.constant 0 : index
    %c0_40 = arith.constant 0 : index
    %60 = vector.load %arg1[%c3, %c0_39, %c0_40] : memref<4x8x256xbf16, #tpu.memory_space<vmem>>, vector<1x8x256xbf16>
    %61 = vector.shape_cast %60 : vector<1x8x256xbf16> to vector<8x256xbf16>
    %c3_41 = arith.constant 3 : index
    %c0_42 = arith.constant 0 : index
    %c0_43 = arith.constant 0 : index
    %62 = vector.load %arg2[%c3_41, %c0_42, %c0_43] : memref<4x256x32xbf16, #tpu.memory_space<vmem>>, vector<1x256x32xbf16>
    %63 = vector.shape_cast %62 : vector<1x256x32xbf16> to vector<256x32xbf16>
    %cst_44 = arith.constant dense<0.000000e+00> : vector<8x32xf32>
    %64 = tpu.matmul %61, %63, %cst_44 {dimension_numbers = #tpu.dot_dimension_numbers<[1], [0], [0], [1], [0, 0, 1, 1], [], []>} : vector<8x256xbf16>, vector<256x32xbf16>, vector<8x32xf32> -> vector<8x32xf32>
    %65 = vector.broadcast %0 : vector<1x32xf32> to vector<8x32xf32>
    %66 = arith.addf %64, %65 : vector<8x32xf32>
    %cst_45 = arith.constant 0.000000e+00 : f32
    %67 = vector.broadcast %cst_45 : f32 to vector<8x32xf32>
    %68 = arith.maximumf %66, %67 : vector<8x32xf32>
    %cst_46 = arith.constant dense<0.000000e+00> : vector<32xf32>
    %69 = vector.multi_reduction <add>, %68, %cst_46 [0] : vector<8x32xf32> to vector<32xf32>
    %70 = vector.shape_cast %69 : vector<32xf32> to vector<1x32xf32>
    %71 = arith.addf %52, %70 : vector<1x32xf32>
    %72 = arith.mulf %68, %68 : vector<8x32xf32>
    %cst_47 = arith.constant dense<0.000000e+00> : vector<32xf32>
    %73 = vector.multi_reduction <add>, %72, %cst_47 [0] : vector<8x32xf32> to vector<32xf32>
    %74 = vector.shape_cast %73 : vector<32xf32> to vector<1x32xf32>
    %75 = arith.addf %56, %74 : vector<1x32xf32>
    %c3_48 = arith.constant 3 : index
    %c0_49 = arith.constant 0 : index
    %c0_50 = arith.constant 0 : index
    %76 = vector.load %arg6[%c3_48, %c0_49, %c0_50] : memref<4x8x32xf32, #tpu.memory_space<vmem>>, vector<1x8x32xf32>
    %77 = vector.shape_cast %76 : vector<1x8x32xf32> to vector<8x32xf32>
    %78 = vector.shape_cast %68 : vector<8x32xf32> to vector<1x8x32xf32>
    tpu.vector_store %arg6[%c3_48, %c0_49, %c0_50], %78 {strides = array<i32>} : memref<4x8x32xf32, #tpu.memory_space<vmem>>, vector<1x8x32xf32>,
    %cst_51 = arith.constant 3.125000e-02 : f32
    %79 = vector.broadcast %cst_51 : f32 to vector<1x32xf32>
    %80 = arith.mulf %71, %79 : vector<1x32xf32>
    %cst_52 = arith.constant 3.125000e-02 : f32
    %81 = vector.broadcast %cst_52 : f32 to vector<1x32xf32>
    %82 = arith.mulf %75, %81 : vector<1x32xf32>
    %83 = arith.mulf %80, %80 : vector<1x32xf32>
    %84 = arith.subf %82, %83 : vector<1x32xf32>
    %cst_53 = arith.constant 0.000000e+00 : f32
    %85 = vector.broadcast %cst_53 : f32 to vector<1x32xf32>
    %86 = arith.maximumf %84, %85 : vector<1x32xf32>
    %c0_54 = arith.constant 0 : index
    %c0_55 = arith.constant 0 : index
    %87 = vector.load %arg4[%c0_54, %c0_55] : memref<1x32xf32, #tpu.memory_space<vmem>>, vector<1x32xf32>
    %cst_56 = arith.constant 9.99999974E-6 : f32
    %88 = vector.broadcast %cst_56 : f32 to vector<1x32xf32>
    %89 = arith.addf %86, %88 : vector<1x32xf32>
    %90 = math.rsqrt %89 : vector<1x32xf32>
    %91 = arith.mulf %87, %90 : vector<1x32xf32>
    %c0_57 = arith.constant 0 : index
    %c0_58 = arith.constant 0 : index
    %92 = vector.load %arg5[%c0_57, %c0_58] : memref<1x32xf32, #tpu.memory_space<vmem>>, vector<1x32xf32>
    %93 = arith.mulf %80, %91 : vector<1x32xf32>
    %94 = arith.subf %92, %93 : vector<1x32xf32>
    %c0_59 = arith.constant 0 : index
    %c0_60 = arith.constant 0 : index
    %c0_61 = arith.constant 0 : index
    %95 = vector.load %arg6[%c0_59, %c0_60, %c0_61] : memref<4x8x32xf32, #tpu.memory_space<vmem>>, vector<1x8x32xf32>
    %96 = vector.shape_cast %95 : vector<1x8x32xf32> to vector<8x32xf32>
    %97 = vector.broadcast %91 : vector<1x32xf32> to vector<8x32xf32>
    %98 = arith.mulf %96, %97 : vector<8x32xf32>
    %99 = vector.broadcast %94 : vector<1x32xf32> to vector<8x32xf32>
    %100 = arith.addf %98, %99 : vector<8x32xf32>
    %c0_62 = arith.constant 0 : index
    %c0_63 = arith.constant 0 : index
    %c0_64 = arith.constant 0 : index
    %101 = vector.load %arg6[%c0_62, %c0_63, %c0_64] : memref<4x8x32xf32, #tpu.memory_space<vmem>>, vector<1x8x32xf32>
    %102 = vector.shape_cast %101 : vector<1x8x32xf32> to vector<8x32xf32>
    %103 = vector.shape_cast %100 : vector<8x32xf32> to vector<1x8x32xf32>
    tpu.vector_store %arg6[%c0_62, %c0_63, %c0_64], %103 {strides = array<i32>} : memref<4x8x32xf32, #tpu.memory_space<vmem>>, vector<1x8x32xf32>,
    %c1_65 = arith.constant 1 : index
    %c0_66 = arith.constant 0 : index
    %c0_67 = arith.constant 0 : index
    %104 = vector.load %arg6[%c1_65, %c0_66, %c0_67] : memref<4x8x32xf32, #tpu.memory_space<vmem>>, vector<1x8x32xf32>
    %105 = vector.shape_cast %104 : vector<1x8x32xf32> to vector<8x32xf32>
    %106 = vector.broadcast %91 : vector<1x32xf32> to vector<8x32xf32>
    %107 = arith.mulf %105, %106 : vector<8x32xf32>
    %108 = vector.broadcast %94 : vector<1x32xf32> to vector<8x32xf32>
    %109 = arith.addf %107, %108 : vector<8x32xf32>
    %c1_68 = arith.constant 1 : index
    %c0_69 = arith.constant 0 : index
    %c0_70 = arith.constant 0 : index
    %110 = vector.load %arg6[%c1_68, %c0_69, %c0_70] : memref<4x8x32xf32, #tpu.memory_space<vmem>>, vector<1x8x32xf32>
    %111 = vector.shape_cast %110 : vector<1x8x32xf32> to vector<8x32xf32>
    %112 = vector.shape_cast %109 : vector<8x32xf32> to vector<1x8x32xf32>
    tpu.vector_store %arg6[%c1_68, %c0_69, %c0_70], %112 {strides = array<i32>} : memref<4x8x32xf32, #tpu.memory_space<vmem>>, vector<1x8x32xf32>,
    %c2_71 = arith.constant 2 : index
    %c0_72 = arith.constant 0 : index
    %c0_73 = arith.constant 0 : index
    %113 = vector.load %arg6[%c2_71, %c0_72, %c0_73] : memref<4x8x32xf32, #tpu.memory_space<vmem>>, vector<1x8x32xf32>
    %114 = vector.shape_cast %113 : vector<1x8x32xf32> to vector<8x32xf32>
    %115 = vector.broadcast %91 : vector<1x32xf32> to vector<8x32xf32>
    %116 = arith.mulf %114, %115 : vector<8x32xf32>
    %117 = vector.broadcast %94 : vector<1x32xf32> to vector<8x32xf32>
    %118 = arith.addf %116, %117 : vector<8x32xf32>
    %c2_74 = arith.constant 2 : index
    %c0_75 = arith.constant 0 : index
    %c0_76 = arith.constant 0 : index
    %119 = vector.load %arg6[%c2_74, %c0_75, %c0_76] : memref<4x8x32xf32, #tpu.memory_space<vmem>>, vector<1x8x32xf32>
    %120 = vector.shape_cast %119 : vector<1x8x32xf32> to vector<8x32xf32>
    %121 = vector.shape_cast %118 : vector<8x32xf32> to vector<1x8x32xf32>
    tpu.vector_store %arg6[%c2_74, %c0_75, %c0_76], %121 {strides = array<i32>} : memref<4x8x32xf32, #tpu.memory_space<vmem>>, vector<1x8x32xf32>,
    %c3_77 = arith.constant 3 : index
    %c0_78 = arith.constant 0 : index
    %c0_79 = arith.constant 0 : index
    %122 = vector.load %arg6[%c3_77, %c0_78, %c0_79] : memref<4x8x32xf32, #tpu.memory_space<vmem>>, vector<1x8x32xf32>
    %123 = vector.shape_cast %122 : vector<1x8x32xf32> to vector<8x32xf32>
    %124 = vector.broadcast %91 : vector<1x32xf32> to vector<8x32xf32>
    %125 = arith.mulf %123, %124 : vector<8x32xf32>
    %126 = vector.broadcast %94 : vector<1x32xf32> to vector<8x32xf32>
    %127 = arith.addf %125, %126 : vector<8x32xf32>
    %c3_80 = arith.constant 3 : index
    %c0_81 = arith.constant 0 : index
    %c0_82 = arith.constant 0 : index
    %128 = vector.load %arg6[%c3_80, %c0_81, %c0_82] : memref<4x8x32xf32, #tpu.memory_space<vmem>>, vector<1x8x32xf32>
    %129 = vector.shape_cast %128 : vector<1x8x32xf32> to vector<8x32xf32>
    %130 = vector.shape_cast %127 : vector<8x32xf32> to vector<1x8x32xf32>
    tpu.vector_store %arg6[%c3_80, %c0_81, %c0_82], %130 {strides = array<i32>} : memref<4x8x32xf32, #tpu.memory_space<vmem>>, vector<1x8x32xf32>,
    return
  }
  func.func @transform_0(%arg0: i32) -> (i32, i32, i32) {
    %c0_i32 = arith.constant 0 : i32
    %c0_i32_0 = arith.constant 0 : i32
    %c0_i32_1 = arith.constant 0 : i32
    %c0_i32_2 = arith.constant 0 : i32
    return %c0_i32, %c0_i32_0, %c0_i32_1 : i32, i32, i32
  }
  func.func @transform_1(%arg0: i32) -> (i32, i32, i32) {
    %c0_i32 = arith.constant 0 : i32
    %c0_i32_0 = arith.constant 0 : i32
    %c0_i32_1 = arith.constant 0 : i32
    %c0_i32_2 = arith.constant 0 : i32
    return %c0_i32, %c0_i32_0, %c0_i32_1 : i32, i32, i32
  }
  func.func @transform_2(%arg0: i32) -> (i32, i32) {
    %c0_i32 = arith.constant 0 : i32
    %c0_i32_0 = arith.constant 0 : i32
    %c0_i32_1 = arith.constant 0 : i32
    return %c0_i32, %c0_i32_0 : i32, i32
  }
  func.func @transform_3(%arg0: i32) -> (i32, i32) {
    %c0_i32 = arith.constant 0 : i32
    %c0_i32_0 = arith.constant 0 : i32
    %c0_i32_1 = arith.constant 0 : i32
    return %c0_i32, %c0_i32_0 : i32, i32
  }
  func.func @transform_4(%arg0: i32) -> (i32, i32) {
    %c0_i32 = arith.constant 0 : i32
    %c0_i32_0 = arith.constant 0 : i32
    %c0_i32_1 = arith.constant 0 : i32
    return %c0_i32, %c0_i32_0 : i32, i32
  }
  func.func @transform_5(%arg0: i32) -> (i32, i32, i32) {
    %c0_i32 = arith.constant 0 : i32
    %c0_i32_0 = arith.constant 0 : i32
    %c0_i32_1 = arith.constant 0 : i32
    %c0_i32_2 = arith.constant 0 : i32
    return %c0_i32, %c0_i32_0, %c0_i32_1 : i32, i32, i32
  }
}

module attributes {stable_mosaic.version = 11 : i64} {
  func.func @_convt_fused_kernel(%arg0: i32, %arg1: memref<4x32x128xbf16, #tpu.memory_space<vmem>>, %arg2: memref<4x128x16xbf16, #tpu.memory_space<vmem>>, %arg3: memref<1x16xf32, #tpu.memory_space<vmem>>, %arg4: memref<1x16xf32, #tpu.memory_space<vmem>>, %arg5: memref<1x16xf32, #tpu.memory_space<vmem>>, %arg6: memref<4x32x16xf32, #tpu.memory_space<vmem>>) attributes {dimension_semantics = [#tpu.dimension_semantics<arbitrary>], iteration_bounds = array<i64: 1>, scalar_prefetch = 0 : i64, scratch_operands = 0 : i64, tpu.core_type = #tpu.core_type<tc>, window_params = [{pipeline_mode = #tpu.pipeline_mode<synchronous>, transform_indices = @transform_0, window_bounds = array<i64: 4, 32, 128>}, {pipeline_mode = #tpu.pipeline_mode<synchronous>, transform_indices = @transform_1, window_bounds = array<i64: 4, 128, 16>}, {pipeline_mode = #tpu.pipeline_mode<synchronous>, transform_indices = @transform_2, window_bounds = array<i64: 1, 16>}, {pipeline_mode = #tpu.pipeline_mode<synchronous>, transform_indices = @transform_3, window_bounds = array<i64: 1, 16>}, {pipeline_mode = #tpu.pipeline_mode<synchronous>, transform_indices = @transform_4, window_bounds = array<i64: 1, 16>}, {pipeline_mode = #tpu.pipeline_mode<synchronous>, transform_indices = @transform_5, window_bounds = array<i64: 4, 32, 16>}]} {
    %c0 = arith.constant 0 : index
    %c0_0 = arith.constant 0 : index
    %0 = vector.load %arg3[%c0, %c0_0] : memref<1x16xf32, #tpu.memory_space<vmem>>, vector<1x16xf32>
    %cst = arith.constant 0.000000e+00 : f32
    %1 = vector.broadcast %cst : f32 to vector<1x16xf32>
    %cst_1 = arith.constant 0.000000e+00 : f32
    %2 = vector.broadcast %cst_1 : f32 to vector<1x16xf32>
    %c0_2 = arith.constant 0 : index
    %c0_3 = arith.constant 0 : index
    %c0_4 = arith.constant 0 : index
    %3 = vector.load %arg1[%c0_2, %c0_3, %c0_4] : memref<4x32x128xbf16, #tpu.memory_space<vmem>>, vector<1x32x128xbf16>
    %4 = vector.shape_cast %3 : vector<1x32x128xbf16> to vector<32x128xbf16>
    %c0_5 = arith.constant 0 : index
    %c0_6 = arith.constant 0 : index
    %c0_7 = arith.constant 0 : index
    %5 = vector.load %arg2[%c0_5, %c0_6, %c0_7] : memref<4x128x16xbf16, #tpu.memory_space<vmem>>, vector<1x128x16xbf16>
    %6 = vector.shape_cast %5 : vector<1x128x16xbf16> to vector<128x16xbf16>
    %cst_8 = arith.constant dense<0.000000e+00> : vector<32x16xf32>
    %7 = tpu.matmul %4, %6, %cst_8 {dimension_numbers = #tpu.dot_dimension_numbers<[1], [0], [0], [1], [0, 0, 1, 1], [], []>} : vector<32x128xbf16>, vector<128x16xbf16>, vector<32x16xf32> -> vector<32x16xf32>
    %8 = vector.broadcast %0 : vector<1x16xf32> to vector<32x16xf32>
    %9 = arith.addf %7, %8 : vector<32x16xf32>
    %cst_9 = arith.constant 0.000000e+00 : f32
    %10 = vector.broadcast %cst_9 : f32 to vector<32x16xf32>
    %11 = arith.maximumf %9, %10 : vector<32x16xf32>
    %cst_10 = arith.constant dense<0.000000e+00> : vector<16xf32>
    %12 = vector.multi_reduction <add>, %11, %cst_10 [0] : vector<32x16xf32> to vector<16xf32>
    %13 = vector.shape_cast %12 : vector<16xf32> to vector<1x16xf32>
    %14 = arith.addf %1, %13 : vector<1x16xf32>
    %15 = arith.mulf %11, %11 : vector<32x16xf32>
    %cst_11 = arith.constant dense<0.000000e+00> : vector<16xf32>
    %16 = vector.multi_reduction <add>, %15, %cst_11 [0] : vector<32x16xf32> to vector<16xf32>
    %17 = vector.shape_cast %16 : vector<16xf32> to vector<1x16xf32>
    %18 = arith.addf %2, %17 : vector<1x16xf32>
    %c0_12 = arith.constant 0 : index
    %c0_13 = arith.constant 0 : index
    %c0_14 = arith.constant 0 : index
    %19 = vector.load %arg6[%c0_12, %c0_13, %c0_14] : memref<4x32x16xf32, #tpu.memory_space<vmem>>, vector<1x32x16xf32>
    %20 = vector.shape_cast %19 : vector<1x32x16xf32> to vector<32x16xf32>
    %21 = vector.shape_cast %11 : vector<32x16xf32> to vector<1x32x16xf32>
    tpu.vector_store %arg6[%c0_12, %c0_13, %c0_14], %21 {strides = array<i32>} : memref<4x32x16xf32, #tpu.memory_space<vmem>>, vector<1x32x16xf32>,
    %c1 = arith.constant 1 : index
    %c0_15 = arith.constant 0 : index
    %c0_16 = arith.constant 0 : index
    %22 = vector.load %arg1[%c1, %c0_15, %c0_16] : memref<4x32x128xbf16, #tpu.memory_space<vmem>>, vector<1x32x128xbf16>
    %23 = vector.shape_cast %22 : vector<1x32x128xbf16> to vector<32x128xbf16>
    %c1_17 = arith.constant 1 : index
    %c0_18 = arith.constant 0 : index
    %c0_19 = arith.constant 0 : index
    %24 = vector.load %arg2[%c1_17, %c0_18, %c0_19] : memref<4x128x16xbf16, #tpu.memory_space<vmem>>, vector<1x128x16xbf16>
    %25 = vector.shape_cast %24 : vector<1x128x16xbf16> to vector<128x16xbf16>
    %cst_20 = arith.constant dense<0.000000e+00> : vector<32x16xf32>
    %26 = tpu.matmul %23, %25, %cst_20 {dimension_numbers = #tpu.dot_dimension_numbers<[1], [0], [0], [1], [0, 0, 1, 1], [], []>} : vector<32x128xbf16>, vector<128x16xbf16>, vector<32x16xf32> -> vector<32x16xf32>
    %27 = vector.broadcast %0 : vector<1x16xf32> to vector<32x16xf32>
    %28 = arith.addf %26, %27 : vector<32x16xf32>
    %cst_21 = arith.constant 0.000000e+00 : f32
    %29 = vector.broadcast %cst_21 : f32 to vector<32x16xf32>
    %30 = arith.maximumf %28, %29 : vector<32x16xf32>
    %cst_22 = arith.constant dense<0.000000e+00> : vector<16xf32>
    %31 = vector.multi_reduction <add>, %30, %cst_22 [0] : vector<32x16xf32> to vector<16xf32>
    %32 = vector.shape_cast %31 : vector<16xf32> to vector<1x16xf32>
    %33 = arith.addf %14, %32 : vector<1x16xf32>
    %34 = arith.mulf %30, %30 : vector<32x16xf32>
    %cst_23 = arith.constant dense<0.000000e+00> : vector<16xf32>
    %35 = vector.multi_reduction <add>, %34, %cst_23 [0] : vector<32x16xf32> to vector<16xf32>
    %36 = vector.shape_cast %35 : vector<16xf32> to vector<1x16xf32>
    %37 = arith.addf %18, %36 : vector<1x16xf32>
    %c1_24 = arith.constant 1 : index
    %c0_25 = arith.constant 0 : index
    %c0_26 = arith.constant 0 : index
    %38 = vector.load %arg6[%c1_24, %c0_25, %c0_26] : memref<4x32x16xf32, #tpu.memory_space<vmem>>, vector<1x32x16xf32>
    %39 = vector.shape_cast %38 : vector<1x32x16xf32> to vector<32x16xf32>
    %40 = vector.shape_cast %30 : vector<32x16xf32> to vector<1x32x16xf32>
    tpu.vector_store %arg6[%c1_24, %c0_25, %c0_26], %40 {strides = array<i32>} : memref<4x32x16xf32, #tpu.memory_space<vmem>>, vector<1x32x16xf32>,
    %c2 = arith.constant 2 : index
    %c0_27 = arith.constant 0 : index
    %c0_28 = arith.constant 0 : index
    %41 = vector.load %arg1[%c2, %c0_27, %c0_28] : memref<4x32x128xbf16, #tpu.memory_space<vmem>>, vector<1x32x128xbf16>
    %42 = vector.shape_cast %41 : vector<1x32x128xbf16> to vector<32x128xbf16>
    %c2_29 = arith.constant 2 : index
    %c0_30 = arith.constant 0 : index
    %c0_31 = arith.constant 0 : index
    %43 = vector.load %arg2[%c2_29, %c0_30, %c0_31] : memref<4x128x16xbf16, #tpu.memory_space<vmem>>, vector<1x128x16xbf16>
    %44 = vector.shape_cast %43 : vector<1x128x16xbf16> to vector<128x16xbf16>
    %cst_32 = arith.constant dense<0.000000e+00> : vector<32x16xf32>
    %45 = tpu.matmul %42, %44, %cst_32 {dimension_numbers = #tpu.dot_dimension_numbers<[1], [0], [0], [1], [0, 0, 1, 1], [], []>} : vector<32x128xbf16>, vector<128x16xbf16>, vector<32x16xf32> -> vector<32x16xf32>
    %46 = vector.broadcast %0 : vector<1x16xf32> to vector<32x16xf32>
    %47 = arith.addf %45, %46 : vector<32x16xf32>
    %cst_33 = arith.constant 0.000000e+00 : f32
    %48 = vector.broadcast %cst_33 : f32 to vector<32x16xf32>
    %49 = arith.maximumf %47, %48 : vector<32x16xf32>
    %cst_34 = arith.constant dense<0.000000e+00> : vector<16xf32>
    %50 = vector.multi_reduction <add>, %49, %cst_34 [0] : vector<32x16xf32> to vector<16xf32>
    %51 = vector.shape_cast %50 : vector<16xf32> to vector<1x16xf32>
    %52 = arith.addf %33, %51 : vector<1x16xf32>
    %53 = arith.mulf %49, %49 : vector<32x16xf32>
    %cst_35 = arith.constant dense<0.000000e+00> : vector<16xf32>
    %54 = vector.multi_reduction <add>, %53, %cst_35 [0] : vector<32x16xf32> to vector<16xf32>
    %55 = vector.shape_cast %54 : vector<16xf32> to vector<1x16xf32>
    %56 = arith.addf %37, %55 : vector<1x16xf32>
    %c2_36 = arith.constant 2 : index
    %c0_37 = arith.constant 0 : index
    %c0_38 = arith.constant 0 : index
    %57 = vector.load %arg6[%c2_36, %c0_37, %c0_38] : memref<4x32x16xf32, #tpu.memory_space<vmem>>, vector<1x32x16xf32>
    %58 = vector.shape_cast %57 : vector<1x32x16xf32> to vector<32x16xf32>
    %59 = vector.shape_cast %49 : vector<32x16xf32> to vector<1x32x16xf32>
    tpu.vector_store %arg6[%c2_36, %c0_37, %c0_38], %59 {strides = array<i32>} : memref<4x32x16xf32, #tpu.memory_space<vmem>>, vector<1x32x16xf32>,
    %c3 = arith.constant 3 : index
    %c0_39 = arith.constant 0 : index
    %c0_40 = arith.constant 0 : index
    %60 = vector.load %arg1[%c3, %c0_39, %c0_40] : memref<4x32x128xbf16, #tpu.memory_space<vmem>>, vector<1x32x128xbf16>
    %61 = vector.shape_cast %60 : vector<1x32x128xbf16> to vector<32x128xbf16>
    %c3_41 = arith.constant 3 : index
    %c0_42 = arith.constant 0 : index
    %c0_43 = arith.constant 0 : index
    %62 = vector.load %arg2[%c3_41, %c0_42, %c0_43] : memref<4x128x16xbf16, #tpu.memory_space<vmem>>, vector<1x128x16xbf16>
    %63 = vector.shape_cast %62 : vector<1x128x16xbf16> to vector<128x16xbf16>
    %cst_44 = arith.constant dense<0.000000e+00> : vector<32x16xf32>
    %64 = tpu.matmul %61, %63, %cst_44 {dimension_numbers = #tpu.dot_dimension_numbers<[1], [0], [0], [1], [0, 0, 1, 1], [], []>} : vector<32x128xbf16>, vector<128x16xbf16>, vector<32x16xf32> -> vector<32x16xf32>
    %65 = vector.broadcast %0 : vector<1x16xf32> to vector<32x16xf32>
    %66 = arith.addf %64, %65 : vector<32x16xf32>
    %cst_45 = arith.constant 0.000000e+00 : f32
    %67 = vector.broadcast %cst_45 : f32 to vector<32x16xf32>
    %68 = arith.maximumf %66, %67 : vector<32x16xf32>
    %cst_46 = arith.constant dense<0.000000e+00> : vector<16xf32>
    %69 = vector.multi_reduction <add>, %68, %cst_46 [0] : vector<32x16xf32> to vector<16xf32>
    %70 = vector.shape_cast %69 : vector<16xf32> to vector<1x16xf32>
    %71 = arith.addf %52, %70 : vector<1x16xf32>
    %72 = arith.mulf %68, %68 : vector<32x16xf32>
    %cst_47 = arith.constant dense<0.000000e+00> : vector<16xf32>
    %73 = vector.multi_reduction <add>, %72, %cst_47 [0] : vector<32x16xf32> to vector<16xf32>
    %74 = vector.shape_cast %73 : vector<16xf32> to vector<1x16xf32>
    %75 = arith.addf %56, %74 : vector<1x16xf32>
    %c3_48 = arith.constant 3 : index
    %c0_49 = arith.constant 0 : index
    %c0_50 = arith.constant 0 : index
    %76 = vector.load %arg6[%c3_48, %c0_49, %c0_50] : memref<4x32x16xf32, #tpu.memory_space<vmem>>, vector<1x32x16xf32>
    %77 = vector.shape_cast %76 : vector<1x32x16xf32> to vector<32x16xf32>
    %78 = vector.shape_cast %68 : vector<32x16xf32> to vector<1x32x16xf32>
    tpu.vector_store %arg6[%c3_48, %c0_49, %c0_50], %78 {strides = array<i32>} : memref<4x32x16xf32, #tpu.memory_space<vmem>>, vector<1x32x16xf32>,
    %cst_51 = arith.constant 7.812500e-03 : f32
    %79 = vector.broadcast %cst_51 : f32 to vector<1x16xf32>
    %80 = arith.mulf %71, %79 : vector<1x16xf32>
    %cst_52 = arith.constant 7.812500e-03 : f32
    %81 = vector.broadcast %cst_52 : f32 to vector<1x16xf32>
    %82 = arith.mulf %75, %81 : vector<1x16xf32>
    %83 = arith.mulf %80, %80 : vector<1x16xf32>
    %84 = arith.subf %82, %83 : vector<1x16xf32>
    %cst_53 = arith.constant 0.000000e+00 : f32
    %85 = vector.broadcast %cst_53 : f32 to vector<1x16xf32>
    %86 = arith.maximumf %84, %85 : vector<1x16xf32>
    %c0_54 = arith.constant 0 : index
    %c0_55 = arith.constant 0 : index
    %87 = vector.load %arg4[%c0_54, %c0_55] : memref<1x16xf32, #tpu.memory_space<vmem>>, vector<1x16xf32>
    %cst_56 = arith.constant 9.99999974E-6 : f32
    %88 = vector.broadcast %cst_56 : f32 to vector<1x16xf32>
    %89 = arith.addf %86, %88 : vector<1x16xf32>
    %90 = math.rsqrt %89 : vector<1x16xf32>
    %91 = arith.mulf %87, %90 : vector<1x16xf32>
    %c0_57 = arith.constant 0 : index
    %c0_58 = arith.constant 0 : index
    %92 = vector.load %arg5[%c0_57, %c0_58] : memref<1x16xf32, #tpu.memory_space<vmem>>, vector<1x16xf32>
    %93 = arith.mulf %80, %91 : vector<1x16xf32>
    %94 = arith.subf %92, %93 : vector<1x16xf32>
    %c0_59 = arith.constant 0 : index
    %c0_60 = arith.constant 0 : index
    %c0_61 = arith.constant 0 : index
    %95 = vector.load %arg6[%c0_59, %c0_60, %c0_61] : memref<4x32x16xf32, #tpu.memory_space<vmem>>, vector<1x32x16xf32>
    %96 = vector.shape_cast %95 : vector<1x32x16xf32> to vector<32x16xf32>
    %97 = vector.broadcast %91 : vector<1x16xf32> to vector<32x16xf32>
    %98 = arith.mulf %96, %97 : vector<32x16xf32>
    %99 = vector.broadcast %94 : vector<1x16xf32> to vector<32x16xf32>
    %100 = arith.addf %98, %99 : vector<32x16xf32>
    %c0_62 = arith.constant 0 : index
    %c0_63 = arith.constant 0 : index
    %c0_64 = arith.constant 0 : index
    %101 = vector.load %arg6[%c0_62, %c0_63, %c0_64] : memref<4x32x16xf32, #tpu.memory_space<vmem>>, vector<1x32x16xf32>
    %102 = vector.shape_cast %101 : vector<1x32x16xf32> to vector<32x16xf32>
    %103 = vector.shape_cast %100 : vector<32x16xf32> to vector<1x32x16xf32>
    tpu.vector_store %arg6[%c0_62, %c0_63, %c0_64], %103 {strides = array<i32>} : memref<4x32x16xf32, #tpu.memory_space<vmem>>, vector<1x32x16xf32>,
    %c1_65 = arith.constant 1 : index
    %c0_66 = arith.constant 0 : index
    %c0_67 = arith.constant 0 : index
    %104 = vector.load %arg6[%c1_65, %c0_66, %c0_67] : memref<4x32x16xf32, #tpu.memory_space<vmem>>, vector<1x32x16xf32>
    %105 = vector.shape_cast %104 : vector<1x32x16xf32> to vector<32x16xf32>
    %106 = vector.broadcast %91 : vector<1x16xf32> to vector<32x16xf32>
    %107 = arith.mulf %105, %106 : vector<32x16xf32>
    %108 = vector.broadcast %94 : vector<1x16xf32> to vector<32x16xf32>
    %109 = arith.addf %107, %108 : vector<32x16xf32>
    %c1_68 = arith.constant 1 : index
    %c0_69 = arith.constant 0 : index
    %c0_70 = arith.constant 0 : index
    %110 = vector.load %arg6[%c1_68, %c0_69, %c0_70] : memref<4x32x16xf32, #tpu.memory_space<vmem>>, vector<1x32x16xf32>
    %111 = vector.shape_cast %110 : vector<1x32x16xf32> to vector<32x16xf32>
    %112 = vector.shape_cast %109 : vector<32x16xf32> to vector<1x32x16xf32>
    tpu.vector_store %arg6[%c1_68, %c0_69, %c0_70], %112 {strides = array<i32>} : memref<4x32x16xf32, #tpu.memory_space<vmem>>, vector<1x32x16xf32>,
    %c2_71 = arith.constant 2 : index
    %c0_72 = arith.constant 0 : index
    %c0_73 = arith.constant 0 : index
    %113 = vector.load %arg6[%c2_71, %c0_72, %c0_73] : memref<4x32x16xf32, #tpu.memory_space<vmem>>, vector<1x32x16xf32>
    %114 = vector.shape_cast %113 : vector<1x32x16xf32> to vector<32x16xf32>
    %115 = vector.broadcast %91 : vector<1x16xf32> to vector<32x16xf32>
    %116 = arith.mulf %114, %115 : vector<32x16xf32>
    %117 = vector.broadcast %94 : vector<1x16xf32> to vector<32x16xf32>
    %118 = arith.addf %116, %117 : vector<32x16xf32>
    %c2_74 = arith.constant 2 : index
    %c0_75 = arith.constant 0 : index
    %c0_76 = arith.constant 0 : index
    %119 = vector.load %arg6[%c2_74, %c0_75, %c0_76] : memref<4x32x16xf32, #tpu.memory_space<vmem>>, vector<1x32x16xf32>
    %120 = vector.shape_cast %119 : vector<1x32x16xf32> to vector<32x16xf32>
    %121 = vector.shape_cast %118 : vector<32x16xf32> to vector<1x32x16xf32>
    tpu.vector_store %arg6[%c2_74, %c0_75, %c0_76], %121 {strides = array<i32>} : memref<4x32x16xf32, #tpu.memory_space<vmem>>, vector<1x32x16xf32>,
    %c3_77 = arith.constant 3 : index
    %c0_78 = arith.constant 0 : index
    %c0_79 = arith.constant 0 : index
    %122 = vector.load %arg6[%c3_77, %c0_78, %c0_79] : memref<4x32x16xf32, #tpu.memory_space<vmem>>, vector<1x32x16xf32>
    %123 = vector.shape_cast %122 : vector<1x32x16xf32> to vector<32x16xf32>
    %124 = vector.broadcast %91 : vector<1x16xf32> to vector<32x16xf32>
    %125 = arith.mulf %123, %124 : vector<32x16xf32>
    %126 = vector.broadcast %94 : vector<1x16xf32> to vector<32x16xf32>
    %127 = arith.addf %125, %126 : vector<32x16xf32>
    %c3_80 = arith.constant 3 : index
    %c0_81 = arith.constant 0 : index
    %c0_82 = arith.constant 0 : index
    %128 = vector.load %arg6[%c3_80, %c0_81, %c0_82] : memref<4x32x16xf32, #tpu.memory_space<vmem>>, vector<1x32x16xf32>
    %129 = vector.shape_cast %128 : vector<1x32x16xf32> to vector<32x16xf32>
    %130 = vector.shape_cast %127 : vector<32x16xf32> to vector<1x32x16xf32>
    tpu.vector_store %arg6[%c3_80, %c0_81, %c0_82], %130 {strides = array<i32>} : memref<4x32x16xf32, #tpu.memory_space<vmem>>, vector<1x32x16xf32>,
    return
  }
  func.func @transform_0(%arg0: i32) -> (i32, i32, i32) {
    %c0_i32 = arith.constant 0 : i32
    %c0_i32_0 = arith.constant 0 : i32
    %c0_i32_1 = arith.constant 0 : i32
    %c0_i32_2 = arith.constant 0 : i32
    return %c0_i32, %c0_i32_0, %c0_i32_1 : i32, i32, i32
  }
  func.func @transform_1(%arg0: i32) -> (i32, i32, i32) {
    %c0_i32 = arith.constant 0 : i32
    %c0_i32_0 = arith.constant 0 : i32
    %c0_i32_1 = arith.constant 0 : i32
    %c0_i32_2 = arith.constant 0 : i32
    return %c0_i32, %c0_i32_0, %c0_i32_1 : i32, i32, i32
  }
  func.func @transform_2(%arg0: i32) -> (i32, i32) {
    %c0_i32 = arith.constant 0 : i32
    %c0_i32_0 = arith.constant 0 : i32
    %c0_i32_1 = arith.constant 0 : i32
    return %c0_i32, %c0_i32_0 : i32, i32
  }
  func.func @transform_3(%arg0: i32) -> (i32, i32) {
    %c0_i32 = arith.constant 0 : i32
    %c0_i32_0 = arith.constant 0 : i32
    %c0_i32_1 = arith.constant 0 : i32
    return %c0_i32, %c0_i32_0 : i32, i32
  }
  func.func @transform_4(%arg0: i32) -> (i32, i32) {
    %c0_i32 = arith.constant 0 : i32
    %c0_i32_0 = arith.constant 0 : i32
    %c0_i32_1 = arith.constant 0 : i32
    return %c0_i32, %c0_i32_0 : i32, i32
  }
  func.func @transform_5(%arg0: i32) -> (i32, i32, i32) {
    %c0_i32 = arith.constant 0 : i32
    %c0_i32_0 = arith.constant 0 : i32
    %c0_i32_1 = arith.constant 0 : i32
    %c0_i32_2 = arith.constant 0 : i32
    return %c0_i32, %c0_i32_0, %c0_i32_1 : i32, i32, i32
  }
}

module attributes {stable_mosaic.version = 11 : i64} {
  func.func @_convt_fused_kernel(%arg0: i32, %arg1: memref<4x128x64xbf16, #tpu.memory_space<vmem>>, %arg2: memref<4x64x8xbf16, #tpu.memory_space<vmem>>, %arg3: memref<1x8xf32, #tpu.memory_space<vmem>>, %arg4: memref<1x8xf32, #tpu.memory_space<vmem>>, %arg5: memref<1x8xf32, #tpu.memory_space<vmem>>, %arg6: memref<4x128x8xf32, #tpu.memory_space<vmem>>) attributes {dimension_semantics = [#tpu.dimension_semantics<arbitrary>], iteration_bounds = array<i64: 1>, scalar_prefetch = 0 : i64, scratch_operands = 0 : i64, tpu.core_type = #tpu.core_type<tc>, window_params = [{pipeline_mode = #tpu.pipeline_mode<synchronous>, transform_indices = @transform_0, window_bounds = array<i64: 4, 128, 64>}, {pipeline_mode = #tpu.pipeline_mode<synchronous>, transform_indices = @transform_1, window_bounds = array<i64: 4, 64, 8>}, {pipeline_mode = #tpu.pipeline_mode<synchronous>, transform_indices = @transform_2, window_bounds = array<i64: 1, 8>}, {pipeline_mode = #tpu.pipeline_mode<synchronous>, transform_indices = @transform_3, window_bounds = array<i64: 1, 8>}, {pipeline_mode = #tpu.pipeline_mode<synchronous>, transform_indices = @transform_4, window_bounds = array<i64: 1, 8>}, {pipeline_mode = #tpu.pipeline_mode<synchronous>, transform_indices = @transform_5, window_bounds = array<i64: 4, 128, 8>}]} {
    %c0 = arith.constant 0 : index
    %c0_0 = arith.constant 0 : index
    %0 = vector.load %arg3[%c0, %c0_0] : memref<1x8xf32, #tpu.memory_space<vmem>>, vector<1x8xf32>
    %cst = arith.constant 0.000000e+00 : f32
    %1 = vector.broadcast %cst : f32 to vector<1x8xf32>
    %cst_1 = arith.constant 0.000000e+00 : f32
    %2 = vector.broadcast %cst_1 : f32 to vector<1x8xf32>
    %c0_2 = arith.constant 0 : index
    %c0_3 = arith.constant 0 : index
    %c0_4 = arith.constant 0 : index
    %3 = vector.load %arg1[%c0_2, %c0_3, %c0_4] : memref<4x128x64xbf16, #tpu.memory_space<vmem>>, vector<1x128x64xbf16>
    %4 = vector.shape_cast %3 : vector<1x128x64xbf16> to vector<128x64xbf16>
    %c0_5 = arith.constant 0 : index
    %c0_6 = arith.constant 0 : index
    %c0_7 = arith.constant 0 : index
    %5 = vector.load %arg2[%c0_5, %c0_6, %c0_7] : memref<4x64x8xbf16, #tpu.memory_space<vmem>>, vector<1x64x8xbf16>
    %6 = vector.shape_cast %5 : vector<1x64x8xbf16> to vector<64x8xbf16>
    %cst_8 = arith.constant dense<0.000000e+00> : vector<128x8xf32>
    %7 = tpu.matmul %4, %6, %cst_8 {dimension_numbers = #tpu.dot_dimension_numbers<[1], [0], [0], [1], [0, 0, 1, 1], [], []>} : vector<128x64xbf16>, vector<64x8xbf16>, vector<128x8xf32> -> vector<128x8xf32>
    %8 = vector.broadcast %0 : vector<1x8xf32> to vector<128x8xf32>
    %9 = arith.addf %7, %8 : vector<128x8xf32>
    %cst_9 = arith.constant 0.000000e+00 : f32
    %10 = vector.broadcast %cst_9 : f32 to vector<128x8xf32>
    %11 = arith.maximumf %9, %10 : vector<128x8xf32>
    %cst_10 = arith.constant dense<0.000000e+00> : vector<8xf32>
    %12 = vector.multi_reduction <add>, %11, %cst_10 [0] : vector<128x8xf32> to vector<8xf32>
    %13 = vector.shape_cast %12 : vector<8xf32> to vector<1x8xf32>
    %14 = arith.addf %1, %13 : vector<1x8xf32>
    %15 = arith.mulf %11, %11 : vector<128x8xf32>
    %cst_11 = arith.constant dense<0.000000e+00> : vector<8xf32>
    %16 = vector.multi_reduction <add>, %15, %cst_11 [0] : vector<128x8xf32> to vector<8xf32>
    %17 = vector.shape_cast %16 : vector<8xf32> to vector<1x8xf32>
    %18 = arith.addf %2, %17 : vector<1x8xf32>
    %c0_12 = arith.constant 0 : index
    %c0_13 = arith.constant 0 : index
    %c0_14 = arith.constant 0 : index
    %19 = vector.load %arg6[%c0_12, %c0_13, %c0_14] : memref<4x128x8xf32, #tpu.memory_space<vmem>>, vector<1x128x8xf32>
    %20 = vector.shape_cast %19 : vector<1x128x8xf32> to vector<128x8xf32>
    %21 = vector.shape_cast %11 : vector<128x8xf32> to vector<1x128x8xf32>
    tpu.vector_store %arg6[%c0_12, %c0_13, %c0_14], %21 {strides = array<i32>} : memref<4x128x8xf32, #tpu.memory_space<vmem>>, vector<1x128x8xf32>,
    %c1 = arith.constant 1 : index
    %c0_15 = arith.constant 0 : index
    %c0_16 = arith.constant 0 : index
    %22 = vector.load %arg1[%c1, %c0_15, %c0_16] : memref<4x128x64xbf16, #tpu.memory_space<vmem>>, vector<1x128x64xbf16>
    %23 = vector.shape_cast %22 : vector<1x128x64xbf16> to vector<128x64xbf16>
    %c1_17 = arith.constant 1 : index
    %c0_18 = arith.constant 0 : index
    %c0_19 = arith.constant 0 : index
    %24 = vector.load %arg2[%c1_17, %c0_18, %c0_19] : memref<4x64x8xbf16, #tpu.memory_space<vmem>>, vector<1x64x8xbf16>
    %25 = vector.shape_cast %24 : vector<1x64x8xbf16> to vector<64x8xbf16>
    %cst_20 = arith.constant dense<0.000000e+00> : vector<128x8xf32>
    %26 = tpu.matmul %23, %25, %cst_20 {dimension_numbers = #tpu.dot_dimension_numbers<[1], [0], [0], [1], [0, 0, 1, 1], [], []>} : vector<128x64xbf16>, vector<64x8xbf16>, vector<128x8xf32> -> vector<128x8xf32>
    %27 = vector.broadcast %0 : vector<1x8xf32> to vector<128x8xf32>
    %28 = arith.addf %26, %27 : vector<128x8xf32>
    %cst_21 = arith.constant 0.000000e+00 : f32
    %29 = vector.broadcast %cst_21 : f32 to vector<128x8xf32>
    %30 = arith.maximumf %28, %29 : vector<128x8xf32>
    %cst_22 = arith.constant dense<0.000000e+00> : vector<8xf32>
    %31 = vector.multi_reduction <add>, %30, %cst_22 [0] : vector<128x8xf32> to vector<8xf32>
    %32 = vector.shape_cast %31 : vector<8xf32> to vector<1x8xf32>
    %33 = arith.addf %14, %32 : vector<1x8xf32>
    %34 = arith.mulf %30, %30 : vector<128x8xf32>
    %cst_23 = arith.constant dense<0.000000e+00> : vector<8xf32>
    %35 = vector.multi_reduction <add>, %34, %cst_23 [0] : vector<128x8xf32> to vector<8xf32>
    %36 = vector.shape_cast %35 : vector<8xf32> to vector<1x8xf32>
    %37 = arith.addf %18, %36 : vector<1x8xf32>
    %c1_24 = arith.constant 1 : index
    %c0_25 = arith.constant 0 : index
    %c0_26 = arith.constant 0 : index
    %38 = vector.load %arg6[%c1_24, %c0_25, %c0_26] : memref<4x128x8xf32, #tpu.memory_space<vmem>>, vector<1x128x8xf32>
    %39 = vector.shape_cast %38 : vector<1x128x8xf32> to vector<128x8xf32>
    %40 = vector.shape_cast %30 : vector<128x8xf32> to vector<1x128x8xf32>
    tpu.vector_store %arg6[%c1_24, %c0_25, %c0_26], %40 {strides = array<i32>} : memref<4x128x8xf32, #tpu.memory_space<vmem>>, vector<1x128x8xf32>,
    %c2 = arith.constant 2 : index
    %c0_27 = arith.constant 0 : index
    %c0_28 = arith.constant 0 : index
    %41 = vector.load %arg1[%c2, %c0_27, %c0_28] : memref<4x128x64xbf16, #tpu.memory_space<vmem>>, vector<1x128x64xbf16>
    %42 = vector.shape_cast %41 : vector<1x128x64xbf16> to vector<128x64xbf16>
    %c2_29 = arith.constant 2 : index
    %c0_30 = arith.constant 0 : index
    %c0_31 = arith.constant 0 : index
    %43 = vector.load %arg2[%c2_29, %c0_30, %c0_31] : memref<4x64x8xbf16, #tpu.memory_space<vmem>>, vector<1x64x8xbf16>
    %44 = vector.shape_cast %43 : vector<1x64x8xbf16> to vector<64x8xbf16>
    %cst_32 = arith.constant dense<0.000000e+00> : vector<128x8xf32>
    %45 = tpu.matmul %42, %44, %cst_32 {dimension_numbers = #tpu.dot_dimension_numbers<[1], [0], [0], [1], [0, 0, 1, 1], [], []>} : vector<128x64xbf16>, vector<64x8xbf16>, vector<128x8xf32> -> vector<128x8xf32>
    %46 = vector.broadcast %0 : vector<1x8xf32> to vector<128x8xf32>
    %47 = arith.addf %45, %46 : vector<128x8xf32>
    %cst_33 = arith.constant 0.000000e+00 : f32
    %48 = vector.broadcast %cst_33 : f32 to vector<128x8xf32>
    %49 = arith.maximumf %47, %48 : vector<128x8xf32>
    %cst_34 = arith.constant dense<0.000000e+00> : vector<8xf32>
    %50 = vector.multi_reduction <add>, %49, %cst_34 [0] : vector<128x8xf32> to vector<8xf32>
    %51 = vector.shape_cast %50 : vector<8xf32> to vector<1x8xf32>
    %52 = arith.addf %33, %51 : vector<1x8xf32>
    %53 = arith.mulf %49, %49 : vector<128x8xf32>
    %cst_35 = arith.constant dense<0.000000e+00> : vector<8xf32>
    %54 = vector.multi_reduction <add>, %53, %cst_35 [0] : vector<128x8xf32> to vector<8xf32>
    %55 = vector.shape_cast %54 : vector<8xf32> to vector<1x8xf32>
    %56 = arith.addf %37, %55 : vector<1x8xf32>
    %c2_36 = arith.constant 2 : index
    %c0_37 = arith.constant 0 : index
    %c0_38 = arith.constant 0 : index
    %57 = vector.load %arg6[%c2_36, %c0_37, %c0_38] : memref<4x128x8xf32, #tpu.memory_space<vmem>>, vector<1x128x8xf32>
    %58 = vector.shape_cast %57 : vector<1x128x8xf32> to vector<128x8xf32>
    %59 = vector.shape_cast %49 : vector<128x8xf32> to vector<1x128x8xf32>
    tpu.vector_store %arg6[%c2_36, %c0_37, %c0_38], %59 {strides = array<i32>} : memref<4x128x8xf32, #tpu.memory_space<vmem>>, vector<1x128x8xf32>,
    %c3 = arith.constant 3 : index
    %c0_39 = arith.constant 0 : index
    %c0_40 = arith.constant 0 : index
    %60 = vector.load %arg1[%c3, %c0_39, %c0_40] : memref<4x128x64xbf16, #tpu.memory_space<vmem>>, vector<1x128x64xbf16>
    %61 = vector.shape_cast %60 : vector<1x128x64xbf16> to vector<128x64xbf16>
    %c3_41 = arith.constant 3 : index
    %c0_42 = arith.constant 0 : index
    %c0_43 = arith.constant 0 : index
    %62 = vector.load %arg2[%c3_41, %c0_42, %c0_43] : memref<4x64x8xbf16, #tpu.memory_space<vmem>>, vector<1x64x8xbf16>
    %63 = vector.shape_cast %62 : vector<1x64x8xbf16> to vector<64x8xbf16>
    %cst_44 = arith.constant dense<0.000000e+00> : vector<128x8xf32>
    %64 = tpu.matmul %61, %63, %cst_44 {dimension_numbers = #tpu.dot_dimension_numbers<[1], [0], [0], [1], [0, 0, 1, 1], [], []>} : vector<128x64xbf16>, vector<64x8xbf16>, vector<128x8xf32> -> vector<128x8xf32>
    %65 = vector.broadcast %0 : vector<1x8xf32> to vector<128x8xf32>
    %66 = arith.addf %64, %65 : vector<128x8xf32>
    %cst_45 = arith.constant 0.000000e+00 : f32
    %67 = vector.broadcast %cst_45 : f32 to vector<128x8xf32>
    %68 = arith.maximumf %66, %67 : vector<128x8xf32>
    %cst_46 = arith.constant dense<0.000000e+00> : vector<8xf32>
    %69 = vector.multi_reduction <add>, %68, %cst_46 [0] : vector<128x8xf32> to vector<8xf32>
    %70 = vector.shape_cast %69 : vector<8xf32> to vector<1x8xf32>
    %71 = arith.addf %52, %70 : vector<1x8xf32>
    %72 = arith.mulf %68, %68 : vector<128x8xf32>
    %cst_47 = arith.constant dense<0.000000e+00> : vector<8xf32>
    %73 = vector.multi_reduction <add>, %72, %cst_47 [0] : vector<128x8xf32> to vector<8xf32>
    %74 = vector.shape_cast %73 : vector<8xf32> to vector<1x8xf32>
    %75 = arith.addf %56, %74 : vector<1x8xf32>
    %c3_48 = arith.constant 3 : index
    %c0_49 = arith.constant 0 : index
    %c0_50 = arith.constant 0 : index
    %76 = vector.load %arg6[%c3_48, %c0_49, %c0_50] : memref<4x128x8xf32, #tpu.memory_space<vmem>>, vector<1x128x8xf32>
    %77 = vector.shape_cast %76 : vector<1x128x8xf32> to vector<128x8xf32>
    %78 = vector.shape_cast %68 : vector<128x8xf32> to vector<1x128x8xf32>
    tpu.vector_store %arg6[%c3_48, %c0_49, %c0_50], %78 {strides = array<i32>} : memref<4x128x8xf32, #tpu.memory_space<vmem>>, vector<1x128x8xf32>,
    %cst_51 = arith.constant 0.001953125 : f32
    %79 = vector.broadcast %cst_51 : f32 to vector<1x8xf32>
    %80 = arith.mulf %71, %79 : vector<1x8xf32>
    %cst_52 = arith.constant 0.001953125 : f32
    %81 = vector.broadcast %cst_52 : f32 to vector<1x8xf32>
    %82 = arith.mulf %75, %81 : vector<1x8xf32>
    %83 = arith.mulf %80, %80 : vector<1x8xf32>
    %84 = arith.subf %82, %83 : vector<1x8xf32>
    %cst_53 = arith.constant 0.000000e+00 : f32
    %85 = vector.broadcast %cst_53 : f32 to vector<1x8xf32>
    %86 = arith.maximumf %84, %85 : vector<1x8xf32>
    %c0_54 = arith.constant 0 : index
    %c0_55 = arith.constant 0 : index
    %87 = vector.load %arg4[%c0_54, %c0_55] : memref<1x8xf32, #tpu.memory_space<vmem>>, vector<1x8xf32>
    %cst_56 = arith.constant 9.99999974E-6 : f32
    %88 = vector.broadcast %cst_56 : f32 to vector<1x8xf32>
    %89 = arith.addf %86, %88 : vector<1x8xf32>
    %90 = math.rsqrt %89 : vector<1x8xf32>
    %91 = arith.mulf %87, %90 : vector<1x8xf32>
    %c0_57 = arith.constant 0 : index
    %c0_58 = arith.constant 0 : index
    %92 = vector.load %arg5[%c0_57, %c0_58] : memref<1x8xf32, #tpu.memory_space<vmem>>, vector<1x8xf32>
    %93 = arith.mulf %80, %91 : vector<1x8xf32>
    %94 = arith.subf %92, %93 : vector<1x8xf32>
    %c0_59 = arith.constant 0 : index
    %c0_60 = arith.constant 0 : index
    %c0_61 = arith.constant 0 : index
    %95 = vector.load %arg6[%c0_59, %c0_60, %c0_61] : memref<4x128x8xf32, #tpu.memory_space<vmem>>, vector<1x128x8xf32>
    %96 = vector.shape_cast %95 : vector<1x128x8xf32> to vector<128x8xf32>
    %97 = vector.broadcast %91 : vector<1x8xf32> to vector<128x8xf32>
    %98 = arith.mulf %96, %97 : vector<128x8xf32>
    %99 = vector.broadcast %94 : vector<1x8xf32> to vector<128x8xf32>
    %100 = arith.addf %98, %99 : vector<128x8xf32>
    %c0_62 = arith.constant 0 : index
    %c0_63 = arith.constant 0 : index
    %c0_64 = arith.constant 0 : index
    %101 = vector.load %arg6[%c0_62, %c0_63, %c0_64] : memref<4x128x8xf32, #tpu.memory_space<vmem>>, vector<1x128x8xf32>
    %102 = vector.shape_cast %101 : vector<1x128x8xf32> to vector<128x8xf32>
    %103 = vector.shape_cast %100 : vector<128x8xf32> to vector<1x128x8xf32>
    tpu.vector_store %arg6[%c0_62, %c0_63, %c0_64], %103 {strides = array<i32>} : memref<4x128x8xf32, #tpu.memory_space<vmem>>, vector<1x128x8xf32>,
    %c1_65 = arith.constant 1 : index
    %c0_66 = arith.constant 0 : index
    %c0_67 = arith.constant 0 : index
    %104 = vector.load %arg6[%c1_65, %c0_66, %c0_67] : memref<4x128x8xf32, #tpu.memory_space<vmem>>, vector<1x128x8xf32>
    %105 = vector.shape_cast %104 : vector<1x128x8xf32> to vector<128x8xf32>
    %106 = vector.broadcast %91 : vector<1x8xf32> to vector<128x8xf32>
    %107 = arith.mulf %105, %106 : vector<128x8xf32>
    %108 = vector.broadcast %94 : vector<1x8xf32> to vector<128x8xf32>
    %109 = arith.addf %107, %108 : vector<128x8xf32>
    %c1_68 = arith.constant 1 : index
    %c0_69 = arith.constant 0 : index
    %c0_70 = arith.constant 0 : index
    %110 = vector.load %arg6[%c1_68, %c0_69, %c0_70] : memref<4x128x8xf32, #tpu.memory_space<vmem>>, vector<1x128x8xf32>
    %111 = vector.shape_cast %110 : vector<1x128x8xf32> to vector<128x8xf32>
    %112 = vector.shape_cast %109 : vector<128x8xf32> to vector<1x128x8xf32>
    tpu.vector_store %arg6[%c1_68, %c0_69, %c0_70], %112 {strides = array<i32>} : memref<4x128x8xf32, #tpu.memory_space<vmem>>, vector<1x128x8xf32>,
    %c2_71 = arith.constant 2 : index
    %c0_72 = arith.constant 0 : index
    %c0_73 = arith.constant 0 : index
    %113 = vector.load %arg6[%c2_71, %c0_72, %c0_73] : memref<4x128x8xf32, #tpu.memory_space<vmem>>, vector<1x128x8xf32>
    %114 = vector.shape_cast %113 : vector<1x128x8xf32> to vector<128x8xf32>
    %115 = vector.broadcast %91 : vector<1x8xf32> to vector<128x8xf32>
    %116 = arith.mulf %114, %115 : vector<128x8xf32>
    %117 = vector.broadcast %94 : vector<1x8xf32> to vector<128x8xf32>
    %118 = arith.addf %116, %117 : vector<128x8xf32>
    %c2_74 = arith.constant 2 : index
    %c0_75 = arith.constant 0 : index
    %c0_76 = arith.constant 0 : index
    %119 = vector.load %arg6[%c2_74, %c0_75, %c0_76] : memref<4x128x8xf32, #tpu.memory_space<vmem>>, vector<1x128x8xf32>
    %120 = vector.shape_cast %119 : vector<1x128x8xf32> to vector<128x8xf32>
    %121 = vector.shape_cast %118 : vector<128x8xf32> to vector<1x128x8xf32>
    tpu.vector_store %arg6[%c2_74, %c0_75, %c0_76], %121 {strides = array<i32>} : memref<4x128x8xf32, #tpu.memory_space<vmem>>, vector<1x128x8xf32>,
    %c3_77 = arith.constant 3 : index
    %c0_78 = arith.constant 0 : index
    %c0_79 = arith.constant 0 : index
    %122 = vector.load %arg6[%c3_77, %c0_78, %c0_79] : memref<4x128x8xf32, #tpu.memory_space<vmem>>, vector<1x128x8xf32>
    %123 = vector.shape_cast %122 : vector<1x128x8xf32> to vector<128x8xf32>
    %124 = vector.broadcast %91 : vector<1x8xf32> to vector<128x8xf32>
    %125 = arith.mulf %123, %124 : vector<128x8xf32>
    %126 = vector.broadcast %94 : vector<1x8xf32> to vector<128x8xf32>
    %127 = arith.addf %125, %126 : vector<128x8xf32>
    %c3_80 = arith.constant 3 : index
    %c0_81 = arith.constant 0 : index
    %c0_82 = arith.constant 0 : index
    %128 = vector.load %arg6[%c3_80, %c0_81, %c0_82] : memref<4x128x8xf32, #tpu.memory_space<vmem>>, vector<1x128x8xf32>
    %129 = vector.shape_cast %128 : vector<1x128x8xf32> to vector<128x8xf32>
    %130 = vector.shape_cast %127 : vector<128x8xf32> to vector<1x128x8xf32>
    tpu.vector_store %arg6[%c3_80, %c0_81, %c0_82], %130 {strides = array<i32>} : memref<4x128x8xf32, #tpu.memory_space<vmem>>, vector<1x128x8xf32>,
    return
  }
  func.func @transform_0(%arg0: i32) -> (i32, i32, i32) {
    %c0_i32 = arith.constant 0 : i32
    %c0_i32_0 = arith.constant 0 : i32
    %c0_i32_1 = arith.constant 0 : i32
    %c0_i32_2 = arith.constant 0 : i32
    return %c0_i32, %c0_i32_0, %c0_i32_1 : i32, i32, i32
  }
  func.func @transform_1(%arg0: i32) -> (i32, i32, i32) {
    %c0_i32 = arith.constant 0 : i32
    %c0_i32_0 = arith.constant 0 : i32
    %c0_i32_1 = arith.constant 0 : i32
    %c0_i32_2 = arith.constant 0 : i32
    return %c0_i32, %c0_i32_0, %c0_i32_1 : i32, i32, i32
  }
  func.func @transform_2(%arg0: i32) -> (i32, i32) {
    %c0_i32 = arith.constant 0 : i32
    %c0_i32_0 = arith.constant 0 : i32
    %c0_i32_1 = arith.constant 0 : i32
    return %c0_i32, %c0_i32_0 : i32, i32
  }
  func.func @transform_3(%arg0: i32) -> (i32, i32) {
    %c0_i32 = arith.constant 0 : i32
    %c0_i32_0 = arith.constant 0 : i32
    %c0_i32_1 = arith.constant 0 : i32
    return %c0_i32, %c0_i32_0 : i32, i32
  }
  func.func @transform_4(%arg0: i32) -> (i32, i32) {
    %c0_i32 = arith.constant 0 : i32
    %c0_i32_0 = arith.constant 0 : i32
    %c0_i32_1 = arith.constant 0 : i32
    return %c0_i32, %c0_i32_0 : i32, i32
  }
  func.func @transform_5(%arg0: i32) -> (i32, i32, i32) {
    %c0_i32 = arith.constant 0 : i32
    %c0_i32_0 = arith.constant 0 : i32
    %c0_i32_1 = arith.constant 0 : i32
    %c0_i32_2 = arith.constant 0 : i32
    return %c0_i32, %c0_i32_0, %c0_i32_1 : i32, i32, i32
  }
}

module attributes {stable_mosaic.version = 11 : i64} {
  func.func @_convt_fused_kernel(%arg0: i32, %arg1: memref<4x512x32xbf16, #tpu.memory_space<vmem>>, %arg2: memref<4x32x3xbf16, #tpu.memory_space<vmem>>, %arg3: memref<1x3xf32, #tpu.memory_space<vmem>>, %arg4: memref<1x3xf32, #tpu.memory_space<vmem>>, %arg5: memref<1x3xf32, #tpu.memory_space<vmem>>, %arg6: memref<4x512x3xf32, #tpu.memory_space<vmem>>) attributes {dimension_semantics = [#tpu.dimension_semantics<arbitrary>], iteration_bounds = array<i64: 1>, scalar_prefetch = 0 : i64, scratch_operands = 0 : i64, tpu.core_type = #tpu.core_type<tc>, window_params = [{pipeline_mode = #tpu.pipeline_mode<synchronous>, transform_indices = @transform_0, window_bounds = array<i64: 4, 512, 32>}, {pipeline_mode = #tpu.pipeline_mode<synchronous>, transform_indices = @transform_1, window_bounds = array<i64: 4, 32, 3>}, {pipeline_mode = #tpu.pipeline_mode<synchronous>, transform_indices = @transform_2, window_bounds = array<i64: 1, 3>}, {pipeline_mode = #tpu.pipeline_mode<synchronous>, transform_indices = @transform_3, window_bounds = array<i64: 1, 3>}, {pipeline_mode = #tpu.pipeline_mode<synchronous>, transform_indices = @transform_4, window_bounds = array<i64: 1, 3>}, {pipeline_mode = #tpu.pipeline_mode<synchronous>, transform_indices = @transform_5, window_bounds = array<i64: 4, 512, 3>}]} {
    %c0 = arith.constant 0 : index
    %c0_0 = arith.constant 0 : index
    %0 = vector.load %arg3[%c0, %c0_0] : memref<1x3xf32, #tpu.memory_space<vmem>>, vector<1x3xf32>
    %c0_1 = arith.constant 0 : index
    %c0_2 = arith.constant 0 : index
    %c0_3 = arith.constant 0 : index
    %1 = vector.load %arg1[%c0_1, %c0_2, %c0_3] : memref<4x512x32xbf16, #tpu.memory_space<vmem>>, vector<1x512x32xbf16>
    %2 = vector.shape_cast %1 : vector<1x512x32xbf16> to vector<512x32xbf16>
    %c0_4 = arith.constant 0 : index
    %c0_5 = arith.constant 0 : index
    %c0_6 = arith.constant 0 : index
    %3 = vector.load %arg2[%c0_4, %c0_5, %c0_6] : memref<4x32x3xbf16, #tpu.memory_space<vmem>>, vector<1x32x3xbf16>
    %4 = vector.shape_cast %3 : vector<1x32x3xbf16> to vector<32x3xbf16>
    %cst = arith.constant dense<0.000000e+00> : vector<512x3xf32>
    %5 = tpu.matmul %2, %4, %cst {dimension_numbers = #tpu.dot_dimension_numbers<[1], [0], [0], [1], [0, 0, 1, 1], [], []>} : vector<512x32xbf16>, vector<32x3xbf16>, vector<512x3xf32> -> vector<512x3xf32>
    %6 = vector.broadcast %0 : vector<1x3xf32> to vector<512x3xf32>
    %7 = arith.addf %5, %6 : vector<512x3xf32>
    %cst_7 = arith.constant 0.000000e+00 : f32
    %8 = vector.broadcast %cst_7 : f32 to vector<512x3xf32>
    %9 = arith.subf %8, %7 : vector<512x3xf32>
    %10 = math.exp %9 : vector<512x3xf32>
    %cst_8 = arith.constant 1.000000e+00 : f32
    %11 = vector.broadcast %cst_8 : f32 to vector<512x3xf32>
    %12 = arith.addf %11, %10 : vector<512x3xf32>
    %13 = tpu.reciprocal %12 {approx = true} : vector<512x3xf32> -> vector<512x3xf32>
    %c0_9 = arith.constant 0 : index
    %c0_10 = arith.constant 0 : index
    %c0_11 = arith.constant 0 : index
    %14 = vector.load %arg6[%c0_9, %c0_10, %c0_11] : memref<4x512x3xf32, #tpu.memory_space<vmem>>, vector<1x512x3xf32>
    %15 = vector.shape_cast %14 : vector<1x512x3xf32> to vector<512x3xf32>
    %16 = vector.shape_cast %13 : vector<512x3xf32> to vector<1x512x3xf32>
    tpu.vector_store %arg6[%c0_9, %c0_10, %c0_11], %16 {strides = array<i32>} : memref<4x512x3xf32, #tpu.memory_space<vmem>>, vector<1x512x3xf32>,
    %c1 = arith.constant 1 : index
    %c0_12 = arith.constant 0 : index
    %c0_13 = arith.constant 0 : index
    %17 = vector.load %arg1[%c1, %c0_12, %c0_13] : memref<4x512x32xbf16, #tpu.memory_space<vmem>>, vector<1x512x32xbf16>
    %18 = vector.shape_cast %17 : vector<1x512x32xbf16> to vector<512x32xbf16>
    %c1_14 = arith.constant 1 : index
    %c0_15 = arith.constant 0 : index
    %c0_16 = arith.constant 0 : index
    %19 = vector.load %arg2[%c1_14, %c0_15, %c0_16] : memref<4x32x3xbf16, #tpu.memory_space<vmem>>, vector<1x32x3xbf16>
    %20 = vector.shape_cast %19 : vector<1x32x3xbf16> to vector<32x3xbf16>
    %cst_17 = arith.constant dense<0.000000e+00> : vector<512x3xf32>
    %21 = tpu.matmul %18, %20, %cst_17 {dimension_numbers = #tpu.dot_dimension_numbers<[1], [0], [0], [1], [0, 0, 1, 1], [], []>} : vector<512x32xbf16>, vector<32x3xbf16>, vector<512x3xf32> -> vector<512x3xf32>
    %22 = vector.broadcast %0 : vector<1x3xf32> to vector<512x3xf32>
    %23 = arith.addf %21, %22 : vector<512x3xf32>
    %cst_18 = arith.constant 0.000000e+00 : f32
    %24 = vector.broadcast %cst_18 : f32 to vector<512x3xf32>
    %25 = arith.subf %24, %23 : vector<512x3xf32>
    %26 = math.exp %25 : vector<512x3xf32>
    %cst_19 = arith.constant 1.000000e+00 : f32
    %27 = vector.broadcast %cst_19 : f32 to vector<512x3xf32>
    %28 = arith.addf %27, %26 : vector<512x3xf32>
    %29 = tpu.reciprocal %28 {approx = true} : vector<512x3xf32> -> vector<512x3xf32>
    %c1_20 = arith.constant 1 : index
    %c0_21 = arith.constant 0 : index
    %c0_22 = arith.constant 0 : index
    %30 = vector.load %arg6[%c1_20, %c0_21, %c0_22] : memref<4x512x3xf32, #tpu.memory_space<vmem>>, vector<1x512x3xf32>
    %31 = vector.shape_cast %30 : vector<1x512x3xf32> to vector<512x3xf32>
    %32 = vector.shape_cast %29 : vector<512x3xf32> to vector<1x512x3xf32>
    tpu.vector_store %arg6[%c1_20, %c0_21, %c0_22], %32 {strides = array<i32>} : memref<4x512x3xf32, #tpu.memory_space<vmem>>, vector<1x512x3xf32>,
    %c2 = arith.constant 2 : index
    %c0_23 = arith.constant 0 : index
    %c0_24 = arith.constant 0 : index
    %33 = vector.load %arg1[%c2, %c0_23, %c0_24] : memref<4x512x32xbf16, #tpu.memory_space<vmem>>, vector<1x512x32xbf16>
    %34 = vector.shape_cast %33 : vector<1x512x32xbf16> to vector<512x32xbf16>
    %c2_25 = arith.constant 2 : index
    %c0_26 = arith.constant 0 : index
    %c0_27 = arith.constant 0 : index
    %35 = vector.load %arg2[%c2_25, %c0_26, %c0_27] : memref<4x32x3xbf16, #tpu.memory_space<vmem>>, vector<1x32x3xbf16>
    %36 = vector.shape_cast %35 : vector<1x32x3xbf16> to vector<32x3xbf16>
    %cst_28 = arith.constant dense<0.000000e+00> : vector<512x3xf32>
    %37 = tpu.matmul %34, %36, %cst_28 {dimension_numbers = #tpu.dot_dimension_numbers<[1], [0], [0], [1], [0, 0, 1, 1], [], []>} : vector<512x32xbf16>, vector<32x3xbf16>, vector<512x3xf32> -> vector<512x3xf32>
    %38 = vector.broadcast %0 : vector<1x3xf32> to vector<512x3xf32>
    %39 = arith.addf %37, %38 : vector<512x3xf32>
    %cst_29 = arith.constant 0.000000e+00 : f32
    %40 = vector.broadcast %cst_29 : f32 to vector<512x3xf32>
    %41 = arith.subf %40, %39 : vector<512x3xf32>
    %42 = math.exp %41 : vector<512x3xf32>
    %cst_30 = arith.constant 1.000000e+00 : f32
    %43 = vector.broadcast %cst_30 : f32 to vector<512x3xf32>
    %44 = arith.addf %43, %42 : vector<512x3xf32>
    %45 = tpu.reciprocal %44 {approx = true} : vector<512x3xf32> -> vector<512x3xf32>
    %c2_31 = arith.constant 2 : index
    %c0_32 = arith.constant 0 : index
    %c0_33 = arith.constant 0 : index
    %46 = vector.load %arg6[%c2_31, %c0_32, %c0_33] : memref<4x512x3xf32, #tpu.memory_space<vmem>>, vector<1x512x3xf32>
    %47 = vector.shape_cast %46 : vector<1x512x3xf32> to vector<512x3xf32>
    %48 = vector.shape_cast %45 : vector<512x3xf32> to vector<1x512x3xf32>
    tpu.vector_store %arg6[%c2_31, %c0_32, %c0_33], %48 {strides = array<i32>} : memref<4x512x3xf32, #tpu.memory_space<vmem>>, vector<1x512x3xf32>,
    %c3 = arith.constant 3 : index
    %c0_34 = arith.constant 0 : index
    %c0_35 = arith.constant 0 : index
    %49 = vector.load %arg1[%c3, %c0_34, %c0_35] : memref<4x512x32xbf16, #tpu.memory_space<vmem>>, vector<1x512x32xbf16>
    %50 = vector.shape_cast %49 : vector<1x512x32xbf16> to vector<512x32xbf16>
    %c3_36 = arith.constant 3 : index
    %c0_37 = arith.constant 0 : index
    %c0_38 = arith.constant 0 : index
    %51 = vector.load %arg2[%c3_36, %c0_37, %c0_38] : memref<4x32x3xbf16, #tpu.memory_space<vmem>>, vector<1x32x3xbf16>
    %52 = vector.shape_cast %51 : vector<1x32x3xbf16> to vector<32x3xbf16>
    %cst_39 = arith.constant dense<0.000000e+00> : vector<512x3xf32>
    %53 = tpu.matmul %50, %52, %cst_39 {dimension_numbers = #tpu.dot_dimension_numbers<[1], [0], [0], [1], [0, 0, 1, 1], [], []>} : vector<512x32xbf16>, vector<32x3xbf16>, vector<512x3xf32> -> vector<512x3xf32>
    %54 = vector.broadcast %0 : vector<1x3xf32> to vector<512x3xf32>
    %55 = arith.addf %53, %54 : vector<512x3xf32>
    %cst_40 = arith.constant 0.000000e+00 : f32
    %56 = vector.broadcast %cst_40 : f32 to vector<512x3xf32>
    %57 = arith.subf %56, %55 : vector<512x3xf32>
    %58 = math.exp %57 : vector<512x3xf32>
    %cst_41 = arith.constant 1.000000e+00 : f32
    %59 = vector.broadcast %cst_41 : f32 to vector<512x3xf32>
    %60 = arith.addf %59, %58 : vector<512x3xf32>
    %61 = tpu.reciprocal %60 {approx = true} : vector<512x3xf32> -> vector<512x3xf32>
    %c3_42 = arith.constant 3 : index
    %c0_43 = arith.constant 0 : index
    %c0_44 = arith.constant 0 : index
    %62 = vector.load %arg6[%c3_42, %c0_43, %c0_44] : memref<4x512x3xf32, #tpu.memory_space<vmem>>, vector<1x512x3xf32>
    %63 = vector.shape_cast %62 : vector<1x512x3xf32> to vector<512x3xf32>
    %64 = vector.shape_cast %61 : vector<512x3xf32> to vector<1x512x3xf32>
    tpu.vector_store %arg6[%c3_42, %c0_43, %c0_44], %64 {strides = array<i32>} : memref<4x512x3xf32, #tpu.memory_space<vmem>>, vector<1x512x3xf32>,
    return
  }
  func.func @transform_0(%arg0: i32) -> (i32, i32, i32) {
    %c0_i32 = arith.constant 0 : i32
    %c0_i32_0 = arith.constant 0 : i32
    %c0_i32_1 = arith.constant 0 : i32
    %c0_i32_2 = arith.constant 0 : i32
    return %c0_i32, %c0_i32_0, %c0_i32_1 : i32, i32, i32
  }
  func.func @transform_1(%arg0: i32) -> (i32, i32, i32) {
    %c0_i32 = arith.constant 0 : i32
    %c0_i32_0 = arith.constant 0 : i32
    %c0_i32_1 = arith.constant 0 : i32
    %c0_i32_2 = arith.constant 0 : i32
    return %c0_i32, %c0_i32_0, %c0_i32_1 : i32, i32, i32
  }
  func.func @transform_2(%arg0: i32) -> (i32, i32) {
    %c0_i32 = arith.constant 0 : i32
    %c0_i32_0 = arith.constant 0 : i32
    %c0_i32_1 = arith.constant 0 : i32
    return %c0_i32, %c0_i32_0 : i32, i32
  }
  func.func @transform_3(%arg0: i32) -> (i32, i32) {
    %c0_i32 = arith.constant 0 : i32
    %c0_i32_0 = arith.constant 0 : i32
    %c0_i32_1 = arith.constant 0 : i32
    return %c0_i32, %c0_i32_0 : i32, i32
  }
  func.func @transform_4(%arg0: i32) -> (i32, i32) {
    %c0_i32 = arith.constant 0 : i32
    %c0_i32_0 = arith.constant 0 : i32
    %c0_i32_1 = arith.constant 0 : i32
    return %c0_i32, %c0_i32_0 : i32, i32
  }
  func.func @transform_5(%arg0: i32) -> (i32, i32, i32) {
    %c0_i32 = arith.constant 0 : i32
    %c0_i32_0 = arith.constant 0 : i32
    %c0_i32_1 = arith.constant 0 : i32
    %c0_i32_2 = arith.constant 0 : i32
    return %c0_i32, %c0_i32_0, %c0_i32_1 : i32, i32, i32
  }
}

</mosaic_0001>

<bundles_post_ra>
// kernel: generator_forward.5
= control target key start
LH: loop header
LB: loop body
LE: loop exit
PB: predicated region body
PF: predicated region fallthrough
CT: control target
= control target key end

     0   :  { %8 = vsyncpa [#allocation3], 0  ;;  %s131_s15 = smov [#allocation2]   ;;  %s173_s0 = inlined_call_operand.vmem [shape: bf16[2,16], index: 0, kind: input, shape index: {}]   ;;  %s174_s1 = inlined_call_operand.vmem [shape: bf16[16,256], index: 1, kind: input, shape index: {}]   ;;  %s175_s2 = inlined_call_operand.hbm [shape: f32[1,256], index: 2, kind: input, shape index: {}]   ;;  %s176_s3 = inlined_call_operand.vmem [shape: f32[2,256], index: 3, kind: output, shape index: {}]  }
   0x1   :  { %s18_s14 = sshll.u32 %s175_s2, 4  ;;  %s20_s16 = sshll.u32 %s131_s15, 4  ;;  %s19_s14 = int_to_ptr.hbm [resolvable:$true] %s18_s14  ;;  %s21_s16 = int_to_ptr.vmem [resolvable:$true] %s20_s16 }
   0x2   :  { %23 = dma.hbm_to_vmem [thread:$0]  %s19_s14, 32, %s21_s16, [#allocation3]  }
   0x3   :  { %129 = dma.done.wait [#allocation3], 32  }
   0x4   :  { %130 = vsyncadd [#allocation3], 4294967264  ;;  %v94_v0 = vld [vmem:[%s174_s1] sm:$0xf]  ;;  %v103_v1 = vld [vmem:[%s174_s1 + $0x4] sm:$0xf0] }
   0x5   :  { %v102_v2 = vld [vmem:[%s174_s1 + $0x4] sm:$0xf]  ;;  %v95_v3 = vor.u32 %v103_v1, %v94_v0  ;;  %v96_v4 = vld [vmem:[%s174_s1 + $0x8] sm:$0xf0]  ;;  %v29_v6 = vld [vmem:[%s173_s0] sm:$0x1] }
   0x6   :  { %v99_v5 = vor.u32 %v102_v2, %v96_v4  ;;  %vm48_vm0 = vcmask 130048   ;;  %v32_v7 = vld [vmem:[#allocation2] sm:$0x3]  ;;  %vm83_vm1 = vcmask 1041408  }
   0x7   :  { %59 = vmatpush.bf16.msra.mxu0 %v95_v3  ;;  %v34_v8 = vperm.slane %v32_v7, 0  ;;  %v35_v9 = vperm.slane %v32_v7, 1 }
   0x8   :  { %72 = vmatpush.bf16.msra.mxu1 %v99_v5 }
   0xa   :  { %100 = vmatmul.msk.bf16.vlgmr.msra.gmra.mxu0 %vm48_vm0, %v29_v6 }
   0xb   :  { %101 = vmatmul.msk.bf16.vlgmr.msra.gmra.mxu1 %vm48_vm0, %v29_v6 }
  0x87   :  { %v61_v10 = vpop.f32.mrf.mxu0 }
  0x88   :  { %v74_v11 = vpop.f32.mrf.mxu1  ;;  %v62_v12 = vadd.f32 %v61_v10, %v34_v8 }
  0x89   :  { %v75_v13 = vadd.f32 %v74_v11, %v35_v9 }
  0x8a   :  { %v78_v15 = vmax.f32 %v62_v12, 0.0 }
  0x8b   :  { %v79_v14 = vmax.f32 %v75_v13, 0.0 }
  0x8d   :  { %v82_v16 = vrot.slane %v79_v14, 6 }
  0x8f   :  { %v84_v17 = vsel %vm83_vm1, %v78_v15, %v82_v16  ;;  %v63_v18 = vpop.f32.mrf.mxu0 }
  0x90   :  { %86 = vst [vmem:[%s176_s3] sm:$0xf] %v84_v17  ;;  %v76_v19 = vpop.f32.mrf.mxu1 }
  0x91   :  { %91 = vsyncpa [#allocation3], 1 }

// kernel: generator_forward.6
= control target key start
LH: loop header
LB: loop body
LE: loop exit
PB: predicated region body
PF: predicated region fallthrough
CT: control target
= control target key end

     0   :  { %vm187_vm0 = vcmask 261120   ;;  %s1531_s1 = inlined_call_operand.vmem [shape: bf16[4,256,32], index: 1, kind: input, shape index: {}]   ;;  %s1532_s2 = inlined_call_operand.vmem [shape: f32[1,32], index: 2, kind: input, shape index: {}]   ;;  %s1533_s0 = inlined_call_operand.vmem [shape: bf16[4,8,256], index: 0, kind: input, shape index: {}]   ;;  %s1534_s5 = inlined_call_operand.vmem [shape: f32[4,8,32], index: 5, kind: output, shape index: {}]   ;;  %s1535_s3 = inlined_call_operand.vmem [shape: f32[1,32], index: 3, kind: input, shape index: {}]   ;;  %s1536_s4 = inlined_call_operand.vmem [shape: f32[1,32], index: 4, kind: input, shape index: {}]  }
   0x1   :  { %v1176_v0 = vld [vmem:[%s1531_s1 + $0x38] sm:$0xff]  ;;  %v1175_v4 = vld [vmem:[%s1531_s1 + $0x30] sm:$0xff]  ;;  %v1174_v8 = vld [vmem:[%s1531_s1 + $0x28] sm:$0xff] }
   0x2   :  { %v1184_v1 = vld [vmem:[%s1531_s1 + $0x78] sm:$0xff]  ;;  %160 = vmatpush.bf16.msra.mxu0 %v1176_v0  ;;  %v1183_v5 = vld [vmem:[%s1531_s1 + $0x70] sm:$0xff]  ;;  %v1182_v9 = vld [vmem:[%s1531_s1 + $0x68] sm:$0xff] }
   0x3   :  { %v1192_v2 = vld [vmem:[%s1531_s1 + $0xb8] sm:$0xff]  ;;  %173 = vmatpush.bf16.msra.mxu1 %v1184_v1  ;;  %v1191_v6 = vld [vmem:[%s1531_s1 + $0xb0] sm:$0xff]  ;;  %v1190_v10 = vld [vmem:[%s1531_s1 + $0xa8] sm:$0xff] }
   0x4   :  { %v1200_v3 = vld [vmem:[%s1531_s1 + $0xf8] sm:$0xff]  ;;  %344 = vmatpush.bf16.msra.mxu2 %v1192_v2  ;;  %v1199_v7 = vld [vmem:[%s1531_s1 + $0xf0] sm:$0xff]  ;;  %v1198_v11 = vld [vmem:[%s1531_s1 + $0xe8] sm:$0xff] }
   0x5   :  { %357 = vmatpush.bf16.msra.mxu3 %v1200_v3  ;;  %v1173_v12 = vld [vmem:[%s1531_s1 + $0x20] sm:$0xff]  ;;  %v1172_v16 = vld [vmem:[%s1531_s1 + $0x18] sm:$0xff]  ;;  %v1171_v20 = vld [vmem:[%s1531_s1 + $0x10] sm:$0xff] }
   0x6   :  { %161 = vmatpush.bf16.msra.mxu0 %v1175_v4  ;;  %v1181_v13 = vld [vmem:[%s1531_s1 + $0x60] sm:$0xff]  ;;  %v1180_v17 = vld [vmem:[%s1531_s1 + $0x58] sm:$0xff]  ;;  %v1179_v21 = vld [vmem:[%s1531_s1 + $0x50] sm:$0xff] }
   0x7   :  { %174 = vmatpush.bf16.msra.mxu1 %v1183_v5  ;;  %v1189_v14 = vld [vmem:[%s1531_s1 + $0xa0] sm:$0xff]  ;;  %v1188_v18 = vld [vmem:[%s1531_s1 + $0x98] sm:$0xff]  ;;  %v1187_v22 = vld [vmem:[%s1531_s1 + $0x90] sm:$0xff] }
   0x8   :  { %345 = vmatpush.bf16.msra.mxu2 %v1191_v6  ;;  %v1197_v15 = vld [vmem:[%s1531_s1 + $0xe0] sm:$0xff]  ;;  %v1196_v19 = vld [vmem:[%s1531_s1 + $0xd8] sm:$0xff]  ;;  %v1195_v23 = vld [vmem:[%s1531_s1 + $0xd0] sm:$0xff] }
   0x9   :  { %358 = vmatpush.bf16.msra.mxu3 %v1199_v7  ;;  %v1170_v24 = vld [vmem:[%s1531_s1 + $0x8] sm:$0xff]  ;;  %v21_v29 = vld [vmem:[%s1533_s0] sm:$0xff]  ;;  %v1208_v38 = vld [vmem:[%s1531_s1 + $0x138] sm:$0xff] }
   0xa   :  { %162 = vmatpush.bf16.msra.mxu0 %v1174_v8  ;;  %v1178_v25 = vld [vmem:[%s1531_s1 + $0x48] sm:$0xff]  ;;  %v1169_v30 = vld [vmem:[%s1531_s1] sm:$0xff]  ;;  %v58_v36 = vunpack.c.l.b16 %v21_v29  ;;  %v59_v37 = vunpack.c.h.b16 %v21_v29  ;;  %v1216_v39 = vld [vmem:[%s1531_s1 + $0x178] sm:$0xff] }
   0xb   :  { %175 = vmatpush.bf16.msra.mxu1 %v1182_v9  ;;  %v1186_v26 = vld [vmem:[%s1531_s1 + $0x88] sm:$0xff]  ;;  %v1177_v31 = vld [vmem:[%s1531_s1 + $0x40] sm:$0xff]  ;;  %v1224_v40 = vld [vmem:[%s1531_s1 + $0x1b8] sm:$0xff] }
   0xc   :  { %346 = vmatpush.bf16.msra.mxu2 %v1190_v10  ;;  %v1194_v27 = vld [vmem:[%s1531_s1 + $0xc8] sm:$0xff]  ;;  %v1185_v34 = vld [vmem:[%s1531_s1 + $0x80] sm:$0xff]  ;;  %v1232_v41 = vld [vmem:[%s1531_s1 + $0x1f8] sm:$0xff]  ;;  %v60_v44 = vpack.c.b16 %v58_v36, %v58_v36  ;;  %v61_v45 = vpack.c.b16 %v59_v37, %v59_v37 }
   0xd   :  { %359 = vmatpush.bf16.msra.mxu3 %v1198_v11  ;;  %v869_v28 = vld [vmem:[%s1533_s0 + $0x8] sm:$0xff]  ;;  %v1193_v35 = vld [vmem:[%s1531_s1 + $0xc0] sm:$0xff]  ;;  %v1207_v46 = vld [vmem:[%s1531_s1 + $0x130] sm:$0xff] }
   0xe   :  { %163 = vmatpush.bf16.msra.mxu0 %v1173_v12  ;;  %v242_v32 = vunpack.c.l.b16 %v869_v28  ;;  %v243_v33 = vunpack.c.h.b16 %v869_v28  ;;  %v1215_v47 = vld [vmem:[%s1531_s1 + $0x170] sm:$0xff]  ;;  %v1206_v50 = vld [vmem:[%s1531_s1 + $0x128] sm:$0xff]  ;;  %v1205_v54 = vld [vmem:[%s1531_s1 + $0x120] sm:$0xff] }
   0xf   :  { %176 = vmatpush.bf16.msra.mxu1 %v1181_v13  ;;  %v1223_v48 = vld [vmem:[%s1531_s1 + $0x1b0] sm:$0xff]  ;;  %v1214_v51 = vld [vmem:[%s1531_s1 + $0x168] sm:$0xff]  ;;  %v1213_v55 = vld [vmem:[%s1531_s1 + $0x160] sm:$0xff] }
  0x10   :  { %347 = vmatpush.bf16.msra.mxu2 %v1189_v14  ;;  %v244_v42 = vpack.c.b16 %v242_v32, %v242_v32  ;;  %v245_v43 = vpack.c.b16 %v243_v33, %v243_v33  ;;  %v1231_v49 = vld [vmem:[%s1531_s1 + $0x1f0] sm:$0xff]  ;;  %v1222_v52 = vld [vmem:[%s1531_s1 + $0x1a8] sm:$0xff]  ;;  %v1221_v56 = vld [vmem:[%s1531_s1 + $0x1a0] sm:$0xff] }
  0x11   :  { %360 = vmatpush.bf16.msra.mxu3 %v1197_v15  ;;  %v1230_v53 = vld [vmem:[%s1531_s1 + $0x1e8] sm:$0xff]  ;;  %v1229_v57 = vld [vmem:[%s1531_s1 + $0x1e0] sm:$0xff]  ;;  %v1204_v58 = vld [vmem:[%s1531_s1 + $0x118] sm:$0xff] }
  0x12   :  { %164 = vmatpush.bf16.msra.mxu0 %v1172_v16  ;;  %v1212_v59 = vld [vmem:[%s1531_s1 + $0x158] sm:$0xff]  ;;  %v1203_v62 = vld [vmem:[%s1531_s1 + $0x110] sm:$0xff]  ;;  %v1202_v2 = vld [vmem:[%s1531_s1 + $0x108] sm:$0xff] }
  0x13   :  { %177 = vmatpush.bf16.msra.mxu1 %v1180_v17  ;;  %v1220_v60 = vld [vmem:[%s1531_s1 + $0x198] sm:$0xff]  ;;  %v1211_v63 = vld [vmem:[%s1531_s1 + $0x150] sm:$0xff]  ;;  %v1210_v3 = vld [vmem:[%s1531_s1 + $0x148] sm:$0xff] }
  0x14   :  { %348 = vmatpush.bf16.msra.mxu2 %v1188_v18  ;;  %v1228_v61 = vld [vmem:[%s1531_s1 + $0x1d8] sm:$0xff]  ;;  %v1219_v0 = vld [vmem:[%s1531_s1 + $0x190] sm:$0xff]  ;;  %v1218_v5 = vld [vmem:[%s1531_s1 + $0x188] sm:$0xff] }
  0x15   :  { %361 = vmatpush.bf16.msra.mxu3 %v1196_v19  ;;  %v1227_v1 = vld [vmem:[%s1531_s1 + $0x1d0] sm:$0xff]  ;;  %v1226_v6 = vld [vmem:[%s1531_s1 + $0x1c8] sm:$0xff]  ;;  %v1065_v7 = vld [vmem:[%s1533_s0 + $0x18] sm:$0xff] }
  0x16   :  { %165 = vmatpush.bf16.msra.mxu0 %v1171_v20  ;;  %v967_v4 = vld [vmem:[%s1533_s0 + $0x10] sm:$0xff]  ;;  %v1201_v10 = vld [vmem:[%s1531_s1 + $0x100] sm:$0xff]  ;;  %v610_v12 = vunpack.c.l.b16 %v1065_v7  ;;  %v611_v13 = vunpack.c.h.b16 %v1065_v7 }
  0x17   :  { %178 = vmatpush.bf16.msra.mxu1 %v1179_v21  ;;  %v426_v8 = vunpack.c.l.b16 %v967_v4  ;;  %v427_v9 = vunpack.c.h.b16 %v967_v4  ;;  %v1209_v11 = vld [vmem:[%s1531_s1 + $0x140] sm:$0xff] }
  0x18   :  { %349 = vmatpush.bf16.msra.mxu2 %v1187_v22  ;;  %v1217_v14 = vld [vmem:[%s1531_s1 + $0x180] sm:$0xff]  ;;  %v612_v18 = vpack.c.b16 %v610_v12, %v610_v12  ;;  %v613_v19 = vpack.c.b16 %v611_v13, %v611_v13 }
  0x19   :  { %362 = vmatpush.bf16.msra.mxu3 %v1195_v23  ;;  %v1225_v15 = vld [vmem:[%s1531_s1 + $0x1c0] sm:$0xff]  ;;  %v428_v16 = vpack.c.b16 %v426_v8, %v426_v8  ;;  %v429_v17 = vpack.c.b16 %v427_v9, %v427_v9 }
  0x1a   :  { %166 = vmatpush.bf16.msra.mxu0 %v1170_v24  ;;  %v1233_v20 = vld [vmem:[%s1532_s2] ss:$0 sm:$0xff] }
  0x1b   :  { %179 = vmatpush.bf16.msra.mxu1 %v1178_v25 }
  0x1c   :  { %350 = vmatpush.bf16.msra.mxu2 %v1186_v26 }
  0x1d   :  { %363 = vmatpush.bf16.msra.mxu3 %v1194_v27 }
  0x1e   :  { %167 = vmatpush.bf16.msra.mxu0 %v1169_v30 }
  0x1f   :  { %180 = vmatpush.bf16.msra.mxu1 %v1177_v31 }
  0x20   :  { %351 = vmatpush.bf16.msra.mxu2 %v1185_v34 }
  0x21   :  { %364 = vmatpush.bf16.msra.mxu3 %v1193_v35  ;;  %168 = vmatmul.bf16.vlgmr.msra.gmra.mxu0 %v60_v44 }
  0x22   :  { %528 = vmatpush.bf16.msrb.mxu0 %v1208_v38  ;;  %181 = vmatmul.bf16.vlgmr.msra.gmra.mxu1 %v61_v45 }
  0x23   :  { %541 = vmatpush.bf16.msrb.mxu1 %v1216_v39  ;;  %352 = vmatmul.bf16.vlgmr.msra.gmra.mxu2 %v244_v42 }
  0x24   :  { %712 = vmatpush.bf16.msrb.mxu2 %v1224_v40  ;;  %365 = vmatmul.bf16.vlgmr.msra.gmra.mxu3 %v245_v43 }
  0x25   :  { %725 = vmatpush.bf16.msrb.mxu3 %v1232_v41 }
  0x26   :  { %529 = vmatpush.bf16.msrb.mxu0 %v1207_v46 }
  0x27   :  { %542 = vmatpush.bf16.msrb.mxu1 %v1215_v47 }
  0x28   :  { %713 = vmatpush.bf16.msrb.mxu2 %v1223_v48 }
  0x29   :  { %726 = vmatpush.bf16.msrb.mxu3 %v1231_v49 }
  0x2a   :  { %530 = vmatpush.bf16.msrb.mxu0 %v1206_v50 }
  0x2b   :  { %543 = vmatpush.bf16.msrb.mxu1 %v1214_v51 }
  0x2c   :  { %714 = vmatpush.bf16.msrb.mxu2 %v1222_v52 }
  0x2d   :  { %727 = vmatpush.bf16.msrb.mxu3 %v1230_v53 }
  0x2e   :  { %531 = vmatpush.bf16.msrb.mxu0 %v1205_v54 }
  0x2f   :  { %544 = vmatpush.bf16.msrb.mxu1 %v1213_v55 }
  0x30   :  { %715 = vmatpush.bf16.msrb.mxu2 %v1221_v56 }
  0x31   :  { %728 = vmatpush.bf16.msrb.mxu3 %v1229_v57 }
  0x32   :  { %532 = vmatpush.bf16.msrb.mxu0 %v1204_v58 }
  0x33   :  { %545 = vmatpush.bf16.msrb.mxu1 %v1212_v59 }
  0x34   :  { %716 = vmatpush.bf16.msrb.mxu2 %v1220_v60 }
  0x35   :  { %729 = vmatpush.bf16.msrb.mxu3 %v1228_v61 }
  0x36   :  { %533 = vmatpush.bf16.msrb.mxu0 %v1203_v62 }
  0x37   :  { %546 = vmatpush.bf16.msrb.mxu1 %v1211_v63 }
  0x38   :  { %717 = vmatpush.bf16.msrb.mxu2 %v1219_v0 }
  0x39   :  { %730 = vmatpush.bf16.msrb.mxu3 %v1227_v1 }
  0x3a   :  { %534 = vmatpush.bf16.msrb.mxu0 %v1202_v2 }
  0x3b   :  { %547 = vmatpush.bf16.msrb.mxu1 %v1210_v3 }
  0x3c   :  { %718 = vmatpush.bf16.msrb.mxu2 %v1218_v5 }
  0x3d   :  { %731 = vmatpush.bf16.msrb.mxu3 %v1226_v6 }
  0x3e   :  { %535 = vmatpush.bf16.msrb.mxu0 %v1201_v10 }
  0x3f   :  { %548 = vmatpush.bf16.msrb.mxu1 %v1209_v11 }
  0x40   :  { %719 = vmatpush.bf16.msrb.mxu2 %v1217_v14 }
  0x41   :  { %732 = vmatpush.bf16.msrb.mxu3 %v1225_v15  ;;  %536 = vmatmul.bf16.vlgmr.msrb.gmra.mxu0 %v428_v16 }
  0x42   :  { %549 = vmatmul.bf16.vlgmr.msrb.gmra.mxu1 %v429_v17 }
  0x43   :  { %720 = vmatmul.bf16.vlgmr.msrb.gmra.mxu2 %v612_v18 }
  0x44   :  { %733 = vmatmul.bf16.vlgmr.msrb.gmra.mxu3 %v613_v19 }
  0x9e   :  { %v169_v21 = vpop.f32.mrf.mxu0 }
  0x9f   :  { %v182_v22 = vpop.f32.mrf.mxu1  ;;  %v170_v23 = vadd.f32 %v1233_v20, %v169_v21 }
  0xa1   :  { %v183_v24 = vadd.f32 %v182_v22, %v170_v23 }
  0xa3   :  { %v186_v25 = vmax.f32 %v183_v24, 0.0 }
  0xa5   :  { %205 = vst.msk [vmem:[%s1534_s5] sm:$0xff] %vm187_vm0, %v186_v25  ;;  %v196_v35 = vmul.f32 %v186_v25, %v186_v25  ;;  %v188_v36 = vsel %vm187_vm0, %v186_v25, 0.0 }
  0xa6   :  { %v353_v26 = vpop.f32.mrf.mxu2  ;;  %v171_v30 = vpop.f32.mrf.mxu0  ;;  %v189_v39 = vrot.slane %v188_v36, 4 }
  0xa7   :  { %v366_v27 = vpop.f32.mrf.mxu3  ;;  %v354_v28 = vadd.f32 %v1233_v20, %v353_v26  ;;  %v184_v31 = vpop.f32.mrf.mxu1  ;;  %v197_v40 = vsel %vm187_vm0, %v196_v35, 0.0 }
  0xa8   :  { %v198_v43 = vrot.slane %v197_v40, 4  ;;  %v190_v46 = vadd.f32 %v189_v39, %v188_v36 }
  0xa9   :  { %v367_v29 = vadd.f32 %v366_v27, %v354_v28 }
  0xaa   :  { %v199_v51 = vadd.f32 %v198_v43, %v197_v40  ;;  %v191_v52 = vrot.slane %v190_v46, 2 }
  0xab   :  { %v370_v32 = vmax.f32 %v367_v29, 0.0 }
  0xac   :  { %v200_v60 = vrot.slane %v199_v51, 2  ;;  %v192_v1 = vadd.f32 %v191_v52, %v190_v46 }
  0xad   :  { %966 = vst.msk [vmem:[%s1534_s5 + $0x8] sm:$0xff] %vm187_vm0, %v370_v32  ;;  %v379_v37 = vmul.f32 %v370_v32, %v370_v32  ;;  %v371_v38 = vsel %vm187_vm0, %v370_v32, 0.0 }
  0xae   :  { %v355_v33 = vpop.f32.mrf.mxu2  ;;  %v372_v42 = vrot.slane %v371_v38, 4  ;;  %v201_v8 = vadd.f32 %v200_v60, %v199_v51  ;;  %v193_v12 = vrot.slane %v192_v1, 1 }
  0xaf   :  { %v368_v34 = vpop.f32.mrf.mxu3  ;;  %v380_v41 = vsel %vm187_vm0, %v379_v37, 0.0 }
  0xb0   :  { %v381_v47 = vrot.slane %v380_v41, 4  ;;  %v373_v49 = vadd.f32 %v372_v42, %v371_v38  ;;  %v202_v22 = vrot.slane %v201_v8, 1  ;;  %v194_v29 = vadd.f32 %v193_v12, %v192_v1 }
  0xb2   :  { %v382_v53 = vadd.f32 %v381_v47, %v380_v41  ;;  %v374_v55 = vrot.slane %v373_v49, 2  ;;  %v203_v34 = vadd.f32 %v202_v22, %v201_v8 }
  0xb4   :  { %v383_v2 = vrot.slane %v382_v53, 2  ;;  %v375_v7 = vadd.f32 %v374_v55, %v373_v49 }
  0xb6   :  { %v384_v13 = vadd.f32 %v383_v2, %v382_v53  ;;  %v376_v18 = vrot.slane %v375_v7, 1  ;;  %v776_v2 = vld [vmem:[%s1536_s4] sm:$0x1] }
  0xb8   :  { %v385_v25 = vrot.slane %v384_v13, 1  ;;  %v377_v30 = vadd.f32 %v376_v18, %v375_v7  ;;  %v1163_v7 = vld [vmem:[%s1534_s5 + $0x8] sm:$0xff] }
  0xba   :  { %v386_v35 = vadd.f32 %v385_v25, %v384_v13  ;;  %v378_v39 = vadd.f32 %v377_v30, %v194_v29 }
  0xbc   :  { %v387_v43 = vadd.f32 %v386_v35, %v203_v34 }
  0xbe   :  { %v537_v44 = vpop.f32.mrf.mxu0 }
  0xbf   :  { %v550_v45 = vpop.f32.mrf.mxu1  ;;  %v538_v48 = vadd.f32 %v1233_v20, %v537_v44 }
  0xc1   :  { %v551_v50 = vadd.f32 %v550_v45, %v538_v48 }
  0xc3   :  { %v554_v54 = vmax.f32 %v551_v50, 0.0 }
  0xc5   :  { %v555_v56 = vsel %vm187_vm0, %v554_v54, 0.0  ;;  %v563_v57 = vmul.f32 %v554_v54, %v554_v54  ;;  %1064 = vst.msk [vmem:[%s1534_s5 + $0x10] sm:$0xff] %vm187_vm0, %v554_v54 }
  0xc6   :  { %v721_v58 = vpop.f32.mrf.mxu2  ;;  %v556_v61 = vrot.slane %v555_v56, 4  ;;  %v539_v63 = vpop.f32.mrf.mxu0 }
  0xc7   :  { %v734_v59 = vpop.f32.mrf.mxu3  ;;  %v722_v62 = vadd.f32 %v1233_v20, %v721_v58  ;;  %v552_v0 = vpop.f32.mrf.mxu1  ;;  %v564_v3 = vsel %vm187_vm0, %v563_v57, 0.0 }
  0xc8   :  { %v557_v4 = vadd.f32 %v556_v61, %v555_v56  ;;  %v565_v5 = vrot.slane %v564_v3, 4 }
  0xc9   :  { %v735_v6 = vadd.f32 %v734_v59, %v722_v62  ;;  %v763_v62 = vld [vmem:[%s1535_s3] sm:$0x1] }
  0xca   :  { %v558_v9 = vrot.slane %v557_v4, 2  ;;  %v566_v10 = vadd.f32 %v565_v5, %v564_v3 }
  0xcb   :  { %v738_v11 = vmax.f32 %v735_v6, 0.0  ;;  %v779_v6 = vld [vmem:[%s1534_s5] sm:$0xff] }
  0xcc   :  { %v559_v14 = vadd.f32 %v558_v9, %v557_v4  ;;  %v567_v15 = vrot.slane %v566_v10, 2  ;;  %v1165_v8 = vld [vmem:[%s1534_s5 + $0x10] sm:$0xff] }
  0xcd   :  { %v739_v16 = vsel %vm187_vm0, %v738_v11, 0.0  ;;  %v747_v17 = vmul.f32 %v738_v11, %v738_v11  ;;  %1162 = vst.msk [vmem:[%s1534_s5 + $0x18] sm:$0xff] %vm187_vm0, %v738_v11 }
  0xce   :  { %v740_v19 = vrot.slane %v739_v16, 4  ;;  %v723_v20 = vpop.f32.mrf.mxu2  ;;  %v568_v23 = vadd.f32 %v567_v15, %v566_v10  ;;  %v560_v26 = vrot.slane %v559_v14, 1 }
  0xcf   :  { %v736_v21 = vpop.f32.mrf.mxu3  ;;  %v748_v24 = vsel %vm187_vm0, %v747_v17, 0.0 }
  0xd0   :  { %v741_v27 = vadd.f32 %v740_v19, %v739_v16  ;;  %v749_v28 = vrot.slane %v748_v24, 4  ;;  %v569_v31 = vrot.slane %v568_v23, 1  ;;  %v561_v36 = vadd.f32 %v560_v26, %v559_v14 }
  0xd2   :  { %v742_v32 = vrot.slane %v741_v27, 2  ;;  %v750_v33 = vadd.f32 %v749_v28, %v748_v24  ;;  %v570_v40 = vadd.f32 %v569_v31, %v568_v23  ;;  %v562_v44 = vadd.f32 %v561_v36, %v378_v39 }
  0xd4   :  { %v743_v37 = vadd.f32 %v742_v32, %v741_v27  ;;  %v751_v38 = vrot.slane %v750_v33, 2  ;;  %v571_v47 = vadd.f32 %v570_v40, %v387_v43  ;;  %v1167_v13 = vld [vmem:[%s1534_s5 + $0x18] sm:$0xff] }
  0xd6   :  { %v744_v41 = vrot.slane %v743_v37, 1  ;;  %v752_v42 = vadd.f32 %v751_v38, %v750_v33 }
  0xd8   :  { %v745_v45 = vadd.f32 %v744_v41, %v743_v37  ;;  %v753_v46 = vrot.slane %v752_v42, 1 }
  0xda   :  { %v746_v48 = vadd.f32 %v745_v45, %v562_v44  ;;  %v754_v49 = vadd.f32 %v753_v46, %v752_v42 }
  0xdc   :  { %v755_v50 = vadd.f32 %v754_v49, %v571_v47  ;;  %v758_v51 = vmul.f32 0.03125, %v746_v48 }
  0xde   :  { %v759_v52 = vmul.f32 0.03125, %v755_v50  ;;  %v760_v53 = vmul.f32 %v758_v51, %v758_v51 }
  0xe0   :  { %v761_v54 = vsub.f32 %v759_v52, %v760_v53 }
  0xe2   :  { %v762_v55 = vmax.f32 %v761_v54, 0.0 }
  0xe4   :  { %v764_v56 = vadd.f32 1e-05, %v762_v55 }
  0xe6   :  { %1234 = vrsqrt.f32 %v764_v56  ;;  %vm771_vm2 = vweird.f32 %v764_v56 }
  0xec   :  { %v1235_v57 = vpop.eup %1234 }
  0xed   :  { %v766_v58 = vmul.f32 %v1235_v57, %v764_v56  ;;  %vm772_vm1 = vweird.f32 %v1235_v57 }
  0xee   :  { %vm773_vm3 = vmor %vm771_vm2, %vm772_vm1 }
  0xef   :  { %v767_v59 = vmul.f32 %v1235_v57, %v766_v58 }
  0xf1   :  { %v768_v60 = vmul.f32 0.5, %v767_v59 }
  0xf3   :  { %v769_v61 = vsub.f32 1.5, %v768_v60 }
  0xf5   :  { %v770_v63 = vmul.f32 %v1235_v57, %v769_v61 }
  0xf7   :  { %v774_v0 = vsel %vm773_vm3, %v1235_v57, %v770_v63 }
  0xf8   :  { %v775_v1 = vmul.f32 %v774_v0, %v763_v62 }
  0xfa   :  { %v777_v3 = vmul.f32 %v775_v1, %v758_v51  ;;  %v781_v4 = vperm.slane %v775_v1, 0 }
  0xfc   :  { %v778_v5 = vsub.f32 %v776_v2, %v777_v3  ;;  %v783_v9 = vmul.f32 %v781_v4, %v779_v6  ;;  %v790_v11 = vmul.f32 %v1163_v7, %v781_v4  ;;  %v794_v12 = vmul.f32 %v1165_v8, %v781_v4 }
  0xfd   :  { %v798_v14 = vmul.f32 %v1167_v13, %v781_v4 }
  0xfe   :  { %v785_v10 = vperm.slane %v778_v5, 0 }
 0x100   :  { %v787_v15 = vadd.f32 %v785_v10, %v783_v9  ;;  %v791_v16 = vadd.f32 %v790_v11, %v785_v10  ;;  %v795_v17 = vadd.f32 %v794_v12, %v785_v10  ;;  %v799_v18 = vadd.f32 %v798_v14, %v785_v10 }
 0x102   :  { %788 = vst.msk [vmem:[%s1534_s5] sm:$0xff] %vm187_vm0, %v787_v15 }
 0x103   :  { %1164 = vst.msk [vmem:[%s1534_s5 + $0x8] sm:$0xff] %vm187_vm0, %v791_v16 }
 0x104   :  { %1166 = vst.msk [vmem:[%s1534_s5 + $0x10] sm:$0xff] %vm187_vm0, %v795_v17 }
 0x105   :  { %1168 = vst.msk [vmem:[%s1534_s5 + $0x18] sm:$0xff] %vm187_vm0, %v799_v18 }

// kernel: generator_forward.7
= control target key start
LH: loop header
LB: loop body
LE: loop exit
PB: predicated region body
PF: predicated region fallthrough
CT: control target
= control target key end

     0   :  { %vm127_vm0 = vcmask 130048   ;;  %s1372_s1 = inlined_call_operand.vmem [shape: bf16[4,128,16], index: 1, kind: input, shape index: {}]   ;;  %s1373_s2 = inlined_call_operand.vmem [shape: f32[1,16], index: 2, kind: input, shape index: {}]   ;;  %s1374_s0 = inlined_call_operand.vmem [shape: bf16[4,32,128], index: 0, kind: input, shape index: {}]   ;;  %s1375_s5 = inlined_call_operand.vmem [shape: f32[4,32,16], index: 5, kind: output, shape index: {}]   ;;  %s1376_s3 = inlined_call_operand.vmem [shape: f32[1,16], index: 3, kind: input, shape index: {}]   ;;  %s1377_s4 = inlined_call_operand.vmem [shape: f32[1,16], index: 4, kind: input, shape index: {}]  }
   0x1   :  { %v950_v0 = vld [vmem:[%s1372_s1 + $0x38] sm:$0xff]  ;;  %v949_v4 = vld [vmem:[%s1372_s1 + $0x30] sm:$0xff]  ;;  %v948_v8 = vld [vmem:[%s1372_s1 + $0x28] sm:$0xff] }
   0x2   :  { %v960_v1 = vld [vmem:[%s1372_s1 + $0x78] sm:$0xff]  ;;  %104 = vmatpush.bf16.msra.mxu0 %v950_v0  ;;  %v959_v5 = vld [vmem:[%s1372_s1 + $0x70] sm:$0xff]  ;;  %v958_v9 = vld [vmem:[%s1372_s1 + $0x68] sm:$0xff] }
   0x3   :  { %v970_v2 = vld [vmem:[%s1372_s1 + $0xb8] sm:$0xff]  ;;  %246 = vmatpush.bf16.msra.mxu1 %v960_v1  ;;  %v969_v6 = vld [vmem:[%s1372_s1 + $0xb0] sm:$0xff]  ;;  %v968_v10 = vld [vmem:[%s1372_s1 + $0xa8] sm:$0xff] }
   0x4   :  { %v980_v3 = vld [vmem:[%s1372_s1 + $0xf8] sm:$0xff]  ;;  %388 = vmatpush.bf16.msra.mxu2 %v970_v2  ;;  %v979_v7 = vld [vmem:[%s1372_s1 + $0xf0] sm:$0xff]  ;;  %v978_v11 = vld [vmem:[%s1372_s1 + $0xe8] sm:$0xff] }
   0x5   :  { %530 = vmatpush.bf16.msra.mxu3 %v980_v3  ;;  %v947_v12 = vld [vmem:[%s1372_s1 + $0x20] sm:$0xff]  ;;  %v946_v16 = vld [vmem:[%s1372_s1 + $0x18] sm:$0xff]  ;;  %v945_v20 = vld [vmem:[%s1372_s1 + $0x10] sm:$0xff] }
   0x6   :  { %105 = vmatpush.bf16.msra.mxu0 %v949_v4  ;;  %v957_v13 = vld [vmem:[%s1372_s1 + $0x60] sm:$0xff]  ;;  %v956_v17 = vld [vmem:[%s1372_s1 + $0x58] sm:$0xff]  ;;  %v955_v21 = vld [vmem:[%s1372_s1 + $0x50] sm:$0xff] }
   0x7   :  { %247 = vmatpush.bf16.msra.mxu1 %v959_v5  ;;  %v967_v14 = vld [vmem:[%s1372_s1 + $0xa0] sm:$0xff]  ;;  %v966_v18 = vld [vmem:[%s1372_s1 + $0x98] sm:$0xff]  ;;  %v965_v22 = vld [vmem:[%s1372_s1 + $0x90] sm:$0xff] }
   0x8   :  { %389 = vmatpush.bf16.msra.mxu2 %v969_v6  ;;  %v977_v15 = vld [vmem:[%s1372_s1 + $0xe0] sm:$0xff]  ;;  %v976_v19 = vld [vmem:[%s1372_s1 + $0xd8] sm:$0xff]  ;;  %v975_v23 = vld [vmem:[%s1372_s1 + $0xd0] sm:$0xff] }
   0x9   :  { %531 = vmatpush.bf16.msra.mxu3 %v979_v7  ;;  %v944_v24 = vld [vmem:[%s1372_s1 + $0x8] sm:$0xff]  ;;  %v943_v28 = vld [vmem:[%s1372_s1] sm:$0xff]  ;;  %v951_v33 = vld [vmem:[%s1374_s0 + $0x10] sm:$0xff] }
   0xa   :  { %106 = vmatpush.bf16.msra.mxu0 %v948_v8  ;;  %v954_v25 = vld [vmem:[%s1372_s1 + $0x48] sm:$0xff]  ;;  %v953_v29 = vld [vmem:[%s1372_s1 + $0x40] sm:$0xff]  ;;  %v971_v35 = vld [vmem:[%s1374_s0 + $0x30] sm:$0xff] }
   0xb   :  { %248 = vmatpush.bf16.msra.mxu1 %v958_v9  ;;  %v964_v26 = vld [vmem:[%s1372_s1 + $0x88] sm:$0xff]  ;;  %v963_v30 = vld [vmem:[%s1372_s1 + $0x80] sm:$0xff]  ;;  %v952_v37 = vld [vmem:[%s1374_s0 + $0x18] sm:$0xff] }
   0xc   :  { %390 = vmatpush.bf16.msra.mxu2 %v968_v10  ;;  %v974_v27 = vld [vmem:[%s1372_s1 + $0xc8] sm:$0xff]  ;;  %v973_v31 = vld [vmem:[%s1372_s1 + $0xc0] sm:$0xff]  ;;  %v972_v39 = vld [vmem:[%s1374_s0 + $0x38] sm:$0xff] }
   0xd   :  { %532 = vmatpush.bf16.msra.mxu3 %v978_v11  ;;  %v941_v32 = vld [vmem:[%s1374_s0] sm:$0xff]  ;;  %v942_v36 = vld [vmem:[%s1374_s0 + $0x8] sm:$0xff] }
   0xe   :  { %107 = vmatpush.bf16.msra.mxu0 %v947_v12  ;;  %v961_v34 = vld [vmem:[%s1374_s0 + $0x20] sm:$0xff]  ;;  %v962_v38 = vld [vmem:[%s1374_s0 + $0x28] sm:$0xff] }
   0xf   :  { %249 = vmatpush.bf16.msra.mxu1 %v957_v13  ;;  %v1137_v40 = vld [vmem:[%s1373_s2] ss:$0 sm:$0xff] }
  0x10   :  { %391 = vmatpush.bf16.msra.mxu2 %v967_v14 }
  0x11   :  { %533 = vmatpush.bf16.msra.mxu3 %v977_v15 }
  0x12   :  { %108 = vmatpush.bf16.msra.mxu0 %v946_v16 }
  0x13   :  { %250 = vmatpush.bf16.msra.mxu1 %v956_v17 }
  0x14   :  { %392 = vmatpush.bf16.msra.mxu2 %v966_v18 }
  0x15   :  { %534 = vmatpush.bf16.msra.mxu3 %v976_v19 }
  0x16   :  { %109 = vmatpush.bf16.msra.mxu0 %v945_v20 }
  0x17   :  { %251 = vmatpush.bf16.msra.mxu1 %v955_v21 }
  0x18   :  { %393 = vmatpush.bf16.msra.mxu2 %v965_v22 }
  0x19   :  { %535 = vmatpush.bf16.msra.mxu3 %v975_v23 }
  0x1a   :  { %110 = vmatpush.bf16.msra.mxu0 %v944_v24 }
  0x1b   :  { %252 = vmatpush.bf16.msra.mxu1 %v954_v25 }
  0x1c   :  { %394 = vmatpush.bf16.msra.mxu2 %v964_v26 }
  0x1d   :  { %536 = vmatpush.bf16.msra.mxu3 %v974_v27 }
  0x1e   :  { %111 = vmatpush.bf16.msra.mxu0 %v943_v28 }
  0x1f   :  { %253 = vmatpush.bf16.msra.mxu1 %v953_v29 }
  0x20   :  { %395 = vmatpush.bf16.msra.mxu2 %v963_v30 }
  0x21   :  { %537 = vmatpush.bf16.msra.mxu3 %v973_v31  ;;  %112 = vmatmul.bf16.vlgmr.msra.gmra.mxu0 %v941_v32 }
  0x22   :  { %254 = vmatmul.bf16.vlgmr.msra.gmra.mxu1 %v951_v33 }
  0x23   :  { %396 = vmatmul.bf16.vlgmr.msra.gmra.mxu2 %v961_v34 }
  0x24   :  { %538 = vmatmul.bf16.vlgmr.msra.gmra.mxu3 %v971_v35 }
  0x31   :  { %117 = vmatmul.bf16.gmra.mxu0 %v942_v36 }
  0x32   :  { %259 = vmatmul.bf16.gmra.mxu1 %v952_v37 }
  0x33   :  { %401 = vmatmul.bf16.gmra.mxu2 %v962_v38 }
  0x34   :  { %543 = vmatmul.bf16.gmra.mxu3 %v972_v39 }
  0x9e   :  { %v113_v41 = vpop.f32.mrf.mxu0 }
  0x9f   :  { %v255_v42 = vpop.f32.mrf.mxu1  ;;  %v114_v43 = vadd.f32 %v1137_v40, %v113_v41 }
  0xa0   :  { %v256_v44 = vadd.f32 %v1137_v40, %v255_v42 }
  0xa1   :  { %v123_v45 = vmax.f32 %v114_v43, 0.0 }
  0xa2   :  { %v265_v46 = vmax.f32 %v256_v44, 0.0 }
  0xa3   :  { %160 = vst.msk [vmem:[%s1375_s5] sm:$0xff] %vm127_vm0, %v123_v45  ;;  %v142_v59 = vmul.f32 %v123_v45, %v123_v45  ;;  %v128_v61 = vsel %vm127_vm0, %v123_v45, 0.0 }
  0xa4   :  { %785 = vst.msk [vmem:[%s1375_s5 + $0x20] sm:$0xff] %vm127_vm0, %v265_v46  ;;  %v283_v60 = vmul.f32 %v265_v46, %v265_v46  ;;  %v269_v62 = vsel %vm127_vm0, %v265_v46, 0.0 }
  0xa5   :  { %v146_v3 = vsel %vm127_vm0, %v142_v59, 0.0 }
  0xa6   :  { %v397_v47 = vpop.f32.mrf.mxu2  ;;  %v115_v51 = vpop.f32.mrf.mxu0  ;;  %v287_v4 = vsel %vm127_vm0, %v283_v60, 0.0 }
  0xa7   :  { %v539_v48 = vpop.f32.mrf.mxu3  ;;  %v398_v49 = vadd.f32 %v1137_v40, %v397_v47  ;;  %v257_v52 = vpop.f32.mrf.mxu1  ;;  %v116_v53 = vadd.f32 %v1137_v40, %v115_v51 }
  0xa8   :  { %v540_v50 = vadd.f32 %v1137_v40, %v539_v48  ;;  %v258_v54 = vadd.f32 %v1137_v40, %v257_v52 }
  0xa9   :  { %v407_v55 = vmax.f32 %v398_v49, 0.0  ;;  %v124_v57 = vmax.f32 %v116_v53, 0.0 }
  0xaa   :  { %v549_v56 = vmax.f32 %v540_v50, 0.0  ;;  %v266_v58 = vmax.f32 %v258_v54, 0.0 }
  0xab   :  { %849 = vst.msk [vmem:[%s1375_s5 + $0x40] sm:$0xff] %vm127_vm0, %v407_v55  ;;  %v143_v63 = vmul.f32 %v124_v57, %v124_v57  ;;  %v425_v9 = vmul.f32 %v407_v55, %v407_v55  ;;  %v411_v13 = vsel %vm127_vm0, %v407_v55, 0.0  ;;  %v129_v14 = vsel %vm127_vm0, %v124_v57, 0.0 }
  0xac   :  { %913 = vst.msk [vmem:[%s1375_s5 + $0x60] sm:$0xff] %vm127_vm0, %v549_v56  ;;  %v284_v0 = vmul.f32 %v266_v58, %v266_v58  ;;  %v567_v10 = vmul.f32 %v549_v56, %v549_v56  ;;  %v270_v18 = vsel %vm127_vm0, %v266_v58, 0.0  ;;  %v553_v26 = vsel %vm127_vm0, %v549_v56, 0.0 }
  0xad   :  { %161 = vst.msk [vmem:[%s1375_s5 + $0x8] sm:$0xff] %vm127_vm0, %v124_v57  ;;  %v147_v17 = vsel %vm127_vm0, %v143_v63, 0.0  ;;  %v429_v25 = vsel %vm127_vm0, %v425_v9, 0.0  ;;  %v130_v29 = vadd.f32 %v129_v14, %v128_v61  ;;  %v271_v31 = vadd.f32 %v270_v18, %v269_v62 }
  0xae   :  { %786 = vst.msk [vmem:[%s1375_s5 + $0x28] sm:$0xff] %vm127_vm0, %v266_v58  ;;  %v399_v1 = vpop.f32.mrf.mxu2  ;;  %v118_v7 = vpop.f32.mrf.mxu0  ;;  %v288_v19 = vsel %vm127_vm0, %v284_v0, 0.0  ;;  %v571_v27 = vsel %vm127_vm0, %v567_v10, 0.0  ;;  %v148_v30 = vadd.f32 %v147_v17, %v146_v3 }
  0xaf   :  { %v541_v2 = vpop.f32.mrf.mxu3  ;;  %v400_v5 = vadd.f32 %v1137_v40, %v399_v1  ;;  %v260_v8 = vpop.f32.mrf.mxu1  ;;  %v119_v11 = vadd.f32 %v1137_v40, %v118_v7  ;;  %v289_v33 = vadd.f32 %v288_v19, %v287_v4 }
  0xb0   :  { %v542_v6 = vadd.f32 %v1137_v40, %v541_v2  ;;  %v261_v12 = vadd.f32 %v1137_v40, %v260_v8 }
  0xb1   :  { %v408_v15 = vmax.f32 %v400_v5, 0.0  ;;  %v125_v20 = vmax.f32 %v119_v11, 0.0 }
  0xb2   :  { %v550_v16 = vmax.f32 %v542_v6, 0.0  ;;  %v267_v24 = vmax.f32 %v261_v12, 0.0 }
  0xb3   :  { %v412_v21 = vsel %vm127_vm0, %v408_v15, 0.0  ;;  %v426_v22 = vmul.f32 %v408_v15, %v408_v15  ;;  %850 = vst.msk [vmem:[%s1375_s5 + $0x48] sm:$0xff] %vm127_vm0, %v408_v15  ;;  %v144_v32 = vmul.f32 %v125_v20, %v125_v20  ;;  %v131_v36 = vsel %vm127_vm0, %v125_v20, 0.0 }
  0xb4   :  { %v554_v23 = vsel %vm127_vm0, %v550_v16, 0.0  ;;  %v568_v28 = vmul.f32 %v550_v16, %v550_v16  ;;  %914 = vst.msk [vmem:[%s1375_s5 + $0x68] sm:$0xff] %vm127_vm0, %v550_v16  ;;  %v413_v34 = vadd.f32 %v412_v21, %v411_v13  ;;  %v285_v41 = vmul.f32 %v267_v24, %v267_v24 }
  0xb5   :  { %162 = vst.msk [vmem:[%s1375_s5 + $0x10] sm:$0xff] %vm127_vm0, %v125_v20  ;;  %v555_v35 = vadd.f32 %v554_v23, %v553_v26  ;;  %v430_v39 = vsel %vm127_vm0, %v426_v22, 0.0  ;;  %v272_v47 = vsel %vm127_vm0, %v267_v24, 0.0  ;;  %v132_v50 = vadd.f32 %v131_v36, %v130_v29 }
  0xb6   :  { %787 = vst.msk [vmem:[%s1375_s5 + $0x30] sm:$0xff] %vm127_vm0, %v267_v24  ;;  %v402_v37 = vpop.f32.mrf.mxu2  ;;  %v120_v44 = vpop.f32.mrf.mxu0  ;;  %v572_v46 = vsel %vm127_vm0, %v568_v28, 0.0  ;;  %v149_v51 = vsel %vm127_vm0, %v144_v32, 0.0  ;;  %v431_v54 = vadd.f32 %v430_v39, %v429_v25  ;;  %v290_v55 = vsel %vm127_vm0, %v285_v41, 0.0 }
  0xb7   :  { %v544_v38 = vpop.f32.mrf.mxu3  ;;  %v403_v42 = vadd.f32 %v1137_v40, %v402_v37  ;;  %v262_v45 = vpop.f32.mrf.mxu1  ;;  %v121_v48 = vadd.f32 %v1137_v40, %v120_v44  ;;  %v1213_v58 = vadd.f32 %v572_v46, %v571_v27  ;;  %v273_v59 = vadd.f32 %v272_v47, %v271_v31 }
  0xb8   :  { %v545_v43 = vadd.f32 %v1137_v40, %v544_v38  ;;  %v263_v49 = vadd.f32 %v1137_v40, %v262_v45  ;;  %v150_v62 = vadd.f32 %v149_v51, %v148_v30  ;;  %v291_v2 = vadd.f32 %v290_v55, %v289_v33 }
  0xb9   :  { %v409_v52 = vmax.f32 %v403_v42, 0.0  ;;  %v126_v56 = vmax.f32 %v121_v48, 0.0 }
  0xba   :  { %v551_v53 = vmax.f32 %v545_v43, 0.0  ;;  %v268_v57 = vmax.f32 %v263_v49, 0.0 }
  0xbb   :  { %v414_v60 = vsel %vm127_vm0, %v409_v52, 0.0  ;;  %v427_v61 = vmul.f32 %v409_v52, %v409_v52  ;;  %851 = vst.msk [vmem:[%s1375_s5 + $0x50] sm:$0xff] %vm127_vm0, %v409_v52  ;;  %v133_v0 = vsel %vm127_vm0, %v126_v56, 0.0  ;;  %v145_v1 = vmul.f32 %v126_v56, %v126_v56 }
  0xbc   :  { %v569_v63 = vmul.f32 %v551_v53, %v551_v53  ;;  %915 = vst.msk [vmem:[%s1375_s5 + $0x70] sm:$0xff] %vm127_vm0, %v551_v53  ;;  %v556_v3 = vsel %vm127_vm0, %v551_v53, 0.0  ;;  %v134_v4 = vadd.f32 %v133_v0, %v132_v50  ;;  %v274_v5 = vsel %vm127_vm0, %v268_v57, 0.0 }
  0xbd   :  { %163 = vst.msk [vmem:[%s1375_s5 + $0x18] sm:$0xff] %vm127_vm0, %v126_v56  ;;  %v415_v6 = vadd.f32 %v414_v60, %v413_v34  ;;  %v432_v7 = vsel %vm127_vm0, %v427_v61, 0.0  ;;  %v151_v8 = vsel %vm127_vm0, %v145_v1, 0.0  ;;  %v275_v9 = vadd.f32 %v274_v5, %v273_v59 }
  0xbe   :  { %788 = vst.msk [vmem:[%s1375_s5 + $0x38] sm:$0xff] %vm127_vm0, %v268_v57  ;;  %v404_v10 = vpop.f32.mrf.mxu2  ;;  %v135_v12 = vrot.slane %v134_v4, 4  ;;  %v152_v13 = vadd.f32 %v151_v8, %v150_v62  ;;  %v286_v14 = vmul.f32 %v268_v57, %v268_v57  ;;  %v557_v16 = vadd.f32 %v556_v3, %v555_v35 }
  0xbf   :  { %v546_v11 = vpop.f32.mrf.mxu3  ;;  %v405_v15 = vadd.f32 %v1137_v40, %v404_v10  ;;  %v574_v17 = vsel %vm127_vm0, %v569_v63, 0.0  ;;  %v276_v18 = vrot.slane %v275_v9, 4  ;;  %v433_v24 = vadd.f32 %v432_v7, %v431_v54 }
  0xc0   :  { %v547_v19 = vadd.f32 %v1137_v40, %v546_v11  ;;  %v136_v20 = vadd.f32 %v135_v12, %v134_v4  ;;  %v153_v21 = vrot.slane %v152_v13, 4  ;;  %v292_v22 = vsel %vm127_vm0, %v286_v14, 0.0 }
  0xc1   :  { %v410_v23 = vmax.f32 %v405_v15, 0.0  ;;  %v277_v25 = vadd.f32 %v276_v18, %v275_v9  ;;  %v293_v26 = vadd.f32 %v292_v22, %v291_v2  ;;  %v575_v52 = vadd.f32 %v574_v17, %v1213_v58 }
  0xc2   :  { %v552_v27 = vmax.f32 %v547_v19, 0.0  ;;  %v137_v28 = vrot.slane %v136_v20, 2  ;;  %v154_v29 = vadd.f32 %v153_v21, %v152_v13 }
  0xc3   :  { %v416_v30 = vsel %vm127_vm0, %v410_v23, 0.0  ;;  %v428_v31 = vmul.f32 %v410_v23, %v410_v23  ;;  %852 = vst.msk [vmem:[%s1375_s5 + $0x58] sm:$0xff] %vm127_vm0, %v410_v23  ;;  %v278_v40 = vrot.slane %v277_v25, 2  ;;  %v294_v32 = vrot.slane %v293_v26, 4 }
  0xc4   :  { %v417_v33 = vadd.f32 %v416_v30, %v415_v6  ;;  %v558_v34 = vsel %vm127_vm0, %v552_v27, 0.0  ;;  %916 = vst.msk [vmem:[%s1375_s5 + $0x78] sm:$0xff] %vm127_vm0, %v552_v27  ;;  %v138_v35 = vadd.f32 %v137_v28, %v136_v20  ;;  %v155_v36 = vrot.slane %v154_v29, 2 }
  0xc5   :  { %v434_v37 = vsel %vm127_vm0, %v428_v31, 0.0  ;;  %v559_v38 = vadd.f32 %v558_v34, %v557_v16  ;;  %v279_v39 = vadd.f32 %v278_v40, %v277_v25  ;;  %v295_v41 = vadd.f32 %v294_v32, %v293_v26  ;;  %v595_v34 = vld [vmem:[%s1376_s3] sm:$0x1] }
  0xc6   :  { %v418_v42 = vrot.slane %v417_v33, 4  ;;  %v435_v43 = vadd.f32 %v434_v37, %v433_v24  ;;  %v139_v44 = vrot.slane %v138_v35, 1  ;;  %v156_v45 = vadd.f32 %v155_v36, %v154_v29 }
  0xc7   :  { %v560_v46 = vrot.slane %v559_v38, 4  ;;  %v570_v47 = vmul.f32 %v552_v27, %v552_v27  ;;  %v280_v48 = vrot.slane %v279_v39, 1  ;;  %v296_v49 = vrot.slane %v295_v41, 2 }
  0xc8   :  { %v419_v50 = vadd.f32 %v418_v42, %v417_v33  ;;  %v436_v51 = vrot.slane %v435_v43, 4  ;;  %v140_v59 = vadd.f32 %v139_v44, %v138_v35  ;;  %v157_v60 = vrot.slane %v156_v45, 1  ;;  %v612_v44 = vld [vmem:[%s1375_s5 + $0x8] sm:$0xff] }
  0xc9   :  { %v561_v53 = vadd.f32 %v560_v46, %v559_v38  ;;  %v576_v54 = vsel %vm127_vm0, %v570_v47, 0.0  ;;  %v297_v55 = vadd.f32 %v296_v49, %v295_v41  ;;  %v281_v63 = vadd.f32 %v280_v48, %v279_v39  ;;  %v608_v38 = vld [vmem:[%s1377_s4] sm:$0x1]  ;;  %v614_v46 = vld [vmem:[%s1375_s5 + $0x18] sm:$0xff] }
  0xca   :  { %v420_v56 = vrot.slane %v419_v50, 2  ;;  %v437_v57 = vadd.f32 %v436_v51, %v435_v43  ;;  %v577_v62 = vadd.f32 %v576_v54, %v575_v52  ;;  %v158_v7 = vadd.f32 %v157_v60, %v156_v45  ;;  %v611_v43 = vld [vmem:[%s1375_s5] sm:$0xff]  ;;  %v613_v45 = vld [vmem:[%s1375_s5 + $0x10] sm:$0xff] }
  0xcb   :  { %v562_v61 = vrot.slane %v561_v53, 2  ;;  %v298_v0 = vrot.slane %v297_v55, 1  ;;  %v282_v10 = vadd.f32 %v281_v63, %v140_v59  ;;  %v917_v51 = vld [vmem:[%s1375_s5 + $0x20] sm:$0xff]  ;;  %v919_v59 = vld [vmem:[%s1375_s5 + $0x30] sm:$0xff] }
  0xcc   :  { %v421_v1 = vadd.f32 %v420_v56, %v419_v50  ;;  %v438_v2 = vrot.slane %v437_v57, 2  ;;  %v578_v4 = vrot.slane %v577_v62, 4 }
  0xcd   :  { %v563_v3 = vadd.f32 %v562_v61, %v561_v53  ;;  %v299_v58 = vadd.f32 %v298_v0, %v297_v55  ;;  %v918_v53 = vld [vmem:[%s1375_s5 + $0x28] sm:$0xff] }
  0xce   :  { %v422_v5 = vrot.slane %v421_v1, 1  ;;  %v439_v6 = vadd.f32 %v438_v2, %v437_v57  ;;  %v579_v9 = vadd.f32 %v578_v4, %v577_v62  ;;  %v920_v62 = vld [vmem:[%s1375_s5 + $0x38] sm:$0xff]  ;;  %v926_v4 = vld [vmem:[%s1375_s5 + $0x48] sm:$0xff] }
  0xcf   :  { %v564_v8 = vrot.slane %v563_v3, 1  ;;  %v300_v17 = vadd.f32 %v299_v58, %v158_v7  ;;  %v927_v7 = vld [vmem:[%s1375_s5 + $0x50] sm:$0xff] }
  0xd0   :  { %v423_v11 = vadd.f32 %v422_v5, %v421_v1  ;;  %v440_v12 = vrot.slane %v439_v6, 1  ;;  %v580_v13 = vrot.slane %v579_v9, 2  ;;  %v925_v1 = vld [vmem:[%s1375_s5 + $0x40] sm:$0xff] }
  0xd1   :  { %v565_v16 = vadd.f32 %v564_v8, %v563_v3 }
  0xd2   :  { %v424_v14 = vadd.f32 %v423_v11, %v282_v10  ;;  %v441_v15 = vadd.f32 %v440_v12, %v439_v6  ;;  %v581_v18 = vadd.f32 %v580_v13, %v579_v9  ;;  %v928_v9 = vld [vmem:[%s1375_s5 + $0x58] sm:$0xff]  ;;  %v933_v12 = vld [vmem:[%s1375_s5 + $0x60] sm:$0xff] }
  0xd4   :  { %v566_v19 = vadd.f32 %v565_v16, %v424_v14  ;;  %v442_v20 = vadd.f32 %v441_v15, %v300_v17  ;;  %v582_v21 = vrot.slane %v581_v18, 1  ;;  %v934_v15 = vld [vmem:[%s1375_s5 + $0x68] sm:$0xff] }
  0xd6   :  { %v590_v22 = vmul.f32 0.0078125, %v566_v19  ;;  %v583_v23 = vadd.f32 %v582_v21, %v581_v18  ;;  %v935_v18 = vld [vmem:[%s1375_s5 + $0x70] sm:$0xff]  ;;  %v936_v21 = vld [vmem:[%s1375_s5 + $0x78] sm:$0xff] }
  0xd8   :  { %v584_v24 = vadd.f32 %v583_v23, %v442_v20  ;;  %v592_v25 = vmul.f32 %v590_v22, %v590_v22 }
  0xda   :  { %v591_v26 = vmul.f32 0.0078125, %v584_v24 }
  0xdc   :  { %v593_v27 = vsub.f32 %v591_v26, %v592_v25 }
  0xde   :  { %v594_v28 = vmax.f32 %v593_v27, 0.0 }
  0xe0   :  { %v596_v29 = vadd.f32 1e-05, %v594_v28 }
  0xe2   :  { %982 = vrsqrt.f32 %v596_v29  ;;  %vm603_vm2 = vweird.f32 %v596_v29 }
  0xe8   :  { %v983_v30 = vpop.eup %982 }
  0xe9   :  { %v598_v31 = vmul.f32 %v983_v30, %v596_v29  ;;  %vm604_vm1 = vweird.f32 %v983_v30 }
  0xea   :  { %vm605_vm3 = vmor %vm603_vm2, %vm604_vm1 }
  0xeb   :  { %v599_v40 = vmul.f32 %v983_v30, %v598_v31 }
  0xed   :  { %v600_v32 = vmul.f32 0.5, %v599_v40 }
  0xef   :  { %v601_v33 = vsub.f32 1.5, %v600_v32 }
  0xf1   :  { %v602_v35 = vmul.f32 %v983_v30, %v601_v33 }
  0xf3   :  { %v606_v36 = vsel %vm605_vm3, %v983_v30, %v602_v35 }
  0xf4   :  { %v607_v37 = vmul.f32 %v606_v36, %v595_v34 }
  0xf6   :  { %v609_v39 = vmul.f32 %v607_v37, %v590_v22  ;;  %v616_v41 = vperm.slane %v607_v37, 0 }
  0xf8   :  { %v610_v42 = vsub.f32 %v608_v38, %v609_v39  ;;  %v618_v47 = vmul.f32 %v616_v41, %v611_v43  ;;  %v619_v48 = vmul.f32 %v616_v41, %v612_v44  ;;  %v620_v49 = vmul.f32 %v616_v41, %v613_v45 }
  0xf9   :  { %v621_v52 = vmul.f32 %v616_v41, %v614_v46  ;;  %v637_v57 = vmul.f32 %v917_v51, %v616_v41  ;;  %v638_v61 = vmul.f32 %v918_v53, %v616_v41  ;;  %v639_v63 = vmul.f32 %v919_v59, %v616_v41 }
  0xfa   :  { %v623_v50 = vperm.slane %v610_v42, 0  ;;  %v640_v2 = vmul.f32 %v920_v62, %v616_v41  ;;  %v653_v6 = vmul.f32 %v925_v1, %v616_v41  ;;  %v654_v8 = vmul.f32 %v926_v4, %v616_v41 }
  0xfb   :  { %v655_v10 = vmul.f32 %v927_v7, %v616_v41  ;;  %v656_v13 = vmul.f32 %v928_v9, %v616_v41  ;;  %v669_v17 = vmul.f32 %v933_v12, %v616_v41  ;;  %v670_v20 = vmul.f32 %v934_v15, %v616_v41 }
  0xfc   :  { %v625_v54 = vadd.f32 %v623_v50, %v618_v47  ;;  %v626_v55 = vadd.f32 %v623_v50, %v619_v48  ;;  %v627_v56 = vadd.f32 %v623_v50, %v620_v49  ;;  %v628_v60 = vadd.f32 %v623_v50, %v621_v52 }
  0xfd   :  { %v641_v0 = vadd.f32 %v637_v57, %v623_v50  ;;  %v642_v3 = vadd.f32 %v638_v61, %v623_v50  ;;  %v643_v5 = vadd.f32 %v639_v63, %v623_v50  ;;  %v644_v58 = vadd.f32 %v640_v2, %v623_v50 }
  0xfe   :  { %629 = vst.msk [vmem:[%s1375_s5] sm:$0xff] %vm127_vm0, %v625_v54  ;;  %v657_v11 = vadd.f32 %v653_v6, %v623_v50  ;;  %v658_v14 = vadd.f32 %v654_v8, %v623_v50  ;;  %v659_v16 = vadd.f32 %v655_v10, %v623_v50  ;;  %v660_v19 = vadd.f32 %v656_v13, %v623_v50 }
  0xff   :  { %630 = vst.msk [vmem:[%s1375_s5 + $0x8] sm:$0xff] %vm127_vm0, %v626_v55  ;;  %v671_v22 = vmul.f32 %v935_v18, %v616_v41  ;;  %v673_v23 = vadd.f32 %v669_v17, %v623_v50  ;;  %v672_v24 = vmul.f32 %v936_v21, %v616_v41  ;;  %v674_v25 = vadd.f32 %v670_v20, %v623_v50 }
 0x100   :  { %631 = vst.msk [vmem:[%s1375_s5 + $0x10] sm:$0xff] %vm127_vm0, %v627_v56 }
 0x101   :  { %632 = vst.msk [vmem:[%s1375_s5 + $0x18] sm:$0xff] %vm127_vm0, %v628_v60  ;;  %v675_v26 = vadd.f32 %v671_v22, %v623_v50  ;;  %v676_v27 = vadd.f32 %v672_v24, %v623_v50 }
 0x102   :  { %921 = vst.msk [vmem:[%s1375_s5 + $0x20] sm:$0xff] %vm127_vm0, %v641_v0 }
 0x103   :  { %922 = vst.msk [vmem:[%s1375_s5 + $0x28] sm:$0xff] %vm127_vm0, %v642_v3 }
 0x104   :  { %923 = vst.msk [vmem:[%s1375_s5 + $0x30] sm:$0xff] %vm127_vm0, %v643_v5 }
 0x105   :  { %924 = vst.msk [vmem:[%s1375_s5 + $0x38] sm:$0xff] %vm127_vm0, %v644_v58 }
 0x106   :  { %929 = vst.msk [vmem:[%s1375_s5 + $0x40] sm:$0xff] %vm127_vm0, %v657_v11 }
 0x107   :  { %930 = vst.msk [vmem:[%s1375_s5 + $0x48] sm:$0xff] %vm127_vm0, %v658_v14 }
 0x108   :  { %931 = vst.msk [vmem:[%s1375_s5 + $0x50] sm:$0xff] %vm127_vm0, %v659_v16 }
 0x109   :  { %932 = vst.msk [vmem:[%s1375_s5 + $0x58] sm:$0xff] %vm127_vm0, %v660_v19 }
 0x10a   :  { %937 = vst.msk [vmem:[%s1375_s5 + $0x60] sm:$0xff] %vm127_vm0, %v673_v23 }
 0x10b   :  { %938 = vst.msk [vmem:[%s1375_s5 + $0x68] sm:$0xff] %vm127_vm0, %v674_v25 }
 0x10c   :  { %939 = vst.msk [vmem:[%s1375_s5 + $0x70] sm:$0xff] %vm127_vm0, %v675_v26 }
 0x10d   :  { %940 = vst.msk [vmem:[%s1375_s5 + $0x78] sm:$0xff] %vm127_vm0, %v676_v27 }

// kernel: generator_forward.8
= control target key start
LH: loop header
LB: loop body
LE: loop exit
PB: predicated region body
PF: predicated region fallthrough
CT: control target
= control target key end

     0   :  { %vm113_vm0 = vcmask 523264   ;;  %vm203_vm1 = vcmask 64512   ;;  %s3334_s1 = inlined_call_operand.vmem [shape: bf16[4,64,8], index: 1, kind: input, shape index: {}]   ;;  %s3335_s2 = inlined_call_operand.vmem [shape: f32[1,8], index: 2, kind: input, shape index: {}]   ;;  %s3336_s0 = inlined_call_operand.vmem [shape: bf16[4,128,64], index: 0, kind: input, shape index: {}]   ;;  %s3337_s5 = inlined_call_operand.vmem [shape: f32[4,128,8], index: 5, kind: output, shape index: {}]   ;;  %s3338_s3 = inlined_call_operand.vmem [shape: f32[1,8], index: 3, kind: input, shape index: {}]   ;;  %s3339_s4 = inlined_call_operand.vmem [shape: f32[1,8], index: 4, kind: input, shape index: {}]  }
   0x1   :  { %v1914_v0 = vld [vmem:[%s3334_s1 + $0x18] sm:$0xff]  ;;  %v1913_v4 = vld [vmem:[%s3334_s1 + $0x10] sm:$0xff]  ;;  %v1912_v8 = vld [vmem:[%s3334_s1 + $0x8] sm:$0xff] }
   0x2   :  { %v1926_v1 = vld [vmem:[%s3334_s1 + $0x38] sm:$0xff]  ;;  %142 = vmatpush.bf16.msra.mxu0 %v1914_v0  ;;  %v1925_v5 = vld [vmem:[%s3334_s1 + $0x30] sm:$0xff]  ;;  %v1924_v9 = vld [vmem:[%s3334_s1 + $0x28] sm:$0xff] }
   0x3   :  { %v1938_v2 = vld [vmem:[%s3334_s1 + $0x58] sm:$0xff]  ;;  %430 = vmatpush.bf16.msra.mxu1 %v1926_v1  ;;  %v1937_v6 = vld [vmem:[%s3334_s1 + $0x50] sm:$0xff]  ;;  %v1936_v10 = vld [vmem:[%s3334_s1 + $0x48] sm:$0xff] }
   0x4   :  { %v1950_v3 = vld [vmem:[%s3334_s1 + $0x78] sm:$0xff]  ;;  %718 = vmatpush.bf16.msra.mxu2 %v1938_v2  ;;  %v1949_v7 = vld [vmem:[%s3334_s1 + $0x70] sm:$0xff]  ;;  %v1948_v11 = vld [vmem:[%s3334_s1 + $0x68] sm:$0xff] }
   0x5   :  { %1006 = vmatpush.bf16.msra.mxu3 %v1950_v3  ;;  %v1911_v12 = vld [vmem:[%s3334_s1] sm:$0xff]  ;;  %v1904_v20 = vld [vmem:[%s3336_s0 + $0x8] sm:$0xff]  ;;  %v1905_v24 = vld [vmem:[%s3336_s0 + $0x10] sm:$0xff] }
   0x6   :  { %143 = vmatpush.bf16.msra.mxu0 %v1913_v4  ;;  %v1923_v13 = vld [vmem:[%s3334_s1 + $0x20] sm:$0xff]  ;;  %v1916_v21 = vld [vmem:[%s3336_s0 + $0x48] sm:$0xff]  ;;  %v1917_v25 = vld [vmem:[%s3336_s0 + $0x50] sm:$0xff] }
   0x7   :  { %431 = vmatpush.bf16.msra.mxu1 %v1925_v5  ;;  %v1935_v14 = vld [vmem:[%s3334_s1 + $0x40] sm:$0xff]  ;;  %v1928_v22 = vld [vmem:[%s3336_s0 + $0x88] sm:$0xff]  ;;  %v1929_v26 = vld [vmem:[%s3336_s0 + $0x90] sm:$0xff] }
   0x8   :  { %719 = vmatpush.bf16.msra.mxu2 %v1937_v6  ;;  %v1947_v15 = vld [vmem:[%s3334_s1 + $0x60] sm:$0xff]  ;;  %v1940_v23 = vld [vmem:[%s3336_s0 + $0xc8] sm:$0xff]  ;;  %v1941_v27 = vld [vmem:[%s3336_s0 + $0xd0] sm:$0xff] }
   0x9   :  { %1007 = vmatpush.bf16.msra.mxu3 %v1949_v7  ;;  %v1903_v16 = vld [vmem:[%s3336_s0] sm:$0xff]  ;;  %v1906_v28 = vld [vmem:[%s3336_s0 + $0x18] sm:$0xff]  ;;  %v1908_v36 = vld [vmem:[%s3336_s0 + $0x28] sm:$0xff] }
   0xa   :  { %144 = vmatpush.bf16.msra.mxu0 %v1912_v8  ;;  %v1915_v17 = vld [vmem:[%s3336_s0 + $0x40] sm:$0xff]  ;;  %v1918_v29 = vld [vmem:[%s3336_s0 + $0x58] sm:$0xff]  ;;  %v1920_v37 = vld [vmem:[%s3336_s0 + $0x68] sm:$0xff] }
   0xb   :  { %432 = vmatpush.bf16.msra.mxu1 %v1924_v9  ;;  %v1927_v18 = vld [vmem:[%s3336_s0 + $0x80] sm:$0xff]  ;;  %v1930_v30 = vld [vmem:[%s3336_s0 + $0x98] sm:$0xff]  ;;  %v1932_v38 = vld [vmem:[%s3336_s0 + $0xa8] sm:$0xff] }
   0xc   :  { %720 = vmatpush.bf16.msra.mxu2 %v1936_v10  ;;  %v1939_v19 = vld [vmem:[%s3336_s0 + $0xc0] sm:$0xff]  ;;  %v1942_v31 = vld [vmem:[%s3336_s0 + $0xd8] sm:$0xff]  ;;  %v1944_v39 = vld [vmem:[%s3336_s0 + $0xe8] sm:$0xff] }
   0xd   :  { %1008 = vmatpush.bf16.msra.mxu3 %v1948_v11  ;;  %v1907_v32 = vld [vmem:[%s3336_s0 + $0x20] sm:$0xff]  ;;  %v1909_v40 = vld [vmem:[%s3336_s0 + $0x30] sm:$0xff]  ;;  %v1910_v44 = vld [vmem:[%s3336_s0 + $0x38] sm:$0xff] }
   0xe   :  { %145 = vmatpush.bf16.msra.mxu0 %v1911_v12  ;;  %v1919_v33 = vld [vmem:[%s3336_s0 + $0x60] sm:$0xff]  ;;  %v1921_v41 = vld [vmem:[%s3336_s0 + $0x70] sm:$0xff]  ;;  %v1922_v45 = vld [vmem:[%s3336_s0 + $0x78] sm:$0xff] }
   0xf   :  { %433 = vmatpush.bf16.msra.mxu1 %v1923_v13  ;;  %v1931_v34 = vld [vmem:[%s3336_s0 + $0xa0] sm:$0xff]  ;;  %v1933_v42 = vld [vmem:[%s3336_s0 + $0xb0] sm:$0xff]  ;;  %v1934_v46 = vld [vmem:[%s3336_s0 + $0xb8] sm:$0xff] }
  0x10   :  { %721 = vmatpush.bf16.msra.mxu2 %v1935_v14  ;;  %v1943_v35 = vld [vmem:[%s3336_s0 + $0xe0] sm:$0xff]  ;;  %v1945_v43 = vld [vmem:[%s3336_s0 + $0xf0] sm:$0xff]  ;;  %v1946_v47 = vld [vmem:[%s3336_s0 + $0xf8] sm:$0xff] }
  0x11   :  { %1009 = vmatpush.bf16.msra.mxu3 %v1947_v15  ;;  %1511 = vmatmul.msk.bf16.vlgmr.msra.gmra.mxu0 %vm113_vm0, %v1903_v16  ;;  %v2164_v48 = vld [vmem:[%s3335_s2] ss:$0 sm:$0xff] }
  0x12   :  { %1591 = vmatmul.msk.bf16.vlgmr.msra.gmra.mxu1 %vm113_vm0, %v1915_v17 }
  0x13   :  { %1687 = vmatmul.msk.bf16.vlgmr.msra.gmra.mxu2 %vm113_vm0, %v1927_v18 }
  0x14   :  { %1783 = vmatmul.msk.bf16.vlgmr.msra.gmra.mxu3 %vm113_vm0, %v1939_v19 }
  0x21   :  { %1512 = vmatmul.msk.bf16.gmra.mxu0 %vm113_vm0, %v1904_v20 }
  0x22   :  { %1592 = vmatmul.msk.bf16.gmra.mxu1 %vm113_vm0, %v1916_v21 }
  0x23   :  { %1688 = vmatmul.msk.bf16.gmra.mxu2 %vm113_vm0, %v1928_v22 }
  0x24   :  { %1784 = vmatmul.msk.bf16.gmra.mxu3 %vm113_vm0, %v1940_v23 }
  0x31   :  { %1513 = vmatmul.msk.bf16.gmra.mxu0 %vm113_vm0, %v1905_v24 }
  0x32   :  { %1593 = vmatmul.msk.bf16.gmra.mxu1 %vm113_vm0, %v1917_v25 }
  0x33   :  { %1689 = vmatmul.msk.bf16.gmra.mxu2 %vm113_vm0, %v1929_v26 }
  0x34   :  { %1785 = vmatmul.msk.bf16.gmra.mxu3 %vm113_vm0, %v1941_v27 }
  0x41   :  { %1514 = vmatmul.msk.bf16.gmra.mxu0 %vm113_vm0, %v1906_v28 }
  0x42   :  { %1594 = vmatmul.msk.bf16.gmra.mxu1 %vm113_vm0, %v1918_v29 }
  0x43   :  { %1690 = vmatmul.msk.bf16.gmra.mxu2 %vm113_vm0, %v1930_v30 }
  0x44   :  { %1786 = vmatmul.msk.bf16.gmra.mxu3 %vm113_vm0, %v1942_v31 }
  0x51   :  { %1515 = vmatmul.msk.bf16.gmra.mxu0 %vm113_vm0, %v1907_v32 }
  0x52   :  { %1595 = vmatmul.msk.bf16.gmra.mxu1 %vm113_vm0, %v1919_v33 }
  0x53   :  { %1691 = vmatmul.msk.bf16.gmra.mxu2 %vm113_vm0, %v1931_v34 }
  0x54   :  { %1787 = vmatmul.msk.bf16.gmra.mxu3 %vm113_vm0, %v1943_v35 }
  0x61   :  { %1516 = vmatmul.msk.bf16.gmra.mxu0 %vm113_vm0, %v1908_v36 }
  0x62   :  { %1596 = vmatmul.msk.bf16.gmra.mxu1 %vm113_vm0, %v1920_v37 }
  0x63   :  { %1692 = vmatmul.msk.bf16.gmra.mxu2 %vm113_vm0, %v1932_v38 }
  0x64   :  { %1788 = vmatmul.msk.bf16.gmra.mxu3 %vm113_vm0, %v1944_v39 }
  0x71   :  { %1517 = vmatmul.msk.bf16.gmra.mxu0 %vm113_vm0, %v1909_v40 }
  0x72   :  { %1597 = vmatmul.msk.bf16.gmra.mxu1 %vm113_vm0, %v1921_v41 }
  0x73   :  { %1693 = vmatmul.msk.bf16.gmra.mxu2 %vm113_vm0, %v1933_v42 }
  0x74   :  { %1789 = vmatmul.msk.bf16.gmra.mxu3 %vm113_vm0, %v1945_v43 }
  0x81   :  { %1518 = vmatmul.msk.bf16.gmra.mxu0 %vm113_vm0, %v1910_v44 }
  0x82   :  { %1598 = vmatmul.msk.bf16.gmra.mxu1 %vm113_vm0, %v1922_v45 }
  0x83   :  { %1694 = vmatmul.msk.bf16.gmra.mxu2 %vm113_vm0, %v1934_v46 }
  0x84   :  { %1790 = vmatmul.msk.bf16.gmra.mxu3 %vm113_vm0, %v1946_v47 }
  0x8e   :  { %v147_v49 = vpop.f32.mrf.mxu0 }
  0x8f   :  { %v435_v50 = vpop.f32.mrf.mxu1  ;;  %v148_v51 = vadd.f32 %v2164_v48, %v147_v49 }
  0x90   :  { %v436_v52 = vadd.f32 %v2164_v48, %v435_v50 }
  0x91   :  { %v187_v53 = vmax.f32 %v148_v51, 0.0 }
  0x92   :  { %v475_v54 = vmax.f32 %v436_v52, 0.0 }
  0x93   :  { %296 = vst.msk [vmem:[%s3337_s5] sm:$0xff] %vm203_vm1, %v187_v53  ;;  %v242_v63 = vmul.f32 %v187_v53, %v187_v53  ;;  %v204_v5 = vsel %vm203_vm1, %v187_v53, 0.0 }
  0x94   :  { %1599 = vst.msk [vmem:[%s3337_s5 + $0x80] sm:$0xff] %vm203_vm1, %v475_v54  ;;  %v529_v0 = vmul.f32 %v475_v54, %v475_v54  ;;  %v491_v6 = vsel %vm203_vm1, %v475_v54, 0.0 }
  0x95   :  { %v258_v11 = vsel %vm203_vm1, %v242_v63, 0.0 }
  0x96   :  { %v723_v55 = vpop.f32.mrf.mxu2  ;;  %v149_v59 = vpop.f32.mrf.mxu0  ;;  %v545_v12 = vsel %vm203_vm1, %v529_v0, 0.0 }
  0x97   :  { %v1011_v56 = vpop.f32.mrf.mxu3  ;;  %v724_v57 = vadd.f32 %v2164_v48, %v723_v55  ;;  %v437_v60 = vpop.f32.mrf.mxu1  ;;  %v150_v61 = vadd.f32 %v2164_v48, %v149_v59 }
  0x98   :  { %v1012_v58 = vadd.f32 %v2164_v48, %v1011_v56  ;;  %v438_v62 = vadd.f32 %v2164_v48, %v437_v60 }
  0x99   :  { %v763_v1 = vmax.f32 %v724_v57, 0.0  ;;  %v188_v3 = vmax.f32 %v150_v61, 0.0 }
  0x9a   :  { %v1051_v2 = vmax.f32 %v1012_v58, 0.0  ;;  %v476_v4 = vmax.f32 %v438_v62, 0.0 }
  0x9b   :  { %1695 = vst.msk [vmem:[%s3337_s5 + $0x100] sm:$0xff] %vm203_vm1, %v763_v1  ;;  %v205_v7 = vsel %vm203_vm1, %v188_v3, 0.0  ;;  %v243_v8 = vmul.f32 %v188_v3, %v188_v3  ;;  %v817_v15 = vmul.f32 %v763_v1, %v763_v1  ;;  %v779_v29 = vsel %vm203_vm1, %v763_v1, 0.0 }
  0x9c   :  { %1791 = vst.msk [vmem:[%s3337_s5 + $0x180] sm:$0xff] %vm203_vm1, %v1051_v2  ;;  %v492_v9 = vsel %vm203_vm1, %v476_v4, 0.0  ;;  %v530_v10 = vmul.f32 %v476_v4, %v476_v4  ;;  %v206_v13 = vadd.f32 %v205_v7, %v204_v5  ;;  %v1105_v16 = vmul.f32 %v1051_v2, %v1051_v2 }
  0x9d   :  { %297 = vst.msk [vmem:[%s3337_s5 + $0x8] sm:$0xff] %vm203_vm1, %v188_v3  ;;  %v493_v14 = vadd.f32 %v492_v9, %v491_v6  ;;  %v259_v17 = vsel %vm203_vm1, %v243_v8, 0.0  ;;  %v1067_v30 = vsel %vm203_vm1, %v1051_v2, 0.0  ;;  %v833_v33 = vsel %vm203_vm1, %v817_v15, 0.0 }
  0x9e   :  { %v546_v18 = vsel %vm203_vm1, %v530_v10, 0.0  ;;  %1600 = vst.msk [vmem:[%s3337_s5 + $0x88] sm:$0xff] %vm203_vm1, %v476_v4  ;;  %v725_v19 = vpop.f32.mrf.mxu2  ;;  %v260_v21 = vadd.f32 %v259_v17, %v258_v11  ;;  %v152_v25 = vpop.f32.mrf.mxu0  ;;  %v1121_v34 = vsel %vm203_vm1, %v1105_v16, 0.0 }
  0x9f   :  { %v1013_v20 = vpop.f32.mrf.mxu3  ;;  %v547_v22 = vadd.f32 %v546_v18, %v545_v12  ;;  %v726_v23 = vadd.f32 %v2164_v48, %v725_v19  ;;  %v440_v26 = vpop.f32.mrf.mxu1  ;;  %v153_v27 = vadd.f32 %v2164_v48, %v152_v25 }
  0xa0   :  { %v1014_v24 = vadd.f32 %v2164_v48, %v1013_v20  ;;  %v441_v28 = vadd.f32 %v2164_v48, %v440_v26 }
  0xa1   :  { %v764_v31 = vmax.f32 %v726_v23, 0.0  ;;  %v189_v35 = vmax.f32 %v153_v27, 0.0 }
  0xa2   :  { %v1052_v32 = vmax.f32 %v1014_v24, 0.0  ;;  %v477_v36 = vmax.f32 %v441_v28, 0.0 }
  0xa3   :  { %v780_v37 = vsel %vm203_vm1, %v764_v31, 0.0  ;;  %v818_v38 = vmul.f32 %v764_v31, %v764_v31  ;;  %1696 = vst.msk [vmem:[%s3337_s5 + $0x108] sm:$0xff] %vm203_vm1, %v764_v31  ;;  %v207_v43 = vsel %vm203_vm1, %v189_v35, 0.0  ;;  %v244_v44 = vmul.f32 %v189_v35, %v189_v35 }
  0xa4   :  { %v1068_v39 = vsel %vm203_vm1, %v1052_v32, 0.0  ;;  %v1106_v40 = vmul.f32 %v1052_v32, %v1052_v32  ;;  %v781_v41 = vadd.f32 %v780_v37, %v779_v29  ;;  %1792 = vst.msk [vmem:[%s3337_s5 + $0x188] sm:$0xff] %vm203_vm1, %v1052_v32  ;;  %v208_v47 = vadd.f32 %v207_v43, %v206_v13 }
  0xa5   :  { %v1069_v42 = vadd.f32 %v1068_v39, %v1067_v30  ;;  %v834_v45 = vsel %vm203_vm1, %v818_v38, 0.0  ;;  %298 = vst.msk [vmem:[%s3337_s5 + $0x10] sm:$0xff] %vm203_vm1, %v189_v35  ;;  %v494_v49 = vsel %vm203_vm1, %v477_v36, 0.0  ;;  %v261_v52 = vsel %vm203_vm1, %v244_v44, 0.0 }
  0xa6   :  { %v1122_v46 = vsel %vm203_vm1, %v1106_v40, 0.0  ;;  %v835_v50 = vadd.f32 %v834_v45, %v833_v33  ;;  %v495_v53 = vadd.f32 %v494_v49, %v493_v14  ;;  %1601 = vst.msk [vmem:[%s3337_s5 + $0x90] sm:$0xff] %vm203_vm1, %v477_v36  ;;  %v728_v54 = vpop.f32.mrf.mxu2  ;;  %v262_v56 = vadd.f32 %v261_v52, %v260_v21  ;;  %v154_v60 = vpop.f32.mrf.mxu0 }
  0xa7   :  { %v1123_v51 = vadd.f32 %v1122_v46, %v1121_v34  ;;  %v1016_v55 = vpop.f32.mrf.mxu3  ;;  %v531_v57 = vmul.f32 %v477_v36, %v477_v36  ;;  %v729_v58 = vadd.f32 %v2164_v48, %v728_v54  ;;  %v442_v61 = vpop.f32.mrf.mxu1  ;;  %v155_v62 = vadd.f32 %v2164_v48, %v154_v60 }
  0xa8   :  { %v1017_v59 = vadd.f32 %v2164_v48, %v1016_v55  ;;  %v443_v63 = vadd.f32 %v2164_v48, %v442_v61 }
  0xa9   :  { %v548_v0 = vsel %vm203_vm1, %v531_v57, 0.0  ;;  %v765_v1 = vmax.f32 %v729_v58, 0.0  ;;  %v190_v4 = vmax.f32 %v155_v62, 0.0 }
  0xaa   :  { %v1053_v2 = vmax.f32 %v1017_v59, 0.0  ;;  %v549_v3 = vadd.f32 %v548_v0, %v547_v22  ;;  %v478_v5 = vmax.f32 %v443_v63, 0.0 }
  0xab   :  { %v782_v6 = vsel %vm203_vm1, %v765_v1, 0.0  ;;  %v819_v7 = vmul.f32 %v765_v1, %v765_v1  ;;  %1697 = vst.msk [vmem:[%s3337_s5 + $0x110] sm:$0xff] %vm203_vm1, %v765_v1  ;;  %v209_v12 = vsel %vm203_vm1, %v190_v4, 0.0  ;;  %v245_v13 = vmul.f32 %v190_v4, %v190_v4 }
  0xac   :  { %v1070_v8 = vsel %vm203_vm1, %v1053_v2, 0.0  ;;  %v1107_v9 = vmul.f32 %v1053_v2, %v1053_v2  ;;  %v783_v10 = vadd.f32 %v782_v6, %v781_v41  ;;  %1793 = vst.msk [vmem:[%s3337_s5 + $0x190] sm:$0xff] %vm203_vm1, %v1053_v2  ;;  %v210_v16 = vadd.f32 %v209_v12, %v208_v47 }
  0xad   :  { %v1071_v11 = vadd.f32 %v1070_v8, %v1069_v42  ;;  %v836_v14 = vsel %vm203_vm1, %v819_v7, 0.0  ;;  %299 = vst.msk [vmem:[%s3337_s5 + $0x18] sm:$0xff] %vm203_vm1, %v190_v4  ;;  %v496_v17 = vsel %vm203_vm1, %v478_v5, 0.0  ;;  %v263_v20 = vsel %vm203_vm1, %v245_v13, 0.0 }
  0xae   :  { %v1124_v15 = vsel %vm203_vm1, %v1107_v9, 0.0  ;;  %v837_v18 = vadd.f32 %v836_v14, %v835_v50  ;;  %v497_v21 = vadd.f32 %v496_v17, %v495_v53  ;;  %1602 = vst.msk [vmem:[%s3337_s5 + $0x98] sm:$0xff] %vm203_vm1, %v478_v5  ;;  %v730_v22 = vpop.f32.mrf.mxu2  ;;  %v264_v24 = vadd.f32 %v263_v20, %v262_v56  ;;  %v157_v28 = vpop.f32.mrf.mxu0 }
  0xaf   :  { %v1125_v19 = vadd.f32 %v1124_v15, %v1123_v51  ;;  %v1018_v23 = vpop.f32.mrf.mxu3  ;;  %v532_v25 = vmul.f32 %v478_v5, %v478_v5  ;;  %v731_v26 = vadd.f32 %v2164_v48, %v730_v22  ;;  %v445_v29 = vpop.f32.mrf.mxu1  ;;  %v158_v30 = vadd.f32 %v2164_v48, %v157_v28 }
  0xb0   :  { %v1019_v27 = vadd.f32 %v2164_v48, %v1018_v23  ;;  %v446_v31 = vadd.f32 %v2164_v48, %v445_v29 }
  0xb1   :  { %v550_v32 = vsel %vm203_vm1, %v532_v25, 0.0  ;;  %v766_v33 = vmax.f32 %v731_v26, 0.0  ;;  %v191_v36 = vmax.f32 %v158_v30, 0.0 }
  0xb2   :  { %v1054_v34 = vmax.f32 %v1019_v27, 0.0  ;;  %v551_v35 = vadd.f32 %v550_v32, %v549_v3  ;;  %v479_v37 = vmax.f32 %v446_v31, 0.0 }
  0xb3   :  { %v784_v38 = vsel %vm203_vm1, %v766_v33, 0.0  ;;  %v820_v39 = vmul.f32 %v766_v33, %v766_v33  ;;  %1698 = vst.msk [vmem:[%s3337_s5 + $0x118] sm:$0xff] %vm203_vm1, %v766_v33  ;;  %v211_v44 = vsel %vm203_vm1, %v191_v36, 0.0  ;;  %v246_v45 = vmul.f32 %v191_v36, %v191_v36 }
  0xb4   :  { %v1072_v40 = vsel %vm203_vm1, %v1054_v34, 0.0  ;;  %v1108_v41 = vmul.f32 %v1054_v34, %v1054_v34  ;;  %v785_v42 = vadd.f32 %v784_v38, %v783_v10  ;;  %1794 = vst.msk [vmem:[%s3337_s5 + $0x198] sm:$0xff] %vm203_vm1, %v1054_v34  ;;  %v212_v49 = vadd.f32 %v211_v44, %v210_v16 }
  0xb5   :  { %v1073_v43 = vadd.f32 %v1072_v40, %v1071_v11  ;;  %v838_v46 = vsel %vm203_vm1, %v820_v39, 0.0  ;;  %300 = vst.msk [vmem:[%s3337_s5 + $0x20] sm:$0xff] %vm203_vm1, %v191_v36  ;;  %v498_v50 = vsel %vm203_vm1, %v479_v37, 0.0  ;;  %v265_v53 = vsel %vm203_vm1, %v246_v45, 0.0 }
  0xb6   :  { %v1126_v47 = vsel %vm203_vm1, %v1108_v41, 0.0  ;;  %v839_v51 = vadd.f32 %v838_v46, %v837_v18  ;;  %v499_v54 = vadd.f32 %v498_v50, %v497_v21  ;;  %1603 = vst.msk [vmem:[%s3337_s5 + $0xa0] sm:$0xff] %vm203_vm1, %v479_v37  ;;  %v733_v55 = vpop.f32.mrf.mxu2  ;;  %v266_v57 = vadd.f32 %v265_v53, %v264_v24  ;;  %v159_v61 = vpop.f32.mrf.mxu0 }
  0xb7   :  { %v1127_v52 = vadd.f32 %v1126_v47, %v1125_v19  ;;  %v1021_v56 = vpop.f32.mrf.mxu3  ;;  %v533_v58 = vmul.f32 %v479_v37, %v479_v37  ;;  %v734_v59 = vadd.f32 %v2164_v48, %v733_v55  ;;  %v447_v62 = vpop.f32.mrf.mxu1  ;;  %v160_v63 = vadd.f32 %v2164_v48, %v159_v61 }
  0xb8   :  { %v1022_v60 = vadd.f32 %v2164_v48, %v1021_v56  ;;  %v448_v0 = vadd.f32 %v2164_v48, %v447_v62 }
  0xb9   :  { %v552_v1 = vsel %vm203_vm1, %v533_v58, 0.0  ;;  %v767_v2 = vmax.f32 %v734_v59, 0.0  ;;  %v192_v5 = vmax.f32 %v160_v63, 0.0 }
  0xba   :  { %v1055_v3 = vmax.f32 %v1022_v60, 0.0  ;;  %v553_v4 = vadd.f32 %v552_v1, %v551_v35  ;;  %v480_v6 = vmax.f32 %v448_v0, 0.0 }
  0xbb   :  { %v786_v7 = vsel %vm203_vm1, %v767_v2, 0.0  ;;  %v821_v8 = vmul.f32 %v767_v2, %v767_v2  ;;  %1699 = vst.msk [vmem:[%s3337_s5 + $0x120] sm:$0xff] %vm203_vm1, %v767_v2  ;;  %v213_v13 = vsel %vm203_vm1, %v192_v5, 0.0  ;;  %v247_v14 = vmul.f32 %v192_v5, %v192_v5 }
  0xbc   :  { %v1074_v9 = vsel %vm203_vm1, %v1055_v3, 0.0  ;;  %v1109_v10 = vmul.f32 %v1055_v3, %v1055_v3  ;;  %v787_v11 = vadd.f32 %v786_v7, %v785_v42  ;;  %1795 = vst.msk [vmem:[%s3337_s5 + $0x1a0] sm:$0xff] %vm203_vm1, %v1055_v3  ;;  %v214_v17 = vadd.f32 %v213_v13, %v212_v49 }
  0xbd   :  { %v1075_v12 = vadd.f32 %v1074_v9, %v1073_v43  ;;  %v840_v15 = vsel %vm203_vm1, %v821_v8, 0.0  ;;  %301 = vst.msk [vmem:[%s3337_s5 + $0x28] sm:$0xff] %vm203_vm1, %v192_v5  ;;  %v500_v18 = vsel %vm203_vm1, %v480_v6, 0.0  ;;  %v267_v21 = vsel %vm203_vm1, %v247_v14, 0.0 }
  0xbe   :  { %v1128_v16 = vsel %vm203_vm1, %v1109_v10, 0.0  ;;  %v841_v19 = vadd.f32 %v840_v15, %v839_v51  ;;  %v2315_v22 = vadd.f32 %v500_v18, %v499_v54  ;;  %1604 = vst.msk [vmem:[%s3337_s5 + $0xa8] sm:$0xff] %vm203_vm1, %v480_v6  ;;  %v735_v23 = vpop.f32.mrf.mxu2  ;;  %v268_v25 = vadd.f32 %v267_v21, %v266_v57  ;;  %v162_v29 = vpop.f32.mrf.mxu0 }
  0xbf   :  { %v1129_v20 = vadd.f32 %v1128_v16, %v1127_v52  ;;  %v1023_v24 = vpop.f32.mrf.mxu3  ;;  %v534_v26 = vmul.f32 %v480_v6, %v480_v6  ;;  %v736_v27 = vadd.f32 %v2164_v48, %v735_v23  ;;  %v450_v30 = vpop.f32.mrf.mxu1  ;;  %v163_v31 = vadd.f32 %v2164_v48, %v162_v29 }
  0xc0   :  { %v1024_v28 = vadd.f32 %v2164_v48, %v1023_v24  ;;  %v451_v32 = vadd.f32 %v2164_v48, %v450_v30 }
  0xc1   :  { %v554_v33 = vsel %vm203_vm1, %v534_v26, 0.0  ;;  %v768_v34 = vmax.f32 %v736_v27, 0.0  ;;  %v193_v37 = vmax.f32 %v163_v31, 0.0 }
  0xc2   :  { %v1056_v35 = vmax.f32 %v1024_v28, 0.0  ;;  %v555_v36 = vadd.f32 %v554_v33, %v553_v4  ;;  %v481_v38 = vmax.f32 %v451_v32, 0.0 }
  0xc3   :  { %v788_v39 = vsel %vm203_vm1, %v768_v34, 0.0  ;;  %v822_v40 = vmul.f32 %v768_v34, %v768_v34  ;;  %1700 = vst.msk [vmem:[%s3337_s5 + $0x128] sm:$0xff] %vm203_vm1, %v768_v34  ;;  %v215_v45 = vsel %vm203_vm1, %v193_v37, 0.0  ;;  %v248_v46 = vmul.f32 %v193_v37, %v193_v37 }
  0xc4   :  { %v1076_v41 = vsel %vm203_vm1, %v1056_v35, 0.0  ;;  %v1110_v42 = vmul.f32 %v1056_v35, %v1056_v35  ;;  %v789_v43 = vadd.f32 %v788_v39, %v787_v11  ;;  %1796 = vst.msk [vmem:[%s3337_s5 + $0x1a8] sm:$0xff] %vm203_vm1, %v1056_v35  ;;  %v2341_v50 = vadd.f32 %v215_v45, %v214_v17 }
  0xc5   :  { %v2332_v44 = vadd.f32 %v1076_v41, %v1075_v12  ;;  %v842_v47 = vsel %vm203_vm1, %v822_v40, 0.0  ;;  %302 = vst.msk [vmem:[%s3337_s5 + $0x30] sm:$0xff] %vm203_vm1, %v193_v37  ;;  %v269_v53 = vsel %vm203_vm1, %v248_v46, 0.0  ;;  %v535_v5 = vmul.f32 %v481_v38, %v481_v38 }
  0xc6   :  { %v1130_v49 = vsel %vm203_vm1, %v1110_v42, 0.0  ;;  %v2347_v51 = vadd.f32 %v842_v47, %v841_v19  ;;  %1605 = vst.msk [vmem:[%s3337_s5 + $0xb0] sm:$0xff] %vm203_vm1, %v481_v38  ;;  %v738_v54 = vpop.f32.mrf.mxu2  ;;  %v2356_v56 = vadd.f32 %v269_v53, %v268_v25  ;;  %v164_v59 = vpop.f32.mrf.mxu0  ;;  %v502_v14 = vsel %vm203_vm1, %v481_v38, 0.0 }
  0xc7   :  { %v2349_v52 = vadd.f32 %v1130_v49, %v1129_v20  ;;  %v1026_v55 = vpop.f32.mrf.mxu3  ;;  %v739_v57 = vadd.f32 %v2164_v48, %v738_v54  ;;  %v452_v60 = vpop.f32.mrf.mxu1  ;;  %v165_v61 = vadd.f32 %v2164_v48, %v164_v59  ;;  %v556_v15 = vsel %vm203_vm1, %v535_v5, 0.0 }
  0xc8   :  { %v1027_v58 = vadd.f32 %v2164_v48, %v1026_v55  ;;  %v453_v62 = vadd.f32 %v2164_v48, %v452_v60  ;;  %v503_v23 = vadd.f32 %v502_v14, %v2315_v22  ;;  %v557_v24 = vadd.f32 %v556_v15, %v555_v36 }
  0xc9   :  { %v769_v63 = vmax.f32 %v739_v57, 0.0  ;;  %v194_v1 = vmax.f32 %v165_v61, 0.0 }
  0xca   :  { %v1057_v0 = vmax.f32 %v1027_v58, 0.0  ;;  %v482_v2 = vmax.f32 %v453_v62, 0.0 }
  0xcb   :  { %1701 = vst.msk [vmem:[%s3337_s5 + $0x130] sm:$0xff] %vm203_vm1, %v769_v63  ;;  %v790_v17 = vsel %vm203_vm1, %v769_v63, 0.0  ;;  %v823_v18 = vmul.f32 %v769_v63, %v769_v63  ;;  %v249_v21 = vmul.f32 %v194_v1, %v194_v1  ;;  %v217_v34 = vsel %vm203_vm1, %v194_v1, 0.0 }
  0xcc   :  { %1797 = vst.msk [vmem:[%s3337_s5 + $0x1b0] sm:$0xff] %vm203_vm1, %v1057_v0  ;;  %v1111_v20 = vmul.f32 %v1057_v0, %v1057_v0  ;;  %v536_v25 = vmul.f32 %v482_v2, %v482_v2  ;;  %v791_v28 = vadd.f32 %v790_v17, %v789_v43  ;;  %v1078_v29 = vsel %vm203_vm1, %v1057_v0, 0.0 }
  0xcd   :  { %303 = vst.msk [vmem:[%s3337_s5 + $0x38] sm:$0xff] %vm203_vm1, %v194_v1  ;;  %v844_v22 = vsel %vm203_vm1, %v823_v18, 0.0  ;;  %v271_v38 = vsel %vm203_vm1, %v249_v21, 0.0  ;;  %v504_v39 = vsel %vm203_vm1, %v482_v2, 0.0  ;;  %v1079_v55 = vadd.f32 %v1078_v29, %v2332_v44 }
  0xce   :  { %1606 = vst.msk [vmem:[%s3337_s5 + $0xb8] sm:$0xff] %vm203_vm1, %v482_v2  ;;  %v740_v3 = vpop.f32.mrf.mxu2  ;;  %v167_v8 = vpop.f32.mrf.mxu0  ;;  %v1132_v37 = vsel %vm203_vm1, %v1111_v20, 0.0  ;;  %v558_v41 = vsel %vm203_vm1, %v536_v25, 0.0  ;;  %v845_v54 = vadd.f32 %v844_v22, %v2347_v51  ;;  %v218_v58 = vadd.f32 %v217_v34, %v2341_v50 }
  0xcf   :  { %v1028_v4 = vpop.f32.mrf.mxu3  ;;  %v741_v6 = vadd.f32 %v2164_v48, %v740_v3  ;;  %v455_v9 = vpop.f32.mrf.mxu1  ;;  %v168_v10 = vadd.f32 %v2164_v48, %v167_v8  ;;  %v1133_v57 = vadd.f32 %v1132_v37, %v2349_v52  ;;  %v272_v59 = vadd.f32 %v271_v38, %v2356_v56 }
  0xd0   :  { %v1029_v7 = vadd.f32 %v2164_v48, %v1028_v4  ;;  %v456_v11 = vadd.f32 %v2164_v48, %v455_v9  ;;  %v505_v60 = vadd.f32 %v504_v39, %v503_v23  ;;  %v559_v44 = vadd.f32 %v558_v41, %v557_v24 }
  0xd1   :  { %v770_v12 = vmax.f32 %v741_v6, 0.0  ;;  %v195_v16 = vmax.f32 %v168_v10, 0.0 }
  0xd2   :  { %v1058_v13 = vmax.f32 %v1029_v7, 0.0  ;;  %v483_v19 = vmax.f32 %v456_v11, 0.0 }
  0xd3   :  { %1702 = vst.msk [vmem:[%s3337_s5 + $0x138] sm:$0xff] %vm203_vm1, %v770_v12  ;;  %v792_v46 = vsel %vm203_vm1, %v770_v12, 0.0  ;;  %v824_v47 = vmul.f32 %v770_v12, %v770_v12  ;;  %v219_v61 = vsel %vm203_vm1, %v195_v16, 0.0  ;;  %v250_v62 = vmul.f32 %v195_v16, %v195_v16 }
  0xd4   :  { %1798 = vst.msk [vmem:[%s3337_s5 + $0x1b8] sm:$0xff] %vm203_vm1, %v1058_v13  ;;  %v1080_v49 = vsel %vm203_vm1, %v1058_v13, 0.0  ;;  %v1112_v53 = vmul.f32 %v1058_v13, %v1058_v13  ;;  %v793_v51 = vadd.f32 %v792_v46, %v791_v28  ;;  %v537_v50 = vmul.f32 %v483_v19, %v483_v19 }
  0xd5   :  { %304 = vst.msk [vmem:[%s3337_s5 + $0x40] sm:$0xff] %vm203_vm1, %v195_v16  ;;  %v1081_v52 = vadd.f32 %v1080_v49, %v1079_v55  ;;  %v846_v0 = vsel %vm203_vm1, %v824_v47, 0.0  ;;  %v220_v6 = vadd.f32 %v219_v61, %v218_v58  ;;  %v506_v7 = vsel %vm203_vm1, %v483_v19, 0.0 }
  0xd6   :  { %1607 = vst.msk [vmem:[%s3337_s5 + $0xc0] sm:$0xff] %vm203_vm1, %v483_v19  ;;  %v743_v26 = vpop.f32.mrf.mxu2  ;;  %v169_v32 = vpop.f32.mrf.mxu0  ;;  %v1134_v1 = vsel %vm203_vm1, %v1112_v53, 0.0  ;;  %v273_v10 = vsel %vm203_vm1, %v250_v62, 0.0  ;;  %v847_v14 = vadd.f32 %v846_v0, %v845_v54  ;;  %v560_v15 = vsel %vm203_vm1, %v537_v50, 0.0 }
  0xd7   :  { %v1031_v27 = vpop.f32.mrf.mxu3  ;;  %v744_v30 = vadd.f32 %v2164_v48, %v743_v26  ;;  %v457_v33 = vpop.f32.mrf.mxu1  ;;  %v170_v35 = vadd.f32 %v2164_v48, %v169_v32  ;;  %v1135_v18 = vadd.f32 %v1134_v1, %v1133_v57  ;;  %v274_v23 = vadd.f32 %v273_v10, %v272_v59 }
  0xd8   :  { %v1032_v31 = vadd.f32 %v2164_v48, %v1031_v27  ;;  %v458_v36 = vadd.f32 %v2164_v48, %v457_v33  ;;  %v507_v24 = vadd.f32 %v506_v7, %v505_v60  ;;  %v561_v27 = vadd.f32 %v560_v15, %v559_v44 }
  0xd9   :  { %v771_v40 = vmax.f32 %v744_v30, 0.0  ;;  %v196_v43 = vmax.f32 %v170_v35, 0.0 }
  0xda   :  { %v1059_v42 = vmax.f32 %v1032_v31, 0.0  ;;  %v484_v45 = vmax.f32 %v458_v36, 0.0 }
  0xdb   :  { %1703 = vst.msk [vmem:[%s3337_s5 + $0x140] sm:$0xff] %vm203_vm1, %v771_v40  ;;  %v825_v11 = vmul.f32 %v771_v40, %v771_v40  ;;  %v794_v16 = vsel %vm203_vm1, %v771_v40, 0.0  ;;  %v221_v19 = vsel %vm203_vm1, %v196_v43, 0.0  ;;  %v251_v25 = vmul.f32 %v196_v43, %v196_v43 }
  0xdc   :  { %1799 = vst.msk [vmem:[%s3337_s5 + $0x1c0] sm:$0xff] %vm203_vm1, %v1059_v42  ;;  %v1113_v17 = vmul.f32 %v1059_v42, %v1059_v42  ;;  %v1082_v20 = vsel %vm203_vm1, %v1059_v42, 0.0  ;;  %v795_v28 = vadd.f32 %v794_v16, %v793_v51  ;;  %v538_v30 = vmul.f32 %v484_v45, %v484_v45 }
  0xdd   :  { %305 = vst.msk [vmem:[%s3337_s5 + $0x48] sm:$0xff] %vm203_vm1, %v196_v43  ;;  %v848_v29 = vsel %vm203_vm1, %v825_v11, 0.0  ;;  %v1083_v31 = vadd.f32 %v1082_v20, %v1081_v52  ;;  %v222_v33 = vadd.f32 %v221_v19, %v220_v6  ;;  %v508_v22 = vsel %vm203_vm1, %v484_v45, 0.0 }
  0xde   :  { %1608 = vst.msk [vmem:[%s3337_s5 + $0xc8] sm:$0xff] %vm203_vm1, %v484_v45  ;;  %v745_v63 = vpop.f32.mrf.mxu2  ;;  %v172_v4 = vpop.f32.mrf.mxu0  ;;  %v1136_v32 = vsel %vm203_vm1, %v1113_v17, 0.0  ;;  %v849_v42 = vadd.f32 %v848_v29, %v847_v14  ;;  %v275_v43 = vsel %vm203_vm1, %v251_v25, 0.0  ;;  %v562_v47 = vsel %vm203_vm1, %v538_v30, 0.0 }
  0xdf   :  { %v1033_v56 = vpop.f32.mrf.mxu3  ;;  %v746_v2 = vadd.f32 %v2164_v48, %v745_v63  ;;  %v460_v5 = vpop.f32.mrf.mxu1  ;;  %v173_v8 = vadd.f32 %v2164_v48, %v172_v4  ;;  %v1137_v60 = vadd.f32 %v1136_v32, %v1135_v18  ;;  %v276_v51 = vadd.f32 %v275_v43, %v274_v23 }
  0xe0   :  { %v1034_v3 = vadd.f32 %v2164_v48, %v1033_v56  ;;  %v461_v9 = vadd.f32 %v2164_v48, %v460_v5  ;;  %v509_v52 = vadd.f32 %v508_v22, %v507_v24  ;;  %v563_v50 = vadd.f32 %v562_v47, %v561_v27 }
  0xe1   :  { %v772_v12 = vmax.f32 %v746_v2, 0.0  ;;  %v197_v21 = vmax.f32 %v173_v8, 0.0 }
  0xe2   :  { %v1060_v13 = vmax.f32 %v1034_v3, 0.0  ;;  %v485_v26 = vmax.f32 %v461_v9, 0.0 }
  0xe3   :  { %1704 = vst.msk [vmem:[%s3337_s5 + $0x148] sm:$0xff] %vm203_vm1, %v772_v12  ;;  %v826_v36 = vmul.f32 %v772_v12, %v772_v12  ;;  %v796_v49 = vsel %vm203_vm1, %v772_v12, 0.0  ;;  %v223_v55 = vsel %vm203_vm1, %v197_v21, 0.0  ;;  %v252_v44 = vmul.f32 %v197_v21, %v197_v21 }
  0xe4   :  { %1800 = vst.msk [vmem:[%s3337_s5 + $0x1c8] sm:$0xff] %vm203_vm1, %v1060_v13  ;;  %v1114_v37 = vmul.f32 %v1060_v13, %v1060_v13  ;;  %v1084_v53 = vsel %vm203_vm1, %v1060_v13, 0.0  ;;  %v539_v63 = vmul.f32 %v485_v26, %v485_v26  ;;  %v797_v56 = vadd.f32 %v796_v49, %v795_v28 }
  0xe5   :  { %306 = vst.msk [vmem:[%s3337_s5 + $0x50] sm:$0xff] %vm203_vm1, %v197_v21  ;;  %v850_v61 = vsel %vm203_vm1, %v826_v36, 0.0  ;;  %v1085_v0 = vadd.f32 %v1084_v53, %v1083_v31  ;;  %v224_v1 = vadd.f32 %v223_v55, %v222_v33  ;;  %v510_v2 = vsel %vm203_vm1, %v485_v26, 0.0 }
  0xe6   :  { %1609 = vst.msk [vmem:[%s3337_s5 + $0xd0] sm:$0xff] %vm203_vm1, %v485_v26  ;;  %v748_v34 = vpop.f32.mrf.mxu2  ;;  %v174_v40 = vpop.f32.mrf.mxu0  ;;  %v1138_v62 = vsel %vm203_vm1, %v1114_v37, 0.0  ;;  %v851_v3 = vadd.f32 %v850_v61, %v849_v42  ;;  %v277_v9 = vsel %vm203_vm1, %v252_v44, 0.0  ;;  %v511_v15 = vadd.f32 %v510_v2, %v509_v52 }
  0xe7   :  { %v1036_v35 = vpop.f32.mrf.mxu3  ;;  %v749_v38 = vadd.f32 %v2164_v48, %v748_v34  ;;  %v462_v41 = vpop.f32.mrf.mxu1  ;;  %v175_v45 = vadd.f32 %v2164_v48, %v174_v40  ;;  %v1139_v4 = vadd.f32 %v1138_v62, %v1137_v60  ;;  %v564_v16 = vsel %vm203_vm1, %v539_v63, 0.0 }
  0xe8   :  { %v1037_v39 = vadd.f32 %v2164_v48, %v1036_v35  ;;  %v463_v46 = vadd.f32 %v2164_v48, %v462_v41  ;;  %v278_v32 = vadd.f32 %v277_v9, %v276_v51  ;;  %v565_v33 = vadd.f32 %v564_v16, %v563_v50 }
  0xe9   :  { %v773_v54 = vmax.f32 %v749_v38, 0.0  ;;  %v198_v58 = vmax.f32 %v175_v45, 0.0 }
  0xea   :  { %v1061_v57 = vmax.f32 %v1037_v39, 0.0  ;;  %v486_v59 = vmax.f32 %v463_v46, 0.0 }
  0xeb   :  { %1705 = vst.msk [vmem:[%s3337_s5 + $0x150] sm:$0xff] %vm203_vm1, %v773_v54  ;;  %v827_v5 = vmul.f32 %v773_v54, %v773_v54  ;;  %v253_v10 = vmul.f32 %v198_v58, %v198_v58  ;;  %v798_v20 = vsel %vm203_vm1, %v773_v54, 0.0  ;;  %v225_v26 = vsel %vm203_vm1, %v198_v58, 0.0 }
  0xec   :  { %1801 = vst.msk [vmem:[%s3337_s5 + $0x1d0] sm:$0xff] %vm203_vm1, %v1061_v57  ;;  %v1115_v6 = vmul.f32 %v1061_v57, %v1061_v57  ;;  %v1086_v19 = vsel %vm203_vm1, %v1061_v57, 0.0  ;;  %v540_v27 = vmul.f32 %v486_v59, %v486_v59  ;;  %v512_v29 = vsel %vm203_vm1, %v486_v59, 0.0 }
  0xed   :  { %307 = vst.msk [vmem:[%s3337_s5 + $0x58] sm:$0xff] %vm203_vm1, %v198_v58  ;;  %v852_v24 = vsel %vm203_vm1, %v827_v5, 0.0  ;;  %v279_v28 = vsel %vm203_vm1, %v253_v10, 0.0  ;;  %v799_v22 = vadd.f32 %v798_v20, %v797_v56  ;;  %v1087_v34 = vadd.f32 %v1086_v19, %v1085_v0 }
  0xee   :  { %1610 = vst.msk [vmem:[%s3337_s5 + $0xd8] sm:$0xff] %vm203_vm1, %v486_v59  ;;  %v750_v7 = vpop.f32.mrf.mxu2  ;;  %v177_v13 = vpop.f32.mrf.mxu0  ;;  %v1140_v25 = vsel %vm203_vm1, %v1115_v6, 0.0  ;;  %v853_v35 = vadd.f32 %v852_v24, %v851_v3  ;;  %v226_v37 = vadd.f32 %v225_v26, %v224_v1  ;;  %v280_v39 = vadd.f32 %v279_v28, %v278_v32 }
  0xef   :  { %v1038_v8 = vpop.f32.mrf.mxu3  ;;  %v751_v11 = vadd.f32 %v2164_v48, %v750_v7  ;;  %v465_v14 = vpop.f32.mrf.mxu1  ;;  %v178_v17 = vadd.f32 %v2164_v48, %v177_v13  ;;  %v1141_v36 = vadd.f32 %v1140_v25, %v1139_v4  ;;  %v513_v40 = vadd.f32 %v512_v29, %v511_v15 }
  0xf0   :  { %v1039_v12 = vadd.f32 %v2164_v48, %v1038_v8  ;;  %v466_v18 = vadd.f32 %v2164_v48, %v465_v14  ;;  %v566_v41 = vsel %vm203_vm1, %v540_v27, 0.0 }
  0xf1   :  { %v774_v21 = vmax.f32 %v751_v11, 0.0  ;;  %v199_v30 = vmax.f32 %v178_v17, 0.0  ;;  %v567_v0 = vadd.f32 %v566_v41, %v565_v33 }
  0xf2   :  { %v1062_v23 = vmax.f32 %v1039_v12, 0.0  ;;  %v487_v31 = vmax.f32 %v466_v18, 0.0 }
  0xf3   :  { %1706 = vst.msk [vmem:[%s3337_s5 + $0x158] sm:$0xff] %vm203_vm1, %v774_v21  ;;  %v828_v38 = vmul.f32 %v774_v21, %v774_v21  ;;  %v254_v46 = vmul.f32 %v199_v30, %v199_v30  ;;  %v800_v57 = vsel %vm203_vm1, %v774_v21, 0.0  ;;  %v227_v62 = vsel %vm203_vm1, %v199_v30, 0.0 }
  0xf4   :  { %1802 = vst.msk [vmem:[%s3337_s5 + $0x1d8] sm:$0xff] %vm203_vm1, %v1062_v23  ;;  %v1116_v42 = vmul.f32 %v1062_v23, %v1062_v23  ;;  %v541_v47 = vmul.f32 %v487_v31, %v487_v31  ;;  %v1088_v58 = vsel %vm203_vm1, %v1062_v23, 0.0  ;;  %v514_v50 = vsel %vm203_vm1, %v487_v31, 0.0 }
  0xf5   :  { %308 = vst.msk [vmem:[%s3337_s5 + $0x60] sm:$0xff] %vm203_vm1, %v199_v30  ;;  %v854_v61 = vsel %vm203_vm1, %v828_v38, 0.0  ;;  %v801_v1 = vadd.f32 %v800_v57, %v799_v22  ;;  %v281_v2 = vsel %vm203_vm1, %v254_v46, 0.0  ;;  %v1089_v4 = vadd.f32 %v1088_v58, %v1087_v34 }
  0xf6   :  { %1611 = vst.msk [vmem:[%s3337_s5 + $0xe0] sm:$0xff] %vm203_vm1, %v487_v31  ;;  %v753_v43 = vpop.f32.mrf.mxu2  ;;  %v179_v54 = vpop.f32.mrf.mxu0  ;;  %v1142_v52 = vsel %vm203_vm1, %v1116_v42, 0.0  ;;  %v568_v3 = vsel %vm203_vm1, %v541_v47, 0.0  ;;  %v228_v5 = vadd.f32 %v227_v62, %v226_v37  ;;  %v855_v8 = vadd.f32 %v854_v61, %v853_v35 }
  0xf7   :  { %v1041_v45 = vpop.f32.mrf.mxu3  ;;  %v754_v49 = vadd.f32 %v2164_v48, %v753_v43  ;;  %v467_v55 = vpop.f32.mrf.mxu1  ;;  %v180_v59 = vadd.f32 %v2164_v48, %v179_v54  ;;  %v1143_v9 = vadd.f32 %v1142_v52, %v1141_v36  ;;  %v515_v10 = vadd.f32 %v514_v50, %v513_v40 }
  0xf8   :  { %v1042_v53 = vadd.f32 %v2164_v48, %v1041_v45  ;;  %v468_v60 = vadd.f32 %v2164_v48, %v467_v55  ;;  %v282_v12 = vadd.f32 %v281_v2, %v280_v39  ;;  %v569_v13 = vadd.f32 %v568_v3, %v567_v0 }
  0xf9   :  { %v775_v44 = vmax.f32 %v754_v49, 0.0  ;;  %v200_v63 = vmax.f32 %v180_v59, 0.0 }
  0xfa   :  { %v1063_v51 = vmax.f32 %v1042_v53, 0.0  ;;  %v488_v56 = vmax.f32 %v468_v60, 0.0 }
  0xfb   :  { %1707 = vst.msk [vmem:[%s3337_s5 + $0x160] sm:$0xff] %vm203_vm1, %v775_v44  ;;  %v802_v6 = vsel %vm203_vm1, %v775_v44, 0.0  ;;  %v829_v7 = vmul.f32 %v775_v44, %v775_v44  ;;  %v255_v15 = vmul.f32 %v200_v63, %v200_v63  ;;  %v229_v26 = vsel %vm203_vm1, %v200_v63, 0.0 }
  0xfc   :  { %1803 = vst.msk [vmem:[%s3337_s5 + $0x1e0] sm:$0xff] %vm203_vm1, %v1063_v51  ;;  %v1117_v11 = vmul.f32 %v1063_v51, %v1063_v51  ;;  %v1090_v14 = vsel %vm203_vm1, %v1063_v51, 0.0  ;;  %v803_v18 = vadd.f32 %v802_v6, %v801_v1  ;;  %v542_v20 = vmul.f32 %v488_v56, %v488_v56 }
  0xfd   :  { %309 = vst.msk [vmem:[%s3337_s5 + $0x68] sm:$0xff] %vm203_vm1, %v200_v63  ;;  %v856_v25 = vsel %vm203_vm1, %v829_v7, 0.0  ;;  %v516_v30 = vsel %vm203_vm1, %v488_v56, 0.0  ;;  %v283_v33 = vsel %vm203_vm1, %v255_v15, 0.0  ;;  %v1091_v41 = vadd.f32 %v1090_v14, %v1089_v4 }
  0xfe   :  { %1612 = vst.msk [vmem:[%s3337_s5 + $0xe8] sm:$0xff] %vm203_vm1, %v488_v56  ;;  %v755_v16 = vpop.f32.mrf.mxu2  ;;  %v182_v23 = vpop.f32.mrf.mxu0  ;;  %v1144_v29 = vsel %vm203_vm1, %v1117_v11, 0.0  ;;  %v570_v22 = vsel %vm203_vm1, %v542_v20, 0.0  ;;  %v857_v40 = vadd.f32 %v856_v25, %v855_v8  ;;  %v230_v43 = vadd.f32 %v229_v26, %v228_v5  ;;  %v1954_v56 = vld [vmem:[%s3335_s2] ss:$0 sm:$0xff] }
  0xff   :  { %v1043_v17 = vpop.f32.mrf.mxu3  ;;  %v756_v19 = vadd.f32 %v2164_v48, %v755_v16  ;;  %v470_v24 = vpop.f32.mrf.mxu1  ;;  %v183_v27 = vadd.f32 %v2164_v48, %v182_v23  ;;  %v1145_v42 = vadd.f32 %v1144_v29, %v1143_v9  ;;  %v284_v45 = vadd.f32 %v283_v33, %v282_v12 }
 0x100   :  { %v1044_v21 = vadd.f32 %v2164_v48, %v1043_v17  ;;  %v471_v28 = vadd.f32 %v2164_v48, %v470_v24  ;;  %v517_v46 = vadd.f32 %v516_v30, %v515_v10  ;;  %v571_v53 = vadd.f32 %v570_v22, %v569_v13 }
 0x101   :  { %v776_v31 = vmax.f32 %v756_v19, 0.0  ;;  %v201_v34 = vmax.f32 %v183_v27, 0.0 }
 0x102   :  { %v1064_v32 = vmax.f32 %v1044_v21, 0.0  ;;  %v489_v35 = vmax.f32 %v471_v28, 0.0 }
 0x103   :  { %v804_v36 = vsel %vm203_vm1, %v776_v31, 0.0  ;;  %v830_v37 = vmul.f32 %v776_v31, %v776_v31  ;;  %1708 = vst.msk [vmem:[%s3337_s5 + $0x168] sm:$0xff] %vm203_vm1, %v776_v31  ;;  %v231_v47 = vsel %vm203_vm1, %v201_v34, 0.0  ;;  %v256_v49 = vmul.f32 %v201_v34, %v201_v34 }
 0x104   :  { %v1092_v38 = vsel %vm203_vm1, %v1064_v32, 0.0  ;;  %v1118_v39 = vmul.f32 %v1064_v32, %v1064_v32  ;;  %1804 = vst.msk [vmem:[%s3337_s5 + $0x1e8] sm:$0xff] %vm203_vm1, %v1064_v32  ;;  %v805_v54 = vadd.f32 %v804_v36, %v803_v18  ;;  %v543_v61 = vmul.f32 %v489_v35, %v489_v35 }
 0x105   :  { %310 = vst.msk [vmem:[%s3337_s5 + $0x70] sm:$0xff] %vm203_vm1, %v201_v34  ;;  %v858_v55 = vsel %vm203_vm1, %v830_v37, 0.0  ;;  %v1093_v57 = vadd.f32 %v1092_v38, %v1091_v41  ;;  %v232_v50 = vadd.f32 %v231_v47, %v230_v43  ;;  %v518_v63 = vsel %vm203_vm1, %v489_v35, 0.0 }
 0x106   :  { %1613 = vst.msk [vmem:[%s3337_s5 + $0xf0] sm:$0xff] %vm203_vm1, %v489_v35  ;;  %v758_v58 = vpop.f32.mrf.mxu2  ;;  %v1146_v60 = vsel %vm203_vm1, %v1118_v39, 0.0  ;;  %v184_v51 = vpop.f32.mrf.mxu0  ;;  %v285_v2 = vsel %vm203_vm1, %v256_v49, 0.0  ;;  %v572_v3 = vsel %vm203_vm1, %v543_v61, 0.0  ;;  %v859_v6 = vadd.f32 %v858_v55, %v857_v40 }
 0x107   :  { %v1046_v59 = vpop.f32.mrf.mxu3  ;;  %v759_v62 = vadd.f32 %v2164_v48, %v758_v58  ;;  %v472_v52 = vpop.f32.mrf.mxu1  ;;  %v185_v0 = vadd.f32 %v1954_v56, %v184_v51  ;;  %v1147_v7 = vadd.f32 %v1146_v60, %v1145_v42  ;;  %v519_v9 = vadd.f32 %v518_v63, %v517_v46 }
 0x108   :  { %v1047_v44 = vadd.f32 %v2164_v48, %v1046_v59  ;;  %v473_v1 = vadd.f32 %v1954_v56, %v472_v52  ;;  %v286_v13 = vadd.f32 %v285_v2, %v284_v45  ;;  %v573_v14 = vadd.f32 %v572_v3, %v571_v53 }
 0x109   :  { %v777_v4 = vmax.f32 %v759_v62, 0.0  ;;  %v202_v48 = vmax.f32 %v185_v0, 0.0 }
 0x10a   :  { %v1065_v5 = vmax.f32 %v1047_v44, 0.0  ;;  %v490_v8 = vmax.f32 %v473_v1, 0.0 }
 0x10b   :  { %v806_v10 = vsel %vm203_vm1, %v777_v4, 0.0  ;;  %v831_v11 = vmul.f32 %v777_v4, %v777_v4  ;;  %1709 = vst.msk [vmem:[%s3337_s5 + $0x170] sm:$0xff] %vm203_vm1, %v777_v4  ;;  %v233_v15 = vsel %vm203_vm1, %v202_v48, 0.0  ;;  %v257_v16 = vmul.f32 %v202_v48, %v202_v48 }
 0x10c   :  { %v1119_v12 = vmul.f32 %v1065_v5, %v1065_v5  ;;  %1805 = vst.msk [vmem:[%s3337_s5 + $0x1f0] sm:$0xff] %vm203_vm1, %v1065_v5  ;;  %v1094_v18 = vsel %vm203_vm1, %v1065_v5, 0.0  ;;  %v234_v20 = vadd.f32 %v233_v15, %v232_v50  ;;  %v520_v19 = vsel %vm203_vm1, %v490_v8, 0.0 }
 0x10d   :  { %v860_v17 = vsel %vm203_vm1, %v831_v11, 0.0  ;;  %311 = vst.msk [vmem:[%s3337_s5 + $0x78] sm:$0xff] %vm203_vm1, %v202_v48  ;;  %v807_v21 = vadd.f32 %v806_v10, %v805_v54  ;;  %v287_v24 = vsel %vm203_vm1, %v257_v16, 0.0  ;;  %v521_v25 = vadd.f32 %v520_v19, %v519_v9 }
 0x10e   :  { %v1148_v23 = vsel %vm203_vm1, %v1119_v12, 0.0  ;;  %1614 = vst.msk [vmem:[%s3337_s5 + $0xf8] sm:$0xff] %vm203_vm1, %v490_v8  ;;  %v760_v26 = vpop.f32.mrf.mxu2  ;;  %v235_v28 = vrot.slane %v234_v20, 4  ;;  %v288_v29 = vadd.f32 %v287_v24, %v286_v13  ;;  %v544_v30 = vmul.f32 %v490_v8, %v490_v8 }
 0x10f   :  { %v1048_v27 = vpop.f32.mrf.mxu3  ;;  %v761_v31 = vadd.f32 %v1954_v56, %v760_v26  ;;  %v861_v32 = vadd.f32 %v860_v17, %v859_v6  ;;  %v1095_v33 = vadd.f32 %v1094_v18, %v1093_v57  ;;  %v522_v22 = vrot.slane %v521_v25, 4 }
 0x110   :  { %v1049_v34 = vadd.f32 %v1954_v56, %v1048_v27  ;;  %v236_v35 = vadd.f32 %v235_v28, %v234_v20  ;;  %v289_v36 = vrot.slane %v288_v29, 4  ;;  %v574_v37 = vsel %vm203_vm1, %v544_v30, 0.0 }
 0x111   :  { %v778_v38 = vmax.f32 %v761_v31, 0.0  ;;  %v1149_v39 = vadd.f32 %v1148_v23, %v1147_v7  ;;  %v523_v40 = vadd.f32 %v522_v22, %v521_v25  ;;  %v575_v41 = vadd.f32 %v574_v37, %v573_v14 }
 0x112   :  { %v1066_v42 = vmax.f32 %v1049_v34, 0.0  ;;  %v237_v43 = vrot.slane %v236_v35, 2  ;;  %v290_v45 = vadd.f32 %v289_v36, %v288_v29 }
 0x113   :  { %v808_v46 = vsel %vm203_vm1, %v778_v38, 0.0  ;;  %v832_v47 = vmul.f32 %v778_v38, %v778_v38  ;;  %1710 = vst.msk [vmem:[%s3337_s5 + $0x178] sm:$0xff] %vm203_vm1, %v778_v38  ;;  %v524_v49 = vrot.slane %v523_v40, 2  ;;  %v576_v53 = vrot.slane %v575_v41, 4 }
 0x114   :  { %v809_v54 = vadd.f32 %v808_v46, %v807_v21  ;;  %v1096_v55 = vsel %vm203_vm1, %v1066_v42, 0.0  ;;  %1806 = vst.msk [vmem:[%s3337_s5 + $0x1f8] sm:$0xff] %vm203_vm1, %v1066_v42  ;;  %v238_v57 = vadd.f32 %v237_v43, %v236_v35  ;;  %v291_v58 = vrot.slane %v290_v45, 2 }
 0x115   :  { %v862_v59 = vsel %vm203_vm1, %v832_v47, 0.0  ;;  %v1097_v60 = vadd.f32 %v1096_v55, %v1095_v33  ;;  %v525_v61 = vadd.f32 %v524_v49, %v523_v40  ;;  %v577_v62 = vadd.f32 %v576_v53, %v575_v41 }
 0x116   :  { %v810_v44 = vrot.slane %v809_v54, 4  ;;  %v863_v51 = vadd.f32 %v862_v59, %v861_v32  ;;  %v239_v52 = vrot.slane %v238_v57, 1  ;;  %v292_v50 = vadd.f32 %v291_v58, %v290_v45  ;;  %v1194_v59 = vld [vmem:[%s3339_s4] sm:$0x1] }
 0x117   :  { %v1098_v63 = vrot.slane %v1097_v60, 4  ;;  %v1120_v56 = vmul.f32 %v1066_v42, %v1066_v42  ;;  %v526_v0 = vrot.slane %v525_v61, 1  ;;  %v578_v1 = vrot.slane %v577_v62, 2 }
 0x118   :  { %v811_v2 = vadd.f32 %v810_v44, %v809_v54  ;;  %v864_v3 = vrot.slane %v863_v51, 4  ;;  %v240_v4 = vadd.f32 %v239_v52, %v238_v57  ;;  %v293_v5 = vrot.slane %v292_v50, 1  ;;  %v1181_v54 = vld [vmem:[%s3338_s3] sm:$0x1]  ;;  %v1200_v52 = vld [vmem:[%s3337_s5 + $0x18] sm:$0xff] }
 0x119   :  { %v1099_v6 = vadd.f32 %v1098_v63, %v1097_v60  ;;  %v1150_v7 = vsel %vm203_vm1, %v1120_v56, 0.0  ;;  %v527_v48 = vadd.f32 %v526_v0, %v525_v61  ;;  %v579_v8 = vadd.f32 %v578_v1, %v577_v62  ;;  %v1197_v60 = vld [vmem:[%s3337_s5] sm:$0xff]  ;;  %v1198_v61 = vld [vmem:[%s3337_s5 + $0x8] sm:$0xff]  ;;  %v1199_v62 = vld [vmem:[%s3337_s5 + $0x10] sm:$0xff] }
 0x11a   :  { %v812_v9 = vrot.slane %v811_v2, 2  ;;  %v865_v10 = vadd.f32 %v864_v3, %v863_v51  ;;  %v294_v11 = vadd.f32 %v293_v5, %v292_v50  ;;  %v1151_v13 = vadd.f32 %v1150_v7, %v1149_v39  ;;  %v1201_v50 = vld [vmem:[%s3337_s5 + $0x20] sm:$0xff]  ;;  %v1202_v63 = vld [vmem:[%s3337_s5 + $0x28] sm:$0xff]  ;;  %v1203_v56 = vld [vmem:[%s3337_s5 + $0x30] sm:$0xff] }
 0x11b   :  { %v1100_v12 = vrot.slane %v1099_v6, 2  ;;  %v528_v14 = vadd.f32 %v527_v48, %v240_v4  ;;  %v580_v15 = vrot.slane %v579_v8, 1  ;;  %v1204_v0 = vld [vmem:[%s3337_s5 + $0x38] sm:$0xff]  ;;  %v1205_v1 = vld [vmem:[%s3337_s5 + $0x40] sm:$0xff]  ;;  %v1206_v7 = vld [vmem:[%s3337_s5 + $0x48] sm:$0xff] }
 0x11c   :  { %v813_v16 = vadd.f32 %v812_v9, %v811_v2  ;;  %v866_v17 = vrot.slane %v865_v10, 2  ;;  %v1152_v20 = vrot.slane %v1151_v13, 4  ;;  %v1207_v48 = vld [vmem:[%s3337_s5 + $0x50] sm:$0xff] }
 0x11d   :  { %v1101_v18 = vadd.f32 %v1100_v12, %v1099_v6  ;;  %v581_v19 = vadd.f32 %v580_v15, %v579_v8  ;;  %v1807_v6 = vld [vmem:[%s3337_s5 + $0x80] sm:$0xff]  ;;  %v1208_v8 = vld [vmem:[%s3337_s5 + $0x58] sm:$0xff]  ;;  %v1211_v15 = vld [vmem:[%s3337_s5 + $0x70] sm:$0xff] }
 0x11e   :  { %v814_v21 = vrot.slane %v813_v16, 1  ;;  %v867_v23 = vadd.f32 %v866_v17, %v865_v10  ;;  %v1153_v25 = vadd.f32 %v1152_v20, %v1151_v13  ;;  %v1209_v13 = vld [vmem:[%s3337_s5 + $0x60] sm:$0xff] }
 0x11f   :  { %v1102_v24 = vrot.slane %v1101_v18, 1  ;;  %v582_v26 = vadd.f32 %v581_v19, %v294_v11  ;;  %v1808_v19 = vld [vmem:[%s3337_s5 + $0x88] sm:$0xff] }
 0x120   :  { %v815_v27 = vadd.f32 %v814_v21, %v813_v16  ;;  %v868_v28 = vrot.slane %v867_v23, 1  ;;  %v1154_v29 = vrot.slane %v1153_v25, 2  ;;  %v1809_v21 = vld [vmem:[%s3337_s5 + $0x90] sm:$0xff] }
 0x121   :  { %v1103_v32 = vadd.f32 %v1102_v24, %v1101_v18 }
 0x122   :  { %v816_v30 = vadd.f32 %v815_v27, %v528_v14  ;;  %v869_v31 = vadd.f32 %v868_v28, %v867_v23  ;;  %v1155_v33 = vadd.f32 %v1154_v29, %v1153_v25  ;;  %v1210_v14 = vld [vmem:[%s3337_s5 + $0x68] sm:$0xff]  ;;  %v1212_v23 = vld [vmem:[%s3337_s5 + $0x78] sm:$0xff]  ;;  %v1811_v29 = vld [vmem:[%s3337_s5 + $0xa0] sm:$0xff] }
 0x123   :  { %v1810_v28 = vld [vmem:[%s3337_s5 + $0x98] sm:$0xff] }
 0x124   :  { %v870_v22 = vadd.f32 %v869_v31, %v582_v26  ;;  %v1104_v34 = vadd.f32 %v1103_v32, %v816_v30  ;;  %v1156_v35 = vrot.slane %v1155_v33, 1  ;;  %v1812_v30 = vld [vmem:[%s3337_s5 + $0xa8] sm:$0xff] }
 0x126   :  { %v1176_v36 = vmul.f32 0.001953125, %v1104_v34  ;;  %v1157_v37 = vadd.f32 %v1156_v35, %v1155_v33 }
 0x128   :  { %v1158_v38 = vadd.f32 %v1157_v37, %v870_v22  ;;  %v1178_v39 = vmul.f32 %v1176_v36, %v1176_v36 }
 0x12a   :  { %v1177_v40 = vmul.f32 0.001953125, %v1158_v38 }
 0x12c   :  { %v1179_v41 = vsub.f32 %v1177_v40, %v1178_v39 }
 0x12e   :  { %v1180_v42 = vmax.f32 %v1179_v41, 0.0 }
 0x130   :  { %v1182_v43 = vadd.f32 1e-05, %v1180_v42 }
 0x132   :  { %1952 = vrsqrt.f32 %v1182_v43  ;;  %vm1189_vm3 = vweird.f32 %v1182_v43 }
 0x138   :  { %v1953_v45 = vpop.eup %1952 }
 0x139   :  { %v1184_v46 = vmul.f32 %v1953_v45, %v1182_v43  ;;  %vm1190_vm2 = vweird.f32 %v1953_v45 }
 0x13a   :  { %vm1191_vm4 = vmor %vm1189_vm3, %vm1190_vm2 }
 0x13b   :  { %v1185_v47 = vmul.f32 %v1953_v45, %v1184_v46 }
 0x13d   :  { %v1186_v49 = vmul.f32 0.5, %v1185_v47  ;;  %v1813_v47 = vld [vmem:[%s3337_s5 + $0xb0] sm:$0xff] }
 0x13f   :  { %v1187_v53 = vsub.f32 1.5, %v1186_v49  ;;  %v1814_v49 = vld [vmem:[%s3337_s5 + $0xb8] sm:$0xff] }
 0x141   :  { %v1188_v55 = vmul.f32 %v1953_v45, %v1187_v53 }
 0x143   :  { %v1192_v57 = vsel %vm1191_vm4, %v1953_v45, %v1188_v55 }
 0x144   :  { %v1193_v58 = vmul.f32 %v1192_v57, %v1181_v54 }
 0x146   :  { %v1195_v44 = vmul.f32 %v1193_v58, %v1176_v36  ;;  %v2646_v51 = vperm.slane %v1193_v58, 0  ;;  %v1815_v58 = vld [vmem:[%s3337_s5 + $0xc0] sm:$0xff] }
 0x148   :  { %v1196_v2 = vsub.f32 %v1194_v59, %v1195_v44  ;;  %v1216_v3 = vmul.f32 %v2646_v51, %v1197_v60  ;;  %v1217_v4 = vmul.f32 %v2646_v51, %v1198_v61  ;;  %v1218_v5 = vmul.f32 %v2646_v51, %v1199_v62  ;;  %v1816_v59 = vld [vmem:[%s3337_s5 + $0xc8] sm:$0xff]  ;;  %v1817_v60 = vld [vmem:[%s3337_s5 + $0xd0] sm:$0xff] }
 0x149   :  { %v1219_v9 = vmul.f32 %v2646_v51, %v1200_v52  ;;  %v1220_v10 = vmul.f32 %v2646_v51, %v1201_v50  ;;  %v1221_v11 = vmul.f32 %v2646_v51, %v1202_v63  ;;  %v1222_v12 = vmul.f32 %v2646_v51, %v1203_v56  ;;  %v1818_v50 = vld [vmem:[%s3337_s5 + $0xd8] sm:$0xff]  ;;  %v1819_v63 = vld [vmem:[%s3337_s5 + $0xe0] sm:$0xff]  ;;  %v1820_v56 = vld [vmem:[%s3337_s5 + $0xe8] sm:$0xff] }
 0x14a   :  { %v1223_v16 = vmul.f32 %v2646_v51, %v1204_v0  ;;  %v1224_v17 = vmul.f32 %v2646_v51, %v1205_v1  ;;  %v1225_v18 = vmul.f32 %v2646_v51, %v1206_v7  ;;  %v1226_v20 = vmul.f32 %v2646_v51, %v1207_v48 }
 0x14b   :  { %v1227_v24 = vmul.f32 %v2646_v51, %v1208_v8  ;;  %v1228_v25 = vmul.f32 %v2646_v51, %v1209_v13  ;;  %v1229_v26 = vmul.f32 %v2646_v51, %v1210_v14  ;;  %v1230_v27 = vmul.f32 %v2646_v51, %v1211_v15 }
 0x14c   :  { %v1231_v31 = vmul.f32 %v2646_v51, %v1212_v23  ;;  %v2721_v32 = vperm.slane %v1196_v2, 0  ;;  %v1283_v33 = vmul.f32 %v1807_v6, %v2646_v51  ;;  %v1284_v22 = vmul.f32 %v1808_v19, %v2646_v51 }
 0x14d   :  { %v1285_v34 = vmul.f32 %v1809_v21, %v2646_v51  ;;  %v1286_v35 = vmul.f32 %v1810_v28, %v2646_v51  ;;  %v1287_v36 = vmul.f32 %v1811_v29, %v2646_v51  ;;  %v1288_v37 = vmul.f32 %v1812_v30, %v2646_v51 }
 0x14e   :  { %v1235_v38 = vadd.f32 %v2721_v32, %v1216_v3  ;;  %v1236_v39 = vadd.f32 %v2721_v32, %v1217_v4  ;;  %v1237_v40 = vadd.f32 %v2721_v32, %v1218_v5  ;;  %v1238_v41 = vadd.f32 %v2721_v32, %v1219_v9  ;;  %v1821_v4 = vld [vmem:[%s3337_s5 + $0xf0] sm:$0xff]  ;;  %v1822_v5 = vld [vmem:[%s3337_s5 + $0xf8] sm:$0xff] }
 0x14f   :  { %v1239_v42 = vadd.f32 %v2721_v32, %v1220_v10  ;;  %v1240_v43 = vadd.f32 %v2721_v32, %v1221_v11  ;;  %v1241_v45 = vadd.f32 %v2721_v32, %v1222_v12  ;;  %v1242_v46 = vadd.f32 %v2721_v32, %v1223_v16 }
 0x150   :  { %v1243_v53 = vadd.f32 %v2721_v32, %v1224_v17  ;;  %v2745_v54 = vadd.f32 %v2721_v32, %v1225_v18  ;;  %v2748_v55 = vadd.f32 %v2721_v32, %v1226_v20  ;;  %v2751_v57 = vadd.f32 %v2721_v32, %v1227_v24  ;;  %1251 = vst.msk [vmem:[%s3337_s5] sm:$0xff] %vm203_vm1, %v1235_v38  ;;  %v1839_v17 = vld [vmem:[%s3337_s5 + $0x100] sm:$0xff]  ;;  %v1840_v18 = vld [vmem:[%s3337_s5 + $0x108] sm:$0xff]  ;;  %v1841_v24 = vld [vmem:[%s3337_s5 + $0x110] sm:$0xff] }
 0x151   :  { %v2767_v61 = vadd.f32 %v2721_v32, %v1228_v25  ;;  %v2770_v62 = vadd.f32 %v2721_v32, %v1229_v26  ;;  %v2773_v44 = vadd.f32 %v2721_v32, %v1230_v27  ;;  %v2776_v52 = vadd.f32 %v2721_v32, %v1231_v31  ;;  %1252 = vst.msk [vmem:[%s3337_s5 + $0x8] sm:$0xff] %vm203_vm1, %v1236_v39  ;;  %v1842_v25 = vld [vmem:[%s3337_s5 + $0x118] sm:$0xff]  ;;  %v1843_v26 = vld [vmem:[%s3337_s5 + $0x120] sm:$0xff]  ;;  %v1844_v31 = vld [vmem:[%s3337_s5 + $0x128] sm:$0xff] }
 0x152   :  { %1253 = vst.msk [vmem:[%s3337_s5 + $0x10] sm:$0xff] %vm203_vm1, %v1237_v40  ;;  %v1289_v0 = vmul.f32 %v1813_v47, %v2646_v51  ;;  %v1290_v1 = vmul.f32 %v1814_v49, %v2646_v51  ;;  %v1291_v2 = vmul.f32 %v1815_v58, %v2646_v51  ;;  %v1292_v3 = vmul.f32 %v1816_v59, %v2646_v51  ;;  %v1847_v38 = vld [vmem:[%s3337_s5 + $0x140] sm:$0xff]  ;;  %v1848_v39 = vld [vmem:[%s3337_s5 + $0x148] sm:$0xff]  ;;  %v1849_v40 = vld [vmem:[%s3337_s5 + $0x150] sm:$0xff] }
 0x153   :  { %1254 = vst.msk [vmem:[%s3337_s5 + $0x18] sm:$0xff] %vm203_vm1, %v1238_v41  ;;  %v1293_v6 = vmul.f32 %v1817_v60, %v2646_v51  ;;  %v1294_v7 = vmul.f32 %v1818_v50, %v2646_v51  ;;  %v1295_v48 = vmul.f32 %v1819_v63, %v2646_v51  ;;  %v1296_v8 = vmul.f32 %v1820_v56, %v2646_v51  ;;  %v1851_v47 = vld [vmem:[%s3337_s5 + $0x160] sm:$0xff]  ;;  %v1852_v49 = vld [vmem:[%s3337_s5 + $0x168] sm:$0xff]  ;;  %v1853_v60 = vld [vmem:[%s3337_s5 + $0x170] sm:$0xff] }
 0x154   :  { %1255 = vst.msk [vmem:[%s3337_s5 + $0x20] sm:$0xff] %vm203_vm1, %v1239_v42  ;;  %v1297_v9 = vmul.f32 %v1821_v4, %v2646_v51  ;;  %v1298_v10 = vmul.f32 %v1822_v5, %v2646_v51  ;;  %v2820_v11 = vadd.f32 %v1283_v33, %v2721_v32  ;;  %v2823_v12 = vadd.f32 %v1284_v22, %v2721_v32  ;;  %v1845_v33 = vld [vmem:[%s3337_s5 + $0x130] sm:$0xff]  ;;  %v1846_v22 = vld [vmem:[%s3337_s5 + $0x138] sm:$0xff] }
 0x155   :  { %1256 = vst.msk [vmem:[%s3337_s5 + $0x28] sm:$0xff] %vm203_vm1, %v1240_v43  ;;  %v2830_v13 = vadd.f32 %v1285_v34, %v2721_v32  ;;  %v2833_v14 = vadd.f32 %v1286_v35, %v2721_v32  ;;  %v2836_v15 = vadd.f32 %v1287_v36, %v2721_v32  ;;  %v2839_v16 = vadd.f32 %v1288_v37, %v2721_v32  ;;  %v1854_v50 = vld [vmem:[%s3337_s5 + $0x178] sm:$0xff] }
 0x156   :  { %1257 = vst.msk [vmem:[%s3337_s5 + $0x30] sm:$0xff] %vm203_vm1, %v1241_v45  ;;  %v2852_v20 = vadd.f32 %v1289_v0, %v2721_v32  ;;  %v2855_v19 = vadd.f32 %v1290_v1, %v2721_v32  ;;  %v2858_v21 = vadd.f32 %v1291_v2, %v2721_v32  ;;  %v2861_v23 = vadd.f32 %v1292_v3, %v2721_v32 }
 0x157   :  { %1258 = vst.msk [vmem:[%s3337_s5 + $0x38] sm:$0xff] %vm203_vm1, %v1242_v46  ;;  %v2877_v27 = vadd.f32 %v1293_v6, %v2721_v32  ;;  %v2880_v28 = vadd.f32 %v1294_v7, %v2721_v32  ;;  %v2883_v29 = vadd.f32 %v1295_v48, %v2721_v32  ;;  %v2886_v30 = vadd.f32 %v1296_v8, %v2721_v32  ;;  %v1850_v46 = vld [vmem:[%s3337_s5 + $0x158] sm:$0xff]  ;;  %v1871_v7 = vld [vmem:[%s3337_s5 + $0x180] sm:$0xff] }
 0x158   :  { %1259 = vst.msk [vmem:[%s3337_s5 + $0x40] sm:$0xff] %vm203_vm1, %v1243_v53  ;;  %v2902_v34 = vadd.f32 %v1297_v9, %v2721_v32  ;;  %v2905_v35 = vadd.f32 %v1298_v10, %v2721_v32  ;;  %v1347_v36 = vmul.f32 %v1839_v17, %v2646_v51  ;;  %v1348_v37 = vmul.f32 %v1840_v18, %v2646_v51  ;;  %v1873_v17 = vld [vmem:[%s3337_s5 + $0x190] sm:$0xff]  ;;  %v1875_v18 = vld [vmem:[%s3337_s5 + $0x1a0] sm:$0xff] }
 0x159   :  { %1260 = vst.msk [vmem:[%s3337_s5 + $0x48] sm:$0xff] %vm203_vm1, %v2745_v54  ;;  %v1349_v41 = vmul.f32 %v1841_v24, %v2646_v51  ;;  %v1350_v42 = vmul.f32 %v1842_v25, %v2646_v51  ;;  %v1351_v43 = vmul.f32 %v1843_v26, %v2646_v51  ;;  %v1352_v45 = vmul.f32 %v1844_v31, %v2646_v51 }
 0x15a   :  { %1261 = vst.msk [vmem:[%s3337_s5 + $0x50] sm:$0xff] %vm203_vm1, %v2748_v55  ;;  %v1353_v53 = vmul.f32 %v1845_v33, %v2646_v51  ;;  %v1354_v54 = vmul.f32 %v1846_v22, %v2646_v51  ;;  %v1355_v58 = vmul.f32 %v1847_v38, %v2646_v51  ;;  %v1356_v59 = vmul.f32 %v1848_v39, %v2646_v51  ;;  %v1876_v33 = vld [vmem:[%s3337_s5 + $0x1a8] sm:$0xff]  ;;  %v1878_v22 = vld [vmem:[%s3337_s5 + $0x1b8] sm:$0xff] }
 0x15b   :  { %1262 = vst.msk [vmem:[%s3337_s5 + $0x58] sm:$0xff] %vm203_vm1, %v2751_v57  ;;  %v1357_v55 = vmul.f32 %v1849_v40, %v2646_v51  ;;  %v1358_v63 = vmul.f32 %v1850_v46, %v2646_v51  ;;  %v1359_v56 = vmul.f32 %v1851_v47, %v2646_v51  ;;  %v1360_v0 = vmul.f32 %v1852_v49, %v2646_v51  ;;  %v1879_v40 = vld [vmem:[%s3337_s5 + $0x1c0] sm:$0xff]  ;;  %v1882_v47 = vld [vmem:[%s3337_s5 + $0x1d8] sm:$0xff] }
 0x15c   :  { %1263 = vst.msk [vmem:[%s3337_s5 + $0x60] sm:$0xff] %vm203_vm1, %v2767_v61  ;;  %v1361_v1 = vmul.f32 %v1853_v60, %v2646_v51  ;;  %v1362_v2 = vmul.f32 %v1854_v50, %v2646_v51  ;;  %v2968_v57 = vadd.f32 %v1347_v36, %v2721_v32  ;;  %v2971_v3 = vadd.f32 %v1348_v37, %v2721_v32  ;;  %v1883_v49 = vld [vmem:[%s3337_s5 + $0x1e0] sm:$0xff]  ;;  %v1885_v60 = vld [vmem:[%s3337_s5 + $0x1f0] sm:$0xff] }
 0x15d   :  { %1264 = vst.msk [vmem:[%s3337_s5 + $0x68] sm:$0xff] %vm203_vm1, %v2770_v62  ;;  %v2979_v4 = vadd.f32 %v1349_v41, %v2721_v32  ;;  %v2982_v61 = vadd.f32 %v1350_v42, %v2721_v32  ;;  %v2985_v5 = vadd.f32 %v1351_v43, %v2721_v32  ;;  %v2988_v6 = vadd.f32 %v1352_v45, %v2721_v32  ;;  %v1872_v62 = vld [vmem:[%s3337_s5 + $0x188] sm:$0xff] }
 0x15e   :  { %1265 = vst.msk [vmem:[%s3337_s5 + $0x70] sm:$0xff] %vm203_vm1, %v2773_v44  ;;  %v3002_v48 = vadd.f32 %v1353_v53, %v2721_v32  ;;  %v3005_v8 = vadd.f32 %v1354_v54, %v2721_v32  ;;  %v3008_v9 = vadd.f32 %v1355_v58, %v2721_v32  ;;  %v3011_v10 = vadd.f32 %v1356_v59, %v2721_v32  ;;  %v1874_v44 = vld [vmem:[%s3337_s5 + $0x198] sm:$0xff]  ;;  %v1880_v41 = vld [vmem:[%s3337_s5 + $0x1c8] sm:$0xff] }
 0x15f   :  { %1266 = vst.msk [vmem:[%s3337_s5 + $0x78] sm:$0xff] %vm203_vm1, %v2776_v52  ;;  %v3028_v24 = vadd.f32 %v1357_v55, %v2721_v32  ;;  %v3031_v25 = vadd.f32 %v1358_v63, %v2721_v32  ;;  %v3034_v26 = vadd.f32 %v1359_v56, %v2721_v32  ;;  %v3037_v31 = vadd.f32 %v1360_v0, %v2721_v32  ;;  %v1877_v52 = vld [vmem:[%s3337_s5 + $0x1b0] sm:$0xff] }
 0x160   :  { %1823 = vst.msk [vmem:[%s3337_s5 + $0x80] sm:$0xff] %vm203_vm1, %v2820_v11  ;;  %v3054_v36 = vadd.f32 %v1361_v1, %v2721_v32  ;;  %v3057_v37 = vadd.f32 %v1362_v2, %v2721_v32  ;;  %v1411_v38 = vmul.f32 %v1871_v7, %v2646_v51  ;;  %v1412_v39 = vmul.f32 %v1872_v62, %v2646_v51  ;;  %v1881_v11 = vld [vmem:[%s3337_s5 + $0x1d0] sm:$0xff] }
 0x161   :  { %1824 = vst.msk [vmem:[%s3337_s5 + $0x88] sm:$0xff] %vm203_vm1, %v2823_v12  ;;  %v1413_v42 = vmul.f32 %v1873_v17, %v2646_v51  ;;  %v1414_v43 = vmul.f32 %v1874_v44, %v2646_v51  ;;  %v1415_v45 = vmul.f32 %v1875_v18, %v2646_v51  ;;  %v1416_v46 = vmul.f32 %v1876_v33, %v2646_v51  ;;  %v1884_v12 = vld [vmem:[%s3337_s5 + $0x1e8] sm:$0xff] }
 0x162   :  { %1825 = vst.msk [vmem:[%s3337_s5 + $0x90] sm:$0xff] %vm203_vm1, %v2830_v13  ;;  %v1417_v53 = vmul.f32 %v1877_v52, %v2646_v51  ;;  %v1418_v54 = vmul.f32 %v1878_v22, %v2646_v51  ;;  %v1419_v58 = vmul.f32 %v1879_v40, %v2646_v51  ;;  %v1420_v59 = vmul.f32 %v1880_v41, %v2646_v51  ;;  %v1886_v13 = vld [vmem:[%s3337_s5 + $0x1f8] sm:$0xff] }
 0x163   :  { %1826 = vst.msk [vmem:[%s3337_s5 + $0x98] sm:$0xff] %vm203_vm1, %v2833_v14  ;;  %v1421_v50 = vmul.f32 %v1881_v11, %v2646_v51  ;;  %v1422_v55 = vmul.f32 %v1882_v47, %v2646_v51  ;;  %v1423_v63 = vmul.f32 %v1883_v49, %v2646_v51  ;;  %v1424_v56 = vmul.f32 %v1884_v12, %v2646_v51 }
 0x164   :  { %1827 = vst.msk [vmem:[%s3337_s5 + $0xa0] sm:$0xff] %vm203_vm1, %v2836_v15  ;;  %v1425_v14 = vmul.f32 %v1885_v60, %v2646_v51  ;;  %v1426_v0 = vmul.f32 %v1886_v13, %v2646_v51  ;;  %v1427_v1 = vadd.f32 %v1411_v38, %v2721_v32  ;;  %v1428_v2 = vadd.f32 %v1412_v39, %v2721_v32 }
 0x165   :  { %1828 = vst.msk [vmem:[%s3337_s5 + $0xa8] sm:$0xff] %vm203_vm1, %v2839_v16  ;;  %v1429_v7 = vadd.f32 %v1413_v42, %v2721_v32  ;;  %v1430_v62 = vadd.f32 %v1414_v43, %v2721_v32  ;;  %v1431_v15 = vadd.f32 %v1415_v45, %v2721_v32  ;;  %v1432_v17 = vadd.f32 %v1416_v46, %v2721_v32 }
 0x166   :  { %1829 = vst.msk [vmem:[%s3337_s5 + $0xb0] sm:$0xff] %vm203_vm1, %v2852_v20  ;;  %v1433_v51 = vadd.f32 %v1417_v53, %v2721_v32  ;;  %v1434_v44 = vadd.f32 %v1418_v54, %v2721_v32  ;;  %v1435_v16 = vadd.f32 %v1419_v58, %v2721_v32  ;;  %v1436_v18 = vadd.f32 %v1420_v59, %v2721_v32 }
 0x167   :  { %1830 = vst.msk [vmem:[%s3337_s5 + $0xb8] sm:$0xff] %vm203_vm1, %v2855_v19  ;;  %v1437_v33 = vadd.f32 %v1421_v50, %v2721_v32  ;;  %v1438_v52 = vadd.f32 %v1422_v55, %v2721_v32  ;;  %v1439_v20 = vadd.f32 %v1423_v63, %v2721_v32  ;;  %v1440_v22 = vadd.f32 %v1424_v56, %v2721_v32 }
 0x168   :  { %1831 = vst.msk [vmem:[%s3337_s5 + $0xc0] sm:$0xff] %vm203_vm1, %v2858_v21  ;;  %v1441_v38 = vadd.f32 %v1425_v14, %v2721_v32  ;;  %v1442_v39 = vadd.f32 %v1426_v0, %v2721_v32 }
 0x169   :  { %1832 = vst.msk [vmem:[%s3337_s5 + $0xc8] sm:$0xff] %vm203_vm1, %v2861_v23 }
 0x16a   :  { %1833 = vst.msk [vmem:[%s3337_s5 + $0xd0] sm:$0xff] %vm203_vm1, %v2877_v27 }
 0x16b   :  { %1834 = vst.msk [vmem:[%s3337_s5 + $0xd8] sm:$0xff] %vm203_vm1, %v2880_v28 }
 0x16c   :  { %1835 = vst.msk [vmem:[%s3337_s5 + $0xe0] sm:$0xff] %vm203_vm1, %v2883_v29 }
 0x16d   :  { %1836 = vst.msk [vmem:[%s3337_s5 + $0xe8] sm:$0xff] %vm203_vm1, %v2886_v30 }
 0x16e   :  { %1837 = vst.msk [vmem:[%s3337_s5 + $0xf0] sm:$0xff] %vm203_vm1, %v2902_v34 }
 0x16f   :  { %1838 = vst.msk [vmem:[%s3337_s5 + $0xf8] sm:$0xff] %vm203_vm1, %v2905_v35 }
 0x170   :  { %1855 = vst.msk [vmem:[%s3337_s5 + $0x100] sm:$0xff] %vm203_vm1, %v2968_v57 }
 0x171   :  { %1856 = vst.msk [vmem:[%s3337_s5 + $0x108] sm:$0xff] %vm203_vm1, %v2971_v3 }
 0x172   :  { %1857 = vst.msk [vmem:[%s3337_s5 + $0x110] sm:$0xff] %vm203_vm1, %v2979_v4 }
 0x173   :  { %1858 = vst.msk [vmem:[%s3337_s5 + $0x118] sm:$0xff] %vm203_vm1, %v2982_v61 }
 0x174   :  { %1859 = vst.msk [vmem:[%s3337_s5 + $0x120] sm:$0xff] %vm203_vm1, %v2985_v5 }
 0x175   :  { %1860 = vst.msk [vmem:[%s3337_s5 + $0x128] sm:$0xff] %vm203_vm1, %v2988_v6 }
 0x176   :  { %1861 = vst.msk [vmem:[%s3337_s5 + $0x130] sm:$0xff] %vm203_vm1, %v3002_v48 }
 0x177   :  { %1862 = vst.msk [vmem:[%s3337_s5 + $0x138] sm:$0xff] %vm203_vm1, %v3005_v8 }
 0x178   :  { %1863 = vst.msk [vmem:[%s3337_s5 + $0x140] sm:$0xff] %vm203_vm1, %v3008_v9 }
 0x179   :  { %1864 = vst.msk [vmem:[%s3337_s5 + $0x148] sm:$0xff] %vm203_vm1, %v3011_v10 }
 0x17a   :  { %1865 = vst.msk [vmem:[%s3337_s5 + $0x150] sm:$0xff] %vm203_vm1, %v3028_v24 }
 0x17b   :  { %1866 = vst.msk [vmem:[%s3337_s5 + $0x158] sm:$0xff] %vm203_vm1, %v3031_v25 }
 0x17c   :  { %1867 = vst.msk [vmem:[%s3337_s5 + $0x160] sm:$0xff] %vm203_vm1, %v3034_v26 }
 0x17d   :  { %1868 = vst.msk [vmem:[%s3337_s5 + $0x168] sm:$0xff] %vm203_vm1, %v3037_v31 }
 0x17e   :  { %1869 = vst.msk [vmem:[%s3337_s5 + $0x170] sm:$0xff] %vm203_vm1, %v3054_v36 }
 0x17f   :  { %1870 = vst.msk [vmem:[%s3337_s5 + $0x178] sm:$0xff] %vm203_vm1, %v3057_v37 }
 0x180   :  { %1887 = vst.msk [vmem:[%s3337_s5 + $0x180] sm:$0xff] %vm203_vm1, %v1427_v1 }
 0x181   :  { %1888 = vst.msk [vmem:[%s3337_s5 + $0x188] sm:$0xff] %vm203_vm1, %v1428_v2 }
 0x182   :  { %1889 = vst.msk [vmem:[%s3337_s5 + $0x190] sm:$0xff] %vm203_vm1, %v1429_v7 }
 0x183   :  { %1890 = vst.msk [vmem:[%s3337_s5 + $0x198] sm:$0xff] %vm203_vm1, %v1430_v62 }
 0x184   :  { %1891 = vst.msk [vmem:[%s3337_s5 + $0x1a0] sm:$0xff] %vm203_vm1, %v1431_v15 }
 0x185   :  { %1892 = vst.msk [vmem:[%s3337_s5 + $0x1a8] sm:$0xff] %vm203_vm1, %v1432_v17 }
 0x186   :  { %1893 = vst.msk [vmem:[%s3337_s5 + $0x1b0] sm:$0xff] %vm203_vm1, %v1433_v51 }
 0x187   :  { %1894 = vst.msk [vmem:[%s3337_s5 + $0x1b8] sm:$0xff] %vm203_vm1, %v1434_v44 }
 0x188   :  { %1895 = vst.msk [vmem:[%s3337_s5 + $0x1c0] sm:$0xff] %vm203_vm1, %v1435_v16 }
 0x189   :  { %1896 = vst.msk [vmem:[%s3337_s5 + $0x1c8] sm:$0xff] %vm203_vm1, %v1436_v18 }
 0x18a   :  { %1897 = vst.msk [vmem:[%s3337_s5 + $0x1d0] sm:$0xff] %vm203_vm1, %v1437_v33 }
 0x18b   :  { %1898 = vst.msk [vmem:[%s3337_s5 + $0x1d8] sm:$0xff] %vm203_vm1, %v1438_v52 }
 0x18c   :  { %1899 = vst.msk [vmem:[%s3337_s5 + $0x1e0] sm:$0xff] %vm203_vm1, %v1439_v20 }
 0x18d   :  { %1900 = vst.msk [vmem:[%s3337_s5 + $0x1e8] sm:$0xff] %vm203_vm1, %v1440_v22 }
 0x18e   :  { %1901 = vst.msk [vmem:[%s3337_s5 + $0x1f0] sm:$0xff] %vm203_vm1, %v1441_v38 }
 0x18f   :  { %1902 = vst.msk [vmem:[%s3337_s5 + $0x1f8] sm:$0xff] %vm203_vm1, %v1442_v39 }

// kernel: generator_forward.9
= control target key start
LH: loop header
LB: loop body
LE: loop exit
PB: predicated region body
PF: predicated region fallthrough
CT: control target
= control target key end

     0   :  { %vm265_vm0 = vcmask 261120   ;;  %vm851_vm1 = vcmask 23552   ;;  %s7706_s1 = inlined_call_operand.vmem [shape: bf16[4,32,3], index: 1, kind: input, shape index: {}]   ;;  %s7707_s3 = inlined_call_operand.vmem [shape: f32[1,3], index: 3, kind: input, shape index: {}]   ;;  %s7708_s4 = inlined_call_operand.vmem [shape: f32[1,3], index: 4, kind: input, shape index: {}]   ;;  %s7709_s0 = inlined_call_operand.vmem [shape: bf16[4,512,32], index: 0, kind: input, shape index: {}]   ;;  %s7710_s2 = inlined_call_operand.vmem [shape: f32[1,3], index: 2, kind: input, shape index: {}]   ;;  %s7711_s5 = inlined_call_operand.vmem [shape: f32[4,512,3], index: 5, kind: output, shape index: {}]  }
   0x1   :  { %v4697_v0 = vld [vmem:[%s7706_s1 + $0x8] sm:$0xff]  ;;  %v4731_v1 = vld [vmem:[%s7706_s1 + $0x18] sm:$0xff]  ;;  %v4696_v4 = vld [vmem:[%s7706_s1] sm:$0xff] }
   0x2   :  { %v4765_v2 = vld [vmem:[%s7706_s1 + $0x28] sm:$0xff]  ;;  %v4799_v3 = vld [vmem:[%s7706_s1 + $0x38] sm:$0xff]  ;;  %368 = vmatpush.bf16.msra.mxu0 %v4697_v0  ;;  %1260 = vmatpush.bf16.msra.mxu1 %v4731_v1  ;;  %v4730_v5 = vld [vmem:[%s7706_s1 + $0x10] sm:$0xff] }
   0x3   :  { %2152 = vmatpush.bf16.msra.mxu2 %v4765_v2  ;;  %3044 = vmatpush.bf16.msra.mxu3 %v4799_v3  ;;  %v4764_v6 = vld [vmem:[%s7706_s1 + $0x20] sm:$0xff]  ;;  %v4798_v7 = vld [vmem:[%s7706_s1 + $0x30] sm:$0xff]  ;;  %v4665_v12 = vld [vmem:[%s7709_s0 + $0x8] sm:$0xff] }
   0x4   :  { %v4664_v8 = vld [vmem:[%s7709_s0] sm:$0xff]  ;;  %v4699_v13 = vld [vmem:[%s7709_s0 + $0x108] sm:$0xff]  ;;  %v4666_v16 = vld [vmem:[%s7709_s0 + $0x10] sm:$0xff] }
   0x5   :  { %v4698_v9 = vld [vmem:[%s7709_s0 + $0x100] sm:$0xff]  ;;  %v4733_v14 = vld [vmem:[%s7709_s0 + $0x208] sm:$0xff]  ;;  %v4700_v17 = vld [vmem:[%s7709_s0 + $0x110] sm:$0xff] }
   0x6   :  { %369 = vmatpush.bf16.msra.mxu0 %v4696_v4  ;;  %1261 = vmatpush.bf16.msra.mxu1 %v4730_v5  ;;  %v4732_v10 = vld [vmem:[%s7709_s0 + $0x200] sm:$0xff]  ;;  %v4767_v15 = vld [vmem:[%s7709_s0 + $0x308] sm:$0xff]  ;;  %v4734_v18 = vld [vmem:[%s7709_s0 + $0x210] sm:$0xff] }
   0x7   :  { %v4766_v11 = vld [vmem:[%s7709_s0 + $0x300] sm:$0xff]  ;;  %2153 = vmatpush.bf16.msra.mxu2 %v4764_v6  ;;  %3045 = vmatpush.bf16.msra.mxu3 %v4798_v7  ;;  %v4768_v19 = vld [vmem:[%s7709_s0 + $0x310] sm:$0xff]  ;;  %v4667_v20 = vld [vmem:[%s7709_s0 + $0x18] sm:$0xff] }
   0x8   :  { %v4701_v21 = vld [vmem:[%s7709_s0 + $0x118] sm:$0xff]  ;;  %v4668_v24 = vld [vmem:[%s7709_s0 + $0x20] sm:$0xff]  ;;  %v4669_v28 = vld [vmem:[%s7709_s0 + $0x28] sm:$0xff] }
   0x9   :  { %3732 = vmatmul.msk.bf16.vlgmr.msra.gmra.mxu0 %vm265_vm0, %v4664_v8  ;;  %3968 = vmatmul.msk.bf16.vlgmr.msra.gmra.mxu1 %vm265_vm0, %v4698_v9  ;;  %v4735_v22 = vld [vmem:[%s7709_s0 + $0x218] sm:$0xff]  ;;  %v4702_v25 = vld [vmem:[%s7709_s0 + $0x120] sm:$0xff]  ;;  %v4703_v29 = vld [vmem:[%s7709_s0 + $0x128] sm:$0xff] }
   0xa   :  { %4268 = vmatmul.msk.bf16.vlgmr.msra.gmra.mxu2 %vm265_vm0, %v4732_v10  ;;  %4568 = vmatmul.msk.bf16.vlgmr.msra.gmra.mxu3 %vm265_vm0, %v4766_v11  ;;  %v4769_v23 = vld [vmem:[%s7709_s0 + $0x318] sm:$0xff]  ;;  %v4736_v26 = vld [vmem:[%s7709_s0 + $0x220] sm:$0xff]  ;;  %v4737_v30 = vld [vmem:[%s7709_s0 + $0x228] sm:$0xff] }
   0xb   :  { %v4770_v27 = vld [vmem:[%s7709_s0 + $0x320] sm:$0xff]  ;;  %v4771_v31 = vld [vmem:[%s7709_s0 + $0x328] sm:$0xff]  ;;  %v4670_v32 = vld [vmem:[%s7709_s0 + $0x30] sm:$0xff] }
   0xc   :  { %v4704_v33 = vld [vmem:[%s7709_s0 + $0x130] sm:$0xff]  ;;  %v4671_v36 = vld [vmem:[%s7709_s0 + $0x38] sm:$0xff]  ;;  %v6015_v40 = vld [vmem:[%s7710_s2] ss:$0 sm:$0xff] }
   0xd   :  { %v4738_v34 = vld [vmem:[%s7709_s0 + $0x230] sm:$0xff]  ;;  %v4705_v37 = vld [vmem:[%s7709_s0 + $0x138] sm:$0xff]  ;;  %v4672_v41 = vld [vmem:[%s7709_s0 + $0x40] sm:$0xff] }
   0xe   :  { %v4772_v35 = vld [vmem:[%s7709_s0 + $0x330] sm:$0xff]  ;;  %v4739_v38 = vld [vmem:[%s7709_s0 + $0x238] sm:$0xff]  ;;  %v4706_v42 = vld [vmem:[%s7709_s0 + $0x140] sm:$0xff] }
   0xf   :  { %v4773_v39 = vld [vmem:[%s7709_s0 + $0x338] sm:$0xff]  ;;  %v4740_v45 = vld [vmem:[%s7709_s0 + $0x240] sm:$0xff]  ;;  %v4673_v11 = vld [vmem:[%s7709_s0 + $0x48] sm:$0xff] }
  0x10   :  { %v4774_v46 = vld [vmem:[%s7709_s0 + $0x340] sm:$0xff] }
  0x19   :  { %3733 = vmatmul.msk.bf16.gmra.mxu0 %vm265_vm0, %v4665_v12  ;;  %3969 = vmatmul.msk.bf16.gmra.mxu1 %vm265_vm0, %v4699_v13  ;;  %v4707_v12 = vld [vmem:[%s7709_s0 + $0x148] sm:$0xff] }
  0x1a   :  { %4269 = vmatmul.msk.bf16.gmra.mxu2 %vm265_vm0, %v4733_v14  ;;  %4569 = vmatmul.msk.bf16.gmra.mxu3 %vm265_vm0, %v4767_v15 }
  0x29   :  { %3734 = vmatmul.msk.bf16.gmra.mxu0 %vm265_vm0, %v4666_v16  ;;  %3970 = vmatmul.msk.bf16.gmra.mxu1 %vm265_vm0, %v4700_v17  ;;  %v4741_v17 = vld [vmem:[%s7709_s0 + $0x248] sm:$0xff] }
  0x2a   :  { %4270 = vmatmul.msk.bf16.gmra.mxu2 %vm265_vm0, %v4734_v18  ;;  %4570 = vmatmul.msk.bf16.gmra.mxu3 %vm265_vm0, %v4768_v19  ;;  %v4775_v18 = vld [vmem:[%s7709_s0 + $0x348] sm:$0xff] }
  0x39   :  { %3735 = vmatmul.msk.bf16.gmra.mxu0 %vm265_vm0, %v4667_v20  ;;  %3971 = vmatmul.msk.bf16.gmra.mxu1 %vm265_vm0, %v4701_v21 }
  0x3a   :  { %4271 = vmatmul.msk.bf16.gmra.mxu2 %vm265_vm0, %v4735_v22  ;;  %4571 = vmatmul.msk.bf16.gmra.mxu3 %vm265_vm0, %v4769_v23 }
  0x49   :  { %3736 = vmatmul.msk.bf16.gmra.mxu0 %vm265_vm0, %v4668_v24  ;;  %3972 = vmatmul.msk.bf16.gmra.mxu1 %vm265_vm0, %v4702_v25 }
  0x4a   :  { %4272 = vmatmul.msk.bf16.gmra.mxu2 %vm265_vm0, %v4736_v26  ;;  %4572 = vmatmul.msk.bf16.gmra.mxu3 %vm265_vm0, %v4770_v27 }
  0x59   :  { %3737 = vmatmul.msk.bf16.gmra.mxu0 %vm265_vm0, %v4669_v28  ;;  %3973 = vmatmul.msk.bf16.gmra.mxu1 %vm265_vm0, %v4703_v29 }
  0x5a   :  { %4273 = vmatmul.msk.bf16.gmra.mxu2 %vm265_vm0, %v4737_v30  ;;  %4573 = vmatmul.msk.bf16.gmra.mxu3 %vm265_vm0, %v4771_v31 }
  0x69   :  { %3738 = vmatmul.msk.bf16.gmra.mxu0 %vm265_vm0, %v4670_v32  ;;  %3974 = vmatmul.msk.bf16.gmra.mxu1 %vm265_vm0, %v4704_v33 }
  0x6a   :  { %4274 = vmatmul.msk.bf16.gmra.mxu2 %vm265_vm0, %v4738_v34  ;;  %4574 = vmatmul.msk.bf16.gmra.mxu3 %vm265_vm0, %v4772_v35 }
  0x79   :  { %3739 = vmatmul.msk.bf16.gmra.mxu0 %vm265_vm0, %v4671_v36  ;;  %3975 = vmatmul.msk.bf16.gmra.mxu1 %vm265_vm0, %v4705_v37 }
  0x7a   :  { %4275 = vmatmul.msk.bf16.gmra.mxu2 %vm265_vm0, %v4739_v38  ;;  %4575 = vmatmul.msk.bf16.gmra.mxu3 %vm265_vm0, %v4773_v39 }
  0x86   :  { %v371_v43 = vpop.f32.mrf.mxu0  ;;  %v1263_v44 = vpop.f32.mrf.mxu1 }
  0x87   :  { %v372_v47 = vadd.f32 %v6015_v40, %v371_v43  ;;  %v1264_v48 = vadd.f32 %v6015_v40, %v1263_v44 }
  0x89   :  { %v531_v49 = vsub.f32 0.0, %v372_v47  ;;  %v1423_v50 = vsub.f32 0.0, %v1264_v48  ;;  %3740 = vmatmul.msk.bf16.gmra.mxu0 %vm265_vm0, %v4672_v41  ;;  %3976 = vmatmul.msk.bf16.gmra.mxu1 %vm265_vm0, %v4706_v42 }
  0x8a   :  { %4276 = vmatmul.msk.bf16.gmra.mxu2 %vm265_vm0, %v4740_v45  ;;  %4576 = vmatmul.msk.bf16.gmra.mxu3 %vm265_vm0, %v4774_v46 }
  0x8b   :  { %v595_v51 = vmul.f32 1.442695, %v531_v49  ;;  %v1487_v52 = vmul.f32 1.442695, %v1423_v50 }
  0x8d   :  { %4801 = vpow2.f32 %v595_v51  ;;  %v2155_v53 = vpop.f32.mrf.mxu2  ;;  %v3047_v54 = vpop.f32.mrf.mxu3 }
  0x8e   :  { %4803 = vpow2.f32 %v1487_v52  ;;  %v2156_v55 = vadd.f32 %v6015_v40, %v2155_v53  ;;  %v3048_v56 = vadd.f32 %v6015_v40, %v3047_v54  ;;  %v373_v57 = vpop.f32.mrf.mxu0  ;;  %v1265_v58 = vpop.f32.mrf.mxu1 }
  0x8f   :  { %v374_v59 = vadd.f32 %v6015_v40, %v373_v57  ;;  %v1266_v60 = vadd.f32 %v6015_v40, %v1265_v58 }
  0x90   :  { %v2315_v61 = vsub.f32 0.0, %v2156_v55  ;;  %v3207_v62 = vsub.f32 0.0, %v3048_v56 }
  0x91   :  { %v532_v63 = vsub.f32 0.0, %v374_v59  ;;  %v1424_v0 = vsub.f32 0.0, %v1266_v60 }
  0x92   :  { %v2379_v1 = vmul.f32 1.442695, %v2315_v61  ;;  %v3271_v2 = vmul.f32 1.442695, %v3207_v62 }
  0x93   :  { %v4802_v3 = vpop.eup %4801  ;;  %v597_v6 = vmul.f32 1.442695, %v532_v63  ;;  %v1489_v8 = vmul.f32 1.442695, %v1424_v0  ;;  %v4674_v63 = vld [vmem:[%s7709_s0 + $0x50] sm:$0xff] }
  0x94   :  { %v4804_v4 = vpop.eup %4803  ;;  %v723_v5 = vadd.f32 1.0, %v4802_v3  ;;  %4805 = vpow2.f32 %v2379_v1  ;;  %v4708_v0 = vld [vmem:[%s7709_s0 + $0x150] sm:$0xff] }
  0x95   :  { %v1615_v7 = vadd.f32 1.0, %v4804_v4  ;;  %4807 = vpow2.f32 %v3271_v2  ;;  %v2157_v9 = vpop.f32.mrf.mxu2  ;;  %v3049_v10 = vpop.f32.mrf.mxu3 }
  0x96   :  { %4809 = vrcp.f32 %v723_v5  ;;  %v2158_v13 = vadd.f32 %v6015_v40, %v2157_v9  ;;  %v3050_v14 = vadd.f32 %v6015_v40, %v3049_v10  ;;  %v376_v15 = vpop.f32.mrf.mxu0  ;;  %v1268_v16 = vpop.f32.mrf.mxu1 }
  0x97   :  { %4811 = vrcp.f32 %v1615_v7  ;;  %v377_v19 = vadd.f32 %v6015_v40, %v376_v15  ;;  %v1269_v20 = vadd.f32 %v6015_v40, %v1268_v16  ;;  %v4742_v7 = vld [vmem:[%s7709_s0 + $0x250] sm:$0xff] }
  0x98   :  { %4813 = vpow2.f32 %v597_v6  ;;  %v2316_v21 = vsub.f32 0.0, %v2158_v13  ;;  %v3208_v22 = vsub.f32 0.0, %v3050_v14 }
  0x99   :  { %4815 = vpow2.f32 %v1489_v8  ;;  %v533_v23 = vsub.f32 0.0, %v377_v19  ;;  %3741 = vmatmul.msk.bf16.gmra.mxu0 %vm265_vm0, %v4673_v11  ;;  %3977 = vmatmul.msk.bf16.gmra.mxu1 %vm265_vm0, %v4707_v12  ;;  %v1425_v26 = vsub.f32 0.0, %v1269_v20  ;;  %v4776_v8 = vld [vmem:[%s7709_s0 + $0x350] sm:$0xff] }
  0x9a   :  { %v4806_v24 = vpop.eup %4805  ;;  %v2381_v25 = vmul.f32 1.442695, %v2316_v21  ;;  %4277 = vmatmul.msk.bf16.gmra.mxu2 %vm265_vm0, %v4741_v17  ;;  %4577 = vmatmul.msk.bf16.gmra.mxu3 %vm265_vm0, %v4775_v18  ;;  %v3273_v29 = vmul.f32 1.442695, %v3208_v22 }
  0x9b   :  { %v4808_v27 = vpop.eup %4807  ;;  %v2507_v28 = vadd.f32 1.0, %v4806_v24  ;;  %v599_v32 = vmul.f32 1.442695, %v533_v23  ;;  %v1491_v37 = vmul.f32 1.442695, %v1425_v26 }
  0x9c   :  { %v4810_v30 = vpop.eup %4809  ;;  %v3399_v31 = vadd.f32 1.0, %v4808_v27  ;;  %4817 = vpow2.f32 %v2381_v25 }
  0x9d   :  { %v4812_v33 = vpop.eup %4811  ;;  %852 = vst.msk [vmem:[%s7711_s5] sm:$0xff] %vm851_vm1, %v4810_v30  ;;  %4819 = vrcp.f32 %v2507_v28  ;;  %v2160_v34 = vpop.f32.mrf.mxu2 }
  0x9e   :  { %v3052_v35 = vpop.f32.mrf.mxu3  ;;  %v4814_v36 = vpop.eup %4813  ;;  %4000 = vst.msk [vmem:[%s7711_s5 + $0x200] sm:$0xff] %vm851_vm1, %v4812_v33  ;;  %4821 = vrcp.f32 %v3399_v31  ;;  %v2161_v38 = vadd.f32 %v6015_v40, %v2160_v34 }
  0x9f   :  { %v3053_v39 = vadd.f32 %v6015_v40, %v3052_v35  ;;  %v378_v41 = vpop.f32.mrf.mxu0  ;;  %v1270_v42 = vpop.f32.mrf.mxu1  ;;  %v724_v44 = vadd.f32 1.0, %v4814_v36  ;;  %4823 = vpow2.f32 %v3273_v29 }
  0xa0   :  { %v4816_v43 = vpop.eup %4815  ;;  %v379_v45 = vadd.f32 %v6015_v40, %v378_v41  ;;  %v1271_v46 = vadd.f32 %v6015_v40, %v1270_v42  ;;  %4825 = vpow2.f32 %v599_v32  ;;  %v2317_v48 = vsub.f32 0.0, %v2161_v38 }
  0xa1   :  { %v1616_v47 = vadd.f32 1.0, %v4816_v43  ;;  %v3209_v49 = vsub.f32 0.0, %v3053_v39  ;;  %4827 = vrcp.f32 %v724_v44 }
  0xa2   :  { %v534_v50 = vsub.f32 0.0, %v379_v45  ;;  %v1426_v51 = vsub.f32 0.0, %v1271_v46  ;;  %v4818_v52 = vpop.eup %4817  ;;  %v2383_v53 = vmul.f32 1.442695, %v2317_v48 }
  0xa3   :  { %4829 = vrcp.f32 %v1616_v47  ;;  %v3275_v54 = vmul.f32 1.442695, %v3209_v49  ;;  %v4820_v55 = vpop.eup %4819  ;;  %v2508_v56 = vadd.f32 1.0, %v4818_v52 }
  0xa4   :  { %4831 = vpow2.f32 %v1491_v37  ;;  %v601_v57 = vmul.f32 1.442695, %v534_v50  ;;  %v4822_v58 = vpop.eup %4821  ;;  %4300 = vst.msk [vmem:[%s7711_s5 + $0x400] sm:$0xff] %vm851_vm1, %v4820_v55  ;;  %v1493_v60 = vmul.f32 1.442695, %v1426_v51 }
  0xa5   :  { %4833 = vpow2.f32 %v2383_v53  ;;  %v4824_v59 = vpop.eup %4823  ;;  %4600 = vst.msk [vmem:[%s7711_s5 + $0x600] sm:$0xff] %vm851_vm1, %v4822_v58  ;;  %v2162_v61 = vpop.f32.mrf.mxu2 }
  0xa6   :  { %4835 = vrcp.f32 %v2508_v56  ;;  %v3054_v62 = vpop.f32.mrf.mxu3  ;;  %v4826_v1 = vpop.eup %4825  ;;  %v3400_v2 = vadd.f32 1.0, %v4824_v59  ;;  %v2163_v3 = vadd.f32 %v6015_v40, %v2162_v61  ;;  %v4675_v59 = vld [vmem:[%s7709_s0 + $0x58] sm:$0xff] }
  0xa7   :  { %4837 = vpow2.f32 %v3275_v54  ;;  %v3055_v4 = vadd.f32 %v6015_v40, %v3054_v62  ;;  %v381_v5 = vpop.f32.mrf.mxu0  ;;  %v1273_v6 = vpop.f32.mrf.mxu1  ;;  %v725_v10 = vadd.f32 1.0, %v4826_v1 }
  0xa8   :  { %v4828_v9 = vpop.eup %4827  ;;  %4839 = vpow2.f32 %v601_v57  ;;  %v382_v11 = vadd.f32 %v6015_v40, %v381_v5  ;;  %v2318_v13 = vsub.f32 0.0, %v2163_v3  ;;  %v1274_v14 = vadd.f32 %v6015_v40, %v1273_v6  ;;  %v4777_v3 = vld [vmem:[%s7709_s0 + $0x358] sm:$0xff] }
  0xa9   :  { %v4830_v12 = vpop.eup %4829  ;;  %853 = vst.msk [vmem:[%s7711_s5 + $0x8] sm:$0xff] %vm851_vm1, %v4828_v9  ;;  %4841 = vrcp.f32 %v3400_v2  ;;  %v3210_v16 = vsub.f32 0.0, %v3055_v4  ;;  %3742 = vmatmul.msk.bf16.gmra.mxu0 %vm265_vm0, %v4674_v63  ;;  %3978 = vmatmul.msk.bf16.gmra.mxu1 %vm265_vm0, %v4708_v0  ;;  %v4743_v2 = vld [vmem:[%s7709_s0 + $0x258] sm:$0xff] }
  0xaa   :  { %v4832_v15 = vpop.eup %4831  ;;  %4001 = vst.msk [vmem:[%s7711_s5 + $0x208] sm:$0xff] %vm851_vm1, %v4830_v12  ;;  %4843 = vrcp.f32 %v725_v10  ;;  %v535_v17 = vsub.f32 0.0, %v382_v11  ;;  %v2385_v20 = vmul.f32 1.442695, %v2318_v13  ;;  %4278 = vmatmul.msk.bf16.gmra.mxu2 %vm265_vm0, %v4742_v7  ;;  %4578 = vmatmul.msk.bf16.gmra.mxu3 %vm265_vm0, %v4776_v8  ;;  %v1427_v24 = vsub.f32 0.0, %v1274_v14 }
  0xab   :  { %v4834_v18 = vpop.eup %4833  ;;  %v1617_v19 = vadd.f32 1.0, %v4832_v15  ;;  %4845 = vpow2.f32 %v1493_v60  ;;  %v3277_v27 = vmul.f32 1.442695, %v3210_v16  ;;  %v4709_v60 = vld [vmem:[%s7709_s0 + $0x158] sm:$0xff] }
  0xac   :  { %v4836_v21 = vpop.eup %4835  ;;  %v2509_v22 = vadd.f32 1.0, %v4834_v18  ;;  %v603_v28 = vmul.f32 1.442695, %v535_v17  ;;  %v1495_v42 = vmul.f32 1.442695, %v1427_v24 }
  0xad   :  { %v4838_v23 = vpop.eup %4837  ;;  %4301 = vst.msk [vmem:[%s7711_s5 + $0x408] sm:$0xff] %vm851_vm1, %v4836_v21  ;;  %4847 = vrcp.f32 %v1617_v19  ;;  %v2165_v29 = vpop.f32.mrf.mxu2 }
  0xae   :  { %v4840_v25 = vpop.eup %4839  ;;  %4849 = vrcp.f32 %v2509_v22  ;;  %v3401_v26 = vadd.f32 1.0, %v4838_v23  ;;  %v3057_v30 = vpop.f32.mrf.mxu3  ;;  %v2166_v33 = vadd.f32 %v6015_v40, %v2165_v29 }
  0xaf   :  { %v4842_v31 = vpop.eup %4841  ;;  %v726_v32 = vadd.f32 1.0, %v4840_v25  ;;  %4851 = vpow2.f32 %v2385_v20  ;;  %v3058_v34 = vadd.f32 %v6015_v40, %v3057_v30  ;;  %v383_v35 = vpop.f32.mrf.mxu0 }
  0xb0   :  { %v1275_v36 = vpop.f32.mrf.mxu1  ;;  %v4844_v37 = vpop.eup %4843  ;;  %4601 = vst.msk [vmem:[%s7711_s5 + $0x608] sm:$0xff] %vm851_vm1, %v4842_v31  ;;  %4853 = vrcp.f32 %v3401_v26  ;;  %v384_v38 = vadd.f32 %v6015_v40, %v383_v35  ;;  %v2319_v43 = vsub.f32 0.0, %v2166_v33 }
  0xb1   :  { %v1276_v39 = vadd.f32 %v6015_v40, %v1275_v36  ;;  %v4846_v41 = vpop.eup %4845  ;;  %854 = vst.msk [vmem:[%s7711_s5 + $0x10] sm:$0xff] %vm851_vm1, %v4844_v37  ;;  %4855 = vrcp.f32 %v726_v32  ;;  %v3211_v44 = vsub.f32 0.0, %v3058_v34 }
  0xb2   :  { %v1618_v45 = vadd.f32 1.0, %v4846_v41  ;;  %4857 = vpow2.f32 %v3277_v27  ;;  %v536_v46 = vsub.f32 0.0, %v384_v38  ;;  %v2387_v49 = vmul.f32 1.442695, %v2319_v43 }
  0xb3   :  { %v1428_v47 = vsub.f32 0.0, %v1276_v39  ;;  %v4848_v48 = vpop.eup %4847  ;;  %4859 = vpow2.f32 %v603_v28  ;;  %v3279_v50 = vmul.f32 1.442695, %v3211_v44 }
  0xb4   :  { %v4850_v51 = vpop.eup %4849  ;;  %4002 = vst.msk [vmem:[%s7711_s5 + $0x210] sm:$0xff] %vm851_vm1, %v4848_v48  ;;  %4861 = vrcp.f32 %v1618_v45  ;;  %v605_v53 = vmul.f32 1.442695, %v536_v46 }
  0xb5   :  { %v4852_v52 = vpop.eup %4851  ;;  %4302 = vst.msk [vmem:[%s7711_s5 + $0x410] sm:$0xff] %vm851_vm1, %v4850_v51  ;;  %4863 = vpow2.f32 %v1495_v42  ;;  %v1497_v56 = vmul.f32 1.442695, %v1428_v47  ;;  %v2167_v57 = vpop.f32.mrf.mxu2 }
  0xb6   :  { %v4854_v54 = vpop.eup %4853  ;;  %v2510_v55 = vadd.f32 1.0, %v4852_v52  ;;  %4865 = vpow2.f32 %v2387_v49  ;;  %v3059_v58 = vpop.f32.mrf.mxu3  ;;  %v2168_v62 = vadd.f32 %v6015_v40, %v2167_v57 }
  0xb7   :  { %v4856_v61 = vpop.eup %4855  ;;  %4602 = vst.msk [vmem:[%s7711_s5 + $0x610] sm:$0xff] %vm851_vm1, %v4854_v54  ;;  %4867 = vpow2.f32 %v3279_v50  ;;  %v3060_v63 = vadd.f32 %v6015_v40, %v3059_v58  ;;  %v386_v0 = vpop.f32.mrf.mxu0 }
  0xb8   :  { %v1278_v1 = vpop.f32.mrf.mxu1  ;;  %v4858_v4 = vpop.eup %4857  ;;  %855 = vst.msk [vmem:[%s7711_s5 + $0x18] sm:$0xff] %vm851_vm1, %v4856_v61  ;;  %4869 = vrcp.f32 %v2510_v55  ;;  %v387_v5 = vadd.f32 %v6015_v40, %v386_v0  ;;  %v2320_v9 = vsub.f32 0.0, %v2168_v62  ;;  %v4676_v55 = vld [vmem:[%s7709_s0 + $0x60] sm:$0xff] }
  0xb9   :  { %v1279_v6 = vadd.f32 %v6015_v40, %v1278_v1  ;;  %v4860_v7 = vpop.eup %4859  ;;  %v3402_v8 = vadd.f32 1.0, %v4858_v4  ;;  %4871 = vpow2.f32 %v605_v53  ;;  %v3212_v10 = vsub.f32 0.0, %v3060_v63  ;;  %3743 = vmatmul.msk.bf16.gmra.mxu0 %vm265_vm0, %v4675_v59  ;;  %3979 = vmatmul.msk.bf16.gmra.mxu1 %vm265_vm0, %v4709_v60  ;;  %v4744_v63 = vld [vmem:[%s7709_s0 + $0x260] sm:$0xff] }
  0xba   :  { %v4862_v11 = vpop.eup %4861  ;;  %v727_v12 = vadd.f32 1.0, %v4860_v7  ;;  %4873 = vpow2.f32 %v1497_v56  ;;  %v537_v13 = vsub.f32 0.0, %v387_v5  ;;  %v2389_v15 = vmul.f32 1.442695, %v2320_v9  ;;  %4279 = vmatmul.msk.bf16.gmra.mxu2 %vm265_vm0, %v4743_v2  ;;  %4579 = vmatmul.msk.bf16.gmra.mxu3 %vm265_vm0, %v4777_v3  ;;  %v4710_v56 = vld [vmem:[%s7709_s0 + $0x160] sm:$0xff] }
  0xbb   :  { %v4864_v14 = vpop.eup %4863  ;;  %4003 = vst.msk [vmem:[%s7711_s5 + $0x218] sm:$0xff] %vm851_vm1, %v4862_v11  ;;  %4875 = vrcp.f32 %v3402_v8  ;;  %v1429_v16 = vsub.f32 0.0, %v1279_v6  ;;  %v3281_v21 = vmul.f32 1.442695, %v3212_v10  ;;  %v4778_v0 = vld [vmem:[%s7709_s0 + $0x360] sm:$0xff] }
  0xbc   :  { %v4866_v17 = vpop.eup %4865  ;;  %4877 = vrcp.f32 %v727_v12  ;;  %v1619_v18 = vadd.f32 1.0, %v4864_v14  ;;  %v607_v24 = vmul.f32 1.442695, %v537_v13 }
  0xbd   :  { %v4868_v19 = vpop.eup %4867  ;;  %v2511_v20 = vadd.f32 1.0, %v4866_v17  ;;  %4879 = vpow2.f32 %v2389_v15  ;;  %v2170_v25 = vpop.f32.mrf.mxu2  ;;  %v1499_v28 = vmul.f32 1.442695, %v1429_v16 }
  0xbe   :  { %v4870_v22 = vpop.eup %4869  ;;  %4881 = vrcp.f32 %v1619_v18  ;;  %v3403_v23 = vadd.f32 1.0, %v4868_v19  ;;  %v3062_v26 = vpop.f32.mrf.mxu3  ;;  %v2171_v29 = vadd.f32 %v6015_v40, %v2170_v25 }
  0xbf   :  { %v4872_v27 = vpop.eup %4871  ;;  %4303 = vst.msk [vmem:[%s7711_s5 + $0x418] sm:$0xff] %vm851_vm1, %v4870_v22  ;;  %4883 = vrcp.f32 %v2511_v20  ;;  %v3063_v30 = vadd.f32 %v6015_v40, %v3062_v26  ;;  %v388_v31 = vpop.f32.mrf.mxu0 }
  0xc0   :  { %v1280_v32 = vpop.f32.mrf.mxu1  ;;  %v4874_v33 = vpop.eup %4873  ;;  %4885 = vrcp.f32 %v3403_v23  ;;  %v728_v34 = vadd.f32 1.0, %v4872_v27  ;;  %v389_v35 = vadd.f32 %v6015_v40, %v388_v31  ;;  %v2321_v39 = vsub.f32 0.0, %v2171_v29 }
  0xc1   :  { %v1281_v36 = vadd.f32 %v6015_v40, %v1280_v32  ;;  %v4876_v37 = vpop.eup %4875  ;;  %v1620_v38 = vadd.f32 1.0, %v4874_v33  ;;  %4887 = vpow2.f32 %v3281_v21  ;;  %v3213_v41 = vsub.f32 0.0, %v3063_v30 }
  0xc2   :  { %v4878_v42 = vpop.eup %4877  ;;  %4603 = vst.msk [vmem:[%s7711_s5 + $0x618] sm:$0xff] %vm851_vm1, %v4876_v37  ;;  %4889 = vrcp.f32 %v728_v34  ;;  %v538_v43 = vsub.f32 0.0, %v389_v35  ;;  %v2391_v45 = vmul.f32 1.442695, %v2321_v39 }
  0xc3   :  { %v4880_v44 = vpop.eup %4879  ;;  %856 = vst.msk [vmem:[%s7711_s5 + $0x20] sm:$0xff] %vm851_vm1, %v4878_v42  ;;  %4891 = vrcp.f32 %v1620_v38  ;;  %v1430_v46 = vsub.f32 0.0, %v1281_v36  ;;  %v3283_v49 = vmul.f32 1.442695, %v3213_v41 }
  0xc4   :  { %v4882_v47 = vpop.eup %4881  ;;  %v2512_v48 = vadd.f32 1.0, %v4880_v44  ;;  %4893 = vpow2.f32 %v607_v24  ;;  %v609_v51 = vmul.f32 1.442695, %v538_v43 }
  0xc5   :  { %v4884_v50 = vpop.eup %4883  ;;  %4004 = vst.msk [vmem:[%s7711_s5 + $0x220] sm:$0xff] %vm851_vm1, %v4882_v47  ;;  %4895 = vpow2.f32 %v1499_v28  ;;  %v2172_v53 = vpop.f32.mrf.mxu2  ;;  %v1501_v58 = vmul.f32 1.442695, %v1430_v46 }
  0xc6   :  { %v4886_v52 = vpop.eup %4885  ;;  %4304 = vst.msk [vmem:[%s7711_s5 + $0x420] sm:$0xff] %vm851_vm1, %v4884_v50  ;;  %4897 = vrcp.f32 %v2512_v48  ;;  %v3064_v54 = vpop.f32.mrf.mxu3  ;;  %v2173_v59 = vadd.f32 %v6015_v40, %v2172_v53 }
  0xc7   :  { %v4888_v57 = vpop.eup %4887  ;;  %4604 = vst.msk [vmem:[%s7711_s5 + $0x620] sm:$0xff] %vm851_vm1, %v4886_v52  ;;  %4899 = vpow2.f32 %v2391_v45  ;;  %v3065_v60 = vadd.f32 %v6015_v40, %v3064_v54  ;;  %v391_v61 = vpop.f32.mrf.mxu0  ;;  %v4711_v52 = vld [vmem:[%s7709_s0 + $0x168] sm:$0xff] }
  0xc8   :  { %v1283_v62 = vpop.f32.mrf.mxu1  ;;  %v4890_v1 = vpop.eup %4889  ;;  %v3404_v2 = vadd.f32 1.0, %v4888_v57  ;;  %4901 = vpow2.f32 %v3283_v49  ;;  %v2322_v4 = vsub.f32 0.0, %v2173_v59  ;;  %v392_v5 = vadd.f32 %v6015_v40, %v391_v61  ;;  %v4745_v59 = vld [vmem:[%s7709_s0 + $0x268] sm:$0xff] }
  0xc9   :  { %v4892_v3 = vpop.eup %4891  ;;  %857 = vst.msk [vmem:[%s7711_s5 + $0x28] sm:$0xff] %vm851_vm1, %v4890_v1  ;;  %4903 = vpow2.f32 %v609_v51  ;;  %v3214_v7 = vsub.f32 0.0, %v3065_v60  ;;  %v1284_v8 = vadd.f32 %v6015_v40, %v1283_v62  ;;  %3744 = vmatmul.msk.bf16.gmra.mxu0 %vm265_vm0, %v4676_v55  ;;  %3980 = vmatmul.msk.bf16.gmra.mxu1 %vm265_vm0, %v4710_v56  ;;  %v4677_v51 = vld [vmem:[%s7709_s0 + $0x68] sm:$0xff] }
  0xca   :  { %v4894_v6 = vpop.eup %4893  ;;  %4005 = vst.msk [vmem:[%s7711_s5 + $0x228] sm:$0xff] %vm851_vm1, %v4892_v3  ;;  %4905 = vrcp.f32 %v3404_v2  ;;  %v2393_v11 = vmul.f32 1.442695, %v2322_v4  ;;  %4280 = vmatmul.msk.bf16.gmra.mxu2 %vm265_vm0, %v4744_v63  ;;  %4580 = vmatmul.msk.bf16.gmra.mxu3 %vm265_vm0, %v4778_v0  ;;  %v539_v15 = vsub.f32 0.0, %v392_v5  ;;  %v4779_v60 = vld [vmem:[%s7709_s0 + $0x368] sm:$0xff] }
  0xcb   :  { %v4896_v9 = vpop.eup %4895  ;;  %v729_v10 = vadd.f32 1.0, %v4894_v6  ;;  %4907 = vpow2.f32 %v1501_v58  ;;  %v3285_v18 = vmul.f32 1.442695, %v3214_v7  ;;  %v1431_v19 = vsub.f32 0.0, %v1284_v8 }
  0xcc   :  { %v4898_v12 = vpop.eup %4897  ;;  %v1621_v13 = vadd.f32 1.0, %v4896_v9  ;;  %v611_v33 = vmul.f32 1.442695, %v539_v15 }
  0xcd   :  { %v4900_v14 = vpop.eup %4899  ;;  %4305 = vst.msk [vmem:[%s7711_s5 + $0x428] sm:$0xff] %vm851_vm1, %v4898_v12  ;;  %4909 = vrcp.f32 %v729_v10  ;;  %v2175_v20 = vpop.f32.mrf.mxu2  ;;  %v1503_v37 = vmul.f32 1.442695, %v1431_v19 }
  0xce   :  { %v4902_v16 = vpop.eup %4901  ;;  %4911 = vrcp.f32 %v1621_v13  ;;  %v2513_v17 = vadd.f32 1.0, %v4900_v14  ;;  %v3067_v21 = vpop.f32.mrf.mxu3  ;;  %v2176_v24 = vadd.f32 %v6015_v40, %v2175_v20 }
  0xcf   :  { %v4904_v22 = vpop.eup %4903  ;;  %v3405_v23 = vadd.f32 1.0, %v4902_v16  ;;  %4913 = vpow2.f32 %v2393_v11  ;;  %v3068_v25 = vadd.f32 %v6015_v40, %v3067_v21  ;;  %v393_v26 = vpop.f32.mrf.mxu0 }
  0xd0   :  { %v1285_v27 = vpop.f32.mrf.mxu1  ;;  %v4906_v28 = vpop.eup %4905  ;;  %4915 = vrcp.f32 %v2513_v17  ;;  %v730_v29 = vadd.f32 1.0, %v4904_v22  ;;  %v394_v30 = vadd.f32 %v6015_v40, %v393_v26  ;;  %v2323_v34 = vsub.f32 0.0, %v2176_v24 }
  0xd1   :  { %v1286_v31 = vadd.f32 %v6015_v40, %v1285_v27  ;;  %v4908_v32 = vpop.eup %4907  ;;  %4605 = vst.msk [vmem:[%s7711_s5 + $0x628] sm:$0xff] %vm851_vm1, %v4906_v28  ;;  %4917 = vrcp.f32 %v3405_v23  ;;  %v3215_v35 = vsub.f32 0.0, %v3068_v25 }
  0xd2   :  { %4919 = vrcp.f32 %v730_v29  ;;  %v1622_v36 = vadd.f32 1.0, %v4908_v32  ;;  %v540_v38 = vsub.f32 0.0, %v394_v30  ;;  %v2395_v41 = vmul.f32 1.442695, %v2323_v34 }
  0xd3   :  { %v4910_v39 = vpop.eup %4909  ;;  %4921 = vpow2.f32 %v3285_v18  ;;  %v1432_v42 = vsub.f32 0.0, %v1286_v31  ;;  %v3287_v45 = vmul.f32 1.442695, %v3215_v35 }
  0xd4   :  { %v4912_v43 = vpop.eup %4911  ;;  %858 = vst.msk [vmem:[%s7711_s5 + $0x30] sm:$0xff] %vm851_vm1, %v4910_v39  ;;  %4923 = vrcp.f32 %v1622_v36  ;;  %v613_v48 = vmul.f32 1.442695, %v540_v38 }
  0xd5   :  { %v4914_v44 = vpop.eup %4913  ;;  %4006 = vst.msk [vmem:[%s7711_s5 + $0x230] sm:$0xff] %vm851_vm1, %v4912_v43  ;;  %4925 = vpow2.f32 %v611_v33  ;;  %v2177_v49 = vpop.f32.mrf.mxu2  ;;  %v1505_v54 = vmul.f32 1.442695, %v1432_v42 }
  0xd6   :  { %v4916_v46 = vpop.eup %4915  ;;  %v2514_v47 = vadd.f32 1.0, %v4914_v44  ;;  %4927 = vpow2.f32 %v1503_v37  ;;  %v3069_v50 = vpop.f32.mrf.mxu3  ;;  %v2178_v55 = vadd.f32 %v6015_v40, %v2177_v49 }
  0xd7   :  { %v4918_v53 = vpop.eup %4917  ;;  %4306 = vst.msk [vmem:[%s7711_s5 + $0x430] sm:$0xff] %vm851_vm1, %v4916_v46  ;;  %4929 = vpow2.f32 %v2395_v41  ;;  %v3070_v56 = vadd.f32 %v6015_v40, %v3069_v50  ;;  %v396_v57 = vpop.f32.mrf.mxu0 }
  0xd8   :  { %v1288_v58 = vpop.f32.mrf.mxu1  ;;  %v4920_v61 = vpop.eup %4919  ;;  %4606 = vst.msk [vmem:[%s7711_s5 + $0x630] sm:$0xff] %vm851_vm1, %v4918_v53  ;;  %4931 = vrcp.f32 %v2514_v47  ;;  %v397_v62 = vadd.f32 %v6015_v40, %v396_v57  ;;  %v2324_v0 = vsub.f32 0.0, %v2178_v55  ;;  %v4678_v47 = vld [vmem:[%s7709_s0 + $0x70] sm:$0xff] }
  0xd9   :  { %v4922_v63 = vpop.eup %4921  ;;  %859 = vst.msk [vmem:[%s7711_s5 + $0x38] sm:$0xff] %vm851_vm1, %v4920_v61  ;;  %4933 = vpow2.f32 %v3287_v45  ;;  %v3216_v1 = vsub.f32 0.0, %v3070_v56  ;;  %v1289_v4 = vadd.f32 %v6015_v40, %v1288_v58  ;;  %3745 = vmatmul.msk.bf16.gmra.mxu0 %vm265_vm0, %v4677_v51  ;;  %3981 = vmatmul.msk.bf16.gmra.mxu1 %vm265_vm0, %v4711_v52  ;;  %v4746_v55 = vld [vmem:[%s7709_s0 + $0x270] sm:$0xff] }
  0xda   :  { %v4924_v2 = vpop.eup %4923  ;;  %v3406_v3 = vadd.f32 1.0, %v4922_v63  ;;  %4935 = vpow2.f32 %v613_v48  ;;  %v2397_v6 = vmul.f32 1.442695, %v2324_v0  ;;  %v541_v7 = vsub.f32 0.0, %v397_v62  ;;  %4281 = vmatmul.msk.bf16.gmra.mxu2 %vm265_vm0, %v4745_v59  ;;  %4581 = vmatmul.msk.bf16.gmra.mxu3 %vm265_vm0, %v4779_v60  ;;  %v4712_v48 = vld [vmem:[%s7709_s0 + $0x170] sm:$0xff] }
  0xdb   :  { %v4926_v5 = vpop.eup %4925  ;;  %4007 = vst.msk [vmem:[%s7711_s5 + $0x238] sm:$0xff] %vm851_vm1, %v4924_v2  ;;  %4937 = vpow2.f32 %v1505_v54  ;;  %v3289_v12 = vmul.f32 1.442695, %v3216_v1  ;;  %v1433_v15 = vsub.f32 0.0, %v1289_v4  ;;  %v4780_v56 = vld [vmem:[%s7709_s0 + $0x370] sm:$0xff] }
  0xdc   :  { %v4928_v8 = vpop.eup %4927  ;;  %4939 = vrcp.f32 %v3406_v3  ;;  %v731_v9 = vadd.f32 1.0, %v4926_v5  ;;  %v615_v19 = vmul.f32 1.442695, %v541_v7 }
  0xdd   :  { %v4930_v10 = vpop.eup %4929  ;;  %v1623_v11 = vadd.f32 1.0, %v4928_v8  ;;  %4941 = vpow2.f32 %v2397_v6  ;;  %v2180_v16 = vpop.f32.mrf.mxu2  ;;  %v1507_v35 = vmul.f32 1.442695, %v1433_v15 }
  0xde   :  { %v4932_v13 = vpop.eup %4931  ;;  %4943 = vrcp.f32 %v731_v9  ;;  %v2515_v14 = vadd.f32 1.0, %v4930_v10  ;;  %v3072_v17 = vpop.f32.mrf.mxu3  ;;  %v2181_v20 = vadd.f32 %v6015_v40, %v2180_v16  ;;  %v6338_v16 = vld [vmem:[%s7710_s2] ss:$0 sm:$0xff] }
  0xdf   :  { %v4934_v18 = vpop.eup %4933  ;;  %4307 = vst.msk [vmem:[%s7711_s5 + $0x438] sm:$0xff] %vm851_vm1, %v4932_v13  ;;  %4945 = vrcp.f32 %v1623_v11  ;;  %v3073_v21 = vadd.f32 %v6015_v40, %v3072_v17  ;;  %v398_v22 = vpop.f32.mrf.mxu0 }
  0xe0   :  { %v1290_v23 = vpop.f32.mrf.mxu1  ;;  %v4936_v24 = vpop.eup %4935  ;;  %4947 = vrcp.f32 %v2515_v14  ;;  %v3407_v25 = vadd.f32 1.0, %v4934_v18  ;;  %v399_v26 = vadd.f32 %v6015_v40, %v398_v22  ;;  %v2325_v30 = vsub.f32 0.0, %v2181_v20 }
  0xe1   :  { %v1291_v27 = vadd.f32 %v6015_v40, %v1290_v23  ;;  %v4938_v28 = vpop.eup %4937  ;;  %v732_v29 = vadd.f32 1.0, %v4936_v24  ;;  %4949 = vpow2.f32 %v3289_v12  ;;  %v3217_v31 = vsub.f32 0.0, %v3073_v21 }
  0xe2   :  { %v4940_v32 = vpop.eup %4939  ;;  %4951 = vrcp.f32 %v3407_v25  ;;  %v1624_v33 = vadd.f32 1.0, %v4938_v28  ;;  %v542_v36 = vsub.f32 0.0, %v399_v26  ;;  %v2399_v39 = vmul.f32 1.442695, %v2325_v30 }
  0xe3   :  { %v4942_v34 = vpop.eup %4941  ;;  %4607 = vst.msk [vmem:[%s7711_s5 + $0x638] sm:$0xff] %vm851_vm1, %v4940_v32  ;;  %4953 = vrcp.f32 %v732_v29  ;;  %v1434_v41 = vsub.f32 0.0, %v1291_v27  ;;  %v3291_v43 = vmul.f32 1.442695, %v3217_v31 }
  0xe4   :  { %v4944_v37 = vpop.eup %4943  ;;  %4955 = vrcp.f32 %v1624_v33  ;;  %v2516_v38 = vadd.f32 1.0, %v4942_v34  ;;  %v617_v50 = vmul.f32 1.442695, %v542_v36 }
  0xe5   :  { %v4946_v42 = vpop.eup %4945  ;;  %860 = vst.msk [vmem:[%s7711_s5 + $0x40] sm:$0xff] %vm851_vm1, %v4944_v37  ;;  %4957 = vpow2.f32 %v615_v19  ;;  %v2182_v45 = vpop.f32.mrf.mxu2  ;;  %v1509_v59 = vmul.f32 1.442695, %v1434_v41 }
  0xe6   :  { %v4948_v44 = vpop.eup %4947  ;;  %4008 = vst.msk [vmem:[%s7711_s5 + $0x240] sm:$0xff] %vm851_vm1, %v4946_v42  ;;  %4959 = vrcp.f32 %v2516_v38  ;;  %v3074_v46 = vpop.f32.mrf.mxu3  ;;  %v2183_v51 = vadd.f32 %v6015_v40, %v2182_v45  ;;  %v4679_v45 = vld [vmem:[%s7709_s0 + $0x78] sm:$0xff] }
  0xe7   :  { %v4950_v49 = vpop.eup %4949  ;;  %4308 = vst.msk [vmem:[%s7711_s5 + $0x440] sm:$0xff] %vm851_vm1, %v4948_v44  ;;  %4961 = vpow2.f32 %v1507_v35  ;;  %v3075_v52 = vadd.f32 %v6015_v40, %v3074_v46  ;;  %v401_v53 = vpop.f32.mrf.mxu0  ;;  %v4713_v46 = vld [vmem:[%s7709_s0 + $0x178] sm:$0xff] }
  0xe8   :  { %v1293_v54 = vpop.f32.mrf.mxu1  ;;  %v4952_v57 = vpop.eup %4951  ;;  %v3408_v58 = vadd.f32 1.0, %v4950_v49  ;;  %4963 = vpow2.f32 %v2399_v39  ;;  %v402_v60 = vadd.f32 %v6015_v40, %v401_v53  ;;  %v2326_v62 = vsub.f32 0.0, %v2183_v51  ;;  %v4747_v53 = vld [vmem:[%s7709_s0 + $0x278] sm:$0xff] }
  0xe9   :  { %v4954_v61 = vpop.eup %4953  ;;  %4608 = vst.msk [vmem:[%s7711_s5 + $0x640] sm:$0xff] %vm851_vm1, %v4952_v57  ;;  %4965 = vpow2.f32 %v3291_v43  ;;  %v3218_v63 = vsub.f32 0.0, %v3075_v52  ;;  %v1294_v2 = vadd.f32 %v6015_v40, %v1293_v54  ;;  %3746 = vmatmul.msk.bf16.gmra.mxu0 %vm265_vm0, %v4678_v47  ;;  %3982 = vmatmul.msk.bf16.gmra.mxu1 %vm265_vm0, %v4712_v48  ;;  %v4781_v54 = vld [vmem:[%s7709_s0 + $0x378] sm:$0xff] }
  0xea   :  { %v4956_v0 = vpop.eup %4955  ;;  %861 = vst.msk [vmem:[%s7711_s5 + $0x48] sm:$0xff] %vm851_vm1, %v4954_v61  ;;  %4967 = vrcp.f32 %v3408_v58  ;;  %v543_v1 = vsub.f32 0.0, %v402_v60  ;;  %v2401_v4 = vmul.f32 1.442695, %v2326_v62  ;;  %4282 = vmatmul.msk.bf16.gmra.mxu2 %vm265_vm0, %v4746_v55  ;;  %4582 = vmatmul.msk.bf16.gmra.mxu3 %vm265_vm0, %v4780_v56 }
  0xeb   :  { %v4958_v3 = vpop.eup %4957  ;;  %4009 = vst.msk [vmem:[%s7711_s5 + $0x248] sm:$0xff] %vm851_vm1, %v4956_v0  ;;  %4969 = vpow2.f32 %v617_v50  ;;  %v3293_v5 = vmul.f32 1.442695, %v3218_v63  ;;  %v1435_v11 = vsub.f32 0.0, %v1294_v2 }
  0xec   :  { %v4960_v6 = vpop.eup %4959  ;;  %v733_v7 = vadd.f32 1.0, %v4958_v3  ;;  %4971 = vpow2.f32 %v1509_v59  ;;  %v619_v10 = vmul.f32 1.442695, %v543_v1 }
  0xed   :  { %v4962_v40 = vpop.eup %4961  ;;  %4309 = vst.msk [vmem:[%s7711_s5 + $0x448] sm:$0xff] %vm851_vm1, %v4960_v6  ;;  %4973 = vpow2.f32 %v2401_v4  ;;  %v2185_v12 = vpop.f32.mrf.mxu2  ;;  %v1511_v32 = vmul.f32 1.442695, %v1435_v11 }
  0xee   :  { %v4964_v8 = vpop.eup %4963  ;;  %4975 = vrcp.f32 %v733_v7  ;;  %v1625_v9 = vadd.f32 1.0, %v4962_v40  ;;  %v3077_v13 = vpop.f32.mrf.mxu3  ;;  %v2186_v17 = vadd.f32 %v6338_v16, %v2185_v12 }
  0xef   :  { %v4966_v14 = vpop.eup %4965  ;;  %v2517_v15 = vadd.f32 1.0, %v4964_v8  ;;  %4977 = vpow2.f32 %v3293_v5  ;;  %v3078_v18 = vadd.f32 %v6338_v16, %v3077_v13  ;;  %v403_v19 = vpop.f32.mrf.mxu0 }
  0xf0   :  { %v1295_v20 = vpop.f32.mrf.mxu1  ;;  %v4968_v21 = vpop.eup %4967  ;;  %4979 = vrcp.f32 %v1625_v9  ;;  %v3409_v22 = vadd.f32 1.0, %v4966_v14  ;;  %v404_v23 = vadd.f32 %v6338_v16, %v403_v19  ;;  %v2327_v25 = vsub.f32 0.0, %v2186_v17 }
  0xf1   :  { %v4970_v24 = vpop.eup %4969  ;;  %4609 = vst.msk [vmem:[%s7711_s5 + $0x648] sm:$0xff] %vm851_vm1, %v4968_v21  ;;  %4981 = vrcp.f32 %v2517_v15  ;;  %v1296_v26 = vadd.f32 %v6338_v16, %v1295_v20  ;;  %v3219_v29 = vsub.f32 0.0, %v3078_v18 }
  0xf2   :  { %v4972_v27 = vpop.eup %4971  ;;  %4983 = vrcp.f32 %v3409_v22  ;;  %v734_v28 = vadd.f32 1.0, %v4970_v24  ;;  %v544_v33 = vsub.f32 0.0, %v404_v23  ;;  %v2403_v37 = vmul.f32 1.442695, %v2327_v25 }
  0xf3   :  { %v4974_v30 = vpop.eup %4973  ;;  %v1626_v31 = vadd.f32 1.0, %v4972_v27  ;;  %4985 = vpow2.f32 %v619_v10  ;;  %v1436_v38 = vsub.f32 0.0, %v1296_v26  ;;  %v3295_v42 = vmul.f32 1.442695, %v3219_v29 }
  0xf4   :  { %v4976_v34 = vpop.eup %4975  ;;  %4987 = vrcp.f32 %v734_v28  ;;  %v2518_v35 = vadd.f32 1.0, %v4974_v30  ;;  %v621_v48 = vmul.f32 1.442695, %v544_v33 }
  0xf5   :  { %v4978_v36 = vpop.eup %4977  ;;  %862 = vst.msk [vmem:[%s7711_s5 + $0x50] sm:$0xff] %vm851_vm1, %v4976_v34  ;;  %4989 = vrcp.f32 %v1626_v31  ;;  %v2187_v43 = vpop.f32.mrf.mxu2  ;;  %v1513_v59 = vmul.f32 1.442695, %v1436_v38 }
  0xf6   :  { %v4980_v39 = vpop.eup %4979  ;;  %4991 = vrcp.f32 %v2518_v35  ;;  %v3410_v41 = vadd.f32 1.0, %v4978_v36  ;;  %v3079_v44 = vpop.f32.mrf.mxu3  ;;  %v2188_v49 = vadd.f32 %v6338_v16, %v2187_v43  ;;  %v4714_v43 = vld [vmem:[%s7709_s0 + $0x180] sm:$0xff] }
  0xf7   :  { %v4982_v47 = vpop.eup %4981  ;;  %4010 = vst.msk [vmem:[%s7711_s5 + $0x250] sm:$0xff] %vm851_vm1, %v4980_v39  ;;  %4993 = vpow2.f32 %v1511_v32  ;;  %v3080_v50 = vadd.f32 %v6338_v16, %v3079_v44  ;;  %v406_v51 = vpop.f32.mrf.mxu0 }
  0xf8   :  { %v1298_v52 = vpop.f32.mrf.mxu1  ;;  %v4984_v55 = vpop.eup %4983  ;;  %4310 = vst.msk [vmem:[%s7711_s5 + $0x450] sm:$0xff] %vm851_vm1, %v4982_v47  ;;  %4995 = vrcp.f32 %v3410_v41  ;;  %v407_v56 = vadd.f32 %v6338_v16, %v406_v51  ;;  %v2328_v60 = vsub.f32 0.0, %v2188_v49  ;;  %v4782_v51 = vld [vmem:[%s7709_s0 + $0x380] sm:$0xff] }
  0xf9   :  { %v1299_v57 = vadd.f32 %v6338_v16, %v1298_v52  ;;  %v4986_v58 = vpop.eup %4985  ;;  %4610 = vst.msk [vmem:[%s7711_s5 + $0x650] sm:$0xff] %vm851_vm1, %v4984_v55  ;;  %4997 = vpow2.f32 %v2403_v37  ;;  %v3220_v61 = vsub.f32 0.0, %v3080_v50  ;;  %3747 = vmatmul.msk.bf16.gmra.mxu0 %vm265_vm0, %v4679_v45  ;;  %3983 = vmatmul.msk.bf16.gmra.mxu1 %vm265_vm0, %v4713_v46  ;;  %v4748_v50 = vld [vmem:[%s7709_s0 + $0x280] sm:$0xff] }
  0xfa   :  { %v4988_v62 = vpop.eup %4987  ;;  %v735_v63 = vadd.f32 1.0, %v4986_v58  ;;  %4999 = vpow2.f32 %v3295_v42  ;;  %v545_v0 = vsub.f32 0.0, %v407_v56  ;;  %v2405_v2 = vmul.f32 1.442695, %v2328_v60  ;;  %4283 = vmatmul.msk.bf16.gmra.mxu2 %vm265_vm0, %v4747_v53  ;;  %4583 = vmatmul.msk.bf16.gmra.mxu3 %vm265_vm0, %v4781_v54  ;;  %v4680_v42 = vld [vmem:[%s7709_s0 + $0x80] sm:$0xff] }
  0xfb   :  { %v4990_v1 = vpop.eup %4989  ;;  %863 = vst.msk [vmem:[%s7711_s5 + $0x58] sm:$0xff] %vm851_vm1, %v4988_v62  ;;  %5001 = vpow2.f32 %v621_v48  ;;  %v3297_v3 = vmul.f32 1.442695, %v3220_v61  ;;  %v1437_v5 = vsub.f32 0.0, %v1299_v57 }
  0xfc   :  { %v4992_v4 = vpop.eup %4991  ;;  %4011 = vst.msk [vmem:[%s7711_s5 + $0x258] sm:$0xff] %vm851_vm1, %v4990_v1  ;;  %5003 = vrcp.f32 %v735_v63  ;;  %v623_v7 = vmul.f32 1.442695, %v545_v0 }
  0xfd   :  { %v4994_v6 = vpop.eup %4993  ;;  %4311 = vst.msk [vmem:[%s7711_s5 + $0x458] sm:$0xff] %vm851_vm1, %v4992_v4  ;;  %5005 = vpow2.f32 %v1513_v59  ;;  %v2190_v9 = vpop.f32.mrf.mxu2  ;;  %v1515_v19 = vmul.f32 1.442695, %v1437_v5 }
  0xfe   :  { %v4996_v40 = vpop.eup %4995  ;;  %v1627_v8 = vadd.f32 1.0, %v4994_v6  ;;  %5007 = vpow2.f32 %v2405_v2  ;;  %v3082_v10 = vpop.f32.mrf.mxu3  ;;  %v2191_v12 = vadd.f32 %v6338_v16, %v2190_v9 }
  0xff   :  { %v4998_v11 = vpop.eup %4997  ;;  %4611 = vst.msk [vmem:[%s7711_s5 + $0x658] sm:$0xff] %vm851_vm1, %v4996_v40  ;;  %5009 = vpow2.f32 %v3297_v3  ;;  %v3083_v13 = vadd.f32 %v6338_v16, %v3082_v10  ;;  %v408_v14 = vpop.f32.mrf.mxu0 }
 0x100   :  { %v1300_v15 = vpop.f32.mrf.mxu1  ;;  %v5000_v17 = vpop.eup %4999  ;;  %5011 = vrcp.f32 %v1627_v8  ;;  %v2519_v18 = vadd.f32 1.0, %v4998_v11  ;;  %v409_v20 = vadd.f32 %v6338_v16, %v408_v14  ;;  %v2329_v23 = vsub.f32 0.0, %v2191_v12 }
 0x101   :  { %v5002_v21 = vpop.eup %5001  ;;  %v3411_v22 = vadd.f32 1.0, %v5000_v17  ;;  %5013 = vpow2.f32 %v623_v7  ;;  %v1301_v24 = vadd.f32 %v6338_v16, %v1300_v15  ;;  %v3221_v27 = vsub.f32 0.0, %v3083_v13 }
 0x102   :  { %v5004_v25 = vpop.eup %5003  ;;  %5015 = vrcp.f32 %v2519_v18  ;;  %v736_v26 = vadd.f32 1.0, %v5002_v21  ;;  %v546_v29 = vsub.f32 0.0, %v409_v20  ;;  %v2407_v34 = vmul.f32 1.442695, %v2329_v23 }
 0x103   :  { %v5006_v28 = vpop.eup %5005  ;;  %864 = vst.msk [vmem:[%s7711_s5 + $0x60] sm:$0xff] %vm851_vm1, %v5004_v25  ;;  %5017 = vrcp.f32 %v3411_v22  ;;  %v1438_v35 = vsub.f32 0.0, %v1301_v24  ;;  %v3299_v38 = vmul.f32 1.442695, %v3221_v27 }
 0x104   :  { %v5008_v30 = vpop.eup %5007  ;;  %5019 = vrcp.f32 %v736_v26  ;;  %v1628_v31 = vadd.f32 1.0, %v5006_v28  ;;  %v625_v45 = vmul.f32 1.442695, %v546_v29 }
 0x105   :  { %v5010_v32 = vpop.eup %5009  ;;  %v2520_v33 = vadd.f32 1.0, %v5008_v30  ;;  %5021 = vpow2.f32 %v1515_v19  ;;  %v2192_v39 = vpop.f32.mrf.mxu2  ;;  %v1517_v57 = vmul.f32 1.442695, %v1438_v35 }
 0x106   :  { %v5012_v36 = vpop.eup %5011  ;;  %5023 = vrcp.f32 %v1628_v31  ;;  %v3412_v37 = vadd.f32 1.0, %v5010_v32  ;;  %v3084_v41 = vpop.f32.mrf.mxu3  ;;  %v2193_v46 = vadd.f32 %v6338_v16, %v2192_v39 }
 0x107   :  { %v5014_v44 = vpop.eup %5013  ;;  %4012 = vst.msk [vmem:[%s7711_s5 + $0x260] sm:$0xff] %vm851_vm1, %v5012_v36  ;;  %5025 = vrcp.f32 %v2520_v33  ;;  %v3085_v47 = vadd.f32 %v6338_v16, %v3084_v41  ;;  %v411_v48 = vpop.f32.mrf.mxu0 }
 0x108   :  { %v1303_v49 = vpop.f32.mrf.mxu1  ;;  %v5016_v52 = vpop.eup %5015  ;;  %5027 = vrcp.f32 %v3412_v37  ;;  %v737_v53 = vadd.f32 1.0, %v5014_v44  ;;  %v412_v54 = vadd.f32 %v6338_v16, %v411_v48  ;;  %v2330_v58 = vsub.f32 0.0, %v2193_v46  ;;  %v4681_v37 = vld [vmem:[%s7709_s0 + $0x88] sm:$0xff] }
 0x109   :  { %v1304_v55 = vadd.f32 %v6338_v16, %v1303_v49  ;;  %v5018_v56 = vpop.eup %5017  ;;  %4312 = vst.msk [vmem:[%s7711_s5 + $0x460] sm:$0xff] %vm851_vm1, %v5016_v52  ;;  %5029 = vpow2.f32 %v2407_v34  ;;  %v3222_v59 = vsub.f32 0.0, %v3085_v47  ;;  %3748 = vmatmul.msk.bf16.gmra.mxu0 %vm265_vm0, %v4680_v42  ;;  %3984 = vmatmul.msk.bf16.gmra.mxu1 %vm265_vm0, %v4714_v43  ;;  %v4749_v46 = vld [vmem:[%s7709_s0 + $0x288] sm:$0xff] }
 0x10a   :  { %v5020_v60 = vpop.eup %5019  ;;  %4612 = vst.msk [vmem:[%s7711_s5 + $0x660] sm:$0xff] %vm851_vm1, %v5018_v56  ;;  %5031 = vrcp.f32 %v737_v53  ;;  %v547_v61 = vsub.f32 0.0, %v412_v54  ;;  %v2409_v63 = vmul.f32 1.442695, %v2330_v58  ;;  %4284 = vmatmul.msk.bf16.gmra.mxu2 %vm265_vm0, %v4748_v50  ;;  %4584 = vmatmul.msk.bf16.gmra.mxu3 %vm265_vm0, %v4782_v51  ;;  %v4783_v47 = vld [vmem:[%s7709_s0 + $0x388] sm:$0xff] }
 0x10b   :  { %v5022_v62 = vpop.eup %5021  ;;  %865 = vst.msk [vmem:[%s7711_s5 + $0x68] sm:$0xff] %vm851_vm1, %v5020_v60  ;;  %5033 = vpow2.f32 %v3299_v38  ;;  %v1439_v0 = vsub.f32 0.0, %v1304_v55  ;;  %v3301_v3 = vmul.f32 1.442695, %v3222_v59  ;;  %v4715_v38 = vld [vmem:[%s7709_s0 + $0x188] sm:$0xff] }
 0x10c   :  { %v5024_v1 = vpop.eup %5023  ;;  %v1629_v2 = vadd.f32 1.0, %v5022_v62  ;;  %5035 = vpow2.f32 %v625_v45  ;;  %v627_v5 = vmul.f32 1.442695, %v547_v61 }
 0x10d   :  { %v5026_v4 = vpop.eup %5025  ;;  %4013 = vst.msk [vmem:[%s7711_s5 + $0x268] sm:$0xff] %vm851_vm1, %v5024_v1  ;;  %5037 = vpow2.f32 %v1517_v57  ;;  %v2195_v7 = vpop.f32.mrf.mxu2  ;;  %v1519_v9 = vmul.f32 1.442695, %v1439_v0 }
 0x10e   :  { %v5028_v6 = vpop.eup %5027  ;;  %4313 = vst.msk [vmem:[%s7711_s5 + $0x468] sm:$0xff] %vm851_vm1, %v5026_v4  ;;  %5039 = vrcp.f32 %v1629_v2  ;;  %v3087_v40 = vpop.f32.mrf.mxu3  ;;  %v2196_v10 = vadd.f32 %v6338_v16, %v2195_v7 }
 0x10f   :  { %v5030_v8 = vpop.eup %5029  ;;  %4613 = vst.msk [vmem:[%s7711_s5 + $0x668] sm:$0xff] %vm851_vm1, %v5028_v6  ;;  %5041 = vpow2.f32 %v2409_v63  ;;  %v3088_v11 = vadd.f32 %v6338_v16, %v3087_v40  ;;  %v413_v12 = vpop.f32.mrf.mxu0 }
 0x110   :  { %v1305_v13 = vpop.f32.mrf.mxu1  ;;  %v5032_v14 = vpop.eup %5031  ;;  %v2521_v15 = vadd.f32 1.0, %v5030_v8  ;;  %5043 = vpow2.f32 %v3301_v3  ;;  %v2331_v18 = vsub.f32 0.0, %v2196_v10  ;;  %v414_v19 = vadd.f32 %v6338_v16, %v413_v12 }
 0x111   :  { %v5034_v17 = vpop.eup %5033  ;;  %866 = vst.msk [vmem:[%s7711_s5 + $0x70] sm:$0xff] %vm851_vm1, %v5032_v14  ;;  %5045 = vpow2.f32 %v627_v5  ;;  %v3223_v22 = vsub.f32 0.0, %v3088_v11  ;;  %v1306_v23 = vadd.f32 %v6338_v16, %v1305_v13 }
 0x112   :  { %v5036_v20 = vpop.eup %5035  ;;  %5047 = vrcp.f32 %v2521_v15  ;;  %v3413_v21 = vadd.f32 1.0, %v5034_v17  ;;  %v2411_v26 = vmul.f32 1.442695, %v2331_v18  ;;  %v548_v30 = vsub.f32 0.0, %v414_v19 }
 0x113   :  { %v5038_v24 = vpop.eup %5037  ;;  %v738_v25 = vadd.f32 1.0, %v5036_v20  ;;  %5049 = vpow2.f32 %v1519_v9  ;;  %v3303_v33 = vmul.f32 1.442695, %v3223_v22  ;;  %v1440_v34 = vsub.f32 0.0, %v1306_v23 }
 0x114   :  { %v5040_v27 = vpop.eup %5039  ;;  %5051 = vrcp.f32 %v3413_v21  ;;  %v1630_v28 = vadd.f32 1.0, %v5038_v24  ;;  %v629_v53 = vmul.f32 1.442695, %v548_v30 }
 0x115   :  { %v5042_v29 = vpop.eup %5041  ;;  %4014 = vst.msk [vmem:[%s7711_s5 + $0x270] sm:$0xff] %vm851_vm1, %v5040_v27  ;;  %5053 = vrcp.f32 %v738_v25  ;;  %v2197_v35 = vpop.f32.mrf.mxu2  ;;  %v1521_v58 = vmul.f32 1.442695, %v1440_v34  ;;  %v4682_v34 = vld [vmem:[%s7709_s0 + $0x90] sm:$0xff] }
 0x116   :  { %v5044_v31 = vpop.eup %5043  ;;  %5055 = vrcp.f32 %v1630_v28  ;;  %v2522_v32 = vadd.f32 1.0, %v5042_v29  ;;  %v3089_v36 = vpop.f32.mrf.mxu3  ;;  %v2198_v42 = vadd.f32 %v6338_v16, %v2197_v35  ;;  %v4716_v35 = vld [vmem:[%s7709_s0 + $0x190] sm:$0xff] }
 0x117   :  { %v5046_v39 = vpop.eup %5045  ;;  %v3414_v41 = vadd.f32 1.0, %v5044_v31  ;;  %5057 = vpow2.f32 %v2411_v26  ;;  %v3090_v43 = vadd.f32 %v6338_v16, %v3089_v36  ;;  %v416_v44 = vpop.f32.mrf.mxu0 }
 0x118   :  { %v1308_v45 = vpop.f32.mrf.mxu1  ;;  %v5048_v48 = vpop.eup %5047  ;;  %5059 = vrcp.f32 %v2522_v32  ;;  %v739_v49 = vadd.f32 1.0, %v5046_v39  ;;  %v417_v50 = vadd.f32 %v6338_v16, %v416_v44  ;;  %v2332_v54 = vsub.f32 0.0, %v2198_v42  ;;  %v4784_v44 = vld [vmem:[%s7709_s0 + $0x390] sm:$0xff] }
 0x119   :  { %v1309_v51 = vadd.f32 %v6338_v16, %v1308_v45  ;;  %v5050_v52 = vpop.eup %5049  ;;  %4314 = vst.msk [vmem:[%s7711_s5 + $0x470] sm:$0xff] %vm851_vm1, %v5048_v48  ;;  %5061 = vrcp.f32 %v3414_v41  ;;  %v3224_v55 = vsub.f32 0.0, %v3090_v43  ;;  %3749 = vmatmul.msk.bf16.gmra.mxu0 %vm265_vm0, %v4681_v37  ;;  %3985 = vmatmul.msk.bf16.gmra.mxu1 %vm265_vm0, %v4715_v38  ;;  %v4750_v43 = vld [vmem:[%s7709_s0 + $0x290] sm:$0xff] }
 0x11a   :  { %v5052_v56 = vpop.eup %5051  ;;  %5063 = vrcp.f32 %v739_v49  ;;  %v1631_v57 = vadd.f32 1.0, %v5050_v52  ;;  %v549_v59 = vsub.f32 0.0, %v417_v50  ;;  %v2413_v61 = vmul.f32 1.442695, %v2332_v54  ;;  %4285 = vmatmul.msk.bf16.gmra.mxu2 %vm265_vm0, %v4749_v46  ;;  %4585 = vmatmul.msk.bf16.gmra.mxu3 %vm265_vm0, %v4783_v47 }
 0x11b   :  { %v5054_v60 = vpop.eup %5053  ;;  %4614 = vst.msk [vmem:[%s7711_s5 + $0x670] sm:$0xff] %vm851_vm1, %v5052_v56  ;;  %5065 = vpow2.f32 %v3303_v33  ;;  %v1441_v62 = vsub.f32 0.0, %v1309_v51  ;;  %v3305_v1 = vmul.f32 1.442695, %v3224_v55 }
 0x11c   :  { %v5056_v63 = vpop.eup %5055  ;;  %867 = vst.msk [vmem:[%s7711_s5 + $0x78] sm:$0xff] %vm851_vm1, %v5054_v60  ;;  %5067 = vrcp.f32 %v1631_v57  ;;  %v631_v4 = vmul.f32 1.442695, %v549_v59 }
 0x11d   :  { %v5058_v0 = vpop.eup %5057  ;;  %4015 = vst.msk [vmem:[%s7711_s5 + $0x278] sm:$0xff] %vm851_vm1, %v5056_v63  ;;  %5069 = vpow2.f32 %v629_v53  ;;  %v2200_v5 = vpop.f32.mrf.mxu2  ;;  %v1523_v40 = vmul.f32 1.442695, %v1441_v62 }
 0x11e   :  { %v5060_v2 = vpop.eup %5059  ;;  %v2523_v3 = vadd.f32 1.0, %v5058_v0  ;;  %5071 = vpow2.f32 %v1521_v58  ;;  %v3092_v6 = vpop.f32.mrf.mxu3  ;;  %v2201_v8 = vadd.f32 %v6338_v16, %v2200_v5 }
 0x11f   :  { %v5062_v7 = vpop.eup %5061  ;;  %4315 = vst.msk [vmem:[%s7711_s5 + $0x478] sm:$0xff] %vm851_vm1, %v5060_v2  ;;  %5073 = vpow2.f32 %v2413_v61  ;;  %v3093_v9 = vadd.f32 %v6338_v16, %v3092_v6  ;;  %v418_v10 = vpop.f32.mrf.mxu0 }
 0x120   :  { %v1310_v11 = vpop.f32.mrf.mxu1  ;;  %v5064_v12 = vpop.eup %5063  ;;  %4615 = vst.msk [vmem:[%s7711_s5 + $0x678] sm:$0xff] %vm851_vm1, %v5062_v7  ;;  %5075 = vrcp.f32 %v2523_v3  ;;  %v419_v13 = vadd.f32 %v6338_v16, %v418_v10  ;;  %v2333_v15 = vsub.f32 0.0, %v2201_v8 }
 0x121   :  { %v5066_v14 = vpop.eup %5065  ;;  %868 = vst.msk [vmem:[%s7711_s5 + $0x80] sm:$0xff] %vm851_vm1, %v5064_v12  ;;  %5077 = vpow2.f32 %v3305_v1  ;;  %v3225_v17 = vsub.f32 0.0, %v3093_v9  ;;  %v1311_v20 = vadd.f32 %v6338_v16, %v1310_v11 }
 0x122   :  { %v5068_v18 = vpop.eup %5067  ;;  %v3415_v19 = vadd.f32 1.0, %v5066_v14  ;;  %5079 = vpow2.f32 %v631_v4  ;;  %v2415_v22 = vmul.f32 1.442695, %v2333_v15  ;;  %v550_v23 = vsub.f32 0.0, %v419_v13 }
 0x123   :  { %v5070_v21 = vpop.eup %5069  ;;  %4016 = vst.msk [vmem:[%s7711_s5 + $0x280] sm:$0xff] %vm851_vm1, %v5068_v18  ;;  %5081 = vpow2.f32 %v1523_v40  ;;  %v3307_v28 = vmul.f32 1.442695, %v3225_v17  ;;  %v1442_v31 = vsub.f32 0.0, %v1311_v20 }
 0x124   :  { %v5072_v24 = vpop.eup %5071  ;;  %5083 = vrcp.f32 %v3415_v19  ;;  %v740_v25 = vadd.f32 1.0, %v5070_v21  ;;  %v633_v37 = vmul.f32 1.442695, %v550_v23 }
 0x125   :  { %v5074_v26 = vpop.eup %5073  ;;  %v1632_v27 = vadd.f32 1.0, %v5072_v24  ;;  %5085 = vpow2.f32 %v2415_v22  ;;  %v2202_v32 = vpop.f32.mrf.mxu2  ;;  %v1525_v56 = vmul.f32 1.442695, %v1442_v31  ;;  %v4683_v31 = vld [vmem:[%s7709_s0 + $0x98] sm:$0xff] }
 0x126   :  { %v5076_v29 = vpop.eup %5075  ;;  %5087 = vrcp.f32 %v740_v25  ;;  %v2524_v30 = vadd.f32 1.0, %v5074_v26  ;;  %v3094_v33 = vpop.f32.mrf.mxu3  ;;  %v2203_v38 = vadd.f32 %v6338_v16, %v2202_v32  ;;  %v4717_v32 = vld [vmem:[%s7709_s0 + $0x198] sm:$0xff] }
 0x127   :  { %v5078_v36 = vpop.eup %5077  ;;  %4316 = vst.msk [vmem:[%s7711_s5 + $0x480] sm:$0xff] %vm851_vm1, %v5076_v29  ;;  %5089 = vrcp.f32 %v1632_v27  ;;  %v3095_v39 = vadd.f32 %v6338_v16, %v3094_v33  ;;  %v421_v41 = vpop.f32.mrf.mxu0 }
 0x128   :  { %v1313_v42 = vpop.f32.mrf.mxu1  ;;  %v5080_v45 = vpop.eup %5079  ;;  %5091 = vrcp.f32 %v2524_v30  ;;  %v3416_v46 = vadd.f32 1.0, %v5078_v36  ;;  %v422_v47 = vadd.f32 %v6338_v16, %v421_v41  ;;  %v2334_v51 = vsub.f32 0.0, %v2203_v38  ;;  %v4785_v41 = vld [vmem:[%s7709_s0 + $0x398] sm:$0xff] }
 0x129   :  { %v1314_v48 = vadd.f32 %v6338_v16, %v1313_v42  ;;  %v5082_v49 = vpop.eup %5081  ;;  %v741_v50 = vadd.f32 1.0, %v5080_v45  ;;  %5093 = vpow2.f32 %v3307_v28  ;;  %v3226_v52 = vsub.f32 0.0, %v3095_v39  ;;  %3750 = vmatmul.msk.bf16.gmra.mxu0 %vm265_vm0, %v4682_v34  ;;  %3986 = vmatmul.msk.bf16.gmra.mxu1 %vm265_vm0, %v4716_v35  ;;  %v4751_v39 = vld [vmem:[%s7709_s0 + $0x298] sm:$0xff] }
 0x12a   :  { %v5084_v53 = vpop.eup %5083  ;;  %5095 = vrcp.f32 %v3416_v46  ;;  %v1633_v54 = vadd.f32 1.0, %v5082_v49  ;;  %v551_v57 = vsub.f32 0.0, %v422_v47  ;;  %4286 = vmatmul.msk.bf16.gmra.mxu2 %vm265_vm0, %v4750_v43  ;;  %4586 = vmatmul.msk.bf16.gmra.mxu3 %vm265_vm0, %v4784_v44  ;;  %v2417_v60 = vmul.f32 1.442695, %v2334_v51 }
 0x12b   :  { %v5086_v55 = vpop.eup %5085  ;;  %4616 = vst.msk [vmem:[%s7711_s5 + $0x680] sm:$0xff] %vm851_vm1, %v5084_v53  ;;  %5097 = vrcp.f32 %v741_v50  ;;  %v1443_v61 = vsub.f32 0.0, %v1314_v48  ;;  %v3309_v63 = vmul.f32 1.442695, %v3226_v52 }
 0x12c   :  { %v5088_v58 = vpop.eup %5087  ;;  %5099 = vrcp.f32 %v1633_v54  ;;  %v2525_v59 = vadd.f32 1.0, %v5086_v55  ;;  %v635_v4 = vmul.f32 1.442695, %v551_v57 }
 0x12d   :  { %v5090_v62 = vpop.eup %5089  ;;  %869 = vst.msk [vmem:[%s7711_s5 + $0x88] sm:$0xff] %vm851_vm1, %v5088_v58  ;;  %5101 = vpow2.f32 %v633_v37  ;;  %v2205_v1 = vpop.f32.mrf.mxu2  ;;  %v1527_v10 = vmul.f32 1.442695, %v1443_v61 }
 0x12e   :  { %v5092_v0 = vpop.eup %5091  ;;  %4017 = vst.msk [vmem:[%s7711_s5 + $0x288] sm:$0xff] %vm851_vm1, %v5090_v62  ;;  %5103 = vrcp.f32 %v2525_v59  ;;  %v3097_v2 = vpop.f32.mrf.mxu3  ;;  %v2206_v5 = vadd.f32 %v6338_v16, %v2205_v1 }
 0x12f   :  { %v5094_v3 = vpop.eup %5093  ;;  %4317 = vst.msk [vmem:[%s7711_s5 + $0x488] sm:$0xff] %vm851_vm1, %v5092_v0  ;;  %5105 = vpow2.f32 %v1525_v56  ;;  %v3098_v6 = vadd.f32 %v6338_v16, %v3097_v2  ;;  %v423_v7 = vpop.f32.mrf.mxu0 }
 0x130   :  { %v1315_v40 = vpop.f32.mrf.mxu1  ;;  %v5096_v8 = vpop.eup %5095  ;;  %v3417_v9 = vadd.f32 1.0, %v5094_v3  ;;  %5107 = vpow2.f32 %v2417_v60  ;;  %v424_v11 = vadd.f32 %v6338_v16, %v423_v7  ;;  %v2335_v13 = vsub.f32 0.0, %v2206_v5 }
 0x131   :  { %v5098_v12 = vpop.eup %5097  ;;  %4617 = vst.msk [vmem:[%s7711_s5 + $0x688] sm:$0xff] %vm851_vm1, %v5096_v8  ;;  %5109 = vpow2.f32 %v3309_v63  ;;  %v3227_v14 = vsub.f32 0.0, %v3098_v6  ;;  %v1316_v18 = vadd.f32 %v6338_v16, %v1315_v40 }
 0x132   :  { %v5100_v15 = vpop.eup %5099  ;;  %870 = vst.msk [vmem:[%s7711_s5 + $0x90] sm:$0xff] %vm851_vm1, %v5098_v12  ;;  %5111 = vrcp.f32 %v3417_v9  ;;  %v552_v17 = vsub.f32 0.0, %v424_v11  ;;  %v2419_v20 = vmul.f32 1.442695, %v2335_v13 }
 0x133   :  { %v5102_v19 = vpop.eup %5101  ;;  %4018 = vst.msk [vmem:[%s7711_s5 + $0x290] sm:$0xff] %vm851_vm1, %v5100_v15  ;;  %5113 = vpow2.f32 %v635_v4  ;;  %v3311_v21 = vmul.f32 1.442695, %v3227_v14  ;;  %v1444_v28 = vsub.f32 0.0, %v1316_v18 }
 0x134   :  { %v5104_v22 = vpop.eup %5103  ;;  %v742_v23 = vadd.f32 1.0, %v5102_v19  ;;  %5115 = vpow2.f32 %v1527_v10  ;;  %v637_v27 = vmul.f32 1.442695, %v552_v17 }
 0x135   :  { %v5106_v24 = vpop.eup %5105  ;;  %4318 = vst.msk [vmem:[%s7711_s5 + $0x490] sm:$0xff] %vm851_vm1, %v5104_v22  ;;  %5117 = vpow2.f32 %v2419_v20  ;;  %v2207_v29 = vpop.f32.mrf.mxu2  ;;  %v1529_v53 = vmul.f32 1.442695, %v1444_v28  ;;  %v4684_v28 = vld [vmem:[%s7709_s0 + $0xa0] sm:$0xff] }
 0x136   :  { %v5108_v25 = vpop.eup %5107  ;;  %5119 = vrcp.f32 %v742_v23  ;;  %v1634_v26 = vadd.f32 1.0, %v5106_v24  ;;  %v3099_v30 = vpop.f32.mrf.mxu3  ;;  %v2208_v35 = vadd.f32 %v6338_v16, %v2207_v29  ;;  %v4718_v29 = vld [vmem:[%s7709_s0 + $0x1a0] sm:$0xff] }
 0x137   :  { %v5110_v33 = vpop.eup %5109  ;;  %v2526_v34 = vadd.f32 1.0, %v5108_v25  ;;  %5121 = vpow2.f32 %v3311_v21  ;;  %v3100_v36 = vadd.f32 %v6338_v16, %v3099_v30  ;;  %v426_v37 = vpop.f32.mrf.mxu0 }
 0x138   :  { %v1318_v38 = vpop.f32.mrf.mxu1  ;;  %v5112_v42 = vpop.eup %5111  ;;  %5123 = vrcp.f32 %v1634_v26  ;;  %v3418_v43 = vadd.f32 1.0, %v5110_v33  ;;  %v427_v44 = vadd.f32 %v6338_v16, %v426_v37  ;;  %v2336_v46 = vsub.f32 0.0, %v2208_v35  ;;  %v4752_v35 = vld [vmem:[%s7709_s0 + $0x2a0] sm:$0xff] }
 0x139   :  { %v5114_v45 = vpop.eup %5113  ;;  %4618 = vst.msk [vmem:[%s7711_s5 + $0x690] sm:$0xff] %vm851_vm1, %v5112_v42  ;;  %5125 = vrcp.f32 %v2526_v34  ;;  %v1319_v47 = vadd.f32 %v6338_v16, %v1318_v38  ;;  %v3228_v50 = vsub.f32 0.0, %v3100_v36  ;;  %3751 = vmatmul.msk.bf16.gmra.mxu0 %vm265_vm0, %v4683_v31  ;;  %3987 = vmatmul.msk.bf16.gmra.mxu1 %vm265_vm0, %v4717_v32  ;;  %v4786_v36 = vld [vmem:[%s7709_s0 + $0x3a0] sm:$0xff] }
 0x13a   :  { %v5116_v48 = vpop.eup %5115  ;;  %5127 = vrcp.f32 %v3418_v43  ;;  %v743_v49 = vadd.f32 1.0, %v5114_v45  ;;  %v553_v54 = vsub.f32 0.0, %v427_v44  ;;  %4287 = vmatmul.msk.bf16.gmra.mxu2 %vm265_vm0, %v4751_v39  ;;  %4587 = vmatmul.msk.bf16.gmra.mxu3 %vm265_vm0, %v4785_v41  ;;  %v2421_v58 = vmul.f32 1.442695, %v2336_v46 }
 0x13b   :  { %v5118_v51 = vpop.eup %5117  ;;  %v1635_v52 = vadd.f32 1.0, %v5116_v48  ;;  %5129 = vpow2.f32 %v637_v27  ;;  %v1445_v59 = vsub.f32 0.0, %v1319_v47  ;;  %v3313_v62 = vmul.f32 1.442695, %v3228_v50 }
 0x13c   :  { %v5120_v55 = vpop.eup %5119  ;;  %5131 = vrcp.f32 %v743_v49  ;;  %v2527_v56 = vadd.f32 1.0, %v5118_v51  ;;  %v639_v2 = vmul.f32 1.442695, %v553_v54 }
 0x13d   :  { %v5122_v57 = vpop.eup %5121  ;;  %871 = vst.msk [vmem:[%s7711_s5 + $0x98] sm:$0xff] %vm851_vm1, %v5120_v55  ;;  %5133 = vrcp.f32 %v1635_v52  ;;  %v2210_v63 = vpop.f32.mrf.mxu2  ;;  %v1531_v10 = vmul.f32 1.442695, %v1445_v59 }
 0x13e   :  { %v5124_v60 = vpop.eup %5123  ;;  %5135 = vrcp.f32 %v2527_v56  ;;  %v3419_v61 = vadd.f32 1.0, %v5122_v57  ;;  %v3102_v0 = vpop.f32.mrf.mxu3  ;;  %v2211_v3 = vadd.f32 %v6338_v16, %v2210_v63  ;;  %v6675_v63 = vld [vmem:[%s7710_s2] ss:$0 sm:$0xff] }
 0x13f   :  { %v5126_v1 = vpop.eup %5125  ;;  %4019 = vst.msk [vmem:[%s7711_s5 + $0x298] sm:$0xff] %vm851_vm1, %v5124_v60  ;;  %5137 = vpow2.f32 %v1529_v53  ;;  %v3103_v4 = vadd.f32 %v6338_v16, %v3102_v0  ;;  %v428_v5 = vpop.f32.mrf.mxu0 }
 0x140   :  { %v1320_v6 = vpop.f32.mrf.mxu1  ;;  %v5128_v7 = vpop.eup %5127  ;;  %4319 = vst.msk [vmem:[%s7711_s5 + $0x498] sm:$0xff] %vm851_vm1, %v5126_v1  ;;  %5139 = vrcp.f32 %v3419_v61  ;;  %v429_v40 = vadd.f32 %v6338_v16, %v428_v5  ;;  %v2337_v11 = vsub.f32 0.0, %v2211_v3 }
 0x141   :  { %v1321_v8 = vadd.f32 %v6338_v16, %v1320_v6  ;;  %v5130_v9 = vpop.eup %5129  ;;  %4619 = vst.msk [vmem:[%s7711_s5 + $0x698] sm:$0xff] %vm851_vm1, %v5128_v7  ;;  %5141 = vpow2.f32 %v2421_v58  ;;  %v3229_v12 = vsub.f32 0.0, %v3103_v4 }
 0x142   :  { %v5132_v13 = vpop.eup %5131  ;;  %v744_v14 = vadd.f32 1.0, %v5130_v9  ;;  %5143 = vpow2.f32 %v3313_v62  ;;  %v554_v15 = vsub.f32 0.0, %v429_v40  ;;  %v2423_v18 = vmul.f32 1.442695, %v2337_v11 }
 0x143   :  { %v5134_v17 = vpop.eup %5133  ;;  %872 = vst.msk [vmem:[%s7711_s5 + $0xa0] sm:$0xff] %vm851_vm1, %v5132_v13  ;;  %5145 = vpow2.f32 %v639_v2  ;;  %v3315_v19 = vmul.f32 1.442695, %v3229_v12  ;;  %v1446_v21 = vsub.f32 0.0, %v1321_v8 }
 0x144   :  { %v5136_v20 = vpop.eup %5135  ;;  %4020 = vst.msk [vmem:[%s7711_s5 + $0x2a0] sm:$0xff] %vm851_vm1, %v5134_v17  ;;  %5147 = vrcp.f32 %v744_v14  ;;  %v641_v23 = vmul.f32 1.442695, %v554_v15 }
 0x145   :  { %v5138_v22 = vpop.eup %5137  ;;  %4320 = vst.msk [vmem:[%s7711_s5 + $0x4a0] sm:$0xff] %vm851_vm1, %v5136_v20  ;;  %5149 = vpow2.f32 %v1531_v10  ;;  %v2212_v26 = vpop.f32.mrf.mxu2  ;;  %v1533_v39 = vmul.f32 1.442695, %v1446_v21 }
 0x146   :  { %v5140_v24 = vpop.eup %5139  ;;  %v1636_v25 = vadd.f32 1.0, %v5138_v22  ;;  %5151 = vpow2.f32 %v2423_v18  ;;  %v3104_v27 = vpop.f32.mrf.mxu3  ;;  %v2213_v31 = vadd.f32 %v6338_v16, %v2212_v26  ;;  %v4719_v26 = vld [vmem:[%s7709_s0 + $0x1a8] sm:$0xff] }
 0x147   :  { %v5142_v30 = vpop.eup %5141  ;;  %4620 = vst.msk [vmem:[%s7711_s5 + $0x6a0] sm:$0xff] %vm851_vm1, %v5140_v24  ;;  %5153 = vpow2.f32 %v3315_v19  ;;  %v3105_v32 = vadd.f32 %v6338_v16, %v3104_v27  ;;  %v431_v33 = vpop.f32.mrf.mxu0 }
 0x148   :  { %v1323_v34 = vpop.f32.mrf.mxu1  ;;  %v5144_v37 = vpop.eup %5143  ;;  %5155 = vrcp.f32 %v1636_v25  ;;  %v2528_v38 = vadd.f32 1.0, %v5142_v30  ;;  %v432_v41 = vadd.f32 %v6338_v16, %v431_v33  ;;  %v2338_v44 = vsub.f32 0.0, %v2213_v31  ;;  %v4685_v25 = vld [vmem:[%s7709_s0 + $0xa8] sm:$0xff] }
 0x149   :  { %v5146_v42 = vpop.eup %5145  ;;  %v3420_v43 = vadd.f32 1.0, %v5144_v37  ;;  %5157 = vpow2.f32 %v641_v23  ;;  %v1324_v45 = vadd.f32 %v6338_v16, %v1323_v34  ;;  %v3230_v48 = vsub.f32 0.0, %v3105_v32  ;;  %3752 = vmatmul.msk.bf16.gmra.mxu0 %vm265_vm0, %v4684_v28  ;;  %3988 = vmatmul.msk.bf16.gmra.mxu1 %vm265_vm0, %v4718_v29  ;;  %v4753_v33 = vld [vmem:[%s7709_s0 + $0x2a8] sm:$0xff] }
 0x14a   :  { %v5148_v46 = vpop.eup %5147  ;;  %5159 = vrcp.f32 %v2528_v38  ;;  %v745_v47 = vadd.f32 1.0, %v5146_v42  ;;  %v555_v50 = vsub.f32 0.0, %v432_v41  ;;  %4288 = vmatmul.msk.bf16.gmra.mxu2 %vm265_vm0, %v4752_v35  ;;  %4588 = vmatmul.msk.bf16.gmra.mxu3 %vm265_vm0, %v4786_v36  ;;  %v2425_v54 = vmul.f32 1.442695, %v2338_v44  ;;  %v4787_v34 = vld [vmem:[%s7709_s0 + $0x3a8] sm:$0xff] }
 0x14b   :  { %v5150_v49 = vpop.eup %5149  ;;  %873 = vst.msk [vmem:[%s7711_s5 + $0xa8] sm:$0xff] %vm851_vm1, %v5148_v46  ;;  %5161 = vrcp.f32 %v3420_v43  ;;  %v1447_v55 = vsub.f32 0.0, %v1324_v45  ;;  %v3317_v58 = vmul.f32 1.442695, %v3230_v48 }
 0x14c   :  { %v5152_v16 = vpop.eup %5151  ;;  %5163 = vrcp.f32 %v745_v47  ;;  %v1637_v51 = vadd.f32 1.0, %v5150_v49  ;;  %v643_v62 = vmul.f32 1.442695, %v555_v50 }
 0x14d   :  { %v5154_v52 = vpop.eup %5153  ;;  %v2529_v53 = vadd.f32 1.0, %v5152_v16  ;;  %5165 = vpow2.f32 %v1533_v39  ;;  %v2215_v59 = vpop.f32.mrf.mxu2  ;;  %v1535_v8 = vmul.f32 1.442695, %v1447_v55 }
 0x14e   :  { %v5156_v56 = vpop.eup %5155  ;;  %5167 = vrcp.f32 %v1637_v51  ;;  %v3421_v57 = vadd.f32 1.0, %v5154_v52  ;;  %v3107_v60 = vpop.f32.mrf.mxu3  ;;  %v2216_v0 = vadd.f32 %v6675_v63, %v2215_v59 }
 0x14f   :  { %v5158_v61 = vpop.eup %5157  ;;  %4021 = vst.msk [vmem:[%s7711_s5 + $0x2a8] sm:$0xff] %vm851_vm1, %v5156_v56  ;;  %5169 = vrcp.f32 %v2529_v53  ;;  %v3108_v1 = vadd.f32 %v6675_v63, %v3107_v60  ;;  %v433_v2 = vpop.f32.mrf.mxu0 }
 0x150   :  { %v1325_v3 = vpop.f32.mrf.mxu1  ;;  %v5160_v4 = vpop.eup %5159  ;;  %5171 = vrcp.f32 %v3421_v57  ;;  %v746_v5 = vadd.f32 1.0, %v5158_v61  ;;  %v434_v6 = vadd.f32 %v6675_v63, %v433_v2  ;;  %v2339_v9 = vsub.f32 0.0, %v2216_v0 }
 0x151   :  { %v1326_v7 = vadd.f32 %v6675_v63, %v1325_v3  ;;  %v5162_v40 = vpop.eup %5161  ;;  %4321 = vst.msk [vmem:[%s7711_s5 + $0x4a8] sm:$0xff] %vm851_vm1, %v5160_v4  ;;  %5173 = vpow2.f32 %v2425_v54  ;;  %v3231_v10 = vsub.f32 0.0, %v3108_v1 }
 0x152   :  { %v5164_v11 = vpop.eup %5163  ;;  %4621 = vst.msk [vmem:[%s7711_s5 + $0x6a8] sm:$0xff] %vm851_vm1, %v5162_v40  ;;  %5175 = vrcp.f32 %v746_v5  ;;  %v556_v12 = vsub.f32 0.0, %v434_v6  ;;  %v2427_v14 = vmul.f32 1.442695, %v2339_v9 }
 0x153   :  { %v5166_v13 = vpop.eup %5165  ;;  %874 = vst.msk [vmem:[%s7711_s5 + $0xb0] sm:$0xff] %vm851_vm1, %v5164_v11  ;;  %5177 = vpow2.f32 %v3317_v58  ;;  %v1448_v15 = vsub.f32 0.0, %v1326_v7  ;;  %v3319_v19 = vmul.f32 1.442695, %v3231_v10 }
 0x154   :  { %v5168_v17 = vpop.eup %5167  ;;  %v1638_v18 = vadd.f32 1.0, %v5166_v13  ;;  %5179 = vpow2.f32 %v643_v62  ;;  %v645_v21 = vmul.f32 1.442695, %v556_v12 }
 0x155   :  { %v5170_v20 = vpop.eup %5169  ;;  %4022 = vst.msk [vmem:[%s7711_s5 + $0x2b0] sm:$0xff] %vm851_vm1, %v5168_v17  ;;  %5181 = vpow2.f32 %v1535_v8  ;;  %v2217_v23 = vpop.f32.mrf.mxu2  ;;  %v1537_v28 = vmul.f32 1.442695, %v1448_v15 }
 0x156   :  { %v5172_v22 = vpop.eup %5171  ;;  %4322 = vst.msk [vmem:[%s7711_s5 + $0x4b0] sm:$0xff] %vm851_vm1, %v5170_v20  ;;  %5183 = vrcp.f32 %v1638_v18  ;;  %v3109_v24 = vpop.f32.mrf.mxu3  ;;  %v2218_v29 = vadd.f32 %v6675_v63, %v2217_v23  ;;  %v4686_v23 = vld [vmem:[%s7709_s0 + $0xb0] sm:$0xff] }
 0x157   :  { %v5174_v27 = vpop.eup %5173  ;;  %4622 = vst.msk [vmem:[%s7711_s5 + $0x6b0] sm:$0xff] %vm851_vm1, %v5172_v22  ;;  %5185 = vpow2.f32 %v2427_v14  ;;  %v3110_v30 = vadd.f32 %v6675_v63, %v3109_v24  ;;  %v436_v31 = vpop.f32.mrf.mxu0  ;;  %v4720_v24 = vld [vmem:[%s7709_s0 + $0x1b0] sm:$0xff] }
 0x158   :  { %v1328_v32 = vpop.f32.mrf.mxu1  ;;  %v5176_v35 = vpop.eup %5175  ;;  %v2530_v36 = vadd.f32 1.0, %v5174_v27  ;;  %5187 = vpow2.f32 %v3319_v19  ;;  %v2340_v38 = vsub.f32 0.0, %v2218_v29  ;;  %v437_v39 = vadd.f32 %v6675_v63, %v436_v31  ;;  %v4754_v31 = vld [vmem:[%s7709_s0 + $0x2b0] sm:$0xff] }
 0x159   :  { %v5178_v37 = vpop.eup %5177  ;;  %875 = vst.msk [vmem:[%s7711_s5 + $0xb8] sm:$0xff] %vm851_vm1, %v5176_v35  ;;  %5189 = vpow2.f32 %v645_v21  ;;  %v3232_v43 = vsub.f32 0.0, %v3110_v30  ;;  %v1329_v44 = vadd.f32 %v6675_v63, %v1328_v32  ;;  %3753 = vmatmul.msk.bf16.gmra.mxu0 %vm265_vm0, %v4685_v25  ;;  %3989 = vmatmul.msk.bf16.gmra.mxu1 %vm265_vm0, %v4719_v26  ;;  %v4788_v32 = vld [vmem:[%s7709_s0 + $0x3b0] sm:$0xff] }
 0x15a   :  { %v5180_v41 = vpop.eup %5179  ;;  %5191 = vrcp.f32 %v2530_v36  ;;  %v3422_v42 = vadd.f32 1.0, %v5178_v37  ;;  %v2429_v47 = vmul.f32 1.442695, %v2340_v38  ;;  %4289 = vmatmul.msk.bf16.gmra.mxu2 %vm265_vm0, %v4753_v33  ;;  %4589 = vmatmul.msk.bf16.gmra.mxu3 %vm265_vm0, %v4787_v34  ;;  %v557_v16 = vsub.f32 0.0, %v437_v39 }
 0x15b   :  { %v5182_v45 = vpop.eup %5181  ;;  %v747_v46 = vadd.f32 1.0, %v5180_v41  ;;  %5193 = vpow2.f32 %v1537_v28  ;;  %v3321_v53 = vmul.f32 1.442695, %v3232_v43  ;;  %v1449_v54 = vsub.f32 0.0, %v1329_v44 }
 0x15c   :  { %v5184_v48 = vpop.eup %5183  ;;  %5195 = vrcp.f32 %v3422_v42  ;;  %v1639_v49 = vadd.f32 1.0, %v5182_v45  ;;  %v647_v5 = vmul.f32 1.442695, %v557_v16 }
 0x15d   :  { %v5186_v50 = vpop.eup %5185  ;;  %4023 = vst.msk [vmem:[%s7711_s5 + $0x2b8] sm:$0xff] %vm851_vm1, %v5184_v48  ;;  %5197 = vrcp.f32 %v747_v46  ;;  %v2220_v55 = vpop.f32.mrf.mxu2  ;;  %v1539_v9 = vmul.f32 1.442695, %v1449_v54 }
 0x15e   :  { %v5188_v51 = vpop.eup %5187  ;;  %5199 = vrcp.f32 %v1639_v49  ;;  %v2531_v52 = vadd.f32 1.0, %v5186_v50  ;;  %v3112_v56 = vpop.f32.mrf.mxu3  ;;  %v2221_v59 = vadd.f32 %v6675_v63, %v2220_v55 }
 0x15f   :  { %v5190_v57 = vpop.eup %5189  ;;  %v3423_v58 = vadd.f32 1.0, %v5188_v51  ;;  %5201 = vpow2.f32 %v2429_v47  ;;  %v3113_v60 = vadd.f32 %v6675_v63, %v3112_v56  ;;  %v438_v61 = vpop.f32.mrf.mxu0 }
 0x160   :  { %v1330_v62 = vpop.f32.mrf.mxu1  ;;  %v5192_v0 = vpop.eup %5191  ;;  %5203 = vrcp.f32 %v2531_v52  ;;  %v748_v1 = vadd.f32 1.0, %v5190_v57  ;;  %v439_v2 = vadd.f32 %v6675_v63, %v438_v61  ;;  %v2341_v6 = vsub.f32 0.0, %v2221_v59 }
 0x161   :  { %v1331_v3 = vadd.f32 %v6675_v63, %v1330_v62  ;;  %v5194_v4 = vpop.eup %5193  ;;  %4323 = vst.msk [vmem:[%s7711_s5 + $0x4b8] sm:$0xff] %vm851_vm1, %v5192_v0  ;;  %5205 = vrcp.f32 %v3423_v58  ;;  %v3233_v7 = vsub.f32 0.0, %v3113_v60 }
 0x162   :  { %v5196_v40 = vpop.eup %5195  ;;  %5207 = vrcp.f32 %v748_v1  ;;  %v1640_v8 = vadd.f32 1.0, %v5194_v4  ;;  %v558_v10 = vsub.f32 0.0, %v439_v2  ;;  %v2431_v12 = vmul.f32 1.442695, %v2341_v6 }
 0x163   :  { %v5198_v11 = vpop.eup %5197  ;;  %4623 = vst.msk [vmem:[%s7711_s5 + $0x6b8] sm:$0xff] %vm851_vm1, %v5196_v40  ;;  %5209 = vpow2.f32 %v3321_v53  ;;  %v1450_v13 = vsub.f32 0.0, %v1331_v3  ;;  %v3323_v17 = vmul.f32 1.442695, %v3233_v7 }
 0x164   :  { %v5200_v14 = vpop.eup %5199  ;;  %876 = vst.msk [vmem:[%s7711_s5 + $0xc0] sm:$0xff] %vm851_vm1, %v5198_v11  ;;  %5211 = vrcp.f32 %v1640_v8  ;;  %v649_v20 = vmul.f32 1.442695, %v558_v10 }
 0x165   :  { %v5202_v15 = vpop.eup %5201  ;;  %4024 = vst.msk [vmem:[%s7711_s5 + $0x2c0] sm:$0xff] %vm851_vm1, %v5200_v14  ;;  %5213 = vpow2.f32 %v647_v5  ;;  %v2222_v21 = vpop.f32.mrf.mxu2  ;;  %v1541_v26 = vmul.f32 1.442695, %v1450_v13 }
 0x166   :  { %v5204_v18 = vpop.eup %5203  ;;  %v2532_v19 = vadd.f32 1.0, %v5202_v15  ;;  %5215 = vpow2.f32 %v1539_v9  ;;  %v3114_v22 = vpop.f32.mrf.mxu3  ;;  %v2223_v27 = vadd.f32 %v6675_v63, %v2222_v21 }
 0x167   :  { %v5206_v25 = vpop.eup %5205  ;;  %4324 = vst.msk [vmem:[%s7711_s5 + $0x4c0] sm:$0xff] %vm851_vm1, %v5204_v18  ;;  %5217 = vpow2.f32 %v2431_v12  ;;  %v3115_v28 = vadd.f32 %v6675_v63, %v3114_v22  ;;  %v441_v29 = vpop.f32.mrf.mxu0 }
 0x168   :  { %v1333_v30 = vpop.f32.mrf.mxu1  ;;  %v5208_v33 = vpop.eup %5207  ;;  %4624 = vst.msk [vmem:[%s7711_s5 + $0x6c0] sm:$0xff] %vm851_vm1, %v5206_v25  ;;  %5219 = vrcp.f32 %v2532_v19  ;;  %v442_v34 = vadd.f32 %v6675_v63, %v441_v29  ;;  %v2342_v36 = vsub.f32 0.0, %v2223_v27  ;;  %v4687_v19 = vld [vmem:[%s7709_s0 + $0xb8] sm:$0xff] }
 0x169   :  { %v5210_v35 = vpop.eup %5209  ;;  %877 = vst.msk [vmem:[%s7711_s5 + $0xc8] sm:$0xff] %vm851_vm1, %v5208_v33  ;;  %5221 = vpow2.f32 %v3323_v17  ;;  %v3234_v37 = vsub.f32 0.0, %v3115_v28  ;;  %v1334_v41 = vadd.f32 %v6675_v63, %v1333_v30  ;;  %3754 = vmatmul.msk.bf16.gmra.mxu0 %vm265_vm0, %v4686_v23  ;;  %3990 = vmatmul.msk.bf16.gmra.mxu1 %vm265_vm0, %v4720_v24  ;;  %v4755_v27 = vld [vmem:[%s7709_s0 + $0x2b8] sm:$0xff] }
 0x16a   :  { %v5212_v38 = vpop.eup %5211  ;;  %v3424_v39 = vadd.f32 1.0, %v5210_v35  ;;  %5223 = vpow2.f32 %v649_v20  ;;  %v2433_v43 = vmul.f32 1.442695, %v2342_v36  ;;  %v559_v44 = vsub.f32 0.0, %v442_v34  ;;  %4290 = vmatmul.msk.bf16.gmra.mxu2 %vm265_vm0, %v4754_v31  ;;  %4590 = vmatmul.msk.bf16.gmra.mxu3 %vm265_vm0, %v4788_v32  ;;  %v4721_v20 = vld [vmem:[%s7709_s0 + $0x1b8] sm:$0xff] }
 0x16b   :  { %v5214_v42 = vpop.eup %5213  ;;  %4025 = vst.msk [vmem:[%s7711_s5 + $0x2c8] sm:$0xff] %vm851_vm1, %v5212_v38  ;;  %5225 = vpow2.f32 %v1541_v26  ;;  %v3325_v49 = vmul.f32 1.442695, %v3234_v37  ;;  %v1451_v51 = vsub.f32 0.0, %v1334_v41  ;;  %v4789_v28 = vld [vmem:[%s7709_s0 + $0x3b8] sm:$0xff] }
 0x16c   :  { %v5216_v45 = vpop.eup %5215  ;;  %5227 = vrcp.f32 %v3424_v39  ;;  %v749_v46 = vadd.f32 1.0, %v5214_v42  ;;  %v651_v55 = vmul.f32 1.442695, %v559_v44 }
 0x16d   :  { %v5218_v47 = vpop.eup %5217  ;;  %v1641_v48 = vadd.f32 1.0, %v5216_v45  ;;  %5229 = vpow2.f32 %v2433_v43  ;;  %v2225_v52 = vpop.f32.mrf.mxu2  ;;  %v1543_v40 = vmul.f32 1.442695, %v1451_v51 }
 0x16e   :  { %v5220_v50 = vpop.eup %5219  ;;  %5231 = vrcp.f32 %v749_v46  ;;  %v2533_v16 = vadd.f32 1.0, %v5218_v47  ;;  %v3117_v53 = vpop.f32.mrf.mxu3  ;;  %v2226_v56 = vadd.f32 %v6675_v63, %v2225_v52 }
 0x16f   :  { %v5222_v54 = vpop.eup %5221  ;;  %4325 = vst.msk [vmem:[%s7711_s5 + $0x4c8] sm:$0xff] %vm851_vm1, %v5220_v50  ;;  %5233 = vrcp.f32 %v1641_v48  ;;  %v3118_v57 = vadd.f32 %v6675_v63, %v3117_v53  ;;  %v443_v58 = vpop.f32.mrf.mxu0 }
 0x170   :  { %v1335_v59 = vpop.f32.mrf.mxu1  ;;  %v5224_v60 = vpop.eup %5223  ;;  %5235 = vrcp.f32 %v2533_v16  ;;  %v3425_v61 = vadd.f32 1.0, %v5222_v54  ;;  %v444_v62 = vadd.f32 %v6675_v63, %v443_v58  ;;  %v2343_v3 = vsub.f32 0.0, %v2226_v56 }
 0x171   :  { %v1336_v0 = vadd.f32 %v6675_v63, %v1335_v59  ;;  %v5226_v1 = vpop.eup %5225  ;;  %v750_v2 = vadd.f32 1.0, %v5224_v60  ;;  %5237 = vpow2.f32 %v3325_v49  ;;  %v3235_v4 = vsub.f32 0.0, %v3118_v57 }
 0x172   :  { %v5228_v5 = vpop.eup %5227  ;;  %5239 = vrcp.f32 %v3425_v61  ;;  %v1642_v6 = vadd.f32 1.0, %v5226_v1  ;;  %v560_v8 = vsub.f32 0.0, %v444_v62  ;;  %v2435_v11 = vmul.f32 1.442695, %v2343_v3 }
 0x173   :  { %v5230_v7 = vpop.eup %5229  ;;  %4625 = vst.msk [vmem:[%s7711_s5 + $0x6c8] sm:$0xff] %vm851_vm1, %v5228_v5  ;;  %5241 = vrcp.f32 %v750_v2  ;;  %v1452_v12 = vsub.f32 0.0, %v1336_v0  ;;  %v3327_v14 = vmul.f32 1.442695, %v3235_v4 }
 0x174   :  { %v5232_v9 = vpop.eup %5231  ;;  %5243 = vrcp.f32 %v1642_v6  ;;  %v2534_v10 = vadd.f32 1.0, %v5230_v7  ;;  %v653_v22 = vmul.f32 1.442695, %v560_v8 }
 0x175   :  { %v5234_v13 = vpop.eup %5233  ;;  %878 = vst.msk [vmem:[%s7711_s5 + $0xd0] sm:$0xff] %vm851_vm1, %v5232_v9  ;;  %5245 = vpow2.f32 %v651_v55  ;;  %v2227_v17 = vpop.f32.mrf.mxu2  ;;  %v1545_v31 = vmul.f32 1.442695, %v1452_v12 }
 0x176   :  { %v5236_v15 = vpop.eup %5235  ;;  %4026 = vst.msk [vmem:[%s7711_s5 + $0x2d0] sm:$0xff] %vm851_vm1, %v5234_v13  ;;  %5247 = vrcp.f32 %v2534_v10  ;;  %v3119_v18 = vpop.f32.mrf.mxu3  ;;  %v2228_v23 = vadd.f32 %v6675_v63, %v2227_v17  ;;  %v4688_v17 = vld [vmem:[%s7709_s0 + $0xc0] sm:$0xff] }
 0x177   :  { %v5238_v21 = vpop.eup %5237  ;;  %4326 = vst.msk [vmem:[%s7711_s5 + $0x4d0] sm:$0xff] %vm851_vm1, %v5236_v15  ;;  %5249 = vpow2.f32 %v1543_v40  ;;  %v3120_v24 = vadd.f32 %v6675_v63, %v3119_v18  ;;  %v446_v25 = vpop.f32.mrf.mxu0  ;;  %v4722_v18 = vld [vmem:[%s7709_s0 + $0x1c0] sm:$0xff] }
 0x178   :  { %v1338_v26 = vpop.f32.mrf.mxu1  ;;  %v5240_v29 = vpop.eup %5239  ;;  %v3426_v30 = vadd.f32 1.0, %v5238_v21  ;;  %5251 = vpow2.f32 %v2435_v11  ;;  %v447_v32 = vadd.f32 %v6675_v63, %v446_v25  ;;  %v2344_v34 = vsub.f32 0.0, %v2228_v23  ;;  %v4756_v25 = vld [vmem:[%s7709_s0 + $0x2c0] sm:$0xff] }
 0x179   :  { %v5242_v33 = vpop.eup %5241  ;;  %4626 = vst.msk [vmem:[%s7711_s5 + $0x6d0] sm:$0xff] %vm851_vm1, %v5240_v29  ;;  %5253 = vpow2.f32 %v3327_v14  ;;  %v3236_v35 = vsub.f32 0.0, %v3120_v24  ;;  %v1339_v38 = vadd.f32 %v6675_v63, %v1338_v26  ;;  %3755 = vmatmul.msk.bf16.gmra.mxu0 %vm265_vm0, %v4687_v19  ;;  %3991 = vmatmul.msk.bf16.gmra.mxu1 %vm265_vm0, %v4721_v20  ;;  %v4790_v26 = vld [vmem:[%s7709_s0 + $0x3c0] sm:$0xff] }
 0x17a   :  { %v5244_v36 = vpop.eup %5243  ;;  %879 = vst.msk [vmem:[%s7711_s5 + $0xd8] sm:$0xff] %vm851_vm1, %v5242_v33  ;;  %5255 = vrcp.f32 %v3426_v30  ;;  %v561_v37 = vsub.f32 0.0, %v447_v32  ;;  %v2437_v41 = vmul.f32 1.442695, %v2344_v34  ;;  %4291 = vmatmul.msk.bf16.gmra.mxu2 %vm265_vm0, %v4755_v27  ;;  %4591 = vmatmul.msk.bf16.gmra.mxu3 %vm265_vm0, %v4789_v28 }
 0x17b   :  { %v5246_v39 = vpop.eup %5245  ;;  %4027 = vst.msk [vmem:[%s7711_s5 + $0x2d8] sm:$0xff] %vm851_vm1, %v5244_v36  ;;  %5257 = vpow2.f32 %v653_v22  ;;  %v3329_v42 = vmul.f32 1.442695, %v3236_v35  ;;  %v1453_v49 = vsub.f32 0.0, %v1339_v38 }
 0x17c   :  { %v5248_v43 = vpop.eup %5247  ;;  %v751_v44 = vadd.f32 1.0, %v5246_v39  ;;  %5259 = vpow2.f32 %v1545_v31  ;;  %v655_v48 = vmul.f32 1.442695, %v561_v37 }
 0x17d   :  { %v5250_v45 = vpop.eup %5249  ;;  %4327 = vst.msk [vmem:[%s7711_s5 + $0x4d8] sm:$0xff] %vm851_vm1, %v5248_v43  ;;  %5261 = vpow2.f32 %v2437_v41  ;;  %v2230_v50 = vpop.f32.mrf.mxu2  ;;  %v1547_v5 = vmul.f32 1.442695, %v1453_v49 }
 0x17e   :  { %v5252_v46 = vpop.eup %5251  ;;  %5263 = vrcp.f32 %v751_v44  ;;  %v1643_v47 = vadd.f32 1.0, %v5250_v45  ;;  %v3122_v16 = vpop.f32.mrf.mxu3  ;;  %v2231_v53 = vadd.f32 %v6675_v63, %v2230_v50 }
 0x17f   :  { %v5254_v51 = vpop.eup %5253  ;;  %v2535_v52 = vadd.f32 1.0, %v5252_v46  ;;  %5265 = vpow2.f32 %v3329_v42  ;;  %v3123_v54 = vadd.f32 %v6675_v63, %v3122_v16  ;;  %v448_v55 = vpop.f32.mrf.mxu0 }
 0x180   :  { %v1340_v56 = vpop.f32.mrf.mxu1  ;;  %v5256_v57 = vpop.eup %5255  ;;  %5267 = vrcp.f32 %v1643_v47  ;;  %v3427_v58 = vadd.f32 1.0, %v5254_v51  ;;  %v449_v59 = vadd.f32 %v6675_v63, %v448_v55  ;;  %v2345_v61 = vsub.f32 0.0, %v2231_v53 }
 0x181   :  { %v5258_v60 = vpop.eup %5257  ;;  %4627 = vst.msk [vmem:[%s7711_s5 + $0x6d8] sm:$0xff] %vm851_vm1, %v5256_v57  ;;  %5269 = vrcp.f32 %v2535_v52  ;;  %v1341_v62 = vadd.f32 %v6675_v63, %v1340_v56  ;;  %v3237_v2 = vsub.f32 0.0, %v3123_v54 }
 0x182   :  { %v5260_v0 = vpop.eup %5259  ;;  %5271 = vrcp.f32 %v3427_v58  ;;  %v752_v1 = vadd.f32 1.0, %v5258_v60  ;;  %v562_v6 = vsub.f32 0.0, %v449_v59  ;;  %v2439_v9 = vmul.f32 1.442695, %v2345_v61 }
 0x183   :  { %v5262_v3 = vpop.eup %5261  ;;  %v1644_v4 = vadd.f32 1.0, %v5260_v0  ;;  %5273 = vpow2.f32 %v655_v48  ;;  %v1454_v10 = vsub.f32 0.0, %v1341_v62  ;;  %v3331_v13 = vmul.f32 1.442695, %v3237_v2 }
 0x184   :  { %v5264_v7 = vpop.eup %5263  ;;  %5275 = vrcp.f32 %v752_v1  ;;  %v2536_v40 = vadd.f32 1.0, %v5262_v3  ;;  %v657_v20 = vmul.f32 1.442695, %v562_v6 }
 0x185   :  { %v5266_v8 = vpop.eup %5265  ;;  %880 = vst.msk [vmem:[%s7711_s5 + $0xe0] sm:$0xff] %vm851_vm1, %v5264_v7  ;;  %5277 = vrcp.f32 %v1644_v4  ;;  %v2232_v14 = vpop.f32.mrf.mxu2  ;;  %v1549_v31 = vmul.f32 1.442695, %v1454_v10 }
 0x186   :  { %v5268_v11 = vpop.eup %5267  ;;  %5279 = vrcp.f32 %v2536_v40  ;;  %v3428_v12 = vadd.f32 1.0, %v5266_v8  ;;  %v3124_v15 = vpop.f32.mrf.mxu3  ;;  %v2233_v21 = vadd.f32 %v6675_v63, %v2232_v14  ;;  %v4723_v14 = vld [vmem:[%s7709_s0 + $0x1c8] sm:$0xff] }
 0x187   :  { %v5270_v19 = vpop.eup %5269  ;;  %4028 = vst.msk [vmem:[%s7711_s5 + $0x2e0] sm:$0xff] %vm851_vm1, %v5268_v11  ;;  %5281 = vpow2.f32 %v1547_v5  ;;  %v3125_v22 = vadd.f32 %v6675_v63, %v3124_v15  ;;  %v451_v23 = vpop.f32.mrf.mxu0 }
 0x188   :  { %v1343_v24 = vpop.f32.mrf.mxu1  ;;  %v5272_v27 = vpop.eup %5271  ;;  %4328 = vst.msk [vmem:[%s7711_s5 + $0x4e0] sm:$0xff] %vm851_vm1, %v5270_v19  ;;  %5283 = vrcp.f32 %v3428_v12  ;;  %v452_v28 = vadd.f32 %v6675_v63, %v451_v23  ;;  %v2346_v32 = vsub.f32 0.0, %v2233_v21  ;;  %v4791_v23 = vld [vmem:[%s7709_s0 + $0x3c8] sm:$0xff] }
 0x189   :  { %v1344_v29 = vadd.f32 %v6675_v63, %v1343_v24  ;;  %v5274_v30 = vpop.eup %5273  ;;  %4628 = vst.msk [vmem:[%s7711_s5 + $0x6e0] sm:$0xff] %vm851_vm1, %v5272_v27  ;;  %5285 = vpow2.f32 %v2439_v9  ;;  %v3238_v33 = vsub.f32 0.0, %v3125_v22  ;;  %3756 = vmatmul.msk.bf16.gmra.mxu0 %vm265_vm0, %v4688_v17  ;;  %3992 = vmatmul.msk.bf16.gmra.mxu1 %vm265_vm0, %v4722_v18  ;;  %v4757_v22 = vld [vmem:[%s7709_s0 + $0x2c8] sm:$0xff] }
 0x18a   :  { %v5276_v34 = vpop.eup %5275  ;;  %v753_v35 = vadd.f32 1.0, %v5274_v30  ;;  %5287 = vpow2.f32 %v3331_v13  ;;  %v563_v36 = vsub.f32 0.0, %v452_v28  ;;  %v2441_v38 = vmul.f32 1.442695, %v2346_v32  ;;  %4292 = vmatmul.msk.bf16.gmra.mxu2 %vm265_vm0, %v4756_v25  ;;  %4592 = vmatmul.msk.bf16.gmra.mxu3 %vm265_vm0, %v4790_v26  ;;  %v4689_v13 = vld [vmem:[%s7709_s0 + $0xc8] sm:$0xff] }
 0x18b   :  { %v5278_v37 = vpop.eup %5277  ;;  %881 = vst.msk [vmem:[%s7711_s5 + $0xe8] sm:$0xff] %vm851_vm1, %v5276_v34  ;;  %5289 = vpow2.f32 %v657_v20  ;;  %v3333_v39 = vmul.f32 1.442695, %v3238_v33  ;;  %v1455_v42 = vsub.f32 0.0, %v1344_v29 }
 0x18c   :  { %v5280_v41 = vpop.eup %5279  ;;  %4029 = vst.msk [vmem:[%s7711_s5 + $0x2e8] sm:$0xff] %vm851_vm1, %v5278_v37  ;;  %5291 = vrcp.f32 %v753_v35  ;;  %v659_v44 = vmul.f32 1.442695, %v563_v36 }
 0x18d   :  { %v5282_v43 = vpop.eup %5281  ;;  %4329 = vst.msk [vmem:[%s7711_s5 + $0x4e8] sm:$0xff] %vm851_vm1, %v5280_v41  ;;  %5293 = vpow2.f32 %v1549_v31  ;;  %v2235_v47 = vpop.f32.mrf.mxu2  ;;  %v1551_v55 = vmul.f32 1.442695, %v1455_v42 }
 0x18e   :  { %v5284_v45 = vpop.eup %5283  ;;  %v1645_v46 = vadd.f32 1.0, %v5282_v43  ;;  %5295 = vpow2.f32 %v2441_v38  ;;  %v3127_v48 = vpop.f32.mrf.mxu3  ;;  %v2236_v50 = vadd.f32 %v6675_v63, %v2235_v47 }
 0x18f   :  { %v5286_v49 = vpop.eup %5285  ;;  %4629 = vst.msk [vmem:[%s7711_s5 + $0x6e8] sm:$0xff] %vm851_vm1, %v5284_v45  ;;  %5297 = vpow2.f32 %v3333_v39  ;;  %v3128_v16 = vadd.f32 %v6675_v63, %v3127_v48  ;;  %v453_v51 = vpop.f32.mrf.mxu0 }
 0x190   :  { %v1345_v52 = vpop.f32.mrf.mxu1  ;;  %v5288_v53 = vpop.eup %5287  ;;  %5299 = vrcp.f32 %v1645_v46  ;;  %v2537_v54 = vadd.f32 1.0, %v5286_v49  ;;  %v454_v56 = vadd.f32 %v6675_v63, %v453_v51  ;;  %v2347_v59 = vsub.f32 0.0, %v2236_v50 }
 0x191   :  { %v5290_v57 = vpop.eup %5289  ;;  %v3429_v58 = vadd.f32 1.0, %v5288_v53  ;;  %5301 = vpow2.f32 %v659_v44  ;;  %v1346_v60 = vadd.f32 %v6675_v63, %v1345_v52  ;;  %v3239_v0 = vsub.f32 0.0, %v3128_v16 }
 0x192   :  { %v5292_v61 = vpop.eup %5291  ;;  %5303 = vrcp.f32 %v2537_v54  ;;  %v754_v62 = vadd.f32 1.0, %v5290_v57  ;;  %v564_v2 = vsub.f32 0.0, %v454_v56  ;;  %v2443_v7 = vmul.f32 1.442695, %v2347_v59 }
 0x193   :  { %v5294_v1 = vpop.eup %5293  ;;  %882 = vst.msk [vmem:[%s7711_s5 + $0xf0] sm:$0xff] %vm851_vm1, %v5292_v61  ;;  %5305 = vrcp.f32 %v3429_v58  ;;  %v1456_v40 = vsub.f32 0.0, %v1346_v60  ;;  %v3335_v10 = vmul.f32 1.442695, %v3239_v0 }
 0x194   :  { %v5296_v3 = vpop.eup %5295  ;;  %5307 = vrcp.f32 %v754_v62  ;;  %v1646_v4 = vadd.f32 1.0, %v5294_v1  ;;  %v661_v17 = vmul.f32 1.442695, %v564_v2 }
 0x195   :  { %v5298_v5 = vpop.eup %5297  ;;  %v2538_v6 = vadd.f32 1.0, %v5296_v3  ;;  %5309 = vpow2.f32 %v1551_v55  ;;  %v2237_v11 = vpop.f32.mrf.mxu2  ;;  %v1553_v29 = vmul.f32 1.442695, %v1456_v40 }
 0x196   :  { %v5300_v8 = vpop.eup %5299  ;;  %5311 = vrcp.f32 %v1646_v4  ;;  %v3430_v9 = vadd.f32 1.0, %v5298_v5  ;;  %v3129_v12 = vpop.f32.mrf.mxu3  ;;  %v2238_v18 = vadd.f32 %v6675_v63, %v2237_v11 }
 0x197   :  { %v5302_v15 = vpop.eup %5301  ;;  %4030 = vst.msk [vmem:[%s7711_s5 + $0x2f0] sm:$0xff] %vm851_vm1, %v5300_v8  ;;  %5313 = vrcp.f32 %v2538_v6  ;;  %v3130_v19 = vadd.f32 %v6675_v63, %v3129_v12  ;;  %v456_v20 = vpop.f32.mrf.mxu0 }
 0x198   :  { %v1348_v21 = vpop.f32.mrf.mxu1  ;;  %v5304_v24 = vpop.eup %5303  ;;  %5315 = vrcp.f32 %v3430_v9  ;;  %v755_v25 = vadd.f32 1.0, %v5302_v15  ;;  %v457_v26 = vadd.f32 %v6675_v63, %v456_v20  ;;  %v2348_v30 = vsub.f32 0.0, %v2238_v18  ;;  %v4690_v9 = vld [vmem:[%s7709_s0 + $0xd0] sm:$0xff] }
 0x199   :  { %v1349_v27 = vadd.f32 %v6675_v63, %v1348_v21  ;;  %v5306_v28 = vpop.eup %5305  ;;  %4330 = vst.msk [vmem:[%s7711_s5 + $0x4f0] sm:$0xff] %vm851_vm1, %v5304_v24  ;;  %5317 = vpow2.f32 %v2443_v7  ;;  %v3240_v31 = vsub.f32 0.0, %v3130_v19  ;;  %3757 = vmatmul.msk.bf16.gmra.mxu0 %vm265_vm0, %v4689_v13  ;;  %3993 = vmatmul.msk.bf16.gmra.mxu1 %vm265_vm0, %v4723_v14  ;;  %v4758_v18 = vld [vmem:[%s7709_s0 + $0x2d0] sm:$0xff] }
 0x19a   :  { %v5308_v32 = vpop.eup %5307  ;;  %4630 = vst.msk [vmem:[%s7711_s5 + $0x6f0] sm:$0xff] %vm851_vm1, %v5306_v28  ;;  %5319 = vrcp.f32 %v755_v25  ;;  %v565_v33 = vsub.f32 0.0, %v457_v26  ;;  %v2445_v35 = vmul.f32 1.442695, %v2348_v30  ;;  %4293 = vmatmul.msk.bf16.gmra.mxu2 %vm265_vm0, %v4757_v22  ;;  %4593 = vmatmul.msk.bf16.gmra.mxu3 %vm265_vm0, %v4791_v23  ;;  %v4792_v19 = vld [vmem:[%s7709_s0 + $0x3d0] sm:$0xff] }
 0x19b   :  { %v5310_v34 = vpop.eup %5309  ;;  %883 = vst.msk [vmem:[%s7711_s5 + $0xf8] sm:$0xff] %vm851_vm1, %v5308_v32  ;;  %5321 = vpow2.f32 %v3335_v10  ;;  %v1457_v36 = vsub.f32 0.0, %v1349_v27  ;;  %v3337_v39 = vmul.f32 1.442695, %v3240_v31  ;;  %v4724_v10 = vld [vmem:[%s7709_s0 + $0x1d0] sm:$0xff] }
 0x19c   :  { %v5312_v37 = vpop.eup %5311  ;;  %v1647_v38 = vadd.f32 1.0, %v5310_v34  ;;  %5323 = vpow2.f32 %v661_v17  ;;  %v663_v42 = vmul.f32 1.442695, %v565_v33 }
 0x19d   :  { %v5314_v41 = vpop.eup %5313  ;;  %4031 = vst.msk [vmem:[%s7711_s5 + $0x2f8] sm:$0xff] %vm851_vm1, %v5312_v37  ;;  %5325 = vpow2.f32 %v1553_v29  ;;  %v2240_v44 = vpop.f32.mrf.mxu2  ;;  %v1555_v47 = vmul.f32 1.442695, %v1457_v36 }
 0x19e   :  { %v5316_v43 = vpop.eup %5315  ;;  %4331 = vst.msk [vmem:[%s7711_s5 + $0x4f8] sm:$0xff] %vm851_vm1, %v5314_v41  ;;  %5327 = vrcp.f32 %v1647_v38  ;;  %v3132_v45 = vpop.f32.mrf.mxu3  ;;  %v2241_v48 = vadd.f32 %v6675_v63, %v2240_v44 }
 0x19f   :  { %v5318_v46 = vpop.eup %5317  ;;  %4631 = vst.msk [vmem:[%s7711_s5 + $0x6f8] sm:$0xff] %vm851_vm1, %v5316_v43  ;;  %5329 = vpow2.f32 %v2445_v35  ;;  %v3133_v49 = vadd.f32 %v6675_v63, %v3132_v45  ;;  %v458_v50 = vpop.f32.mrf.mxu0  ;;  %v7020_v45 = vld [vmem:[%s7710_s2] ss:$0 sm:$0xff] }
 0x1a0   :  { %v1350_v16 = vpop.f32.mrf.mxu1  ;;  %v5320_v51 = vpop.eup %5319  ;;  %v2539_v52 = vadd.f32 1.0, %v5318_v46  ;;  %5331 = vpow2.f32 %v3337_v39  ;;  %v2349_v54 = vsub.f32 0.0, %v2241_v48  ;;  %v459_v55 = vadd.f32 %v6675_v63, %v458_v50 }
 0x1a1   :  { %v5322_v53 = vpop.eup %5321  ;;  %884 = vst.msk [vmem:[%s7711_s5 + $0x100] sm:$0xff] %vm851_vm1, %v5320_v51  ;;  %5333 = vpow2.f32 %v663_v42  ;;  %v3241_v58 = vsub.f32 0.0, %v3133_v49  ;;  %v1351_v59 = vadd.f32 %v6675_v63, %v1350_v16 }
 0x1a2   :  { %v5324_v56 = vpop.eup %5323  ;;  %5335 = vrcp.f32 %v2539_v52  ;;  %v3431_v57 = vadd.f32 1.0, %v5322_v53  ;;  %v2447_v62 = vmul.f32 1.442695, %v2349_v54  ;;  %v566_v3 = vsub.f32 0.0, %v459_v55 }
 0x1a3   :  { %v5326_v60 = vpop.eup %5325  ;;  %v756_v61 = vadd.f32 1.0, %v5324_v56  ;;  %5337 = vpow2.f32 %v1555_v47  ;;  %v3339_v6 = vmul.f32 1.442695, %v3241_v58  ;;  %v1458_v7 = vsub.f32 0.0, %v1351_v59 }
 0x1a4   :  { %v5328_v0 = vpop.eup %5327  ;;  %5339 = vrcp.f32 %v3431_v57  ;;  %v1648_v1 = vadd.f32 1.0, %v5326_v60  ;;  %v665_v25 = vmul.f32 1.442695, %v566_v3 }
 0x1a5   :  { %v5330_v2 = vpop.eup %5329  ;;  %4032 = vst.msk [vmem:[%s7711_s5 + $0x300] sm:$0xff] %vm851_vm1, %v5328_v0  ;;  %5341 = vrcp.f32 %v756_v61  ;;  %v2242_v40 = vpop.f32.mrf.mxu2  ;;  %v1557_v30 = vmul.f32 1.442695, %v1458_v7  ;;  %v4691_v7 = vld [vmem:[%s7709_s0 + $0xd8] sm:$0xff] }
 0x1a6   :  { %v5332_v4 = vpop.eup %5331  ;;  %5343 = vrcp.f32 %v1648_v1  ;;  %v2540_v5 = vadd.f32 1.0, %v5330_v2  ;;  %v3134_v8 = vpop.f32.mrf.mxu3  ;;  %v2243_v13 = vadd.f32 %v6675_v63, %v2242_v40  ;;  %v4725_v40 = vld [vmem:[%s7709_s0 + $0x1d8] sm:$0xff] }
 0x1a7   :  { %v5334_v11 = vpop.eup %5333  ;;  %v3432_v12 = vadd.f32 1.0, %v5332_v4  ;;  %5345 = vpow2.f32 %v2447_v62  ;;  %v3135_v14 = vadd.f32 %v6675_v63, %v3134_v8  ;;  %v461_v15 = vpop.f32.mrf.mxu0 }
 0x1a8   :  { %v1353_v17 = vpop.f32.mrf.mxu1  ;;  %v5336_v20 = vpop.eup %5335  ;;  %5347 = vrcp.f32 %v2540_v5  ;;  %v757_v21 = vadd.f32 1.0, %v5334_v11  ;;  %v462_v22 = vadd.f32 %v6675_v63, %v461_v15  ;;  %v2350_v26 = vsub.f32 0.0, %v2243_v13  ;;  %v4793_v15 = vld [vmem:[%s7709_s0 + $0x3d8] sm:$0xff] }
 0x1a9   :  { %v1354_v23 = vadd.f32 %v6675_v63, %v1353_v17  ;;  %v5338_v24 = vpop.eup %5337  ;;  %4332 = vst.msk [vmem:[%s7711_s5 + $0x500] sm:$0xff] %vm851_vm1, %v5336_v20  ;;  %5349 = vrcp.f32 %v3432_v12  ;;  %v3242_v27 = vsub.f32 0.0, %v3135_v14  ;;  %3758 = vmatmul.msk.bf16.gmra.mxu0 %vm265_vm0, %v4690_v9  ;;  %3994 = vmatmul.msk.bf16.gmra.mxu1 %vm265_vm0, %v4724_v10  ;;  %v4759_v14 = vld [vmem:[%s7709_s0 + $0x2d8] sm:$0xff] }
 0x1aa   :  { %v5340_v28 = vpop.eup %5339  ;;  %5351 = vrcp.f32 %v757_v21  ;;  %v1649_v29 = vadd.f32 1.0, %v5338_v24  ;;  %v567_v31 = vsub.f32 0.0, %v462_v22  ;;  %v2449_v32 = vmul.f32 1.442695, %v2350_v26  ;;  %4294 = vmatmul.msk.bf16.gmra.mxu2 %vm265_vm0, %v4758_v18  ;;  %4594 = vmatmul.msk.bf16.gmra.mxu3 %vm265_vm0, %v4792_v19 }
 0x1ab   :  { %v5342_v63 = vpop.eup %5341  ;;  %4632 = vst.msk [vmem:[%s7711_s5 + $0x700] sm:$0xff] %vm851_vm1, %v5340_v28  ;;  %5353 = vpow2.f32 %v3339_v6  ;;  %v1459_v33 = vsub.f32 0.0, %v1354_v23  ;;  %v3341_v36 = vmul.f32 1.442695, %v3242_v27 }
 0x1ac   :  { %v5344_v34 = vpop.eup %5343  ;;  %885 = vst.msk [vmem:[%s7711_s5 + $0x108] sm:$0xff] %vm851_vm1, %v5342_v63  ;;  %5355 = vrcp.f32 %v1649_v29  ;;  %v667_v39 = vmul.f32 1.442695, %v567_v31 }
 0x1ad   :  { %v5346_v35 = vpop.eup %5345  ;;  %4033 = vst.msk [vmem:[%s7711_s5 + $0x308] sm:$0xff] %vm851_vm1, %v5344_v34  ;;  %5357 = vpow2.f32 %v665_v25  ;;  %v2245_v41 = vpop.f32.mrf.mxu2  ;;  %v1559_v44 = vmul.f32 1.442695, %v1459_v33 }
 0x1ae   :  { %v5348_v37 = vpop.eup %5347  ;;  %v2541_v38 = vadd.f32 1.0, %v5346_v35  ;;  %5359 = vpow2.f32 %v1557_v30  ;;  %v3137_v42 = vpop.f32.mrf.mxu3  ;;  %v2246_v46 = vadd.f32 %v7020_v45, %v2245_v41 }
 0x1af   :  { %v5350_v43 = vpop.eup %5349  ;;  %4333 = vst.msk [vmem:[%s7711_s5 + $0x508] sm:$0xff] %vm851_vm1, %v5348_v37  ;;  %5361 = vpow2.f32 %v2449_v32  ;;  %v3138_v47 = vadd.f32 %v7020_v45, %v3137_v42  ;;  %v463_v48 = vpop.f32.mrf.mxu0 }
 0x1b0   :  { %v1355_v49 = vpop.f32.mrf.mxu1  ;;  %v5352_v50 = vpop.eup %5351  ;;  %4633 = vst.msk [vmem:[%s7711_s5 + $0x708] sm:$0xff] %vm851_vm1, %v5350_v43  ;;  %5363 = vrcp.f32 %v2541_v38  ;;  %v464_v16 = vadd.f32 %v7020_v45, %v463_v48  ;;  %v2351_v52 = vsub.f32 0.0, %v2246_v46 }
 0x1b1   :  { %v5354_v51 = vpop.eup %5353  ;;  %886 = vst.msk [vmem:[%s7711_s5 + $0x110] sm:$0xff] %vm851_vm1, %v5352_v50  ;;  %5365 = vpow2.f32 %v3341_v36  ;;  %v3243_v53 = vsub.f32 0.0, %v3138_v47  ;;  %v1356_v56 = vadd.f32 %v7020_v45, %v1355_v49 }
 0x1b2   :  { %v5356_v54 = vpop.eup %5355  ;;  %v3433_v55 = vadd.f32 1.0, %v5354_v51  ;;  %5367 = vpow2.f32 %v667_v39  ;;  %v2451_v58 = vmul.f32 1.442695, %v2351_v52  ;;  %v568_v59 = vsub.f32 0.0, %v464_v16 }
 0x1b3   :  { %v5358_v57 = vpop.eup %5357  ;;  %4034 = vst.msk [vmem:[%s7711_s5 + $0x310] sm:$0xff] %vm851_vm1, %v5356_v54  ;;  %5369 = vpow2.f32 %v1559_v44  ;;  %v3343_v1 = vmul.f32 1.442695, %v3243_v53  ;;  %v1460_v4 = vsub.f32 0.0, %v1356_v56 }
 0x1b4   :  { %v5360_v60 = vpop.eup %5359  ;;  %5371 = vrcp.f32 %v3433_v55  ;;  %v758_v61 = vadd.f32 1.0, %v5358_v57  ;;  %v669_v9 = vmul.f32 1.442695, %v568_v59 }
 0x1b5   :  { %v5362_v62 = vpop.eup %5361  ;;  %v1650_v0 = vadd.f32 1.0, %v5360_v60  ;;  %5373 = vpow2.f32 %v2451_v58  ;;  %v2247_v5 = vpop.f32.mrf.mxu2  ;;  %v1561_v28 = vmul.f32 1.442695, %v1460_v4  ;;  %v4692_v4 = vld [vmem:[%s7709_s0 + $0xe0] sm:$0xff] }
 0x1b6   :  { %v5364_v2 = vpop.eup %5363  ;;  %5375 = vrcp.f32 %v758_v61  ;;  %v2542_v3 = vadd.f32 1.0, %v5362_v62  ;;  %v3139_v6 = vpop.f32.mrf.mxu3  ;;  %v2248_v10 = vadd.f32 %v7020_v45, %v2247_v5  ;;  %v4726_v5 = vld [vmem:[%s7709_s0 + $0x1e0] sm:$0xff] }
 0x1b7   :  { %v5366_v8 = vpop.eup %5365  ;;  %4334 = vst.msk [vmem:[%s7711_s5 + $0x510] sm:$0xff] %vm851_vm1, %v5364_v2  ;;  %5377 = vrcp.f32 %v1650_v0  ;;  %v3140_v11 = vadd.f32 %v7020_v45, %v3139_v6  ;;  %v466_v12 = vpop.f32.mrf.mxu0 }
 0x1b8   :  { %v1358_v13 = vpop.f32.mrf.mxu1  ;;  %v5368_v17 = vpop.eup %5367  ;;  %5379 = vrcp.f32 %v2542_v3  ;;  %v3434_v18 = vadd.f32 1.0, %v5366_v8  ;;  %v467_v19 = vadd.f32 %v7020_v45, %v466_v12  ;;  %v2352_v23 = vsub.f32 0.0, %v2248_v10  ;;  %v4794_v12 = vld [vmem:[%s7709_s0 + $0x3e0] sm:$0xff] }
 0x1b9   :  { %v1359_v20 = vadd.f32 %v7020_v45, %v1358_v13  ;;  %v5370_v21 = vpop.eup %5369  ;;  %v759_v22 = vadd.f32 1.0, %v5368_v17  ;;  %5381 = vpow2.f32 %v3343_v1  ;;  %v3244_v24 = vsub.f32 0.0, %v3140_v11  ;;  %3759 = vmatmul.msk.bf16.gmra.mxu0 %vm265_vm0, %v4691_v7  ;;  %3995 = vmatmul.msk.bf16.gmra.mxu1 %vm265_vm0, %v4725_v40  ;;  %v4760_v11 = vld [vmem:[%s7709_s0 + $0x2e0] sm:$0xff] }
 0x1ba   :  { %v5372_v25 = vpop.eup %5371  ;;  %5383 = vrcp.f32 %v3434_v18  ;;  %v1651_v26 = vadd.f32 1.0, %v5370_v21  ;;  %v569_v29 = vsub.f32 0.0, %v467_v19  ;;  %4295 = vmatmul.msk.bf16.gmra.mxu2 %vm265_vm0, %v4759_v14  ;;  %4595 = vmatmul.msk.bf16.gmra.mxu3 %vm265_vm0, %v4793_v15  ;;  %v2453_v63 = vmul.f32 1.442695, %v2352_v23 }
 0x1bb   :  { %v5374_v27 = vpop.eup %5373  ;;  %4634 = vst.msk [vmem:[%s7711_s5 + $0x710] sm:$0xff] %vm851_vm1, %v5372_v25  ;;  %5385 = vrcp.f32 %v759_v22  ;;  %v1461_v32 = vsub.f32 0.0, %v1359_v20  ;;  %v3345_v34 = vmul.f32 1.442695, %v3244_v24 }
 0x1bc   :  { %v5376_v30 = vpop.eup %5375  ;;  %5387 = vrcp.f32 %v1651_v26  ;;  %v2543_v31 = vadd.f32 1.0, %v5374_v27  ;;  %v671_v39 = vmul.f32 1.442695, %v569_v29 }
 0x1bd   :  { %v5378_v33 = vpop.eup %5377  ;;  %887 = vst.msk [vmem:[%s7711_s5 + $0x118] sm:$0xff] %vm851_vm1, %v5376_v30  ;;  %5389 = vpow2.f32 %v669_v9  ;;  %v2250_v36 = vpop.f32.mrf.mxu2  ;;  %v1563_v48 = vmul.f32 1.442695, %v1461_v32 }
 0x1be   :  { %v5380_v35 = vpop.eup %5379  ;;  %4035 = vst.msk [vmem:[%s7711_s5 + $0x318] sm:$0xff] %vm851_vm1, %v5378_v33  ;;  %5391 = vrcp.f32 %v2543_v31  ;;  %v3142_v37 = vpop.f32.mrf.mxu3  ;;  %v2251_v41 = vadd.f32 %v7020_v45, %v2250_v36 }
 0x1bf   :  { %v5382_v38 = vpop.eup %5381  ;;  %4335 = vst.msk [vmem:[%s7711_s5 + $0x518] sm:$0xff] %vm851_vm1, %v5380_v35  ;;  %5393 = vpow2.f32 %v1561_v28  ;;  %v3143_v42 = vadd.f32 %v7020_v45, %v3142_v37  ;;  %v468_v43 = vpop.f32.mrf.mxu0 }
 0x1c0   :  { %v1360_v44 = vpop.f32.mrf.mxu1  ;;  %v5384_v46 = vpop.eup %5383  ;;  %v3435_v47 = vadd.f32 1.0, %v5382_v38  ;;  %5395 = vpow2.f32 %v2453_v63  ;;  %v469_v49 = vadd.f32 %v7020_v45, %v468_v43  ;;  %v2353_v16 = vsub.f32 0.0, %v2251_v41 }
 0x1c1   :  { %v5386_v50 = vpop.eup %5385  ;;  %4635 = vst.msk [vmem:[%s7711_s5 + $0x718] sm:$0xff] %vm851_vm1, %v5384_v46  ;;  %5397 = vpow2.f32 %v3345_v34  ;;  %v3245_v51 = vsub.f32 0.0, %v3143_v42  ;;  %v1361_v54 = vadd.f32 %v7020_v45, %v1360_v44 }
 0x1c2   :  { %v5388_v52 = vpop.eup %5387  ;;  %888 = vst.msk [vmem:[%s7711_s5 + $0x120] sm:$0xff] %vm851_vm1, %v5386_v50  ;;  %5399 = vrcp.f32 %v3435_v47  ;;  %v570_v53 = vsub.f32 0.0, %v469_v49  ;;  %v2455_v56 = vmul.f32 1.442695, %v2353_v16 }
 0x1c3   :  { %v5390_v55 = vpop.eup %5389  ;;  %4036 = vst.msk [vmem:[%s7711_s5 + $0x320] sm:$0xff] %vm851_vm1, %v5388_v52  ;;  %5401 = vpow2.f32 %v671_v39  ;;  %v3347_v57 = vmul.f32 1.442695, %v3245_v51  ;;  %v1462_v1 = vsub.f32 0.0, %v1361_v54 }
 0x1c4   :  { %v5392_v58 = vpop.eup %5391  ;;  %v760_v59 = vadd.f32 1.0, %v5390_v55  ;;  %5403 = vpow2.f32 %v1563_v48  ;;  %v673_v0 = vmul.f32 1.442695, %v570_v53 }
 0x1c5   :  { %v5394_v60 = vpop.eup %5393  ;;  %4336 = vst.msk [vmem:[%s7711_s5 + $0x520] sm:$0xff] %vm851_vm1, %v5392_v58  ;;  %5405 = vpow2.f32 %v2455_v56  ;;  %v2252_v2 = vpop.f32.mrf.mxu2  ;;  %v1565_v25 = vmul.f32 1.442695, %v1462_v1  ;;  %v4693_v1 = vld [vmem:[%s7709_s0 + $0xe8] sm:$0xff] }
 0x1c6   :  { %v5396_v61 = vpop.eup %5395  ;;  %5407 = vrcp.f32 %v760_v59  ;;  %v1652_v62 = vadd.f32 1.0, %v5394_v60  ;;  %v3144_v3 = vpop.f32.mrf.mxu3  ;;  %v2253_v40 = vadd.f32 %v7020_v45, %v2252_v2  ;;  %v4727_v2 = vld [vmem:[%s7709_s0 + $0x1e8] sm:$0xff] }
 0x1c7   :  { %v5398_v6 = vpop.eup %5397  ;;  %v2544_v7 = vadd.f32 1.0, %v5396_v61  ;;  %5409 = vpow2.f32 %v3347_v57  ;;  %v3145_v8 = vadd.f32 %v7020_v45, %v3144_v3  ;;  %v471_v9 = vpop.f32.mrf.mxu0 }
 0x1c8   :  { %v1363_v10 = vpop.f32.mrf.mxu1  ;;  %v5400_v13 = vpop.eup %5399  ;;  %5411 = vrcp.f32 %v1652_v62  ;;  %v3436_v14 = vadd.f32 1.0, %v5398_v6  ;;  %v472_v15 = vadd.f32 %v7020_v45, %v471_v9  ;;  %v2354_v18 = vsub.f32 0.0, %v2253_v40  ;;  %v4761_v40 = vld [vmem:[%s7709_s0 + $0x2e8] sm:$0xff] }
 0x1c9   :  { %v5402_v17 = vpop.eup %5401  ;;  %4636 = vst.msk [vmem:[%s7711_s5 + $0x720] sm:$0xff] %vm851_vm1, %v5400_v13  ;;  %5413 = vrcp.f32 %v2544_v7  ;;  %v1364_v19 = vadd.f32 %v7020_v45, %v1363_v10  ;;  %v3246_v22 = vsub.f32 0.0, %v3145_v8  ;;  %3760 = vmatmul.msk.bf16.gmra.mxu0 %vm265_vm0, %v4692_v4  ;;  %3996 = vmatmul.msk.bf16.gmra.mxu1 %vm265_vm0, %v4726_v5  ;;  %v4795_v8 = vld [vmem:[%s7709_s0 + $0x3e8] sm:$0xff] }
 0x1ca   :  { %v5404_v20 = vpop.eup %5403  ;;  %5415 = vrcp.f32 %v3436_v14  ;;  %v761_v21 = vadd.f32 1.0, %v5402_v17  ;;  %v571_v26 = vsub.f32 0.0, %v472_v15  ;;  %4296 = vmatmul.msk.bf16.gmra.mxu2 %vm265_vm0, %v4760_v11  ;;  %4596 = vmatmul.msk.bf16.gmra.mxu3 %vm265_vm0, %v4794_v12  ;;  %v2457_v30 = vmul.f32 1.442695, %v2354_v18 }
 0x1cb   :  { %v5406_v23 = vpop.eup %5405  ;;  %v1653_v24 = vadd.f32 1.0, %v5404_v20  ;;  %5417 = vpow2.f32 %v673_v0  ;;  %v1463_v31 = vsub.f32 0.0, %v1364_v19  ;;  %v3349_v33 = vmul.f32 1.442695, %v3246_v22 }
 0x1cc   :  { %v5408_v27 = vpop.eup %5407  ;;  %5419 = vrcp.f32 %v761_v21  ;;  %v2545_v28 = vadd.f32 1.0, %v5406_v23  ;;  %v675_v37 = vmul.f32 1.442695, %v571_v26 }
 0x1cd   :  { %v5410_v29 = vpop.eup %5409  ;;  %889 = vst.msk [vmem:[%s7711_s5 + $0x128] sm:$0xff] %vm851_vm1, %v5408_v27  ;;  %5421 = vrcp.f32 %v1653_v24  ;;  %v2255_v34 = vpop.f32.mrf.mxu2  ;;  %v1567_v48 = vmul.f32 1.442695, %v1463_v31 }
 0x1ce   :  { %v5412_v63 = vpop.eup %5411  ;;  %5423 = vrcp.f32 %v2545_v28  ;;  %v3437_v32 = vadd.f32 1.0, %v5410_v29  ;;  %v3147_v35 = vpop.f32.mrf.mxu3  ;;  %v2256_v38 = vadd.f32 %v7020_v45, %v2255_v34 }
 0x1cf   :  { %v5414_v36 = vpop.eup %5413  ;;  %4037 = vst.msk [vmem:[%s7711_s5 + $0x328] sm:$0xff] %vm851_vm1, %v5412_v63  ;;  %5425 = vpow2.f32 %v1565_v25  ;;  %v3148_v39 = vadd.f32 %v7020_v45, %v3147_v35  ;;  %v473_v41 = vpop.f32.mrf.mxu0 }
 0x1d0   :  { %v1365_v42 = vpop.f32.mrf.mxu1  ;;  %v5416_v43 = vpop.eup %5415  ;;  %4337 = vst.msk [vmem:[%s7711_s5 + $0x528] sm:$0xff] %vm851_vm1, %v5414_v36  ;;  %5427 = vrcp.f32 %v3437_v32  ;;  %v474_v44 = vadd.f32 %v7020_v45, %v473_v41  ;;  %v2355_v49 = vsub.f32 0.0, %v2256_v38 }
 0x1d1   :  { %v1366_v46 = vadd.f32 %v7020_v45, %v1365_v42  ;;  %v5418_v47 = vpop.eup %5417  ;;  %4637 = vst.msk [vmem:[%s7711_s5 + $0x728] sm:$0xff] %vm851_vm1, %v5416_v43  ;;  %5429 = vpow2.f32 %v2457_v30  ;;  %v3247_v50 = vsub.f32 0.0, %v3148_v39 }
 0x1d2   :  { %v5420_v16 = vpop.eup %5419  ;;  %v762_v51 = vadd.f32 1.0, %v5418_v47  ;;  %5431 = vpow2.f32 %v3349_v33  ;;  %v572_v52 = vsub.f32 0.0, %v474_v44  ;;  %v2459_v54 = vmul.f32 1.442695, %v2355_v49 }
 0x1d3   :  { %v5422_v53 = vpop.eup %5421  ;;  %890 = vst.msk [vmem:[%s7711_s5 + $0x130] sm:$0xff] %vm851_vm1, %v5420_v16  ;;  %5433 = vpow2.f32 %v675_v37  ;;  %v3351_v55 = vmul.f32 1.442695, %v3247_v50  ;;  %v1464_v57 = vsub.f32 0.0, %v1366_v46 }
 0x1d4   :  { %v5424_v56 = vpop.eup %5423  ;;  %4038 = vst.msk [vmem:[%s7711_s5 + $0x330] sm:$0xff] %vm851_vm1, %v5422_v53  ;;  %5435 = vrcp.f32 %v762_v51  ;;  %v677_v59 = vmul.f32 1.442695, %v572_v52 }
 0x1d5   :  { %v5426_v58 = vpop.eup %5425  ;;  %4338 = vst.msk [vmem:[%s7711_s5 + $0x530] sm:$0xff] %vm851_vm1, %v5424_v56  ;;  %5437 = vpow2.f32 %v1567_v48  ;;  %v2257_v62 = vpop.f32.mrf.mxu2  ;;  %v1569_v11 = vmul.f32 1.442695, %v1464_v57 }
 0x1d6   :  { %v5428_v60 = vpop.eup %5427  ;;  %v1654_v61 = vadd.f32 1.0, %v5426_v58  ;;  %5439 = vpow2.f32 %v2459_v54  ;;  %v3149_v0 = vpop.f32.mrf.mxu3  ;;  %v2258_v4 = vadd.f32 %v7020_v45, %v2257_v62  ;;  %v4728_v62 = vld [vmem:[%s7709_s0 + $0x1f0] sm:$0xff] }
 0x1d7   :  { %v5430_v3 = vpop.eup %5429  ;;  %4638 = vst.msk [vmem:[%s7711_s5 + $0x730] sm:$0xff] %vm851_vm1, %v5428_v60  ;;  %5441 = vpow2.f32 %v3351_v55  ;;  %v3150_v5 = vadd.f32 %v7020_v45, %v3149_v0  ;;  %v476_v6 = vpop.f32.mrf.mxu0 }
 0x1d8   :  { %v1368_v7 = vpop.f32.mrf.mxu1  ;;  %v5432_v9 = vpop.eup %5431  ;;  %5443 = vrcp.f32 %v1654_v61  ;;  %v2546_v10 = vadd.f32 1.0, %v5430_v3  ;;  %v477_v12 = vadd.f32 %v7020_v45, %v476_v6  ;;  %v2356_v15 = vsub.f32 0.0, %v2258_v4  ;;  %v4694_v61 = vld [vmem:[%s7709_s0 + $0xf0] sm:$0xff] }
 0x1d9   :  { %v5434_v13 = vpop.eup %5433  ;;  %v3438_v14 = vadd.f32 1.0, %v5432_v9  ;;  %5445 = vpow2.f32 %v677_v59  ;;  %v1369_v17 = vadd.f32 %v7020_v45, %v1368_v7  ;;  %v3248_v20 = vsub.f32 0.0, %v3150_v5  ;;  %3761 = vmatmul.msk.bf16.gmra.mxu0 %vm265_vm0, %v4693_v1  ;;  %3997 = vmatmul.msk.bf16.gmra.mxu1 %vm265_vm0, %v4727_v2  ;;  %v4762_v6 = vld [vmem:[%s7709_s0 + $0x2f0] sm:$0xff] }
 0x1da   :  { %v5436_v18 = vpop.eup %5435  ;;  %5447 = vrcp.f32 %v2546_v10  ;;  %v763_v19 = vadd.f32 1.0, %v5434_v13  ;;  %v573_v22 = vsub.f32 0.0, %v477_v12  ;;  %4297 = vmatmul.msk.bf16.gmra.mxu2 %vm265_vm0, %v4761_v40  ;;  %4597 = vmatmul.msk.bf16.gmra.mxu3 %vm265_vm0, %v4795_v8  ;;  %v2461_v27 = vmul.f32 1.442695, %v2356_v15  ;;  %v4796_v7 = vld [vmem:[%s7709_s0 + $0x3f0] sm:$0xff] }
 0x1db   :  { %v5438_v21 = vpop.eup %5437  ;;  %891 = vst.msk [vmem:[%s7711_s5 + $0x138] sm:$0xff] %vm851_vm1, %v5436_v18  ;;  %5449 = vrcp.f32 %v3438_v14  ;;  %v1465_v28 = vsub.f32 0.0, %v1369_v17  ;;  %v3353_v31 = vmul.f32 1.442695, %v3248_v20 }
 0x1dc   :  { %v5440_v23 = vpop.eup %5439  ;;  %5451 = vrcp.f32 %v763_v19  ;;  %v1655_v24 = vadd.f32 1.0, %v5438_v21  ;;  %v679_v34 = vmul.f32 1.442695, %v573_v22 }
 0x1dd   :  { %v5442_v25 = vpop.eup %5441  ;;  %v2547_v26 = vadd.f32 1.0, %v5440_v23  ;;  %5453 = vpow2.f32 %v1569_v11  ;;  %v2260_v63 = vpop.f32.mrf.mxu2  ;;  %v1571_v46 = vmul.f32 1.442695, %v1465_v28 }
 0x1de   :  { %v5444_v29 = vpop.eup %5443  ;;  %5455 = vrcp.f32 %v1655_v24  ;;  %v3439_v30 = vadd.f32 1.0, %v5442_v25  ;;  %v3152_v32 = vpop.f32.mrf.mxu3  ;;  %v2261_v35 = vadd.f32 %v7020_v45, %v2260_v63 }
 0x1df   :  { %v5446_v33 = vpop.eup %5445  ;;  %4039 = vst.msk [vmem:[%s7711_s5 + $0x338] sm:$0xff] %vm851_vm1, %v5444_v29  ;;  %5457 = vrcp.f32 %v2547_v26  ;;  %v3153_v36 = vadd.f32 %v7020_v45, %v3152_v32  ;;  %v478_v37 = vpop.f32.mrf.mxu0 }
 0x1e0   :  { %v1370_v38 = vpop.f32.mrf.mxu1  ;;  %v5448_v39 = vpop.eup %5447  ;;  %5459 = vrcp.f32 %v3439_v30  ;;  %v764_v41 = vadd.f32 1.0, %v5446_v33  ;;  %v479_v42 = vadd.f32 %v7020_v45, %v478_v37  ;;  %v2357_v47 = vsub.f32 0.0, %v2261_v35 }
 0x1e1   :  { %v1371_v43 = vadd.f32 %v7020_v45, %v1370_v38  ;;  %v5450_v44 = vpop.eup %5449  ;;  %4339 = vst.msk [vmem:[%s7711_s5 + $0x538] sm:$0xff] %vm851_vm1, %v5448_v39  ;;  %5461 = vpow2.f32 %v2461_v27  ;;  %v3249_v48 = vsub.f32 0.0, %v3153_v36 }
 0x1e2   :  { %v5452_v49 = vpop.eup %5451  ;;  %4639 = vst.msk [vmem:[%s7711_s5 + $0x738] sm:$0xff] %vm851_vm1, %v5450_v44  ;;  %5463 = vrcp.f32 %v764_v41  ;;  %v574_v50 = vsub.f32 0.0, %v479_v42  ;;  %v2463_v51 = vmul.f32 1.442695, %v2357_v47 }
 0x1e3   :  { %v5454_v16 = vpop.eup %5453  ;;  %892 = vst.msk [vmem:[%s7711_s5 + $0x140] sm:$0xff] %vm851_vm1, %v5452_v49  ;;  %5465 = vpow2.f32 %v3353_v31  ;;  %v1466_v52 = vsub.f32 0.0, %v1371_v43  ;;  %v3355_v55 = vmul.f32 1.442695, %v3249_v48 }
 0x1e4   :  { %v5456_v53 = vpop.eup %5455  ;;  %v1656_v54 = vadd.f32 1.0, %v5454_v16  ;;  %5467 = vpow2.f32 %v679_v34  ;;  %v681_v57 = vmul.f32 1.442695, %v574_v50 }
 0x1e5   :  { %v5458_v56 = vpop.eup %5457  ;;  %4040 = vst.msk [vmem:[%s7711_s5 + $0x340] sm:$0xff] %vm851_vm1, %v5456_v53  ;;  %5469 = vpow2.f32 %v1571_v46  ;;  %v2262_v59 = vpop.f32.mrf.mxu2  ;;  %v1573_v1 = vmul.f32 1.442695, %v1466_v52 }
 0x1e6   :  { %v5460_v58 = vpop.eup %5459  ;;  %4340 = vst.msk [vmem:[%s7711_s5 + $0x540] sm:$0xff] %vm851_vm1, %v5458_v56  ;;  %5471 = vrcp.f32 %v1656_v54  ;;  %v3154_v60 = vpop.f32.mrf.mxu3  ;;  %v2263_v2 = vadd.f32 %v7020_v45, %v2262_v59  ;;  %v4695_v59 = vld [vmem:[%s7709_s0 + $0xf8] sm:$0xff] }
 0x1e7   :  { %v5462_v0 = vpop.eup %5461  ;;  %4640 = vst.msk [vmem:[%s7711_s5 + $0x740] sm:$0xff] %vm851_vm1, %v5460_v58  ;;  %5473 = vpow2.f32 %v2463_v51  ;;  %v3155_v3 = vadd.f32 %v7020_v45, %v3154_v60  ;;  %v481_v4 = vpop.f32.mrf.mxu0  ;;  %v4729_v60 = vld [vmem:[%s7709_s0 + $0x1f8] sm:$0xff] }
 0x1e8   :  { %v1373_v5 = vpop.f32.mrf.mxu1  ;;  %v5464_v40 = vpop.eup %5463  ;;  %v2548_v8 = vadd.f32 1.0, %v5462_v0  ;;  %5475 = vpow2.f32 %v3355_v55  ;;  %v2358_v10 = vsub.f32 0.0, %v2263_v2  ;;  %v482_v11 = vadd.f32 %v7020_v45, %v481_v4  ;;  %v4763_v4 = vld [vmem:[%s7709_s0 + $0x2f8] sm:$0xff] }
 0x1e9   :  { %v5466_v9 = vpop.eup %5465  ;;  %893 = vst.msk [vmem:[%s7711_s5 + $0x148] sm:$0xff] %vm851_vm1, %v5464_v40  ;;  %5477 = vpow2.f32 %v681_v57  ;;  %v3250_v14 = vsub.f32 0.0, %v3155_v3  ;;  %v1374_v15 = vadd.f32 %v7020_v45, %v1373_v5  ;;  %3762 = vmatmul.msk.bf16.gmra.mxu0 %vm265_vm0, %v4694_v61  ;;  %3998 = vmatmul.msk.bf16.gmra.mxu1 %vm265_vm0, %v4728_v62  ;;  %v4797_v5 = vld [vmem:[%s7709_s0 + $0x3f8] sm:$0xff] }
 0x1ea   :  { %v5468_v12 = vpop.eup %5467  ;;  %5479 = vrcp.f32 %v2548_v8  ;;  %v3440_v13 = vadd.f32 1.0, %v5466_v9  ;;  %v2465_v19 = vmul.f32 1.442695, %v2358_v10  ;;  %4298 = vmatmul.msk.bf16.gmra.mxu2 %vm265_vm0, %v4762_v6  ;;  %4598 = vmatmul.msk.bf16.gmra.mxu3 %vm265_vm0, %v4796_v7  ;;  %v575_v23 = vsub.f32 0.0, %v482_v11 }
 0x1eb   :  { %v5470_v17 = vpop.eup %5469  ;;  %v765_v18 = vadd.f32 1.0, %v5468_v12  ;;  %5481 = vpow2.f32 %v1573_v1  ;;  %v3357_v26 = vmul.f32 1.442695, %v3250_v14  ;;  %v1467_v27 = vsub.f32 0.0, %v1374_v15 }
 0x1ec   :  { %v5472_v20 = vpop.eup %5471  ;;  %5483 = vrcp.f32 %v3440_v13  ;;  %v1657_v21 = vadd.f32 1.0, %v5470_v17  ;;  %v683_v41 = vmul.f32 1.442695, %v575_v23 }
 0x1ed   :  { %v5474_v22 = vpop.eup %5473  ;;  %4041 = vst.msk [vmem:[%s7711_s5 + $0x348] sm:$0xff] %vm851_vm1, %v5472_v20  ;;  %5485 = vrcp.f32 %v765_v18  ;;  %v2265_v28 = vpop.f32.mrf.mxu2  ;;  %v1575_v47 = vmul.f32 1.442695, %v1467_v27 }
 0x1ee   :  { %v5476_v24 = vpop.eup %5475  ;;  %5487 = vrcp.f32 %v1657_v21  ;;  %v2549_v25 = vadd.f32 1.0, %v5474_v22  ;;  %v3157_v29 = vpop.f32.mrf.mxu3  ;;  %v2266_v63 = vadd.f32 %v7020_v45, %v2265_v28 }
 0x1ef   :  { %v5478_v30 = vpop.eup %5477  ;;  %v3441_v31 = vadd.f32 1.0, %v5476_v24  ;;  %5489 = vpow2.f32 %v2465_v19  ;;  %v3158_v32 = vadd.f32 %v7020_v45, %v3157_v29  ;;  %v483_v33 = vpop.f32.mrf.mxu0 }
 0x1f0   :  { %v1375_v34 = vpop.f32.mrf.mxu1  ;;  %v5480_v35 = vpop.eup %5479  ;;  %5491 = vrcp.f32 %v2549_v25  ;;  %v766_v36 = vadd.f32 1.0, %v5478_v30  ;;  %v484_v37 = vadd.f32 %v7020_v45, %v483_v33  ;;  %v2359_v42 = vsub.f32 0.0, %v2266_v63 }
 0x1f1   :  { %v1376_v38 = vadd.f32 %v7020_v45, %v1375_v34  ;;  %v5482_v39 = vpop.eup %5481  ;;  %4341 = vst.msk [vmem:[%s7711_s5 + $0x548] sm:$0xff] %vm851_vm1, %v5480_v35  ;;  %5493 = vrcp.f32 %v3441_v31  ;;  %v3251_v43 = vsub.f32 0.0, %v3158_v32 }
 0x1f2   :  { %v5484_v44 = vpop.eup %5483  ;;  %5495 = vrcp.f32 %v766_v36  ;;  %v1658_v46 = vadd.f32 1.0, %v5482_v39  ;;  %v576_v48 = vsub.f32 0.0, %v484_v37  ;;  %v2467_v50 = vmul.f32 1.442695, %v2359_v42 }
 0x1f3   :  { %v5486_v49 = vpop.eup %5485  ;;  %4641 = vst.msk [vmem:[%s7711_s5 + $0x748] sm:$0xff] %vm851_vm1, %v5484_v44  ;;  %5497 = vpow2.f32 %v3357_v26  ;;  %v1468_v16 = vsub.f32 0.0, %v1376_v38  ;;  %v3359_v53 = vmul.f32 1.442695, %v3251_v43 }
 0x1f4   :  { %v5488_v51 = vpop.eup %5487  ;;  %894 = vst.msk [vmem:[%s7711_s5 + $0x150] sm:$0xff] %vm851_vm1, %v5486_v49  ;;  %5499 = vrcp.f32 %v1658_v46  ;;  %v685_v56 = vmul.f32 1.442695, %v576_v48 }
 0x1f5   :  { %v5490_v52 = vpop.eup %5489  ;;  %4042 = vst.msk [vmem:[%s7711_s5 + $0x350] sm:$0xff] %vm851_vm1, %v5488_v51  ;;  %5501 = vpow2.f32 %v683_v41  ;;  %v2267_v57 = vpop.f32.mrf.mxu2  ;;  %v1577_v62 = vmul.f32 1.442695, %v1468_v16 }
 0x1f6   :  { %v5492_v54 = vpop.eup %5491  ;;  %v2550_v55 = vadd.f32 1.0, %v5490_v52  ;;  %5503 = vpow2.f32 %v1575_v47  ;;  %v3159_v58 = vpop.f32.mrf.mxu3  ;;  %v2268_v0 = vadd.f32 %v7020_v45, %v2267_v57 }
 0x1f7   :  { %v5494_v61 = vpop.eup %5493  ;;  %4342 = vst.msk [vmem:[%s7711_s5 + $0x550] sm:$0xff] %vm851_vm1, %v5492_v54  ;;  %5505 = vpow2.f32 %v2467_v50  ;;  %v3160_v1 = vadd.f32 %v7020_v45, %v3159_v58  ;;  %v486_v2 = vpop.f32.mrf.mxu0 }
 0x1f8   :  { %v1378_v3 = vpop.f32.mrf.mxu1  ;;  %v5496_v6 = vpop.eup %5495  ;;  %4642 = vst.msk [vmem:[%s7711_s5 + $0x750] sm:$0xff] %vm851_vm1, %v5494_v61  ;;  %5507 = vrcp.f32 %v2550_v55  ;;  %v487_v7 = vadd.f32 %v7020_v45, %v486_v2  ;;  %v2360_v8 = vsub.f32 0.0, %v2268_v0 }
 0x1f9   :  { %v5498_v40 = vpop.eup %5497  ;;  %895 = vst.msk [vmem:[%s7711_s5 + $0x158] sm:$0xff] %vm851_vm1, %v5496_v6  ;;  %5509 = vpow2.f32 %v3359_v53  ;;  %v3252_v9 = vsub.f32 0.0, %v3160_v1  ;;  %v1379_v12 = vadd.f32 %v7020_v45, %v1378_v3  ;;  %3763 = vmatmul.msk.bf16.gmra.mxu0 %vm265_vm0, %v4695_v59  ;;  %3999 = vmatmul.msk.bf16.gmra.mxu1 %vm265_vm0, %v4729_v60 }
 0x1fa   :  { %v5500_v10 = vpop.eup %5499  ;;  %v3442_v11 = vadd.f32 1.0, %v5498_v40  ;;  %5511 = vpow2.f32 %v685_v56  ;;  %v2469_v14 = vmul.f32 1.442695, %v2360_v8  ;;  %v577_v15 = vsub.f32 0.0, %v487_v7  ;;  %4299 = vmatmul.msk.bf16.gmra.mxu2 %vm265_vm0, %v4763_v4  ;;  %4599 = vmatmul.msk.bf16.gmra.mxu3 %vm265_vm0, %v4797_v5 }
 0x1fb   :  { %v5502_v13 = vpop.eup %5501  ;;  %4043 = vst.msk [vmem:[%s7711_s5 + $0x358] sm:$0xff] %vm851_vm1, %v5500_v10  ;;  %5513 = vpow2.f32 %v1577_v62  ;;  %v3361_v21 = vmul.f32 1.442695, %v3252_v9  ;;  %v1469_v24 = vsub.f32 0.0, %v1379_v12 }
 0x1fc   :  { %v5504_v17 = vpop.eup %5503  ;;  %5515 = vrcp.f32 %v3442_v11  ;;  %v767_v18 = vadd.f32 1.0, %v5502_v13  ;;  %v687_v28 = vmul.f32 1.442695, %v577_v15 }
 0x1fd   :  { %v5506_v19 = vpop.eup %5505  ;;  %v1659_v20 = vadd.f32 1.0, %v5504_v17  ;;  %5517 = vpow2.f32 %v2469_v14  ;;  %v2270_v25 = vpop.f32.mrf.mxu2  ;;  %v1579_v44 = vmul.f32 1.442695, %v1469_v24 }
 0x1fe   :  { %v5508_v22 = vpop.eup %5507  ;;  %5519 = vrcp.f32 %v767_v18  ;;  %v2551_v23 = vadd.f32 1.0, %v5506_v19  ;;  %v3162_v26 = vpop.f32.mrf.mxu3  ;;  %v2271_v29 = vadd.f32 %v7020_v45, %v2270_v25 }
 0x1ff   :  { %v5510_v27 = vpop.eup %5509  ;;  %4343 = vst.msk [vmem:[%s7711_s5 + $0x558] sm:$0xff] %vm851_vm1, %v5508_v22  ;;  %5521 = vrcp.f32 %v1659_v20  ;;  %v3163_v30 = vadd.f32 %v7020_v45, %v3162_v26  ;;  %v488_v31 = vpop.f32.mrf.mxu0 }
 0x200   :  { %v1380_v63 = vpop.f32.mrf.mxu1  ;;  %v5512_v32 = vpop.eup %5511  ;;  %5523 = vrcp.f32 %v2551_v23  ;;  %v3443_v33 = vadd.f32 1.0, %v5510_v27  ;;  %v489_v34 = vadd.f32 %v7020_v45, %v488_v31  ;;  %v2361_v38 = vsub.f32 0.0, %v2271_v29 }
 0x201   :  { %v1381_v35 = vadd.f32 %v7020_v45, %v1380_v63  ;;  %v5514_v36 = vpop.eup %5513  ;;  %v768_v37 = vadd.f32 1.0, %v5512_v32  ;;  %5525 = vpow2.f32 %v3361_v21  ;;  %v3253_v39 = vsub.f32 0.0, %v3163_v30  ;;  %v7345_v21 = vld [vmem:[%s7710_s2] ss:$0 sm:$0xff] }
 0x202   :  { %v5516_v41 = vpop.eup %5515  ;;  %5527 = vrcp.f32 %v3443_v33  ;;  %v1660_v42 = vadd.f32 1.0, %v5514_v36  ;;  %v578_v46 = vsub.f32 0.0, %v489_v34  ;;  %v2471_v49 = vmul.f32 1.442695, %v2361_v38 }
 0x203   :  { %v5518_v43 = vpop.eup %5517  ;;  %4643 = vst.msk [vmem:[%s7711_s5 + $0x758] sm:$0xff] %vm851_vm1, %v5516_v41  ;;  %5529 = vrcp.f32 %v768_v37  ;;  %v1470_v50 = vsub.f32 0.0, %v1381_v35  ;;  %v3363_v51 = vmul.f32 1.442695, %v3253_v39 }
 0x204   :  { %v5520_v47 = vpop.eup %5519  ;;  %5531 = vrcp.f32 %v1660_v42  ;;  %v2552_v48 = vadd.f32 1.0, %v5518_v43  ;;  %v689_v56 = vmul.f32 1.442695, %v578_v46 }
 0x205   :  { %v5522_v16 = vpop.eup %5521  ;;  %896 = vst.msk [vmem:[%s7711_s5 + $0x160] sm:$0xff] %vm851_vm1, %v5520_v47  ;;  %5533 = vpow2.f32 %v687_v28  ;;  %v2272_v53 = vpop.f32.mrf.mxu2  ;;  %v1581_v0 = vmul.f32 1.442695, %v1470_v50 }
 0x206   :  { %v5524_v52 = vpop.eup %5523  ;;  %4044 = vst.msk [vmem:[%s7711_s5 + $0x360] sm:$0xff] %vm851_vm1, %v5522_v16  ;;  %5535 = vrcp.f32 %v2552_v48  ;;  %v3164_v54 = vpop.f32.mrf.mxu3  ;;  %v2273_v57 = vadd.f32 %v7020_v45, %v2272_v53 }
 0x207   :  { %v5526_v55 = vpop.eup %5525  ;;  %4344 = vst.msk [vmem:[%s7711_s5 + $0x560] sm:$0xff] %vm851_vm1, %v5524_v52  ;;  %5537 = vpow2.f32 %v1579_v44  ;;  %v3165_v58 = vadd.f32 %v7020_v45, %v3164_v54  ;;  %v491_v59 = vpop.f32.mrf.mxu0 }
 0x208   :  { %v1383_v60 = vpop.f32.mrf.mxu1  ;;  %v5528_v61 = vpop.eup %5527  ;;  %v3444_v62 = vadd.f32 1.0, %v5526_v55  ;;  %5539 = vpow2.f32 %v2471_v49  ;;  %v492_v1 = vadd.f32 %v7020_v45, %v491_v59  ;;  %v2362_v3 = vsub.f32 0.0, %v2273_v57 }
 0x209   :  { %v5530_v2 = vpop.eup %5529  ;;  %4644 = vst.msk [vmem:[%s7711_s5 + $0x760] sm:$0xff] %vm851_vm1, %v5528_v61  ;;  %5541 = vpow2.f32 %v3363_v51  ;;  %v3254_v4 = vsub.f32 0.0, %v3165_v58  ;;  %v1384_v7 = vadd.f32 %v7020_v45, %v1383_v60 }
 0x20a   :  { %v5532_v5 = vpop.eup %5531  ;;  %897 = vst.msk [vmem:[%s7711_s5 + $0x168] sm:$0xff] %vm851_vm1, %v5530_v2  ;;  %5543 = vrcp.f32 %v3444_v62  ;;  %v579_v6 = vsub.f32 0.0, %v492_v1  ;;  %v2473_v8 = vmul.f32 1.442695, %v2362_v3 }
 0x20b   :  { %v5534_v40 = vpop.eup %5533  ;;  %4045 = vst.msk [vmem:[%s7711_s5 + $0x368] sm:$0xff] %vm851_vm1, %v5532_v5  ;;  %5545 = vpow2.f32 %v689_v56  ;;  %v3365_v9 = vmul.f32 1.442695, %v3254_v4  ;;  %v1471_v15 = vsub.f32 0.0, %v1384_v7 }
 0x20c   :  { %v5536_v10 = vpop.eup %5535  ;;  %v769_v11 = vadd.f32 1.0, %v5534_v40  ;;  %5547 = vpow2.f32 %v1581_v0  ;;  %v691_v14 = vmul.f32 1.442695, %v579_v6 }
 0x20d   :  { %v5538_v12 = vpop.eup %5537  ;;  %4345 = vst.msk [vmem:[%s7711_s5 + $0x568] sm:$0xff] %vm851_vm1, %v5536_v10  ;;  %5549 = vpow2.f32 %v2473_v8  ;;  %v2275_v17 = vpop.f32.mrf.mxu2  ;;  %v1583_v36 = vmul.f32 1.442695, %v1471_v15 }
 0x20e   :  { %v5540_v45 = vpop.eup %5539  ;;  %5551 = vrcp.f32 %v769_v11  ;;  %v1661_v13 = vadd.f32 1.0, %v5538_v12  ;;  %v3167_v18 = vpop.f32.mrf.mxu3  ;;  %v2276_v22 = vadd.f32 %v7345_v21, %v2275_v17 }
 0x20f   :  { %v5542_v19 = vpop.eup %5541  ;;  %v2553_v20 = vadd.f32 1.0, %v5540_v45  ;;  %5553 = vpow2.f32 %v3365_v9  ;;  %v3168_v23 = vadd.f32 %v7345_v21, %v3167_v18  ;;  %v493_v24 = vpop.f32.mrf.mxu0 }
 0x210   :  { %v1385_v25 = vpop.f32.mrf.mxu1  ;;  %v5544_v26 = vpop.eup %5543  ;;  %5555 = vrcp.f32 %v1661_v13  ;;  %v3445_v27 = vadd.f32 1.0, %v5542_v19  ;;  %v494_v28 = vadd.f32 %v7345_v21, %v493_v24  ;;  %v2363_v30 = vsub.f32 0.0, %v2276_v22 }
 0x211   :  { %v5546_v29 = vpop.eup %5545  ;;  %4645 = vst.msk [vmem:[%s7711_s5 + $0x768] sm:$0xff] %vm851_vm1, %v5544_v26  ;;  %5557 = vrcp.f32 %v2553_v20  ;;  %v1386_v31 = vadd.f32 %v7345_v21, %v1385_v25  ;;  %v3255_v33 = vsub.f32 0.0, %v3168_v23 }
 0x212   :  { %v5548_v63 = vpop.eup %5547  ;;  %5559 = vrcp.f32 %v3445_v27  ;;  %v770_v32 = vadd.f32 1.0, %v5546_v29  ;;  %v580_v37 = vsub.f32 0.0, %v494_v28  ;;  %v2475_v42 = vmul.f32 1.442695, %v2363_v30 }
 0x213   :  { %v5550_v34 = vpop.eup %5549  ;;  %v1662_v35 = vadd.f32 1.0, %v5548_v63  ;;  %5561 = vpow2.f32 %v691_v14  ;;  %v1472_v43 = vsub.f32 0.0, %v1386_v31  ;;  %v3367_v47 = vmul.f32 1.442695, %v3255_v33 }
 0x214   :  { %v5552_v38 = vpop.eup %5551  ;;  %5563 = vrcp.f32 %v770_v32  ;;  %v2554_v39 = vadd.f32 1.0, %v5550_v34  ;;  %v693_v16 = vmul.f32 1.442695, %v580_v37 }
 0x215   :  { %v5554_v41 = vpop.eup %5553  ;;  %898 = vst.msk [vmem:[%s7711_s5 + $0x170] sm:$0xff] %vm851_vm1, %v5552_v38  ;;  %5565 = vrcp.f32 %v1662_v35  ;;  %v2277_v48 = vpop.f32.mrf.mxu2  ;;  %v1585_v59 = vmul.f32 1.442695, %v1472_v43 }
 0x216   :  { %v5556_v44 = vpop.eup %5555  ;;  %5567 = vrcp.f32 %v2554_v39  ;;  %v3446_v46 = vadd.f32 1.0, %v5554_v41  ;;  %v3169_v49 = vpop.f32.mrf.mxu3  ;;  %v2278_v51 = vadd.f32 %v7345_v21, %v2277_v48 }
 0x217   :  { %v5558_v50 = vpop.eup %5557  ;;  %4046 = vst.msk [vmem:[%s7711_s5 + $0x370] sm:$0xff] %vm851_vm1, %v5556_v44  ;;  %5569 = vpow2.f32 %v1583_v36  ;;  %v3170_v52 = vadd.f32 %v7345_v21, %v3169_v49  ;;  %v496_v53 = vpop.f32.mrf.mxu0 }
 0x218   :  { %v1388_v54 = vpop.f32.mrf.mxu1  ;;  %v5560_v55 = vpop.eup %5559  ;;  %4346 = vst.msk [vmem:[%s7711_s5 + $0x570] sm:$0xff] %vm851_vm1, %v5558_v50  ;;  %5571 = vrcp.f32 %v3446_v46  ;;  %v497_v56 = vadd.f32 %v7345_v21, %v496_v53  ;;  %v2364_v60 = vsub.f32 0.0, %v2278_v51 }
 0x219   :  { %v1389_v57 = vadd.f32 %v7345_v21, %v1388_v54  ;;  %v5562_v58 = vpop.eup %5561  ;;  %4646 = vst.msk [vmem:[%s7711_s5 + $0x770] sm:$0xff] %vm851_vm1, %v5560_v55  ;;  %5573 = vpow2.f32 %v2475_v42  ;;  %v3256_v61 = vsub.f32 0.0, %v3170_v52 }
 0x21a   :  { %v5564_v62 = vpop.eup %5563  ;;  %v771_v0 = vadd.f32 1.0, %v5562_v58  ;;  %5575 = vpow2.f32 %v3367_v47  ;;  %v581_v1 = vsub.f32 0.0, %v497_v56  ;;  %v2477_v3 = vmul.f32 1.442695, %v2364_v60 }
 0x21b   :  { %v5566_v2 = vpop.eup %5565  ;;  %899 = vst.msk [vmem:[%s7711_s5 + $0x178] sm:$0xff] %vm851_vm1, %v5564_v62  ;;  %5577 = vpow2.f32 %v693_v16  ;;  %v3369_v4 = vmul.f32 1.442695, %v3256_v61  ;;  %v1473_v6 = vsub.f32 0.0, %v1389_v57 }
 0x21c   :  { %v5568_v5 = vpop.eup %5567  ;;  %4047 = vst.msk [vmem:[%s7711_s5 + $0x378] sm:$0xff] %vm851_vm1, %v5566_v2  ;;  %5579 = vrcp.f32 %v771_v0  ;;  %v695_v40 = vmul.f32 1.442695, %v581_v1 }
 0x21d   :  { %v5570_v7 = vpop.eup %5569  ;;  %4347 = vst.msk [vmem:[%s7711_s5 + $0x578] sm:$0xff] %vm851_vm1, %v5568_v5  ;;  %5581 = vpow2.f32 %v1585_v59  ;;  %v2280_v10 = vpop.f32.mrf.mxu2  ;;  %v1587_v19 = vmul.f32 1.442695, %v1473_v6 }
 0x21e   :  { %v5572_v8 = vpop.eup %5571  ;;  %v1663_v9 = vadd.f32 1.0, %v5570_v7  ;;  %5583 = vpow2.f32 %v2477_v3  ;;  %v3172_v11 = vpop.f32.mrf.mxu3  ;;  %v2281_v45 = vadd.f32 %v7345_v21, %v2280_v10 }
 0x21f   :  { %v5574_v12 = vpop.eup %5573  ;;  %4647 = vst.msk [vmem:[%s7711_s5 + $0x778] sm:$0xff] %vm851_vm1, %v5572_v8  ;;  %5585 = vpow2.f32 %v3369_v4  ;;  %v3173_v13 = vadd.f32 %v7345_v21, %v3172_v11  ;;  %v498_v14 = vpop.f32.mrf.mxu0 }
 0x220   :  { %v1390_v15 = vpop.f32.mrf.mxu1  ;;  %v5576_v17 = vpop.eup %5575  ;;  %5587 = vrcp.f32 %v1663_v9  ;;  %v2555_v18 = vadd.f32 1.0, %v5574_v12  ;;  %v499_v20 = vadd.f32 %v7345_v21, %v498_v14  ;;  %v2365_v24 = vsub.f32 0.0, %v2281_v45 }
 0x221   :  { %v5578_v22 = vpop.eup %5577  ;;  %v3447_v23 = vadd.f32 1.0, %v5576_v17  ;;  %5589 = vpow2.f32 %v695_v40  ;;  %v1391_v25 = vadd.f32 %v7345_v21, %v1390_v15  ;;  %v3257_v28 = vsub.f32 0.0, %v3173_v13 }
 0x222   :  { %v5580_v26 = vpop.eup %5579  ;;  %5591 = vrcp.f32 %v2555_v18  ;;  %v772_v27 = vadd.f32 1.0, %v5578_v22  ;;  %v582_v30 = vsub.f32 0.0, %v499_v20  ;;  %v2479_v34 = vmul.f32 1.442695, %v2365_v24 }
 0x223   :  { %v5582_v29 = vpop.eup %5581  ;;  %900 = vst.msk [vmem:[%s7711_s5 + $0x180] sm:$0xff] %vm851_vm1, %v5580_v26  ;;  %5593 = vrcp.f32 %v3447_v23  ;;  %v1474_v35 = vsub.f32 0.0, %v1391_v25  ;;  %v3371_v38 = vmul.f32 1.442695, %v3257_v28 }
 0x224   :  { %v5584_v31 = vpop.eup %5583  ;;  %5595 = vrcp.f32 %v772_v27  ;;  %v1664_v63 = vadd.f32 1.0, %v5582_v29  ;;  %v697_v43 = vmul.f32 1.442695, %v582_v30 }
 0x225   :  { %v5586_v32 = vpop.eup %5585  ;;  %v2556_v33 = vadd.f32 1.0, %v5584_v31  ;;  %5597 = vpow2.f32 %v1587_v19  ;;  %v2282_v39 = vpop.f32.mrf.mxu2  ;;  %v1589_v53 = vmul.f32 1.442695, %v1474_v35 }
 0x226   :  { %v5588_v36 = vpop.eup %5587  ;;  %5599 = vrcp.f32 %v1664_v63  ;;  %v3448_v37 = vadd.f32 1.0, %v5586_v32  ;;  %v3174_v41 = vpop.f32.mrf.mxu3  ;;  %v2283_v44 = vadd.f32 %v7345_v21, %v2282_v39 }
 0x227   :  { %v5590_v42 = vpop.eup %5589  ;;  %4048 = vst.msk [vmem:[%s7711_s5 + $0x380] sm:$0xff] %vm851_vm1, %v5588_v36  ;;  %5601 = vrcp.f32 %v2556_v33  ;;  %v3175_v46 = vadd.f32 %v7345_v21, %v3174_v41  ;;  %v501_v47 = vpop.f32.mrf.mxu0 }
 0x228   :  { %v1393_v48 = vpop.f32.mrf.mxu1  ;;  %v5592_v49 = vpop.eup %5591  ;;  %5603 = vrcp.f32 %v3448_v37  ;;  %v773_v50 = vadd.f32 1.0, %v5590_v42  ;;  %v502_v16 = vadd.f32 %v7345_v21, %v501_v47  ;;  %v2366_v54 = vsub.f32 0.0, %v2283_v44 }
 0x229   :  { %v1394_v51 = vadd.f32 %v7345_v21, %v1393_v48  ;;  %v5594_v52 = vpop.eup %5593  ;;  %4348 = vst.msk [vmem:[%s7711_s5 + $0x580] sm:$0xff] %vm851_vm1, %v5592_v49  ;;  %5605 = vpow2.f32 %v2479_v34  ;;  %v3258_v55 = vsub.f32 0.0, %v3175_v46 }
 0x22a   :  { %v5596_v56 = vpop.eup %5595  ;;  %4648 = vst.msk [vmem:[%s7711_s5 + $0x780] sm:$0xff] %vm851_vm1, %v5594_v52  ;;  %5607 = vrcp.f32 %v773_v50  ;;  %v583_v57 = vsub.f32 0.0, %v502_v16  ;;  %v2481_v59 = vmul.f32 1.442695, %v2366_v54 }
 0x22b   :  { %v5598_v58 = vpop.eup %5597  ;;  %901 = vst.msk [vmem:[%s7711_s5 + $0x188] sm:$0xff] %vm851_vm1, %v5596_v56  ;;  %5609 = vpow2.f32 %v3371_v38  ;;  %v1475_v60 = vsub.f32 0.0, %v1394_v51  ;;  %v3373_v0 = vmul.f32 1.442695, %v3258_v55 }
 0x22c   :  { %v5600_v61 = vpop.eup %5599  ;;  %v1665_v62 = vadd.f32 1.0, %v5598_v58  ;;  %5611 = vpow2.f32 %v697_v43  ;;  %v699_v2 = vmul.f32 1.442695, %v583_v57 }
 0x22d   :  { %v5602_v1 = vpop.eup %5601  ;;  %4049 = vst.msk [vmem:[%s7711_s5 + $0x388] sm:$0xff] %vm851_vm1, %v5600_v61  ;;  %5613 = vpow2.f32 %v1589_v53  ;;  %v2285_v4 = vpop.f32.mrf.mxu2  ;;  %v1591_v7 = vmul.f32 1.442695, %v1475_v60 }
 0x22e   :  { %v5604_v3 = vpop.eup %5603  ;;  %4349 = vst.msk [vmem:[%s7711_s5 + $0x588] sm:$0xff] %vm851_vm1, %v5602_v1  ;;  %5615 = vrcp.f32 %v1665_v62  ;;  %v3177_v5 = vpop.f32.mrf.mxu3  ;;  %v2286_v40 = vadd.f32 %v7345_v21, %v2285_v4 }
 0x22f   :  { %v5606_v6 = vpop.eup %5605  ;;  %4649 = vst.msk [vmem:[%s7711_s5 + $0x788] sm:$0xff] %vm851_vm1, %v5604_v3  ;;  %5617 = vpow2.f32 %v2481_v59  ;;  %v3178_v8 = vadd.f32 %v7345_v21, %v3177_v5  ;;  %v503_v9 = vpop.f32.mrf.mxu0 }
 0x230   :  { %v1395_v10 = vpop.f32.mrf.mxu1  ;;  %v5608_v11 = vpop.eup %5607  ;;  %v2557_v12 = vadd.f32 1.0, %v5606_v6  ;;  %5619 = vpow2.f32 %v3373_v0  ;;  %v2367_v13 = vsub.f32 0.0, %v2286_v40  ;;  %v504_v14 = vadd.f32 %v7345_v21, %v503_v9 }
 0x231   :  { %v5610_v45 = vpop.eup %5609  ;;  %902 = vst.msk [vmem:[%s7711_s5 + $0x190] sm:$0xff] %vm851_vm1, %v5608_v11  ;;  %5621 = vpow2.f32 %v699_v2  ;;  %v3259_v18 = vsub.f32 0.0, %v3178_v8  ;;  %v1396_v19 = vadd.f32 %v7345_v21, %v1395_v10 }
 0x232   :  { %v5612_v15 = vpop.eup %5611  ;;  %5623 = vrcp.f32 %v2557_v12  ;;  %v3449_v17 = vadd.f32 1.0, %v5610_v45  ;;  %v2483_v23 = vmul.f32 1.442695, %v2367_v13  ;;  %v584_v27 = vsub.f32 0.0, %v504_v14 }
 0x233   :  { %v5614_v20 = vpop.eup %5613  ;;  %v774_v22 = vadd.f32 1.0, %v5612_v15  ;;  %5625 = vpow2.f32 %v1591_v7  ;;  %v3375_v30 = vmul.f32 1.442695, %v3259_v18  ;;  %v1476_v31 = vsub.f32 0.0, %v1396_v19 }
 0x234   :  { %v5616_v24 = vpop.eup %5615  ;;  %5627 = vrcp.f32 %v3449_v17  ;;  %v1666_v25 = vadd.f32 1.0, %v5614_v20  ;;  %v701_v46 = vmul.f32 1.442695, %v584_v27 }
 0x235   :  { %v5618_v26 = vpop.eup %5617  ;;  %4050 = vst.msk [vmem:[%s7711_s5 + $0x390] sm:$0xff] %vm851_vm1, %v5616_v24  ;;  %5629 = vrcp.f32 %v774_v22  ;;  %v2287_v63 = vpop.f32.mrf.mxu2  ;;  %v1593_v16 = vmul.f32 1.442695, %v1476_v31 }
 0x236   :  { %v5620_v28 = vpop.eup %5619  ;;  %5631 = vrcp.f32 %v1666_v25  ;;  %v2558_v29 = vadd.f32 1.0, %v5618_v26  ;;  %v3179_v32 = vpop.f32.mrf.mxu3  ;;  %v2288_v35 = vadd.f32 %v7345_v21, %v2287_v63 }
 0x237   :  { %v5622_v33 = vpop.eup %5621  ;;  %v3450_v34 = vadd.f32 1.0, %v5620_v28  ;;  %5633 = vpow2.f32 %v2483_v23  ;;  %v3180_v36 = vadd.f32 %v7345_v21, %v3179_v32  ;;  %v506_v37 = vpop.f32.mrf.mxu0 }
 0x238   :  { %v1398_v38 = vpop.f32.mrf.mxu1  ;;  %v5624_v39 = vpop.eup %5623  ;;  %5635 = vrcp.f32 %v2558_v29  ;;  %v775_v41 = vadd.f32 1.0, %v5622_v33  ;;  %v507_v42 = vadd.f32 %v7345_v21, %v506_v37  ;;  %v2368_v47 = vsub.f32 0.0, %v2288_v35 }
 0x239   :  { %v1399_v43 = vadd.f32 %v7345_v21, %v1398_v38  ;;  %v5626_v44 = vpop.eup %5625  ;;  %4350 = vst.msk [vmem:[%s7711_s5 + $0x590] sm:$0xff] %vm851_vm1, %v5624_v39  ;;  %5637 = vrcp.f32 %v3450_v34  ;;  %v3260_v48 = vsub.f32 0.0, %v3180_v36 }
 0x23a   :  { %v5628_v49 = vpop.eup %5627  ;;  %5639 = vrcp.f32 %v775_v41  ;;  %v1667_v50 = vadd.f32 1.0, %v5626_v44  ;;  %v585_v51 = vsub.f32 0.0, %v507_v42  ;;  %v2485_v53 = vmul.f32 1.442695, %v2368_v47 }
 0x23b   :  { %v5630_v52 = vpop.eup %5629  ;;  %4650 = vst.msk [vmem:[%s7711_s5 + $0x790] sm:$0xff] %vm851_vm1, %v5628_v49  ;;  %5641 = vpow2.f32 %v3375_v30  ;;  %v1477_v54 = vsub.f32 0.0, %v1399_v43  ;;  %v3377_v57 = vmul.f32 1.442695, %v3260_v48 }
 0x23c   :  { %v5632_v55 = vpop.eup %5631  ;;  %903 = vst.msk [vmem:[%s7711_s5 + $0x198] sm:$0xff] %vm851_vm1, %v5630_v52  ;;  %5643 = vrcp.f32 %v1667_v50  ;;  %v703_v60 = vmul.f32 1.442695, %v585_v51 }
 0x23d   :  { %v5634_v56 = vpop.eup %5633  ;;  %4051 = vst.msk [vmem:[%s7711_s5 + $0x398] sm:$0xff] %vm851_vm1, %v5632_v55  ;;  %5645 = vpow2.f32 %v701_v46  ;;  %v2290_v61 = vpop.f32.mrf.mxu2  ;;  %v1595_v1 = vmul.f32 1.442695, %v1477_v54 }
 0x23e   :  { %v5636_v58 = vpop.eup %5635  ;;  %v2559_v59 = vadd.f32 1.0, %v5634_v56  ;;  %5647 = vpow2.f32 %v1593_v16  ;;  %v3182_v62 = vpop.f32.mrf.mxu3  ;;  %v2291_v2 = vadd.f32 %v7345_v21, %v2290_v61 }
 0x23f   :  { %v5638_v0 = vpop.eup %5637  ;;  %4351 = vst.msk [vmem:[%s7711_s5 + $0x598] sm:$0xff] %vm851_vm1, %v5636_v58  ;;  %5649 = vpow2.f32 %v2485_v53  ;;  %v3183_v3 = vadd.f32 %v7345_v21, %v3182_v62  ;;  %v508_v4 = vpop.f32.mrf.mxu0 }
 0x240   :  { %v1400_v5 = vpop.f32.mrf.mxu1  ;;  %v5640_v6 = vpop.eup %5639  ;;  %4651 = vst.msk [vmem:[%s7711_s5 + $0x798] sm:$0xff] %vm851_vm1, %v5638_v0  ;;  %5651 = vrcp.f32 %v2559_v59  ;;  %v509_v7 = vadd.f32 %v7345_v21, %v508_v4  ;;  %v2369_v8 = vsub.f32 0.0, %v2291_v2 }
 0x241   :  { %v5642_v40 = vpop.eup %5641  ;;  %904 = vst.msk [vmem:[%s7711_s5 + $0x1a0] sm:$0xff] %vm851_vm1, %v5640_v6  ;;  %5653 = vpow2.f32 %v3377_v57  ;;  %v3261_v9 = vsub.f32 0.0, %v3183_v3  ;;  %v1401_v12 = vadd.f32 %v7345_v21, %v1400_v5 }
 0x242   :  { %v5644_v10 = vpop.eup %5643  ;;  %v3451_v11 = vadd.f32 1.0, %v5642_v40  ;;  %5655 = vpow2.f32 %v703_v60  ;;  %v2487_v13 = vmul.f32 1.442695, %v2369_v8  ;;  %v586_v14 = vsub.f32 0.0, %v509_v7 }
 0x243   :  { %v5646_v45 = vpop.eup %5645  ;;  %4052 = vst.msk [vmem:[%s7711_s5 + $0x3a0] sm:$0xff] %vm851_vm1, %v5644_v10  ;;  %5657 = vpow2.f32 %v1595_v1  ;;  %v3379_v20 = vmul.f32 1.442695, %v3261_v9  ;;  %v1478_v24 = vsub.f32 0.0, %v1401_v12 }
 0x244   :  { %v5648_v15 = vpop.eup %5647  ;;  %5659 = vrcp.f32 %v3451_v11  ;;  %v776_v17 = vadd.f32 1.0, %v5646_v45  ;;  %v705_v28 = vmul.f32 1.442695, %v586_v14 }
 0x245   :  { %v5650_v18 = vpop.eup %5649  ;;  %v1668_v19 = vadd.f32 1.0, %v5648_v15  ;;  %5661 = vpow2.f32 %v2487_v13  ;;  %v2292_v25 = vpop.f32.mrf.mxu2  ;;  %v1597_v44 = vmul.f32 1.442695, %v1478_v24 }
 0x246   :  { %v5652_v22 = vpop.eup %5651  ;;  %5663 = vrcp.f32 %v776_v17  ;;  %v2560_v23 = vadd.f32 1.0, %v5650_v18  ;;  %v3184_v26 = vpop.f32.mrf.mxu3  ;;  %v2293_v29 = vadd.f32 %v7345_v21, %v2292_v25 }
 0x247   :  { %v5654_v27 = vpop.eup %5653  ;;  %4352 = vst.msk [vmem:[%s7711_s5 + $0x5a0] sm:$0xff] %vm851_vm1, %v5652_v22  ;;  %5665 = vrcp.f32 %v1668_v19  ;;  %v3185_v30 = vadd.f32 %v7345_v21, %v3184_v26  ;;  %v511_v31 = vpop.f32.mrf.mxu0 }
 0x248   :  { %v1403_v63 = vpop.f32.mrf.mxu1  ;;  %v5656_v32 = vpop.eup %5655  ;;  %5667 = vrcp.f32 %v2560_v23  ;;  %v3452_v33 = vadd.f32 1.0, %v5654_v27  ;;  %v512_v34 = vadd.f32 %v7345_v21, %v511_v31  ;;  %v2370_v38 = vsub.f32 0.0, %v2293_v29 }
 0x249   :  { %v1404_v35 = vadd.f32 %v7345_v21, %v1403_v63  ;;  %v5658_v36 = vpop.eup %5657  ;;  %v777_v37 = vadd.f32 1.0, %v5656_v32  ;;  %5669 = vpow2.f32 %v3379_v20  ;;  %v3262_v39 = vsub.f32 0.0, %v3185_v30 }
 0x24a   :  { %v5660_v41 = vpop.eup %5659  ;;  %5671 = vrcp.f32 %v3452_v33  ;;  %v1669_v42 = vadd.f32 1.0, %v5658_v36  ;;  %v587_v46 = vsub.f32 0.0, %v512_v34  ;;  %v2489_v49 = vmul.f32 1.442695, %v2370_v38 }
 0x24b   :  { %v5662_v43 = vpop.eup %5661  ;;  %4652 = vst.msk [vmem:[%s7711_s5 + $0x7a0] sm:$0xff] %vm851_vm1, %v5660_v41  ;;  %5673 = vrcp.f32 %v777_v37  ;;  %v1479_v50 = vsub.f32 0.0, %v1404_v35  ;;  %v3381_v51 = vmul.f32 1.442695, %v3262_v39 }
 0x24c   :  { %v5664_v47 = vpop.eup %5663  ;;  %5675 = vrcp.f32 %v1669_v42  ;;  %v2561_v48 = vadd.f32 1.0, %v5662_v43  ;;  %v707_v56 = vmul.f32 1.442695, %v587_v46 }
 0x24d   :  { %v5666_v16 = vpop.eup %5665  ;;  %905 = vst.msk [vmem:[%s7711_s5 + $0x1a8] sm:$0xff] %vm851_vm1, %v5664_v47  ;;  %5677 = vpow2.f32 %v705_v28  ;;  %v2295_v53 = vpop.f32.mrf.mxu2  ;;  %v1599_v0 = vmul.f32 1.442695, %v1479_v50 }
 0x24e   :  { %v5668_v52 = vpop.eup %5667  ;;  %4053 = vst.msk [vmem:[%s7711_s5 + $0x3a8] sm:$0xff] %vm851_vm1, %v5666_v16  ;;  %5679 = vrcp.f32 %v2561_v48  ;;  %v3187_v54 = vpop.f32.mrf.mxu3  ;;  %v2296_v57 = vadd.f32 %v7345_v21, %v2295_v53 }
 0x24f   :  { %v5670_v55 = vpop.eup %5669  ;;  %4353 = vst.msk [vmem:[%s7711_s5 + $0x5a8] sm:$0xff] %vm851_vm1, %v5668_v52  ;;  %5681 = vpow2.f32 %v1597_v44  ;;  %v3188_v58 = vadd.f32 %v7345_v21, %v3187_v54  ;;  %v513_v59 = vpop.f32.mrf.mxu0 }
 0x250   :  { %v1405_v60 = vpop.f32.mrf.mxu1  ;;  %v5672_v61 = vpop.eup %5671  ;;  %v3453_v62 = vadd.f32 1.0, %v5670_v55  ;;  %5683 = vpow2.f32 %v2489_v49  ;;  %v514_v1 = vadd.f32 %v7345_v21, %v513_v59  ;;  %v2371_v3 = vsub.f32 0.0, %v2296_v57 }
 0x251   :  { %v5674_v2 = vpop.eup %5673  ;;  %4653 = vst.msk [vmem:[%s7711_s5 + $0x7a8] sm:$0xff] %vm851_vm1, %v5672_v61  ;;  %5685 = vpow2.f32 %v3381_v51  ;;  %v3263_v4 = vsub.f32 0.0, %v3188_v58  ;;  %v1406_v7 = vadd.f32 %v7345_v21, %v1405_v60 }
 0x252   :  { %v5676_v5 = vpop.eup %5675  ;;  %906 = vst.msk [vmem:[%s7711_s5 + $0x1b0] sm:$0xff] %vm851_vm1, %v5674_v2  ;;  %5687 = vrcp.f32 %v3453_v62  ;;  %v588_v6 = vsub.f32 0.0, %v514_v1  ;;  %v2491_v8 = vmul.f32 1.442695, %v2371_v3 }
 0x253   :  { %v5678_v40 = vpop.eup %5677  ;;  %4054 = vst.msk [vmem:[%s7711_s5 + $0x3b0] sm:$0xff] %vm851_vm1, %v5676_v5  ;;  %5689 = vpow2.f32 %v707_v56  ;;  %v3383_v9 = vmul.f32 1.442695, %v3263_v4  ;;  %v1480_v15 = vsub.f32 0.0, %v1406_v7 }
 0x254   :  { %v5680_v10 = vpop.eup %5679  ;;  %v778_v11 = vadd.f32 1.0, %v5678_v40  ;;  %5691 = vpow2.f32 %v1599_v0  ;;  %v709_v14 = vmul.f32 1.442695, %v588_v6 }
 0x255   :  { %v5682_v12 = vpop.eup %5681  ;;  %4354 = vst.msk [vmem:[%s7711_s5 + $0x5b0] sm:$0xff] %vm851_vm1, %v5680_v10  ;;  %5693 = vpow2.f32 %v2491_v8  ;;  %v2297_v17 = vpop.f32.mrf.mxu2  ;;  %v1601_v36 = vmul.f32 1.442695, %v1480_v15 }
 0x256   :  { %v5684_v45 = vpop.eup %5683  ;;  %5695 = vrcp.f32 %v778_v11  ;;  %v1670_v13 = vadd.f32 1.0, %v5682_v12  ;;  %v3189_v18 = vpop.f32.mrf.mxu3  ;;  %v2298_v22 = vadd.f32 %v7345_v21, %v2297_v17 }
 0x257   :  { %v5686_v19 = vpop.eup %5685  ;;  %v2562_v20 = vadd.f32 1.0, %v5684_v45  ;;  %5697 = vpow2.f32 %v3383_v9  ;;  %v3190_v23 = vadd.f32 %v7345_v21, %v3189_v18  ;;  %v516_v24 = vpop.f32.mrf.mxu0 }
 0x258   :  { %v1408_v25 = vpop.f32.mrf.mxu1  ;;  %v5688_v26 = vpop.eup %5687  ;;  %5699 = vrcp.f32 %v1670_v13  ;;  %v3454_v27 = vadd.f32 1.0, %v5686_v19  ;;  %v517_v28 = vadd.f32 %v7345_v21, %v516_v24  ;;  %v2372_v30 = vsub.f32 0.0, %v2298_v22 }
 0x259   :  { %v5690_v29 = vpop.eup %5689  ;;  %4654 = vst.msk [vmem:[%s7711_s5 + $0x7b0] sm:$0xff] %vm851_vm1, %v5688_v26  ;;  %5701 = vrcp.f32 %v2562_v20  ;;  %v1409_v31 = vadd.f32 %v7345_v21, %v1408_v25  ;;  %v3264_v33 = vsub.f32 0.0, %v3190_v23 }
 0x25a   :  { %v5692_v63 = vpop.eup %5691  ;;  %5703 = vrcp.f32 %v3454_v27  ;;  %v779_v32 = vadd.f32 1.0, %v5690_v29  ;;  %v589_v37 = vsub.f32 0.0, %v517_v28  ;;  %v2493_v42 = vmul.f32 1.442695, %v2372_v30 }
 0x25b   :  { %v5694_v34 = vpop.eup %5693  ;;  %v1671_v35 = vadd.f32 1.0, %v5692_v63  ;;  %5705 = vpow2.f32 %v709_v14  ;;  %v1481_v43 = vsub.f32 0.0, %v1409_v31  ;;  %v3385_v47 = vmul.f32 1.442695, %v3264_v33 }
 0x25c   :  { %v5696_v38 = vpop.eup %5695  ;;  %5707 = vrcp.f32 %v779_v32  ;;  %v2563_v39 = vadd.f32 1.0, %v5694_v34  ;;  %v711_v16 = vmul.f32 1.442695, %v589_v37 }
 0x25d   :  { %v5698_v41 = vpop.eup %5697  ;;  %907 = vst.msk [vmem:[%s7711_s5 + $0x1b8] sm:$0xff] %vm851_vm1, %v5696_v38  ;;  %5709 = vrcp.f32 %v1671_v35  ;;  %v2300_v48 = vpop.f32.mrf.mxu2  ;;  %v1603_v59 = vmul.f32 1.442695, %v1481_v43 }
 0x25e   :  { %v5700_v44 = vpop.eup %5699  ;;  %5711 = vrcp.f32 %v2563_v39  ;;  %v3455_v46 = vadd.f32 1.0, %v5698_v41  ;;  %v3192_v49 = vpop.f32.mrf.mxu3  ;;  %v2301_v51 = vadd.f32 %v7345_v21, %v2300_v48 }
 0x25f   :  { %v5702_v50 = vpop.eup %5701  ;;  %4055 = vst.msk [vmem:[%s7711_s5 + $0x3b8] sm:$0xff] %vm851_vm1, %v5700_v44  ;;  %5713 = vpow2.f32 %v1601_v36  ;;  %v3193_v52 = vadd.f32 %v7345_v21, %v3192_v49  ;;  %v518_v53 = vpop.f32.mrf.mxu0 }
 0x260   :  { %v1410_v54 = vpop.f32.mrf.mxu1  ;;  %v5704_v55 = vpop.eup %5703  ;;  %4355 = vst.msk [vmem:[%s7711_s5 + $0x5b8] sm:$0xff] %vm851_vm1, %v5702_v50  ;;  %5715 = vrcp.f32 %v3455_v46  ;;  %v519_v56 = vadd.f32 %v7345_v21, %v518_v53  ;;  %v2373_v60 = vsub.f32 0.0, %v2301_v51 }
 0x261   :  { %v1411_v57 = vadd.f32 %v7345_v21, %v1410_v54  ;;  %v5706_v58 = vpop.eup %5705  ;;  %4655 = vst.msk [vmem:[%s7711_s5 + $0x7b8] sm:$0xff] %vm851_vm1, %v5704_v55  ;;  %5717 = vpow2.f32 %v2493_v42  ;;  %v3265_v61 = vsub.f32 0.0, %v3193_v52 }
 0x262   :  { %v5708_v62 = vpop.eup %5707  ;;  %v780_v0 = vadd.f32 1.0, %v5706_v58  ;;  %5719 = vpow2.f32 %v3385_v47  ;;  %v590_v1 = vsub.f32 0.0, %v519_v56  ;;  %v2495_v3 = vmul.f32 1.442695, %v2373_v60 }
 0x263   :  { %v5710_v2 = vpop.eup %5709  ;;  %908 = vst.msk [vmem:[%s7711_s5 + $0x1c0] sm:$0xff] %vm851_vm1, %v5708_v62  ;;  %5721 = vpow2.f32 %v711_v16  ;;  %v3387_v4 = vmul.f32 1.442695, %v3265_v61  ;;  %v1482_v6 = vsub.f32 0.0, %v1411_v57 }
 0x264   :  { %v5712_v5 = vpop.eup %5711  ;;  %4056 = vst.msk [vmem:[%s7711_s5 + $0x3c0] sm:$0xff] %vm851_vm1, %v5710_v2  ;;  %5723 = vrcp.f32 %v780_v0  ;;  %v713_v40 = vmul.f32 1.442695, %v590_v1 }
 0x265   :  { %v5714_v7 = vpop.eup %5713  ;;  %4356 = vst.msk [vmem:[%s7711_s5 + $0x5c0] sm:$0xff] %vm851_vm1, %v5712_v5  ;;  %5725 = vpow2.f32 %v1603_v59  ;;  %v2302_v10 = vpop.f32.mrf.mxu2  ;;  %v1605_v19 = vmul.f32 1.442695, %v1482_v6 }
 0x266   :  { %v5716_v8 = vpop.eup %5715  ;;  %v1672_v9 = vadd.f32 1.0, %v5714_v7  ;;  %5727 = vpow2.f32 %v2495_v3  ;;  %v3194_v11 = vpop.f32.mrf.mxu3  ;;  %v2303_v45 = vadd.f32 %v7345_v21, %v2302_v10  ;;  %v7614_v7 = vld [vmem:[%s7710_s2] ss:$0 sm:$0xff] }
 0x267   :  { %v5718_v12 = vpop.eup %5717  ;;  %4656 = vst.msk [vmem:[%s7711_s5 + $0x7c0] sm:$0xff] %vm851_vm1, %v5716_v8  ;;  %5729 = vpow2.f32 %v3387_v4  ;;  %v3195_v13 = vadd.f32 %v7345_v21, %v3194_v11  ;;  %v521_v14 = vpop.f32.mrf.mxu0 }
 0x268   :  { %v1413_v15 = vpop.f32.mrf.mxu1  ;;  %v5720_v17 = vpop.eup %5719  ;;  %5731 = vrcp.f32 %v1672_v9  ;;  %v2564_v18 = vadd.f32 1.0, %v5718_v12  ;;  %v522_v20 = vadd.f32 %v7345_v21, %v521_v14  ;;  %v2374_v24 = vsub.f32 0.0, %v2303_v45 }
 0x269   :  { %v5722_v22 = vpop.eup %5721  ;;  %v3456_v23 = vadd.f32 1.0, %v5720_v17  ;;  %5733 = vpow2.f32 %v713_v40  ;;  %v1414_v25 = vadd.f32 %v7345_v21, %v1413_v15  ;;  %v3266_v28 = vsub.f32 0.0, %v3195_v13 }
 0x26a   :  { %v5724_v26 = vpop.eup %5723  ;;  %5735 = vrcp.f32 %v2564_v18  ;;  %v781_v27 = vadd.f32 1.0, %v5722_v22  ;;  %v591_v30 = vsub.f32 0.0, %v522_v20  ;;  %v2497_v34 = vmul.f32 1.442695, %v2374_v24 }
 0x26b   :  { %v5726_v29 = vpop.eup %5725  ;;  %909 = vst.msk [vmem:[%s7711_s5 + $0x1c8] sm:$0xff] %vm851_vm1, %v5724_v26  ;;  %5737 = vrcp.f32 %v3456_v23  ;;  %v1483_v35 = vsub.f32 0.0, %v1414_v25  ;;  %v3389_v38 = vmul.f32 1.442695, %v3266_v28 }
 0x26c   :  { %v5728_v31 = vpop.eup %5727  ;;  %5739 = vrcp.f32 %v781_v27  ;;  %v1673_v63 = vadd.f32 1.0, %v5726_v29  ;;  %v715_v43 = vmul.f32 1.442695, %v591_v30 }
 0x26d   :  { %v5730_v32 = vpop.eup %5729  ;;  %v2565_v33 = vadd.f32 1.0, %v5728_v31  ;;  %5741 = vpow2.f32 %v1605_v19  ;;  %v2305_v39 = vpop.f32.mrf.mxu2  ;;  %v1607_v53 = vmul.f32 1.442695, %v1483_v35 }
 0x26e   :  { %v5732_v36 = vpop.eup %5731  ;;  %5743 = vrcp.f32 %v1673_v63  ;;  %v3457_v37 = vadd.f32 1.0, %v5730_v32  ;;  %v3197_v41 = vpop.f32.mrf.mxu3  ;;  %v2306_v44 = vadd.f32 %v7345_v21, %v2305_v39 }
 0x26f   :  { %v5734_v42 = vpop.eup %5733  ;;  %4057 = vst.msk [vmem:[%s7711_s5 + $0x3c8] sm:$0xff] %vm851_vm1, %v5732_v36  ;;  %5745 = vrcp.f32 %v2565_v33  ;;  %v3198_v46 = vadd.f32 %v7345_v21, %v3197_v41  ;;  %v523_v47 = vpop.f32.mrf.mxu0 }
 0x270   :  { %v1415_v48 = vpop.f32.mrf.mxu1  ;;  %v5736_v49 = vpop.eup %5735  ;;  %5747 = vrcp.f32 %v3457_v37  ;;  %v782_v50 = vadd.f32 1.0, %v5734_v42  ;;  %v524_v16 = vadd.f32 %v7345_v21, %v523_v47  ;;  %v2375_v54 = vsub.f32 0.0, %v2306_v44 }
 0x271   :  { %v1416_v51 = vadd.f32 %v7345_v21, %v1415_v48  ;;  %v5738_v52 = vpop.eup %5737  ;;  %4357 = vst.msk [vmem:[%s7711_s5 + $0x5c8] sm:$0xff] %vm851_vm1, %v5736_v49  ;;  %5749 = vpow2.f32 %v2497_v34  ;;  %v3267_v55 = vsub.f32 0.0, %v3198_v46 }
 0x272   :  { %v5740_v56 = vpop.eup %5739  ;;  %4657 = vst.msk [vmem:[%s7711_s5 + $0x7c8] sm:$0xff] %vm851_vm1, %v5738_v52  ;;  %5751 = vrcp.f32 %v782_v50  ;;  %v592_v57 = vsub.f32 0.0, %v524_v16  ;;  %v2499_v21 = vmul.f32 1.442695, %v2375_v54 }
 0x273   :  { %v5742_v58 = vpop.eup %5741  ;;  %910 = vst.msk [vmem:[%s7711_s5 + $0x1d0] sm:$0xff] %vm851_vm1, %v5740_v56  ;;  %5753 = vpow2.f32 %v3389_v38  ;;  %v1484_v59 = vsub.f32 0.0, %v1416_v51  ;;  %v3391_v62 = vmul.f32 1.442695, %v3267_v55 }
 0x274   :  { %v5744_v60 = vpop.eup %5743  ;;  %v1674_v61 = vadd.f32 1.0, %v5742_v58  ;;  %5755 = vpow2.f32 %v715_v43  ;;  %v717_v1 = vmul.f32 1.442695, %v592_v57 }
 0x275   :  { %v5746_v0 = vpop.eup %5745  ;;  %4058 = vst.msk [vmem:[%s7711_s5 + $0x3d0] sm:$0xff] %vm851_vm1, %v5744_v60  ;;  %5757 = vpow2.f32 %v1607_v53  ;;  %v2307_v3 = vpop.f32.mrf.mxu2  ;;  %v1609_v6 = vmul.f32 1.442695, %v1484_v59 }
 0x276   :  { %v5748_v2 = vpop.eup %5747  ;;  %4358 = vst.msk [vmem:[%s7711_s5 + $0x5d0] sm:$0xff] %vm851_vm1, %v5746_v0  ;;  %5759 = vrcp.f32 %v1674_v61  ;;  %v3199_v4 = vpop.f32.mrf.mxu3  ;;  %v2308_v40 = vadd.f32 %v7614_v7, %v2307_v3 }
 0x277   :  { %v5750_v5 = vpop.eup %5749  ;;  %4658 = vst.msk [vmem:[%s7711_s5 + $0x7d0] sm:$0xff] %vm851_vm1, %v5748_v2  ;;  %5761 = vpow2.f32 %v2499_v21  ;;  %v3200_v8 = vadd.f32 %v7614_v7, %v3199_v4  ;;  %v526_v9 = vpop.f32.mrf.mxu0 }
 0x278   :  { %v1418_v10 = vpop.f32.mrf.mxu1  ;;  %v5752_v11 = vpop.eup %5751  ;;  %v2566_v12 = vadd.f32 1.0, %v5750_v5  ;;  %5763 = vpow2.f32 %v3391_v62  ;;  %v2376_v13 = vsub.f32 0.0, %v2308_v40  ;;  %v527_v14 = vadd.f32 %v7614_v7, %v526_v9 }
 0x279   :  { %v5754_v45 = vpop.eup %5753  ;;  %911 = vst.msk [vmem:[%s7711_s5 + $0x1d8] sm:$0xff] %vm851_vm1, %v5752_v11  ;;  %5765 = vpow2.f32 %v717_v1  ;;  %v3268_v18 = vsub.f32 0.0, %v3200_v8  ;;  %v1419_v19 = vadd.f32 %v7614_v7, %v1418_v10 }
 0x27a   :  { %v5756_v15 = vpop.eup %5755  ;;  %5767 = vrcp.f32 %v2566_v12  ;;  %v3458_v17 = vadd.f32 1.0, %v5754_v45  ;;  %v2501_v23 = vmul.f32 1.442695, %v2376_v13  ;;  %v593_v27 = vsub.f32 0.0, %v527_v14 }
 0x27b   :  { %v5758_v20 = vpop.eup %5757  ;;  %v783_v22 = vadd.f32 1.0, %v5756_v15  ;;  %5769 = vpow2.f32 %v1609_v6  ;;  %v3393_v30 = vmul.f32 1.442695, %v3268_v18  ;;  %v1485_v31 = vsub.f32 0.0, %v1419_v19 }
 0x27c   :  { %v5760_v24 = vpop.eup %5759  ;;  %5771 = vrcp.f32 %v3458_v17  ;;  %v1675_v25 = vadd.f32 1.0, %v5758_v20  ;;  %v719_v46 = vmul.f32 1.442695, %v593_v27 }
 0x27d   :  { %v5762_v26 = vpop.eup %5761  ;;  %4059 = vst.msk [vmem:[%s7711_s5 + $0x3d8] sm:$0xff] %vm851_vm1, %v5760_v24  ;;  %5773 = vrcp.f32 %v783_v22  ;;  %v2310_v63 = vpop.f32.mrf.mxu2  ;;  %v1611_v16 = vmul.f32 1.442695, %v1485_v31 }
 0x27e   :  { %v5764_v28 = vpop.eup %5763  ;;  %5775 = vrcp.f32 %v1675_v25  ;;  %v2567_v29 = vadd.f32 1.0, %v5762_v26  ;;  %v3202_v32 = vpop.f32.mrf.mxu3  ;;  %v2311_v35 = vadd.f32 %v7614_v7, %v2310_v63 }
 0x27f   :  { %v5766_v33 = vpop.eup %5765  ;;  %v3459_v34 = vadd.f32 1.0, %v5764_v28  ;;  %5777 = vpow2.f32 %v2501_v23  ;;  %v3203_v36 = vadd.f32 %v7614_v7, %v3202_v32  ;;  %v528_v37 = vpop.f32.mrf.mxu0 }
 0x280   :  { %v1420_v38 = vpop.f32.mrf.mxu1  ;;  %v5768_v39 = vpop.eup %5767  ;;  %5779 = vrcp.f32 %v2567_v29  ;;  %v784_v41 = vadd.f32 1.0, %v5766_v33  ;;  %v529_v42 = vadd.f32 %v7614_v7, %v528_v37  ;;  %v2377_v47 = vsub.f32 0.0, %v2311_v35 }
 0x281   :  { %v1421_v43 = vadd.f32 %v7614_v7, %v1420_v38  ;;  %v5770_v44 = vpop.eup %5769  ;;  %4359 = vst.msk [vmem:[%s7711_s5 + $0x5d8] sm:$0xff] %vm851_vm1, %v5768_v39  ;;  %5781 = vrcp.f32 %v3459_v34  ;;  %v3269_v48 = vsub.f32 0.0, %v3203_v36 }
 0x282   :  { %v5772_v49 = vpop.eup %5771  ;;  %5783 = vrcp.f32 %v784_v41  ;;  %v1676_v50 = vadd.f32 1.0, %v5770_v44  ;;  %v594_v51 = vsub.f32 0.0, %v529_v42  ;;  %v2503_v53 = vmul.f32 1.442695, %v2377_v47 }
 0x283   :  { %v5774_v52 = vpop.eup %5773  ;;  %4659 = vst.msk [vmem:[%s7711_s5 + $0x7d8] sm:$0xff] %vm851_vm1, %v5772_v49  ;;  %5785 = vpow2.f32 %v3393_v30  ;;  %v1486_v54 = vsub.f32 0.0, %v1421_v43  ;;  %v3395_v57 = vmul.f32 1.442695, %v3269_v48 }
 0x284   :  { %v5776_v55 = vpop.eup %5775  ;;  %912 = vst.msk [vmem:[%s7711_s5 + $0x1e0] sm:$0xff] %vm851_vm1, %v5774_v52  ;;  %5787 = vrcp.f32 %v1676_v50  ;;  %v721_v59 = vmul.f32 1.442695, %v594_v51 }
 0x285   :  { %v5778_v56 = vpop.eup %5777  ;;  %4060 = vst.msk [vmem:[%s7711_s5 + $0x3e0] sm:$0xff] %vm851_vm1, %v5776_v55  ;;  %5789 = vpow2.f32 %v719_v46  ;;  %v2312_v60 = vpop.f32.mrf.mxu2  ;;  %v1613_v0 = vmul.f32 1.442695, %v1486_v54 }
 0x286   :  { %v5780_v58 = vpop.eup %5779  ;;  %v2568_v21 = vadd.f32 1.0, %v5778_v56  ;;  %5791 = vpow2.f32 %v1611_v16  ;;  %v3204_v61 = vpop.f32.mrf.mxu3  ;;  %v2313_v1 = vadd.f32 %v7614_v7, %v2312_v60 }
 0x287   :  { %v5782_v62 = vpop.eup %5781  ;;  %4360 = vst.msk [vmem:[%s7711_s5 + $0x5e0] sm:$0xff] %vm851_vm1, %v5780_v58  ;;  %5793 = vpow2.f32 %v2503_v53  ;;  %v3205_v2 = vadd.f32 %v7614_v7, %v3204_v61 }
 0x288   :  { %v5784_v3 = vpop.eup %5783  ;;  %4660 = vst.msk [vmem:[%s7711_s5 + $0x7e0] sm:$0xff] %vm851_vm1, %v5782_v62  ;;  %5795 = vrcp.f32 %v2568_v21  ;;  %v2378_v5 = vsub.f32 0.0, %v2313_v1 }
 0x289   :  { %v5786_v4 = vpop.eup %5785  ;;  %913 = vst.msk [vmem:[%s7711_s5 + $0x1e8] sm:$0xff] %vm851_vm1, %v5784_v3  ;;  %5797 = vpow2.f32 %v3395_v57  ;;  %v3270_v6 = vsub.f32 0.0, %v3205_v2 }
 0x28a   :  { %v5788_v40 = vpop.eup %5787  ;;  %v3460_v8 = vadd.f32 1.0, %v5786_v4  ;;  %5799 = vpow2.f32 %v721_v59  ;;  %v2505_v9 = vmul.f32 1.442695, %v2378_v5 }
 0x28b   :  { %v5790_v7 = vpop.eup %5789  ;;  %4061 = vst.msk [vmem:[%s7711_s5 + $0x3e8] sm:$0xff] %vm851_vm1, %v5788_v40  ;;  %5801 = vpow2.f32 %v1613_v0  ;;  %v3397_v13 = vmul.f32 1.442695, %v3270_v6 }
 0x28c   :  { %v5792_v10 = vpop.eup %5791  ;;  %5803 = vrcp.f32 %v3460_v8  ;;  %v785_v11 = vadd.f32 1.0, %v5790_v7 }
 0x28d   :  { %v5794_v12 = vpop.eup %5793  ;;  %v1677_v45 = vadd.f32 1.0, %v5792_v10  ;;  %5805 = vpow2.f32 %v2505_v9 }
 0x28e   :  { %v5796_v14 = vpop.eup %5795  ;;  %5807 = vrcp.f32 %v785_v11  ;;  %v2569_v15 = vadd.f32 1.0, %v5794_v12 }
 0x28f   :  { %v5798_v17 = vpop.eup %5797  ;;  %4361 = vst.msk [vmem:[%s7711_s5 + $0x5e8] sm:$0xff] %vm851_vm1, %v5796_v14  ;;  %5809 = vrcp.f32 %v1677_v45 }
 0x290   :  { %v5800_v18 = vpop.eup %5799  ;;  %5811 = vrcp.f32 %v2569_v15  ;;  %v3461_v19 = vadd.f32 1.0, %v5798_v17 }
 0x291   :  { %v5802_v20 = vpop.eup %5801  ;;  %v786_v22 = vadd.f32 1.0, %v5800_v18  ;;  %5813 = vpow2.f32 %v3397_v13 }
 0x292   :  { %v5804_v23 = vpop.eup %5803  ;;  %5815 = vrcp.f32 %v3461_v19  ;;  %v1678_v24 = vadd.f32 1.0, %v5802_v20 }
 0x293   :  { %v5806_v25 = vpop.eup %5805  ;;  %4661 = vst.msk [vmem:[%s7711_s5 + $0x7e8] sm:$0xff] %vm851_vm1, %v5804_v23  ;;  %5817 = vrcp.f32 %v786_v22 }
 0x294   :  { %v5808_v26 = vpop.eup %5807  ;;  %5819 = vrcp.f32 %v1678_v24  ;;  %v2570_v27 = vadd.f32 1.0, %v5806_v25 }
 0x295   :  { %v5810_v28 = vpop.eup %5809  ;;  %914 = vst.msk [vmem:[%s7711_s5 + $0x1f0] sm:$0xff] %vm851_vm1, %v5808_v26 }
 0x296   :  { %v5812_v29 = vpop.eup %5811  ;;  %4062 = vst.msk [vmem:[%s7711_s5 + $0x3f0] sm:$0xff] %vm851_vm1, %v5810_v28  ;;  %5821 = vrcp.f32 %v2570_v27 }
 0x297   :  { %v5814_v30 = vpop.eup %5813  ;;  %4362 = vst.msk [vmem:[%s7711_s5 + $0x5f0] sm:$0xff] %vm851_vm1, %v5812_v29 }
 0x298   :  { %v5816_v31 = vpop.eup %5815  ;;  %v3462_v63 = vadd.f32 1.0, %v5814_v30 }
 0x299   :  { %v5818_v32 = vpop.eup %5817  ;;  %4662 = vst.msk [vmem:[%s7711_s5 + $0x7f0] sm:$0xff] %vm851_vm1, %v5816_v31 }
 0x29a   :  { %v5820_v33 = vpop.eup %5819  ;;  %915 = vst.msk [vmem:[%s7711_s5 + $0x1f8] sm:$0xff] %vm851_vm1, %v5818_v32  ;;  %5823 = vrcp.f32 %v3462_v63 }
 0x29b   :  { %4063 = vst.msk [vmem:[%s7711_s5 + $0x3f8] sm:$0xff] %vm851_vm1, %v5820_v33 }
 0x29c   :  { %v5822_v34 = vpop.eup %5821 }
 0x29d   :  { %4363 = vst.msk [vmem:[%s7711_s5 + $0x5f8] sm:$0xff] %vm851_vm1, %v5822_v34 }
 0x2a0   :  { %v5824_v35 = vpop.eup %5823 }
 0x2a1   :  { %4663 = vst.msk [vmem:[%s7711_s5 + $0x7f8] sm:$0xff] %vm851_vm1, %v5824_v35 }

</bundles_post_ra>
